<compile_context>
chip_gen: v7x
topology: tpu7x:2x2x1
jax: 0.10.0
libtpu: 0.0.40
codegen_flags: <defaults>
</compile_context>

<pallas_src>
import math
from functools import partial

import jax
import jax.numpy as jnp
from jax.experimental import pallas as pl
from jax.experimental.pallas import tpu as pltpu

_LN_EPS = 1e-6


# ------------------------- per-generation tuning knobs -------------------------

def _device_kind():
    try:
        return jax.devices()[0].device_kind.lower()
    except Exception:
        return ""


_KIND = _device_kind()
_SMALL_VMEM = "v7" in _KIND                 # v7x: 64 MiB physical VMEM per TensorCore
# v5e / v6e have 128 MiB physical VMEM but a small scoped default -> raise it explicitly.
_VMEM_LIMIT = (100 * 1024 * 1024) if ("v5" in _KIND or "v6" in _KIND) else None
_ROW_CAP = 256 if _SMALL_VMEM else 512      # row tiles for the fused matmul kernels
_LN_ROW_CAP = 512 if _SMALL_VMEM else 1024  # row tiles for the standalone LayerNorm
_FLASH_Q_CAP = 256 if _SMALL_VMEM else 512
_FLASH_K_CAP = 512 if _SMALL_VMEM else 1024
# bf16 exp roughly doubles EUP throughput on v6e/v7x; v5e's EUP has no bf16 path.
_EXP_DTYPE = jnp.bfloat16 if ("v6" in _KIND or "v7" in _KIND) else jnp.float32


def _cparams(*semantics):
    return pltpu.CompilerParams(dimension_semantics=semantics,
                                vmem_limit_bytes=_VMEM_LIMIT)


# ----------------------------- tiling helpers -----------------------------

def _row_tile(dim, cap):
    """Largest tile <= cap that divides dim and is a multiple of 8 (else the full dim)."""
    if dim <= cap:
        return dim
    t = (cap // 8) * 8
    while t >= 8:
        if dim % t == 0:
            return t
        t -= 8
    return dim


def _lane_tile(dim, cap):
    """Largest tile <= cap that divides dim and is a multiple of 128 (else the full dim)."""
    if dim <= cap:
        return dim
    t = (cap // 128) * 128
    while t >= 128:
        if dim % t == 0:
            return t
        t -= 128
    return dim


# ----------------------------- in-kernel helpers -----------------------------

def _layernorm_f32(x, g, b, approx=True):
    # Annotated-Transformer LayerNorm: g * (x - mean) / (std + eps) + b
    # torch .std() is unbiased (divide by D-1); eps is added to std. All math in f32.
    d = x.shape[-1]
    mean = jnp.mean(x, axis=-1, keepdims=True)
    var = jnp.sum((x - mean) ** 2, axis=-1, keepdims=True) * (1.0 / (d - 1))
    denom = jnp.sqrt(var) + _LN_EPS
    if approx:
        return g * ((x - mean) * pl.reciprocal(denom, approx=True)) + b
    return g * ((x - mean) / denom) + b


# ----------------------------- Pallas kernels -----------------------------

def _ln_kernel(x_ref, g_ref, b_ref, o_ref):
    # Standalone LayerNorm (encoder memory / final decoder output): exact divide.
    x = x_ref[...].astype(jnp.float32)
    o_ref[...] = _layernorm_f32(x, g_ref[...], b_ref[...], approx=False).astype(o_ref.dtype)


def _ln_matmul_kernel(x_ref, g_ref, bn_ref, w_ref, b_ref, o_ref, y_sc):
    # o[:, j] = LayerNorm(x) @ w[:, j] + b[j]
    # LN(x) is computed once per row tile (j == 0) and cached in VMEM for j > 0.
    @pl.when(pl.program_id(1) == 0)
    def _():
        x = x_ref[...].astype(jnp.float32)
        y_sc[...] = _layernorm_f32(x, g_ref[...], bn_ref[...]).astype(jnp.bfloat16)

    acc = jnp.dot(y_sc[...], w_ref[...], preferred_element_type=jnp.float32)
    o_ref[...] = (acc + b_ref[...]).astype(o_ref.dtype)


def _matmul_kernel(x_ref, w_ref, b_ref, o_ref):
    acc = jnp.dot(x_ref[...], w_ref[...], preferred_element_type=jnp.float32)
    o_ref[...] = (acc + b_ref[...]).astype(o_ref.dtype)


def _matmul_residual_kernel(x_ref, w_ref, b_ref, r_ref, o_ref):
    # o = x @ w + b + residual            (residual add fused into the output projection)
    acc = jnp.dot(x_ref[...], w_ref[...], preferred_element_type=jnp.float32)
    o_ref[...] = (acc + b_ref[...] + r_ref[...].astype(jnp.float32)).astype(o_ref.dtype)


def _ln_ffn_kernel(x_ref, g_ref, bn_ref, w1_ref, b1_ref, w2_ref, b2_ref, o_ref,
                   y_sc, acc_sc):
    # Whole FFN sublayer: o = x + relu(LN(x) @ w1 + b1) @ w2 + b2
    # The d_ff dimension is streamed along grid axis 1 ('arbitrary'): w1 column blocks /
    # w2 row blocks are never fully resident, and the (tm, d_ff) hidden never materializes.
    j = pl.program_id(1)

    @pl.when(j == 0)
    def _():
        x = x_ref[...].astype(jnp.float32)
        y_sc[...] = _layernorm_f32(x, g_ref[...], bn_ref[...]).astype(jnp.bfloat16)
        acc_sc[...] = jnp.zeros_like(acc_sc)

    hidden = jnp.dot(y_sc[...], w1_ref[...], preferred_element_type=jnp.float32) + b1_ref[...]
    hidden = jnp.maximum(hidden, 0.0).astype(jnp.bfloat16)
    acc_sc[...] += jnp.dot(hidden, w2_ref[...], preferred_element_type=jnp.float32)

    @pl.when(j == pl.num_programs(1) - 1)
    def _():
        o_ref[...] = (acc_sc[...] + b2_ref[...]
                      + x_ref[...].astype(jnp.float32)).astype(o_ref.dtype)


def _make_flash_kernel(n_heads, head_dim, exp_dtype):
    """Flash-style multi-head attention; online softmax over the k-block grid axis.
    1/sqrt(head_dim) is already folded into the query projection weights."""
    d_model = n_heads * head_dim

    def flash_kernel(q_ref, k_ref, v_ref, mask_ref, o_ref, m_sc, l_sc, acc_sc):
        ki = pl.program_id(2)

        @pl.when(ki == 0)
        def _init():
            m_sc[...] = jnp.full(m_sc.shape, -jnp.inf, m_sc.dtype)
            l_sc[...] = jnp.zeros(l_sc.shape, l_sc.dtype)
            acc_sc[...] = jnp.zeros(acc_sc.shape, acc_sc.dtype)

        q = q_ref[...]                                  # (tq, D)  bf16 (q pre-scaled)
        k = k_ref[...]                                  # (tk, D)  bf16
        v = v_ref[...]                                  # (tk, D)  bf16
        tq, tk = q.shape[0], k.shape[0]
        valid = jnp.broadcast_to(mask_ref[...] != 0, (tq, tk))   # hoisted out of head loop

        alphas, pvs = [], []
        for hi in range(n_heads):                       # statically unrolled per-head update
            sl = slice(hi * head_dim, (hi + 1) * head_dim)
            s = jax.lax.dot_general(q[:, sl], k[:, sl], (((1,), (1,)), ((), ())),
                                    preferred_element_type=jnp.float32)
            s = jnp.where(valid, s, jnp.float32(-1e9))
            m_prev = m_sc[hi]                                        # (tq, 1) f32
            m_new = jnp.maximum(m_prev, jnp.max(s, axis=-1, keepdims=True))
            alpha = jnp.exp(m_prev - m_new)                          # (tq, 1) f32
            p = jnp.exp((s - m_new).astype(exp_dtype))               # bf16 EUP on v6e/v7x
            l_sc[hi] = alpha * l_sc[hi] + jnp.sum(p.astype(jnp.float32),
                                                  axis=-1, keepdims=True)
            pv = jax.lax.dot_general(p.astype(v.dtype), v[:, sl], (((1,), (0,)), ((), ())),
                                     preferred_element_type=jnp.float32)
            m_sc[hi] = m_new
            alphas.append(jnp.broadcast_to(alpha, (tq, head_dim)))
            pvs.append(pv)

        # single lane-dense (tq, D) accumulator update per k step
        alpha_full = jnp.concatenate(alphas, axis=-1)
        pv_full = jnp.concatenate(pvs, axis=-1)
        acc_sc[...] = alpha_full * acc_sc[...] + pv_full

        @pl.when(ki == pl.num_programs(2) - 1)
        def _finalize():
            inv = [jnp.broadcast_to(pl.reciprocal(l_sc[hi], approx=True), (tq, head_dim))
                   for hi in range(n_heads)]
            # single full-slab (tq, D) store — no masked partial stores
            o_ref[...] = (acc_sc[...] * jnp.concatenate(inv, axis=-1)).astype(o_ref.dtype)

    return flash_kernel


# ----------------------------- kernel wrappers -----------------------------

def layer_norm(x, g, b, out_dtype=jnp.bfloat16):
    B, S, D = x.shape
    M = B * S
    tm = _row_tile(M, _LN_ROW_CAP)
    out = pl.pallas_call(
        _ln_kernel,
        out_shape=jax.ShapeDtypeStruct((M, D), out_dtype),
        grid=(M // tm,),
        in_specs=[pl.BlockSpec((tm, D), lambda i: (i, 0)),
                  pl.BlockSpec((1, D), lambda i: (0, 0)),
                  pl.BlockSpec((1, D), lambda i: (0, 0))],
        out_specs=pl.BlockSpec((tm, D), lambda i: (i, 0)),
        compiler_params=_cparams("parallel"),
    )(x.reshape(M, D), g.reshape(1, D), b.reshape(1, D))
    return out.reshape(B, S, D)


def ln_linear(x2d, g, bn, w, b):
    # LayerNorm(x) @ w + b, tiled over rows (M) and output columns (N); LN cached over j.
    M, K = x2d.shape
    N = w.shape[1]
    tm, tn = _row_tile(M, _ROW_CAP), _lane_tile(N, 1024)
    return pl.pallas_call(
        _ln_matmul_kernel,
        out_shape=jax.ShapeDtypeStruct((M, N), jnp.bfloat16),
        grid=(M // tm, N // tn),
        in_specs=[pl.BlockSpec((tm, K), lambda i, j: (i, 0)),
                  pl.BlockSpec((1, K), lambda i, j: (0, 0)),
                  pl.BlockSpec((1, K), lambda i, j: (0, 0)),
                  pl.BlockSpec((K, tn), lambda i, j: (0, j)),
                  pl.BlockSpec((1, tn), lambda i, j: (0, j))],
        out_specs=pl.BlockSpec((tm, tn), lambda i, j: (i, j)),
        scratch_shapes=[pltpu.VMEM((tm, K), jnp.bfloat16)],   # cached LN(x) for j > 0
        compiler_params=_cparams("parallel", "arbitrary"),
    )(x2d, g.reshape(1, K), bn.reshape(1, K), w, b.reshape(1, N))


def linear(x2d, w, b):
    M, K = x2d.shape
    N = w.shape[1]
    tm, tn = _row_tile(M, _ROW_CAP), _lane_tile(N, 1024)
    return pl.pallas_call(
        _matmul_kernel,
        out_shape=jax.ShapeDtypeStruct((M, N), jnp.bfloat16),
        grid=(M // tm, N // tn),
        in_specs=[pl.BlockSpec((tm, K), lambda i, j: (i, 0)),
                  pl.BlockSpec((K, tn), lambda i, j: (0, j)),
                  pl.BlockSpec((1, tn), lambda i, j: (0, j))],
        out_specs=pl.BlockSpec((tm, tn), lambda i, j: (i, j)),
        compiler_params=_cparams("parallel", "parallel"),
    )(x2d, w, b.reshape(1, N))


def linear_residual(x2d, w, b, resid2d):
    M, K = x2d.shape
    N = w.shape[1]
    tm, tn = _row_tile(M, _ROW_CAP), _lane_tile(N, 1024)
    return pl.pallas_call(
        _matmul_residual_kernel,
        out_shape=jax.ShapeDtypeStruct((M, N), jnp.bfloat16),
        grid=(M // tm, N // tn),
        in_specs=[pl.BlockSpec((tm, K), lambda i, j: (i, 0)),
                  pl.BlockSpec((K, tn), lambda i, j: (0, j)),
                  pl.BlockSpec((1, tn), lambda i, j: (0, j)),
                  pl.BlockSpec((tm, tn), lambda i, j: (i, j))],
        out_specs=pl.BlockSpec((tm, tn), lambda i, j: (i, j)),
        compiler_params=_cparams("parallel", "parallel"),
    )(x2d, w, b.reshape(1, N), resid2d)


def ln_feed_forward(x, g, bn, w1, b1, w2, b2):
    B, S, D = x.shape
    M = B * S
    d_ff = w1.shape[1]
    tm = _row_tile(M, _ROW_CAP)
    tf = _lane_tile(d_ff, 512)               # streamed d_ff chunk
    out = pl.pallas_call(
        _ln_ffn_kernel,
        out_shape=jax.ShapeDtypeStruct((M, D), jnp.bfloat16),
        grid=(M // tm, d_ff // tf),
        in_specs=[pl.BlockSpec((tm, D), lambda i, j: (i, 0)),
                  pl.BlockSpec((1, D), lambda i, j: (0, 0)),
                  pl.BlockSpec((1, D), lambda i, j: (0, 0)),
                  pl.BlockSpec((D, tf), lambda i, j: (0, j)),
                  pl.BlockSpec((1, tf), lambda i, j: (0, j)),
                  pl.BlockSpec((tf, D), lambda i, j: (j, 0)),
                  pl.BlockSpec((1, D), lambda i, j: (0, 0))],
        out_specs=pl.BlockSpec((tm, D), lambda i, j: (i, 0)),
        scratch_shapes=[pltpu.VMEM((tm, D), jnp.bfloat16),    # cached LN(x)
                        pltpu.VMEM((tm, D), jnp.float32)],    # f32 accumulator
        compiler_params=_cparams("parallel", "arbitrary"),
    )(x.reshape(M, D), g.reshape(1, D), bn.reshape(1, D),
      w1, b1.reshape(1, d_ff), w2, b2.reshape(1, D))
    return out.reshape(B, S, D)


def flash_attention(q_arr, q_off, kv_arr, k_off, v_off, mask, *, n_heads, d_model):
    """q_arr: (B,Sq,*) with the query projection at column block q_off (units of d_model);
    kv_arr: (B,Sk,*) with key/value projections at column blocks k_off / v_off;
    mask: (B,1,Sk) or (B,Sq,Sk), nonzero = attend.  Returns (B,Sq,d_model) bf16."""
    B, Sq, _ = q_arr.shape
    _, Sk, _ = kv_arr.shape
    D = d_model
    dh = D // n_heads
    assert D % 128 == 0, "d_model must be a multiple of 128 for fused-QKV column addressing"

    tq = _row_tile(Sq, _FLASH_Q_CAP)
    tk = _lane_tile(Sk, _FLASH_K_CAP)
    mask = mask.astype(jnp.int32)
    if mask.shape[1] == 1:
        mask_spec = pl.BlockSpec((None, 1, tk), lambda b, qi, ki: (b, 0, ki))
    else:
        mask_spec = pl.BlockSpec((None, tq, tk), lambda b, qi, ki: (b, qi, ki))

    kernel = _make_flash_kernel(n_heads, dh, _EXP_DTYPE)
    return pl.pallas_call(
        kernel,
        out_shape=jax.ShapeDtypeStruct((B, Sq, D), jnp.bfloat16),
        grid=(B, Sq // tq, Sk // tk),
        in_specs=[pl.BlockSpec((None, tq, D), lambda b, qi, ki: (b, qi, q_off)),
                  pl.BlockSpec((None, tk, D), lambda b, qi, ki: (b, ki, k_off)),
                  pl.BlockSpec((None, tk, D), lambda b, qi, ki: (b, ki, v_off)),
                  mask_spec],
        out_specs=pl.BlockSpec((None, tq, D), lambda b, qi, ki: (b, qi, 0)),
        scratch_shapes=[pltpu.VMEM((n_heads, tq, 1), jnp.float32),   # m
                        pltpu.VMEM((n_heads, tq, 1), jnp.float32),   # l
                        pltpu.VMEM((tq, D), jnp.float32)],           # lane-dense acc
        compiler_params=_cparams("parallel", "parallel", "arbitrary"),
    )(q_arr, kv_arr, kv_arr, mask)


# ----------------------------- model (glue) -----------------------------

def positional_encoding(seq_len, d_model):
    pos = jnp.arange(seq_len, dtype=jnp.float32)[:, None]
    div = jnp.exp(jnp.arange(0, d_model, 2, dtype=jnp.float32)
                  * (-math.log(10000.0) / d_model))
    pe = jnp.zeros((seq_len, d_model), dtype=jnp.float32)
    pe = pe.at[:, 0::2].set(jnp.sin(pos * div))
    pe = pe.at[:, 1::2].set(jnp.cos(pos * div))
    return pe


def embed(lut, tokens):
    # LUT is stored bf16 with sqrt(d_model) pre-folded -> single bf16 gather + PE add.
    d_model = lut.shape[1]
    pe = positional_encoding(tokens.shape[1], d_model).astype(jnp.bfloat16)
    return lut[tokens] + pe[None]     # dropout: eval mode (identity)


def encoder_layer(p, x, src_mask, h):
    B, S, D = x.shape
    M = B * S
    x2 = x.reshape(M, D)
    # self-attention sublayer: LN fused into the QKV projection, residual fused into out-proj
    qkv = ln_linear(x2, p['ln1_g'], p['ln1_b'],
                    p['self_attn']['wqkv'], p['self_attn']['bqkv']).reshape(B, S, 3 * D)
    ctx = flash_attention(qkv, 0, qkv, 1, 2, src_mask, n_heads=h, d_model=D)
    x2 = linear_residual(ctx.reshape(M, D), p['self_attn']['wo'], p['self_attn']['bo'], x2)
    x = x2.reshape(B, S, D)
    # feed-forward sublayer: LN + FFN + residual in one kernel (d_ff streamed)
    return ln_feed_forward(x, p['ln2_g'], p['ln2_b'],
                           p['ffn']['w1'], p['ffn']['b1'],
                           p['ffn']['w2'], p['ffn']['b2'])


def decoder_layer(p, x, memory, src_mask, tgt_mask, h):
    B, St, D = x.shape
    Ss = memory.shape[1]
    M = B * St
    x2 = x.reshape(M, D)
    # masked self-attention
    qkv = ln_linear(x2, p['ln1_g'], p['ln1_b'],
                    p['self_attn']['wqkv'], p['self_attn']['bqkv']).reshape(B, St, 3 * D)
    ctx = flash_attention(qkv, 0, qkv, 1, 2, tgt_mask, n_heads=h, d_model=D)
    x2 = linear_residual(ctx.reshape(M, D), p['self_attn']['wo'], p['self_attn']['bo'], x2)
    # cross-attention over encoder memory (memory used un-normalized, as in the reference)
    q = ln_linear(x2, p['ln2_g'], p['ln2_b'],
                  p['cross_attn']['wq'], p['cross_attn']['bq']).reshape(B, St, D)
    kv = linear(memory.reshape(B * Ss, D), p['cross_attn']['wkv'],
                p['cross_attn']['bkv']).reshape(B, Ss, 2 * D)
    ctx = flash_attention(q, 0, kv, 0, 1, src_mask, n_heads=h, d_model=D)
    x2 = linear_residual(ctx.reshape(M, D), p['cross_attn']['wo'], p['cross_attn']['bo'], x2)
    x = x2.reshape(B, St, D)
    # feed-forward
    return ln_feed_forward(x, p['ln3_g'], p['ln3_b'],
                           p['ffn']['w1'], p['ffn']['b1'],
                           p['ffn']['w2'], p['ffn']['b2'])


def encode(params, src, src_mask, h):
    x = embed(params['src_lut'], src)
    for lp in params['encoder_layers']:
        x = encoder_layer(lp, x, src_mask, h)
    return layer_norm(x, params['enc_ln_g'], params['enc_ln_b'])


def decode(params, memory, src_mask, tgt, tgt_mask, h):
    x = embed(params['tgt_lut'], tgt)
    for lp in params['decoder_layers']:
        x = decoder_layer(lp, x, memory, src_mask, tgt_mask, h)
    return layer_norm(x, params['dec_ln_g'], params['dec_ln_b'], out_dtype=jnp.float32)


def encoder_decoder_forward(params, src, tgt, src_mask, tgt_mask, h):
    # Matches EncoderDecoder.forward: the generator is NOT applied.
    memory = encode(params, src, src_mask, h)
    return decode(params, memory, src_mask, tgt, tgt_mask, h)


# ----------------------------- parameter init -----------------------------

def init_params(key, src_vocab, tgt_vocab, d_model, d_ff, h, n_layers):
    keys = iter(jax.random.split(key, 1024))
    q_scale = 1.0 / math.sqrt(d_model // h)   # folded into the q projection (weights+bias)

    def glorot(shape, scale=1.0):
        lim = math.sqrt(6.0 / (shape[0] + shape[1]))
        w = jax.random.uniform(next(keys), shape, jnp.float32, -lim, lim) * scale
        return w.astype(jnp.bfloat16)

    def zeros(n):
        return jnp.zeros((n,), jnp.float32)

    def self_attn_params():
        # scores = (x@wq) (x@wk)^T / sqrt(dh)  -> scale baked into the q columns of wqkv
        wq = glorot((d_model, d_model), q_scale)
        wk, wv = glorot((d_model, d_model)), glorot((d_model, d_model))
        return {'wqkv': jnp.concatenate([wq, wk, wv], axis=1), 'bqkv': zeros(3 * d_model),
                'wo': glorot((d_model, d_model)), 'bo': zeros(d_model)}

    def cross_attn_params():
        wk, wv = glorot((d_model, d_model)), glorot((d_model, d_model))
        return {'wq': glorot((d_model, d_model), q_scale), 'bq': zeros(d_model),
                'wkv': jnp.concatenate([wk, wv], axis=1), 'bkv': zeros(2 * d_model),
                'wo': glorot((d_model, d_model)), 'bo': zeros(d_model)}

    def ffn_params():
        return {'w1': glorot((d_model, d_ff)), 'b1': zeros(d_ff),
                'w2': glorot((d_ff, d_model)), 'b2': zeros(d_model)}

    def ln():
        return jnp.ones((d_model,), jnp.float32), jnp.zeros((d_model,), jnp.float32)

    enc_layers = []
    for _ in range(n_layers):
        g1, b1 = ln(); g2, b2 = ln()
        enc_layers.append({'ln1_g': g1, 'ln1_b': b1, 'self_attn': self_attn_params(),
                           'ln2_g': g2, 'ln2_b': b2, 'ffn': ffn_params()})
    dec_layers = []
    for _ in range(n_layers):
        g1, b1 = ln(); g2, b2 = ln(); g3, b3 = ln()
        dec_layers.append({'ln1_g': g1, 'ln1_b': b1, 'self_attn': self_attn_params(),
                           'ln2_g': g2, 'ln2_b': b2, 'cross_attn': cross_attn_params(),
                           'ln3_g': g3, 'ln3_b': b3, 'ffn': ffn_params()})

    eg, eb = ln()
    dg, db = ln()

    def lut(vocab):
        # bf16 LUT with sqrt(d_model) pre-folded (Embeddings.forward does lut(x)*sqrt(d_model))
        w = jax.random.normal(next(keys), (vocab, d_model), jnp.float32) * 0.02
        return (w * math.sqrt(d_model)).astype(jnp.bfloat16)

    return {
        'src_lut': lut(src_vocab),
        'tgt_lut': lut(tgt_vocab),
        'encoder_layers': enc_layers,
        'decoder_layers': dec_layers,
        'enc_ln_g': eg, 'enc_ln_b': eb,
        'dec_ln_g': dg, 'dec_ln_b': db,
        # generator parameters exist on the module but are unused by forward():
        'gen_w': glorot((d_model, tgt_vocab)), 'gen_b': zeros(tgt_vocab),
    }


# ----------------------------- main -----------------------------

if __name__ == "__main__":
    B, S_src, S_tgt = 2, 16, 16
    src_vocab, tgt_vocab = 32, 32
    d_model, d_ff, n_heads, n_layers = 128, 256, 4, 2

    root = jax.random.PRNGKey(0)
    k_params, k_src, k_tgt = jax.random.split(root, 3)

    params = init_params(k_params, src_vocab, tgt_vocab, d_model, d_ff, n_heads, n_layers)

    src = jax.random.randint(k_src, (B, S_src), 1, src_vocab)
    tgt = jax.random.randint(k_tgt, (B, S_tgt), 1, tgt_vocab)

    # src_mask: (B, 1, S_src) all-valid; tgt_mask: (B, S_tgt, S_tgt) causal (subsequent mask)
    src_mask = jnp.ones((B, 1, S_src), dtype=jnp.float32)
    causal = jnp.tril(jnp.ones((S_tgt, S_tgt), dtype=jnp.float32))
    tgt_mask = jnp.broadcast_to(causal[None, :, :], (B, S_tgt, S_tgt))

    fwd = jax.jit(partial(encoder_decoder_forward, h=n_heads))
    out = jax.block_until_ready(fwd(params, src, tgt, src_mask, tgt_mask))

    assert out.shape == (B, S_tgt, d_model), out.shape
    assert bool(jnp.all(jnp.isfinite(out)))
    print("KERNEL_OK")
</pallas_src>

<mosaic_0001>
module attributes {stable_mosaic.version = 11 : i64} {
  func.func @_ln_matmul_kernel(%arg0: i32, %arg1: i32, %arg2: memref<32x128xbf16, #tpu.memory_space<vmem>>, %arg3: memref<1x128xf32, #tpu.memory_space<vmem>>, %arg4: memref<1x128xf32, #tpu.memory_space<vmem>>, %arg5: memref<128x384xbf16, #tpu.memory_space<vmem>>, %arg6: memref<1x384xf32, #tpu.memory_space<vmem>>, %arg7: memref<32x384xbf16, #tpu.memory_space<vmem>>, %arg8: memref<32x128xbf16, #tpu.memory_space<vmem>>) attributes {dimension_semantics = [#tpu.dimension_semantics<parallel>, #tpu.dimension_semantics<arbitrary>], iteration_bounds = array<i64: 1, 1>, scalar_prefetch = 0 : i64, scratch_operands = 1 : i64, tpu.core_type = #tpu.core_type<tc>, window_params = [{transform_indices = @transform_0, window_bounds = array<i64: 32, 128>}, {pipeline_mode = #tpu.pipeline_mode<synchronous>, transform_indices = @transform_1, window_bounds = array<i64: 1, 128>}, {pipeline_mode = #tpu.pipeline_mode<synchronous>, transform_indices = @transform_2, window_bounds = array<i64: 1, 128>}, {transform_indices = @transform_3, window_bounds = array<i64: 128, 384>}, {transform_indices = @transform_4, window_bounds = array<i64: 1, 384>}, {transform_indices = @transform_5, window_bounds = array<i64: 32, 384>}]} {
    %c0_i32 = arith.constant 0 : i32
    %0 = arith.cmpi eq, %arg1, %c0_i32 : i32
    %1 = arith.extui %0 : i1 to i32
    %c0_i32_0 = arith.constant 0 : i32
    %2 = arith.cmpi ne, %1, %c0_i32_0 : i32
    scf.if %2 {
      %c0_8 = arith.constant 0 : index
      %c0_9 = arith.constant 0 : index
      %11 = vector.load %arg2[%c0_8, %c0_9] : memref<32x128xbf16, #tpu.memory_space<vmem>>, vector<32x128xbf16>
      %12 = arith.extf %11 : vector<32x128xbf16> to vector<32x128xf32>
      %c0_10 = arith.constant 0 : index
      %c0_11 = arith.constant 0 : index
      %13 = vector.load %arg3[%c0_10, %c0_11] : memref<1x128xf32, #tpu.memory_space<vmem>>, vector<1x128xf32>
      %c0_12 = arith.constant 0 : index
      %c0_13 = arith.constant 0 : index
      %14 = vector.load %arg4[%c0_12, %c0_13] : memref<1x128xf32, #tpu.memory_space<vmem>>, vector<1x128xf32>
      %cst_14 = arith.constant dense<0.000000e+00> : vector<32xf32>
      %15 = vector.multi_reduction <add>, %12, %cst_14 [1] : vector<32x128xf32> to vector<32xf32>
      %16 = vector.shape_cast %15 : vector<32xf32> to vector<32x1xf32>
      %cst_15 = arith.constant 1.280000e+02 : f32
      %17 = vector.broadcast %cst_15 : f32 to vector<32x1xf32>
      %18 = arith.divf %16, %17 : vector<32x1xf32>
      %19 = vector.broadcast %18 : vector<32x1xf32> to vector<32x128xf32>
      %20 = arith.subf %12, %19 : vector<32x128xf32>
      %21 = arith.mulf %20, %20 : vector<32x128xf32>
      %cst_16 = arith.constant dense<0.000000e+00> : vector<32xf32>
      %22 = vector.multi_reduction <add>, %21, %cst_16 [1] : vector<32x128xf32> to vector<32xf32>
      %23 = vector.shape_cast %22 : vector<32xf32> to vector<32x1xf32>
      %cst_17 = arith.constant 0.00787401571 : f32
      %24 = vector.broadcast %cst_17 : f32 to vector<32x1xf32>
      %25 = arith.mulf %23, %24 : vector<32x1xf32>
      %26 = math.sqrt %25 : vector<32x1xf32>
      %cst_18 = arith.constant 9.99999997E-7 : f32
      %27 = vector.broadcast %cst_18 : f32 to vector<32x1xf32>
      %28 = arith.addf %26, %27 : vector<32x1xf32>
      %29 = vector.broadcast %18 : vector<32x1xf32> to vector<32x128xf32>
      %30 = arith.subf %12, %29 : vector<32x128xf32>
      %31 = tpu.reciprocal %28 {approx = true} : vector<32x1xf32> -> vector<32x1xf32>
      %32 = vector.broadcast %31 : vector<32x1xf32> to vector<32x128xf32>
      %33 = arith.mulf %30, %32 : vector<32x128xf32>
      %34 = vector.broadcast %13 : vector<1x128xf32> to vector<32x128xf32>
      %35 = arith.mulf %34, %33 : vector<32x128xf32>
      %36 = vector.broadcast %14 : vector<1x128xf32> to vector<32x128xf32>
      %37 = arith.addf %35, %36 : vector<32x128xf32>
      %38 = arith.truncf %37 : vector<32x128xf32> to vector<32x128xbf16>
      %c0_19 = arith.constant 0 : index
      %c0_20 = arith.constant 0 : index
      %39 = vector.load %arg8[%c0_19, %c0_20] : memref<32x128xbf16, #tpu.memory_space<vmem>>, vector<32x128xbf16>
      tpu.vector_store %arg8[%c0_19, %c0_20], %38 {strides = array<i32>} : memref<32x128xbf16, #tpu.memory_space<vmem>>, vector<32x128xbf16>,
    } else {
    }
    %c0 = arith.constant 0 : index
    %c0_1 = arith.constant 0 : index
    %3 = vector.load %arg8[%c0, %c0_1] : memref<32x128xbf16, #tpu.memory_space<vmem>>, vector<32x128xbf16>
    %c0_2 = arith.constant 0 : index
    %c0_3 = arith.constant 0 : index
    %4 = vector.load %arg5[%c0_2, %c0_3] : memref<128x384xbf16, #tpu.memory_space<vmem>>, vector<128x384xbf16>
    %cst = arith.constant dense<0.000000e+00> : vector<32x384xf32>
    %5 = tpu.matmul %3, %4, %cst {dimension_numbers = #tpu.dot_dimension_numbers<[1], [0], [0], [1], [0, 0, 1, 1], [], []>} : vector<32x128xbf16>, vector<128x384xbf16>, vector<32x384xf32> -> vector<32x384xf32>
    %c0_4 = arith.constant 0 : index
    %c0_5 = arith.constant 0 : index
    %6 = vector.load %arg6[%c0_4, %c0_5] : memref<1x384xf32, #tpu.memory_space<vmem>>, vector<1x384xf32>
    %7 = vector.broadcast %6 : vector<1x384xf32> to vector<32x384xf32>
    %8 = arith.addf %5, %7 : vector<32x384xf32>
    %9 = arith.truncf %8 : vector<32x384xf32> to vector<32x384xbf16>
    %c0_6 = arith.constant 0 : index
    %c0_7 = arith.constant 0 : index
    %10 = vector.load %arg7[%c0_6, %c0_7] : memref<32x384xbf16, #tpu.memory_space<vmem>>, vector<32x384xbf16>
    tpu.vector_store %arg7[%c0_6, %c0_7], %9 {strides = array<i32>} : memref<32x384xbf16, #tpu.memory_space<vmem>>, vector<32x384xbf16>,
    return
  }
  func.func @transform_0(%arg0: i32, %arg1: i32) -> (i32, i32) {
    %c0_i32 = arith.constant 0 : i32
    %c0_i32_0 = arith.constant 0 : i32
    return %arg0, %c0_i32 : i32, i32
  }
  func.func @transform_1(%arg0: i32, %arg1: i32) -> (i32, i32) {
    %c0_i32 = arith.constant 0 : i32
    %c0_i32_0 = arith.constant 0 : i32
    %c0_i32_1 = arith.constant 0 : i32
    return %c0_i32, %c0_i32_0 : i32, i32
  }
  func.func @transform_2(%arg0: i32, %arg1: i32) -> (i32, i32) {
    %c0_i32 = arith.constant 0 : i32
    %c0_i32_0 = arith.constant 0 : i32
    %c0_i32_1 = arith.constant 0 : i32
    return %c0_i32, %c0_i32_0 : i32, i32
  }
  func.func @transform_3(%arg0: i32, %arg1: i32) -> (i32, i32) {
    %c0_i32 = arith.constant 0 : i32
    %c0_i32_0 = arith.constant 0 : i32
    return %c0_i32, %arg1 : i32, i32
  }
  func.func @transform_4(%arg0: i32, %arg1: i32) -> (i32, i32) {
    %c0_i32 = arith.constant 0 : i32
    %c0_i32_0 = arith.constant 0 : i32
    return %c0_i32, %arg1 : i32, i32
  }
  func.func @transform_5(%arg0: i32, %arg1: i32) -> (i32, i32) {
    %c0_i32 = arith.constant 0 : i32
    return %arg0, %arg1 : i32, i32
  }
}

module attributes {stable_mosaic.version = 11 : i64} {
  func.func @flash_kernel(%arg0: i32, %arg1: i32, %arg2: i32, %arg3: memref<1x16x128xbf16, #tpu.memory_space<vmem>>, %arg4: memref<1x16x128xbf16, #tpu.memory_space<vmem>>, %arg5: memref<1x16x128xbf16, #tpu.memory_space<vmem>>, %arg6: memref<1x1x16xi32, #tpu.memory_space<vmem>>, %arg7: memref<1x16x128xbf16, #tpu.memory_space<vmem>>, %arg8: memref<4x16x1xf32, #tpu.memory_space<vmem>>, %arg9: memref<4x16x1xf32, #tpu.memory_space<vmem>>, %arg10: memref<16x128xf32, #tpu.memory_space<vmem>>) attributes {dimension_semantics = [#tpu.dimension_semantics<parallel>, #tpu.dimension_semantics<parallel>, #tpu.dimension_semantics<arbitrary>], iteration_bounds = array<i64: 2, 1, 1>, scalar_prefetch = 0 : i64, scratch_operands = 3 : i64, tpu.core_type = #tpu.core_type<tc>, window_params = [{transform_indices = @transform_0, window_bounds = array<i64: 1, 16, 128>}, {transform_indices = @transform_1, window_bounds = array<i64: 1, 16, 128>}, {transform_indices = @transform_2, window_bounds = array<i64: 1, 16, 128>}, {transform_indices = @transform_3, window_bounds = array<i64: 1, 1, 16>}, {transform_indices = @transform_4, window_bounds = array<i64: 1, 16, 128>}]} {
    %c0_i32 = arith.constant 0 : i32
    %0 = arith.cmpi eq, %arg2, %c0_i32 : i32
    %1 = arith.extui %0 : i1 to i32
    %c0_i32_0 = arith.constant 0 : i32
    %2 = arith.cmpi ne, %1, %c0_i32_0 : i32
    scf.if %2 {
      %cst_83 = arith.constant 0xFF800000 : f32
      %152 = vector.broadcast %cst_83 : f32 to vector<4x16x1xf32>
      %c0_84 = arith.constant 0 : index
      %c0_85 = arith.constant 0 : index
      %c0_86 = arith.constant 0 : index
      %153 = vector.load %arg8[%c0_84, %c0_85, %c0_86] : memref<4x16x1xf32, #tpu.memory_space<vmem>>, vector<4x16x1xf32>
      tpu.vector_store %arg8[%c0_84, %c0_85, %c0_86], %152 {strides = array<i32>} : memref<4x16x1xf32, #tpu.memory_space<vmem>>, vector<4x16x1xf32>,
      %cst_87 = arith.constant 0.000000e+00 : f32
      %154 = vector.broadcast %cst_87 : f32 to vector<4x16x1xf32>
      %c0_88 = arith.constant 0 : index
      %c0_89 = arith.constant 0 : index
      %c0_90 = arith.constant 0 : index
      %155 = vector.load %arg9[%c0_88, %c0_89, %c0_90] : memref<4x16x1xf32, #tpu.memory_space<vmem>>, vector<4x16x1xf32>
      tpu.vector_store %arg9[%c0_88, %c0_89, %c0_90], %154 {strides = array<i32>} : memref<4x16x1xf32, #tpu.memory_space<vmem>>, vector<4x16x1xf32>,
      %cst_91 = arith.constant 0.000000e+00 : f32
      %156 = vector.broadcast %cst_91 : f32 to vector<16x128xf32>
      %c0_92 = arith.constant 0 : index
      %c0_93 = arith.constant 0 : index
      %157 = vector.load %arg10[%c0_92, %c0_93] : memref<16x128xf32, #tpu.memory_space<vmem>>, vector<16x128xf32>
      tpu.vector_store %arg10[%c0_92, %c0_93], %156 {strides = array<i32>} : memref<16x128xf32, #tpu.memory_space<vmem>>, vector<16x128xf32>,
    } else {
    }
    %c0 = arith.constant 0 : index
    %c0_1 = arith.constant 0 : index
    %c0_2 = arith.constant 0 : index
    %3 = vector.load %arg3[%c0, %c0_1, %c0_2] : memref<1x16x128xbf16, #tpu.memory_space<vmem>>, vector<1x16x128xbf16>
    %4 = vector.shape_cast %3 : vector<1x16x128xbf16> to vector<16x128xbf16>
    %c0_3 = arith.constant 0 : index
    %c0_4 = arith.constant 0 : index
    %c0_5 = arith.constant 0 : index
    %5 = vector.load %arg4[%c0_3, %c0_4, %c0_5] : memref<1x16x128xbf16, #tpu.memory_space<vmem>>, vector<1x16x128xbf16>
    %6 = vector.shape_cast %5 : vector<1x16x128xbf16> to vector<16x128xbf16>
    %c0_6 = arith.constant 0 : index
    %c0_7 = arith.constant 0 : index
    %c0_8 = arith.constant 0 : index
    %7 = vector.load %arg5[%c0_6, %c0_7, %c0_8] : memref<1x16x128xbf16, #tpu.memory_space<vmem>>, vector<1x16x128xbf16>
    %8 = vector.shape_cast %7 : vector<1x16x128xbf16> to vector<16x128xbf16>
    %c0_9 = arith.constant 0 : index
    %c0_10 = arith.constant 0 : index
    %c0_11 = arith.constant 0 : index
    %9 = vector.load %arg6[%c0_9, %c0_10, %c0_11] : memref<1x1x16xi32, #tpu.memory_space<vmem>>, vector<1x1x16xi32>
    %10 = vector.shape_cast %9 : vector<1x1x16xi32> to vector<1x16xi32>
    %c0_i32_12 = arith.constant 0 : i32
    %11 = vector.broadcast %c0_i32_12 : i32 to vector<1x16xi32>
    %12 = arith.cmpi ne, %10, %11 : vector<1x16xi32>
    %13 = vector.shape_cast %12 : vector<1x16xi1> to vector<1x16xi1>
    %14 = vector.broadcast %13 : vector<1x16xi1> to vector<16x16xi1>
    %15 = vector.extract_strided_slice %4 {offsets = [0, 0], sizes = [16, 32], strides = [1, 1]} : vector<16x128xbf16> to vector<16x32xbf16>
    %16 = vector.extract_strided_slice %6 {offsets = [0, 0], sizes = [16, 32], strides = [1, 1]} : vector<16x128xbf16> to vector<16x32xbf16>
    %cst = arith.constant dense<0.000000e+00> : vector<16x16xf32>
    %17 = tpu.matmul %15, %16, %cst {dimension_numbers = #tpu.dot_dimension_numbers<[1], [1], [0], [0], [0, 0, 1, 0], [], []>} : vector<16x32xbf16>, vector<16x32xbf16>, vector<16x16xf32> -> vector<16x16xf32>
    %cst_13 = arith.constant -1.000000e+09 : f32
    %18 = vector.broadcast %cst_13 : f32 to vector<16x16xf32>
    %19 = arith.select %14, %17, %18 : vector<16x16xi1>, vector<16x16xf32>
    %c0_14 = arith.constant 0 : index
    %c0_15 = arith.constant 0 : index
    %c0_16 = arith.constant 0 : index
    %20 = vector.load %arg8[%c0_14, %c0_15, %c0_16] : memref<4x16x1xf32, #tpu.memory_space<vmem>>, vector<1x16x1xf32>
    %21 = vector.shape_cast %20 : vector<1x16x1xf32> to vector<16x1xf32>
    %cst_17 = arith.constant dense<0xFF800000> : vector<16xf32>
    %22 = vector.multi_reduction <maximumf>, %19, %cst_17 [1] : vector<16x16xf32> to vector<16xf32>
    %23 = vector.shape_cast %22 : vector<16xf32> to vector<16x1xf32>
    %24 = arith.maximumf %21, %23 : vector<16x1xf32>
    %25 = arith.subf %21, %24 : vector<16x1xf32>
    %26 = math.exp %25 : vector<16x1xf32>
    %27 = vector.broadcast %24 : vector<16x1xf32> to vector<16x16xf32>
    %28 = arith.subf %19, %27 : vector<16x16xf32>
    %29 = math.exp %28 : vector<16x16xf32>
    %c0_18 = arith.constant 0 : index
    %c0_19 = arith.constant 0 : index
    %c0_20 = arith.constant 0 : index
    %30 = vector.load %arg9[%c0_18, %c0_19, %c0_20] : memref<4x16x1xf32, #tpu.memory_space<vmem>>, vector<1x16x1xf32>
    %31 = vector.shape_cast %30 : vector<1x16x1xf32> to vector<16x1xf32>
    %32 = arith.mulf %26, %31 : vector<16x1xf32>
    %cst_21 = arith.constant dense<0.000000e+00> : vector<16xf32>
    %33 = vector.multi_reduction <add>, %29, %cst_21 [1] : vector<16x16xf32> to vector<16xf32>
    %34 = vector.shape_cast %33 : vector<16xf32> to vector<16x1xf32>
    %35 = arith.addf %32, %34 : vector<16x1xf32>
    %c0_22 = arith.constant 0 : index
    %c0_23 = arith.constant 0 : index
    %c0_24 = arith.constant 0 : index
    %36 = vector.load %arg9[%c0_22, %c0_23, %c0_24] : memref<4x16x1xf32, #tpu.memory_space<vmem>>, vector<1x16x1xf32>
    %37 = vector.shape_cast %36 : vector<1x16x1xf32> to vector<16x1xf32>
    %38 = vector.shape_cast %35 : vector<16x1xf32> to vector<1x16x1xf32>
    tpu.vector_store %arg9[%c0_22, %c0_23, %c0_24], %38 {strides = array<i32>} : memref<4x16x1xf32, #tpu.memory_space<vmem>>, vector<1x16x1xf32>,
    %39 = arith.truncf %29 : vector<16x16xf32> to vector<16x16xbf16>
    %40 = vector.extract_strided_slice %8 {offsets = [0, 0], sizes = [16, 32], strides = [1, 1]} : vector<16x128xbf16> to vector<16x32xbf16>
    %cst_25 = arith.constant dense<0.000000e+00> : vector<16x32xf32>
    %41 = tpu.matmul %39, %40, %cst_25 {dimension_numbers = #tpu.dot_dimension_numbers<[1], [0], [0], [1], [0, 0, 1, 1], [], []>} : vector<16x16xbf16>, vector<16x32xbf16>, vector<16x32xf32> -> vector<16x32xf32>
    %c0_26 = arith.constant 0 : index
    %c0_27 = arith.constant 0 : index
    %c0_28 = arith.constant 0 : index
    %42 = vector.load %arg8[%c0_26, %c0_27, %c0_28] : memref<4x16x1xf32, #tpu.memory_space<vmem>>, vector<1x16x1xf32>
    %43 = vector.shape_cast %42 : vector<1x16x1xf32> to vector<16x1xf32>
    %44 = vector.shape_cast %24 : vector<16x1xf32> to vector<1x16x1xf32>
    tpu.vector_store %arg8[%c0_26, %c0_27, %c0_28], %44 {strides = array<i32>} : memref<4x16x1xf32, #tpu.memory_space<vmem>>, vector<1x16x1xf32>,
    %45 = vector.shape_cast %26 : vector<16x1xf32> to vector<16x1xf32>
    %46 = vector.broadcast %45 : vector<16x1xf32> to vector<16x32xf32>
    %47 = vector.extract_strided_slice %4 {offsets = [0, 32], sizes = [16, 32], strides = [1, 1]} : vector<16x128xbf16> to vector<16x32xbf16>
    %48 = vector.extract_strided_slice %6 {offsets = [0, 32], sizes = [16, 32], strides = [1, 1]} : vector<16x128xbf16> to vector<16x32xbf16>
    %cst_29 = arith.constant dense<0.000000e+00> : vector<16x16xf32>
    %49 = tpu.matmul %47, %48, %cst_29 {dimension_numbers = #tpu.dot_dimension_numbers<[1], [1], [0], [0], [0, 0, 1, 0], [], []>} : vector<16x32xbf16>, vector<16x32xbf16>, vector<16x16xf32> -> vector<16x16xf32>
    %cst_30 = arith.constant -1.000000e+09 : f32
    %50 = vector.broadcast %cst_30 : f32 to vector<16x16xf32>
    %51 = arith.select %14, %49, %50 : vector<16x16xi1>, vector<16x16xf32>
    %c1 = arith.constant 1 : index
    %c0_31 = arith.constant 0 : index
    %c0_32 = arith.constant 0 : index
    %52 = vector.load %arg8[%c1, %c0_31, %c0_32] : memref<4x16x1xf32, #tpu.memory_space<vmem>>, vector<1x16x1xf32>
    %53 = vector.shape_cast %52 : vector<1x16x1xf32> to vector<16x1xf32>
    %cst_33 = arith.constant dense<0xFF800000> : vector<16xf32>
    %54 = vector.multi_reduction <maximumf>, %51, %cst_33 [1] : vector<16x16xf32> to vector<16xf32>
    %55 = vector.shape_cast %54 : vector<16xf32> to vector<16x1xf32>
    %56 = arith.maximumf %53, %55 : vector<16x1xf32>
    %57 = arith.subf %53, %56 : vector<16x1xf32>
    %58 = math.exp %57 : vector<16x1xf32>
    %59 = vector.broadcast %56 : vector<16x1xf32> to vector<16x16xf32>
    %60 = arith.subf %51, %59 : vector<16x16xf32>
    %61 = math.exp %60 : vector<16x16xf32>
    %c1_34 = arith.constant 1 : index
    %c0_35 = arith.constant 0 : index
    %c0_36 = arith.constant 0 : index
    %62 = vector.load %arg9[%c1_34, %c0_35, %c0_36] : memref<4x16x1xf32, #tpu.memory_space<vmem>>, vector<1x16x1xf32>
    %63 = vector.shape_cast %62 : vector<1x16x1xf32> to vector<16x1xf32>
    %64 = arith.mulf %58, %63 : vector<16x1xf32>
    %cst_37 = arith.constant dense<0.000000e+00> : vector<16xf32>
    %65 = vector.multi_reduction <add>, %61, %cst_37 [1] : vector<16x16xf32> to vector<16xf32>
    %66 = vector.shape_cast %65 : vector<16xf32> to vector<16x1xf32>
    %67 = arith.addf %64, %66 : vector<16x1xf32>
    %c1_38 = arith.constant 1 : index
    %c0_39 = arith.constant 0 : index
    %c0_40 = arith.constant 0 : index
    %68 = vector.load %arg9[%c1_38, %c0_39, %c0_40] : memref<4x16x1xf32, #tpu.memory_space<vmem>>, vector<1x16x1xf32>
    %69 = vector.shape_cast %68 : vector<1x16x1xf32> to vector<16x1xf32>
    %70 = vector.shape_cast %67 : vector<16x1xf32> to vector<1x16x1xf32>
    tpu.vector_store %arg9[%c1_38, %c0_39, %c0_40], %70 {strides = array<i32>} : memref<4x16x1xf32, #tpu.memory_space<vmem>>, vector<1x16x1xf32>,
    %71 = arith.truncf %61 : vector<16x16xf32> to vector<16x16xbf16>
    %72 = vector.extract_strided_slice %8 {offsets = [0, 32], sizes = [16, 32], strides = [1, 1]} : vector<16x128xbf16> to vector<16x32xbf16>
    %cst_41 = arith.constant dense<0.000000e+00> : vector<16x32xf32>
    %73 = tpu.matmul %71, %72, %cst_41 {dimension_numbers = #tpu.dot_dimension_numbers<[1], [0], [0], [1], [0, 0, 1, 1], [], []>} : vector<16x16xbf16>, vector<16x32xbf16>, vector<16x32xf32> -> vector<16x32xf32>
    %c1_42 = arith.constant 1 : index
    %c0_43 = arith.constant 0 : index
    %c0_44 = arith.constant 0 : index
    %74 = vector.load %arg8[%c1_42, %c0_43, %c0_44] : memref<4x16x1xf32, #tpu.memory_space<vmem>>, vector<1x16x1xf32>
    %75 = vector.shape_cast %74 : vector<1x16x1xf32> to vector<16x1xf32>
    %76 = vector.shape_cast %56 : vector<16x1xf32> to vector<1x16x1xf32>
    tpu.vector_store %arg8[%c1_42, %c0_43, %c0_44], %76 {strides = array<i32>} : memref<4x16x1xf32, #tpu.memory_space<vmem>>, vector<1x16x1xf32>,
    %77 = vector.shape_cast %58 : vector<16x1xf32> to vector<16x1xf32>
    %78 = vector.broadcast %77 : vector<16x1xf32> to vector<16x32xf32>
    %79 = vector.extract_strided_slice %4 {offsets = [0, 64], sizes = [16, 32], strides = [1, 1]} : vector<16x128xbf16> to vector<16x32xbf16>
    %80 = vector.extract_strided_slice %6 {offsets = [0, 64], sizes = [16, 32], strides = [1, 1]} : vector<16x128xbf16> to vector<16x32xbf16>
    %cst_45 = arith.constant dense<0.000000e+00> : vector<16x16xf32>
    %81 = tpu.matmul %79, %80, %cst_45 {dimension_numbers = #tpu.dot_dimension_numbers<[1], [1], [0], [0], [0, 0, 1, 0], [], []>} : vector<16x32xbf16>, vector<16x32xbf16>, vector<16x16xf32> -> vector<16x16xf32>
    %cst_46 = arith.constant -1.000000e+09 : f32
    %82 = vector.broadcast %cst_46 : f32 to vector<16x16xf32>
    %83 = arith.select %14, %81, %82 : vector<16x16xi1>, vector<16x16xf32>
    %c2 = arith.constant 2 : index
    %c0_47 = arith.constant 0 : index
    %c0_48 = arith.constant 0 : index
    %84 = vector.load %arg8[%c2, %c0_47, %c0_48] : memref<4x16x1xf32, #tpu.memory_space<vmem>>, vector<1x16x1xf32>
    %85 = vector.shape_cast %84 : vector<1x16x1xf32> to vector<16x1xf32>
    %cst_49 = arith.constant dense<0xFF800000> : vector<16xf32>
    %86 = vector.multi_reduction <maximumf>, %83, %cst_49 [1] : vector<16x16xf32> to vector<16xf32>
    %87 = vector.shape_cast %86 : vector<16xf32> to vector<16x1xf32>
    %88 = arith.maximumf %85, %87 : vector<16x1xf32>
    %89 = arith.subf %85, %88 : vector<16x1xf32>
    %90 = math.exp %89 : vector<16x1xf32>
    %91 = vector.broadcast %88 : vector<16x1xf32> to vector<16x16xf32>
    %92 = arith.subf %83, %91 : vector<16x16xf32>
    %93 = math.exp %92 : vector<16x16xf32>
    %c2_50 = arith.constant 2 : index
    %c0_51 = arith.constant 0 : index
    %c0_52 = arith.constant 0 : index
    %94 = vector.load %arg9[%c2_50, %c0_51, %c0_52] : memref<4x16x1xf32, #tpu.memory_space<vmem>>, vector<1x16x1xf32>
    %95 = vector.shape_cast %94 : vector<1x16x1xf32> to vector<16x1xf32>
    %96 = arith.mulf %90, %95 : vector<16x1xf32>
    %cst_53 = arith.constant dense<0.000000e+00> : vector<16xf32>
    %97 = vector.multi_reduction <add>, %93, %cst_53 [1] : vector<16x16xf32> to vector<16xf32>
    %98 = vector.shape_cast %97 : vector<16xf32> to vector<16x1xf32>
    %99 = arith.addf %96, %98 : vector<16x1xf32>
    %c2_54 = arith.constant 2 : index
    %c0_55 = arith.constant 0 : index
    %c0_56 = arith.constant 0 : index
    %100 = vector.load %arg9[%c2_54, %c0_55, %c0_56] : memref<4x16x1xf32, #tpu.memory_space<vmem>>, vector<1x16x1xf32>
    %101 = vector.shape_cast %100 : vector<1x16x1xf32> to vector<16x1xf32>
    %102 = vector.shape_cast %99 : vector<16x1xf32> to vector<1x16x1xf32>
    tpu.vector_store %arg9[%c2_54, %c0_55, %c0_56], %102 {strides = array<i32>} : memref<4x16x1xf32, #tpu.memory_space<vmem>>, vector<1x16x1xf32>,
    %103 = arith.truncf %93 : vector<16x16xf32> to vector<16x16xbf16>
    %104 = vector.extract_strided_slice %8 {offsets = [0, 64], sizes = [16, 32], strides = [1, 1]} : vector<16x128xbf16> to vector<16x32xbf16>
    %cst_57 = arith.constant dense<0.000000e+00> : vector<16x32xf32>
    %105 = tpu.matmul %103, %104, %cst_57 {dimension_numbers = #tpu.dot_dimension_numbers<[1], [0], [0], [1], [0, 0, 1, 1], [], []>} : vector<16x16xbf16>, vector<16x32xbf16>, vector<16x32xf32> -> vector<16x32xf32>
    %c2_58 = arith.constant 2 : index
    %c0_59 = arith.constant 0 : index
    %c0_60 = arith.constant 0 : index
    %106 = vector.load %arg8[%c2_58, %c0_59, %c0_60] : memref<4x16x1xf32, #tpu.memory_space<vmem>>, vector<1x16x1xf32>
    %107 = vector.shape_cast %106 : vector<1x16x1xf32> to vector<16x1xf32>
    %108 = vector.shape_cast %88 : vector<16x1xf32> to vector<1x16x1xf32>
    tpu.vector_store %arg8[%c2_58, %c0_59, %c0_60], %108 {strides = array<i32>} : memref<4x16x1xf32, #tpu.memory_space<vmem>>, vector<1x16x1xf32>,
    %109 = vector.shape_cast %90 : vector<16x1xf32> to vector<16x1xf32>
    %110 = vector.broadcast %109 : vector<16x1xf32> to vector<16x32xf32>
    %111 = vector.extract_strided_slice %4 {offsets = [0, 96], sizes = [16, 32], strides = [1, 1]} : vector<16x128xbf16> to vector<16x32xbf16>
    %112 = vector.extract_strided_slice %6 {offsets = [0, 96], sizes = [16, 32], strides = [1, 1]} : vector<16x128xbf16> to vector<16x32xbf16>
    %cst_61 = arith.constant dense<0.000000e+00> : vector<16x16xf32>
    %113 = tpu.matmul %111, %112, %cst_61 {dimension_numbers = #tpu.dot_dimension_numbers<[1], [1], [0], [0], [0, 0, 1, 0], [], []>} : vector<16x32xbf16>, vector<16x32xbf16>, vector<16x16xf32> -> vector<16x16xf32>
    %cst_62 = arith.constant -1.000000e+09 : f32
    %114 = vector.broadcast %cst_62 : f32 to vector<16x16xf32>
    %115 = arith.select %14, %113, %114 : vector<16x16xi1>, vector<16x16xf32>
    %c3 = arith.constant 3 : index
    %c0_63 = arith.constant 0 : index
    %c0_64 = arith.constant 0 : index
    %116 = vector.load %arg8[%c3, %c0_63, %c0_64] : memref<4x16x1xf32, #tpu.memory_space<vmem>>, vector<1x16x1xf32>
    %117 = vector.shape_cast %116 : vector<1x16x1xf32> to vector<16x1xf32>
    %cst_65 = arith.constant dense<0xFF800000> : vector<16xf32>
    %118 = vector.multi_reduction <maximumf>, %115, %cst_65 [1] : vector<16x16xf32> to vector<16xf32>
    %119 = vector.shape_cast %118 : vector<16xf32> to vector<16x1xf32>
    %120 = arith.maximumf %117, %119 : vector<16x1xf32>
    %121 = arith.subf %117, %120 : vector<16x1xf32>
    %122 = math.exp %121 : vector<16x1xf32>
    %123 = vector.broadcast %120 : vector<16x1xf32> to vector<16x16xf32>
    %124 = arith.subf %115, %123 : vector<16x16xf32>
    %125 = math.exp %124 : vector<16x16xf32>
    %c3_66 = arith.constant 3 : index
    %c0_67 = arith.constant 0 : index
    %c0_68 = arith.constant 0 : index
    %126 = vector.load %arg9[%c3_66, %c0_67, %c0_68] : memref<4x16x1xf32, #tpu.memory_space<vmem>>, vector<1x16x1xf32>
    %127 = vector.shape_cast %126 : vector<1x16x1xf32> to vector<16x1xf32>
    %128 = arith.mulf %122, %127 : vector<16x1xf32>
    %cst_69 = arith.constant dense<0.000000e+00> : vector<16xf32>
    %129 = vector.multi_reduction <add>, %125, %cst_69 [1] : vector<16x16xf32> to vector<16xf32>
    %130 = vector.shape_cast %129 : vector<16xf32> to vector<16x1xf32>
    %131 = arith.addf %128, %130 : vector<16x1xf32>
    %c3_70 = arith.constant 3 : index
    %c0_71 = arith.constant 0 : index
    %c0_72 = arith.constant 0 : index
    %132 = vector.load %arg9[%c3_70, %c0_71, %c0_72] : memref<4x16x1xf32, #tpu.memory_space<vmem>>, vector<1x16x1xf32>
    %133 = vector.shape_cast %132 : vector<1x16x1xf32> to vector<16x1xf32>
    %134 = vector.shape_cast %131 : vector<16x1xf32> to vector<1x16x1xf32>
    tpu.vector_store %arg9[%c3_70, %c0_71, %c0_72], %134 {strides = array<i32>} : memref<4x16x1xf32, #tpu.memory_space<vmem>>, vector<1x16x1xf32>,
    %135 = arith.truncf %125 : vector<16x16xf32> to vector<16x16xbf16>
    %136 = vector.extract_strided_slice %8 {offsets = [0, 96], sizes = [16, 32], strides = [1, 1]} : vector<16x128xbf16> to vector<16x32xbf16>
    %cst_73 = arith.constant dense<0.000000e+00> : vector<16x32xf32>
    %137 = tpu.matmul %135, %136, %cst_73 {dimension_numbers = #tpu.dot_dimension_numbers<[1], [0], [0], [1], [0, 0, 1, 1], [], []>} : vector<16x16xbf16>, vector<16x32xbf16>, vector<16x32xf32> -> vector<16x32xf32>
    %c3_74 = arith.constant 3 : index
    %c0_75 = arith.constant 0 : index
    %c0_76 = arith.constant 0 : index
    %138 = vector.load %arg8[%c3_74, %c0_75, %c0_76] : memref<4x16x1xf32, #tpu.memory_space<vmem>>, vector<1x16x1xf32>
    %139 = vector.shape_cast %138 : vector<1x16x1xf32> to vector<16x1xf32>
    %140 = vector.shape_cast %120 : vector<16x1xf32> to vector<1x16x1xf32>
    tpu.vector_store %arg8[%c3_74, %c0_75, %c0_76], %140 {strides = array<i32>} : memref<4x16x1xf32, #tpu.memory_space<vmem>>, vector<1x16x1xf32>,
    %141 = vector.shape_cast %122 : vector<16x1xf32> to vector<16x1xf32>
    %142 = vector.broadcast %141 : vector<16x1xf32> to vector<16x32xf32>
    %143 = tpu.concatenate %46, %78, %110, %142 in 1 : vector<16x32xf32>, vector<16x32xf32>, vector<16x32xf32>, vector<16x32xf32> -> vector<16x128xf32>
    %144 = tpu.concatenate %41, %73, %105, %137 in 1 : vector<16x32xf32>, vector<16x32xf32>, vector<16x32xf32>, vector<16x32xf32> -> vector<16x128xf32>
    %c0_77 = arith.constant 0 : index
    %c0_78 = arith.constant 0 : index
    %145 = vector.load %arg10[%c0_77, %c0_78] : memref<16x128xf32, #tpu.memory_space<vmem>>, vector<16x128xf32>
    %146 = arith.mulf %143, %145 : vector<16x128xf32>
    %147 = arith.addf %146, %144 : vector<16x128xf32>
    %c0_79 = arith.constant 0 : index
    %c0_80 = arith.constant 0 : index
    %148 = vector.load %arg10[%c0_79, %c0_80] : memref<16x128xf32, #tpu.memory_space<vmem>>, vector<16x128xf32>
    tpu.vector_store %arg10[%c0_79, %c0_80], %147 {strides = array<i32>} : memref<16x128xf32, #tpu.memory_space<vmem>>, vector<16x128xf32>,
    %c0_i32_81 = arith.constant 0 : i32
    %149 = arith.cmpi eq, %arg2, %c0_i32_81 : i32
    %150 = arith.extui %149 : i1 to i32
    %c0_i32_82 = arith.constant 0 : i32
    %151 = arith.cmpi ne, %150, %c0_i32_82 : i32
    scf.if %151 {
      %c0_83 = arith.constant 0 : index
      %c0_84 = arith.constant 0 : index
      %c0_85 = arith.constant 0 : index
      %152 = vector.load %arg9[%c0_83, %c0_84, %c0_85] : memref<4x16x1xf32, #tpu.memory_space<vmem>>, vector<1x16x1xf32>
      %153 = vector.shape_cast %152 : vector<1x16x1xf32> to vector<16x1xf32>
      %154 = tpu.reciprocal %153 {approx = true} : vector<16x1xf32> -> vector<16x1xf32>
      %155 = vector.shape_cast %154 : vector<16x1xf32> to vector<16x1xf32>
      %156 = vector.broadcast %155 : vector<16x1xf32> to vector<16x32xf32>
      %c1_86 = arith.constant 1 : index
      %c0_87 = arith.constant 0 : index
      %c0_88 = arith.constant 0 : index
      %157 = vector.load %arg9[%c1_86, %c0_87, %c0_88] : memref<4x16x1xf32, #tpu.memory_space<vmem>>, vector<1x16x1xf32>
      %158 = vector.shape_cast %157 : vector<1x16x1xf32> to vector<16x1xf32>
      %159 = tpu.reciprocal %158 {approx = true} : vector<16x1xf32> -> vector<16x1xf32>
      %160 = vector.shape_cast %159 : vector<16x1xf32> to vector<16x1xf32>
      %161 = vector.broadcast %160 : vector<16x1xf32> to vector<16x32xf32>
      %c2_89 = arith.constant 2 : index
      %c0_90 = arith.constant 0 : index
      %c0_91 = arith.constant 0 : index
      %162 = vector.load %arg9[%c2_89, %c0_90, %c0_91] : memref<4x16x1xf32, #tpu.memory_space<vmem>>, vector<1x16x1xf32>
      %163 = vector.shape_cast %162 : vector<1x16x1xf32> to vector<16x1xf32>
      %164 = tpu.reciprocal %163 {approx = true} : vector<16x1xf32> -> vector<16x1xf32>
      %165 = vector.shape_cast %164 : vector<16x1xf32> to vector<16x1xf32>
      %166 = vector.broadcast %165 : vector<16x1xf32> to vector<16x32xf32>
      %c3_92 = arith.constant 3 : index
      %c0_93 = arith.constant 0 : index
      %c0_94 = arith.constant 0 : index
      %167 = vector.load %arg9[%c3_92, %c0_93, %c0_94] : memref<4x16x1xf32, #tpu.memory_space<vmem>>, vector<1x16x1xf32>
      %168 = vector.shape_cast %167 : vector<1x16x1xf32> to vector<16x1xf32>
      %169 = tpu.reciprocal %168 {approx = true} : vector<16x1xf32> -> vector<16x1xf32>
      %170 = vector.shape_cast %169 : vector<16x1xf32> to vector<16x1xf32>
      %171 = vector.broadcast %170 : vector<16x1xf32> to vector<16x32xf32>
      %c0_95 = arith.constant 0 : index
      %c0_96 = arith.constant 0 : index
      %172 = vector.load %arg10[%c0_95, %c0_96] : memref<16x128xf32, #tpu.memory_space<vmem>>, vector<16x128xf32>
      %173 = tpu.concatenate %156, %161, %166, %171 in 1 : vector<16x32xf32>, vector<16x32xf32>, vector<16x32xf32>, vector<16x32xf32> -> vector<16x128xf32>
      %174 = arith.mulf %172, %173 : vector<16x128xf32>
      %175 = arith.truncf %174 : vector<16x128xf32> to vector<16x128xbf16>
      %c0_97 = arith.constant 0 : index
      %c0_98 = arith.constant 0 : index
      %c0_99 = arith.constant 0 : index
      %176 = vector.load %arg7[%c0_97, %c0_98, %c0_99] : memref<1x16x128xbf16, #tpu.memory_space<vmem>>, vector<1x16x128xbf16>
      %177 = vector.shape_cast %176 : vector<1x16x128xbf16> to vector<16x128xbf16>
      %178 = vector.shape_cast %175 : vector<16x128xbf16> to vector<1x16x128xbf16>
      tpu.vector_store %arg7[%c0_97, %c0_98, %c0_99], %178 {strides = array<i32>} : memref<1x16x128xbf16, #tpu.memory_space<vmem>>, vector<1x16x128xbf16>,
    } else {
    }
    return
  }
  func.func @transform_0(%arg0: i32, %arg1: i32, %arg2: i32) -> (i32, i32, i32) {
    %c0_i32 = arith.constant 0 : i32
    %c0_i32_0 = arith.constant 0 : i32
    return %arg0, %arg1, %c0_i32 : i32, i32, i32
  }
  func.func @transform_1(%arg0: i32, %arg1: i32, %arg2: i32) -> (i32, i32, i32) {
    %c1_i32 = arith.constant 1 : i32
    %c0_i32 = arith.constant 0 : i32
    return %arg0, %arg2, %c1_i32 : i32, i32, i32
  }
  func.func @transform_2(%arg0: i32, %arg1: i32, %arg2: i32) -> (i32, i32, i32) {
    %c2_i32 = arith.constant 2 : i32
    %c0_i32 = arith.constant 0 : i32
    return %arg0, %arg2, %c2_i32 : i32, i32, i32
  }
  func.func @transform_3(%arg0: i32, %arg1: i32, %arg2: i32) -> (i32, i32, i32) {
    %c0_i32 = arith.constant 0 : i32
    %c0_i32_0 = arith.constant 0 : i32
    return %arg0, %c0_i32, %arg2 : i32, i32, i32
  }
  func.func @transform_4(%arg0: i32, %arg1: i32, %arg2: i32) -> (i32, i32, i32) {
    %c0_i32 = arith.constant 0 : i32
    %c0_i32_0 = arith.constant 0 : i32
    return %arg0, %arg1, %c0_i32 : i32, i32, i32
  }
}

module attributes {stable_mosaic.version = 11 : i64} {
  func.func @_ln_ffn_kernel(%arg0: i32, %arg1: i32, %arg2: memref<32x128xbf16, #tpu.memory_space<vmem>>, %arg3: memref<1x128xf32, #tpu.memory_space<vmem>>, %arg4: memref<1x128xf32, #tpu.memory_space<vmem>>, %arg5: memref<128x256xbf16, #tpu.memory_space<vmem>>, %arg6: memref<1x256xf32, #tpu.memory_space<vmem>>, %arg7: memref<256x128xbf16, #tpu.memory_space<vmem>>, %arg8: memref<1x128xf32, #tpu.memory_space<vmem>>, %arg9: memref<32x128xbf16, #tpu.memory_space<vmem>>, %arg10: memref<32x128xbf16, #tpu.memory_space<vmem>>, %arg11: memref<32x128xf32, #tpu.memory_space<vmem>>) attributes {dimension_semantics = [#tpu.dimension_semantics<parallel>, #tpu.dimension_semantics<arbitrary>], iteration_bounds = array<i64: 1, 1>, scalar_prefetch = 0 : i64, scratch_operands = 2 : i64, tpu.core_type = #tpu.core_type<tc>, window_params = [{transform_indices = @transform_0, window_bounds = array<i64: 32, 128>}, {pipeline_mode = #tpu.pipeline_mode<synchronous>, transform_indices = @transform_1, window_bounds = array<i64: 1, 128>}, {pipeline_mode = #tpu.pipeline_mode<synchronous>, transform_indices = @transform_2, window_bounds = array<i64: 1, 128>}, {transform_indices = @transform_3, window_bounds = array<i64: 128, 256>}, {transform_indices = @transform_4, window_bounds = array<i64: 1, 256>}, {transform_indices = @transform_5, window_bounds = array<i64: 256, 128>}, {pipeline_mode = #tpu.pipeline_mode<synchronous>, transform_indices = @transform_6, window_bounds = array<i64: 1, 128>}, {transform_indices = @transform_7, window_bounds = array<i64: 32, 128>}]} {
    %c0_i32 = arith.constant 0 : i32
    %0 = arith.cmpi eq, %arg1, %c0_i32 : i32
    %1 = arith.extui %0 : i1 to i32
    %c0_i32_0 = arith.constant 0 : i32
    %2 = arith.cmpi ne, %1, %c0_i32_0 : i32
    scf.if %2 {
      %c0_16 = arith.constant 0 : index
      %c0_17 = arith.constant 0 : index
      %20 = vector.load %arg2[%c0_16, %c0_17] : memref<32x128xbf16, #tpu.memory_space<vmem>>, vector<32x128xbf16>
      %21 = arith.extf %20 : vector<32x128xbf16> to vector<32x128xf32>
      %c0_18 = arith.constant 0 : index
      %c0_19 = arith.constant 0 : index
      %22 = vector.load %arg3[%c0_18, %c0_19] : memref<1x128xf32, #tpu.memory_space<vmem>>, vector<1x128xf32>
      %c0_20 = arith.constant 0 : index
      %c0_21 = arith.constant 0 : index
      %23 = vector.load %arg4[%c0_20, %c0_21] : memref<1x128xf32, #tpu.memory_space<vmem>>, vector<1x128xf32>
      %cst_22 = arith.constant dense<0.000000e+00> : vector<32xf32>
      %24 = vector.multi_reduction <add>, %21, %cst_22 [1] : vector<32x128xf32> to vector<32xf32>
      %25 = vector.shape_cast %24 : vector<32xf32> to vector<32x1xf32>
      %cst_23 = arith.constant 1.280000e+02 : f32
      %26 = vector.broadcast %cst_23 : f32 to vector<32x1xf32>
      %27 = arith.divf %25, %26 : vector<32x1xf32>
      %28 = vector.broadcast %27 : vector<32x1xf32> to vector<32x128xf32>
      %29 = arith.subf %21, %28 : vector<32x128xf32>
      %30 = arith.mulf %29, %29 : vector<32x128xf32>
      %cst_24 = arith.constant dense<0.000000e+00> : vector<32xf32>
      %31 = vector.multi_reduction <add>, %30, %cst_24 [1] : vector<32x128xf32> to vector<32xf32>
      %32 = vector.shape_cast %31 : vector<32xf32> to vector<32x1xf32>
      %cst_25 = arith.constant 0.00787401571 : f32
      %33 = vector.broadcast %cst_25 : f32 to vector<32x1xf32>
      %34 = arith.mulf %32, %33 : vector<32x1xf32>
      %35 = math.sqrt %34 : vector<32x1xf32>
      %cst_26 = arith.constant 9.99999997E-7 : f32
      %36 = vector.broadcast %cst_26 : f32 to vector<32x1xf32>
      %37 = arith.addf %35, %36 : vector<32x1xf32>
      %38 = vector.broadcast %27 : vector<32x1xf32> to vector<32x128xf32>
      %39 = arith.subf %21, %38 : vector<32x128xf32>
      %40 = tpu.reciprocal %37 {approx = true} : vector<32x1xf32> -> vector<32x1xf32>
      %41 = vector.broadcast %40 : vector<32x1xf32> to vector<32x128xf32>
      %42 = arith.mulf %39, %41 : vector<32x128xf32>
      %43 = vector.broadcast %22 : vector<1x128xf32> to vector<32x128xf32>
      %44 = arith.mulf %43, %42 : vector<32x128xf32>
      %45 = vector.broadcast %23 : vector<1x128xf32> to vector<32x128xf32>
      %46 = arith.addf %44, %45 : vector<32x128xf32>
      %47 = arith.truncf %46 : vector<32x128xf32> to vector<32x128xbf16>
      %c0_27 = arith.constant 0 : index
      %c0_28 = arith.constant 0 : index
      %48 = vector.load %arg10[%c0_27, %c0_28] : memref<32x128xbf16, #tpu.memory_space<vmem>>, vector<32x128xbf16>
      tpu.vector_store %arg10[%c0_27, %c0_28], %47 {strides = array<i32>} : memref<32x128xbf16, #tpu.memory_space<vmem>>, vector<32x128xbf16>,
      %cst_29 = arith.constant 0.000000e+00 : f32
      %49 = vector.broadcast %cst_29 : f32 to vector<32x128xf32>
      %c0_30 = arith.constant 0 : index
      %c0_31 = arith.constant 0 : index
      %50 = vector.load %arg11[%c0_30, %c0_31] : memref<32x128xf32, #tpu.memory_space<vmem>>, vector<32x128xf32>
      tpu.vector_store %arg11[%c0_30, %c0_31], %49 {strides = array<i32>} : memref<32x128xf32, #tpu.memory_space<vmem>>, vector<32x128xf32>,
    } else {
    }
    %c0 = arith.constant 0 : index
    %c0_1 = arith.constant 0 : index
    %3 = vector.load %arg10[%c0, %c0_1] : memref<32x128xbf16, #tpu.memory_space<vmem>>, vector<32x128xbf16>
    %c0_2 = arith.constant 0 : index
    %c0_3 = arith.constant 0 : index
    %4 = vector.load %arg5[%c0_2, %c0_3] : memref<128x256xbf16, #tpu.memory_space<vmem>>, vector<128x256xbf16>
    %cst = arith.constant dense<0.000000e+00> : vector<32x256xf32>
    %5 = tpu.matmul %3, %4, %cst {dimension_numbers = #tpu.dot_dimension_numbers<[1], [0], [0], [1], [0, 0, 1, 1], [], []>} : vector<32x128xbf16>, vector<128x256xbf16>, vector<32x256xf32> -> vector<32x256xf32>
    %c0_4 = arith.constant 0 : index
    %c0_5 = arith.constant 0 : index
    %6 = vector.load %arg6[%c0_4, %c0_5] : memref<1x256xf32, #tpu.memory_space<vmem>>, vector<1x256xf32>
    %7 = vector.broadcast %6 : vector<1x256xf32> to vector<32x256xf32>
    %8 = arith.addf %5, %7 : vector<32x256xf32>
    %cst_6 = arith.constant 0.000000e+00 : f32
    %9 = vector.broadcast %cst_6 : f32 to vector<32x256xf32>
    %10 = arith.maximumf %8, %9 : vector<32x256xf32>
    %11 = arith.truncf %10 : vector<32x256xf32> to vector<32x256xbf16>
    %c0_7 = arith.constant 0 : index
    %c0_8 = arith.constant 0 : index
    %12 = vector.load %arg11[%c0_7, %c0_8] : memref<32x128xf32, #tpu.memory_space<vmem>>, vector<32x128xf32>
    %c0_9 = arith.constant 0 : index
    %c0_10 = arith.constant 0 : index
    %13 = vector.load %arg7[%c0_9, %c0_10] : memref<256x128xbf16, #tpu.memory_space<vmem>>, vector<256x128xbf16>
    %cst_11 = arith.constant dense<0.000000e+00> : vector<32x128xf32>
    %14 = tpu.matmul %11, %13, %cst_11 {dimension_numbers = #tpu.dot_dimension_numbers<[1], [0], [0], [1], [0, 0, 1, 1], [], []>} : vector<32x256xbf16>, vector<256x128xbf16>, vector<32x128xf32> -> vector<32x128xf32>
    %15 = arith.addf %12, %14 : vector<32x128xf32>
    %c0_12 = arith.constant 0 : index
    %c0_13 = arith.constant 0 : index
    %16 = vector.load %arg11[%c0_12, %c0_13] : memref<32x128xf32, #tpu.memory_space<vmem>>, vector<32x128xf32>
    tpu.vector_store %arg11[%c0_12, %c0_13], %15 {strides = array<i32>} : memref<32x128xf32, #tpu.memory_space<vmem>>, vector<32x128xf32>,
    %c0_i32_14 = arith.constant 0 : i32
    %17 = arith.cmpi eq, %arg1, %c0_i32_14 : i32
    %18 = arith.extui %17 : i1 to i32
    %c0_i32_15 = arith.constant 0 : i32
    %19 = arith.cmpi ne, %18, %c0_i32_15 : i32
    scf.if %19 {
      %c0_16 = arith.constant 0 : index
      %c0_17 = arith.constant 0 : index
      %20 = vector.load %arg11[%c0_16, %c0_17] : memref<32x128xf32, #tpu.memory_space<vmem>>, vector<32x128xf32>
      %c0_18 = arith.constant 0 : index
      %c0_19 = arith.constant 0 : index
      %21 = vector.load %arg8[%c0_18, %c0_19] : memref<1x128xf32, #tpu.memory_space<vmem>>, vector<1x128xf32>
      %22 = vector.broadcast %21 : vector<1x128xf32> to vector<32x128xf32>
      %23 = arith.addf %20, %22 : vector<32x128xf32>
      %c0_20 = arith.constant 0 : index
      %c0_21 = arith.constant 0 : index
      %24 = vector.load %arg2[%c0_20, %c0_21] : memref<32x128xbf16, #tpu.memory_space<vmem>>, vector<32x128xbf16>
      %25 = arith.extf %24 : vector<32x128xbf16> to vector<32x128xf32>
      %26 = arith.addf %23, %25 : vector<32x128xf32>
      %27 = arith.truncf %26 : vector<32x128xf32> to vector<32x128xbf16>
      %c0_22 = arith.constant 0 : index
      %c0_23 = arith.constant 0 : index
      %28 = vector.load %arg9[%c0_22, %c0_23] : memref<32x128xbf16, #tpu.memory_space<vmem>>, vector<32x128xbf16>
      tpu.vector_store %arg9[%c0_22, %c0_23], %27 {strides = array<i32>} : memref<32x128xbf16, #tpu.memory_space<vmem>>, vector<32x128xbf16>,
    } else {
    }
    return
  }
  func.func @transform_0(%arg0: i32, %arg1: i32) -> (i32, i32) {
    %c0_i32 = arith.constant 0 : i32
    %c0_i32_0 = arith.constant 0 : i32
    return %arg0, %c0_i32 : i32, i32
  }
  func.func @transform_1(%arg0: i32, %arg1: i32) -> (i32, i32) {
    %c0_i32 = arith.constant 0 : i32
    %c0_i32_0 = arith.constant 0 : i32
    %c0_i32_1 = arith.constant 0 : i32
    return %c0_i32, %c0_i32_0 : i32, i32
  }
  func.func @transform_2(%arg0: i32, %arg1: i32) -> (i32, i32) {
    %c0_i32 = arith.constant 0 : i32
    %c0_i32_0 = arith.constant 0 : i32
    %c0_i32_1 = arith.constant 0 : i32
    return %c0_i32, %c0_i32_0 : i32, i32
  }
  func.func @transform_3(%arg0: i32, %arg1: i32) -> (i32, i32) {
    %c0_i32 = arith.constant 0 : i32
    %c0_i32_0 = arith.constant 0 : i32
    return %c0_i32, %arg1 : i32, i32
  }
  func.func @transform_4(%arg0: i32, %arg1: i32) -> (i32, i32) {
    %c0_i32 = arith.constant 0 : i32
    %c0_i32_0 = arith.constant 0 : i32
    return %c0_i32, %arg1 : i32, i32
  }
  func.func @transform_5(%arg0: i32, %arg1: i32) -> (i32, i32) {
    %c0_i32 = arith.constant 0 : i32
    %c0_i32_0 = arith.constant 0 : i32
    return %arg1, %c0_i32 : i32, i32
  }
  func.func @transform_6(%arg0: i32, %arg1: i32) -> (i32, i32) {
    %c0_i32 = arith.constant 0 : i32
    %c0_i32_0 = arith.constant 0 : i32
    %c0_i32_1 = arith.constant 0 : i32
    return %c0_i32, %c0_i32_0 : i32, i32
  }
  func.func @transform_7(%arg0: i32, %arg1: i32) -> (i32, i32) {
    %c0_i32 = arith.constant 0 : i32
    %c0_i32_0 = arith.constant 0 : i32
    return %arg0, %c0_i32 : i32, i32
  }
}

module attributes {stable_mosaic.version = 11 : i64} {
  func.func @_matmul_residual_kernel(%arg0: i32, %arg1: i32, %arg2: memref<32x128xbf16, #tpu.memory_space<vmem>>, %arg3: memref<128x128xbf16, #tpu.memory_space<vmem>>, %arg4: memref<1x128xf32, #tpu.memory_space<vmem>>, %arg5: memref<32x128xbf16, #tpu.memory_space<vmem>>, %arg6: memref<32x128xbf16, #tpu.memory_space<vmem>>) attributes {dimension_semantics = [#tpu.dimension_semantics<parallel>, #tpu.dimension_semantics<parallel>], iteration_bounds = array<i64: 1, 1>, scalar_prefetch = 0 : i64, scratch_operands = 0 : i64, tpu.core_type = #tpu.core_type<tc>, window_params = [{transform_indices = @transform_0, window_bounds = array<i64: 32, 128>}, {transform_indices = @transform_1, window_bounds = array<i64: 128, 128>}, {transform_indices = @transform_2, window_bounds = array<i64: 1, 128>}, {transform_indices = @transform_3, window_bounds = array<i64: 32, 128>}, {transform_indices = @transform_4, window_bounds = array<i64: 32, 128>}]} {
    %c0 = arith.constant 0 : index
    %c0_0 = arith.constant 0 : index
    %0 = vector.load %arg2[%c0, %c0_0] : memref<32x128xbf16, #tpu.memory_space<vmem>>, vector<32x128xbf16>
    %c0_1 = arith.constant 0 : index
    %c0_2 = arith.constant 0 : index
    %1 = vector.load %arg3[%c0_1, %c0_2] : memref<128x128xbf16, #tpu.memory_space<vmem>>, vector<128x128xbf16>
    %cst = arith.constant dense<0.000000e+00> : vector<32x128xf32>
    %2 = tpu.matmul %0, %1, %cst {dimension_numbers = #tpu.dot_dimension_numbers<[1], [0], [0], [1], [0, 0, 1, 1], [], []>} : vector<32x128xbf16>, vector<128x128xbf16>, vector<32x128xf32> -> vector<32x128xf32>
    %c0_3 = arith.constant 0 : index
    %c0_4 = arith.constant 0 : index
    %3 = vector.load %arg4[%c0_3, %c0_4] : memref<1x128xf32, #tpu.memory_space<vmem>>, vector<1x128xf32>
    %4 = vector.broadcast %3 : vector<1x128xf32> to vector<32x128xf32>
    %5 = arith.addf %2, %4 : vector<32x128xf32>
    %c0_5 = arith.constant 0 : index
    %c0_6 = arith.constant 0 : index
    %6 = vector.load %arg5[%c0_5, %c0_6] : memref<32x128xbf16, #tpu.memory_space<vmem>>, vector<32x128xbf16>
    %7 = arith.extf %6 : vector<32x128xbf16> to vector<32x128xf32>
    %8 = arith.addf %5, %7 : vector<32x128xf32>
    %9 = arith.truncf %8 : vector<32x128xf32> to vector<32x128xbf16>
    %c0_7 = arith.constant 0 : index
    %c0_8 = arith.constant 0 : index
    %10 = vector.load %arg6[%c0_7, %c0_8] : memref<32x128xbf16, #tpu.memory_space<vmem>>, vector<32x128xbf16>
    tpu.vector_store %arg6[%c0_7, %c0_8], %9 {strides = array<i32>} : memref<32x128xbf16, #tpu.memory_space<vmem>>, vector<32x128xbf16>,
    return
  }
  func.func @transform_0(%arg0: i32, %arg1: i32) -> (i32, i32) {
    %c0_i32 = arith.constant 0 : i32
    %c0_i32_0 = arith.constant 0 : i32
    return %arg0, %c0_i32 : i32, i32
  }
  func.func @transform_1(%arg0: i32, %arg1: i32) -> (i32, i32) {
    %c0_i32 = arith.constant 0 : i32
    %c0_i32_0 = arith.constant 0 : i32
    return %c0_i32, %arg1 : i32, i32
  }
  func.func @transform_2(%arg0: i32, %arg1: i32) -> (i32, i32) {
    %c0_i32 = arith.constant 0 : i32
    %c0_i32_0 = arith.constant 0 : i32
    return %c0_i32, %arg1 : i32, i32
  }
  func.func @transform_3(%arg0: i32, %arg1: i32) -> (i32, i32) {
    %c0_i32 = arith.constant 0 : i32
    return %arg0, %arg1 : i32, i32
  }
  func.func @transform_4(%arg0: i32, %arg1: i32) -> (i32, i32) {
    %c0_i32 = arith.constant 0 : i32
    return %arg0, %arg1 : i32, i32
  }
}

module attributes {stable_mosaic.version = 11 : i64} {
  func.func @_matmul_kernel(%arg0: i32, %arg1: i32, %arg2: memref<32x128xbf16, #tpu.memory_space<vmem>>, %arg3: memref<128x256xbf16, #tpu.memory_space<vmem>>, %arg4: memref<1x256xf32, #tpu.memory_space<vmem>>, %arg5: memref<32x256xbf16, #tpu.memory_space<vmem>>) attributes {dimension_semantics = [#tpu.dimension_semantics<parallel>, #tpu.dimension_semantics<parallel>], iteration_bounds = array<i64: 1, 1>, scalar_prefetch = 0 : i64, scratch_operands = 0 : i64, tpu.core_type = #tpu.core_type<tc>, window_params = [{transform_indices = @transform_0, window_bounds = array<i64: 32, 128>}, {transform_indices = @transform_1, window_bounds = array<i64: 128, 256>}, {transform_indices = @transform_2, window_bounds = array<i64: 1, 256>}, {transform_indices = @transform_3, window_bounds = array<i64: 32, 256>}]} {
    %c0 = arith.constant 0 : index
    %c0_0 = arith.constant 0 : index
    %0 = vector.load %arg2[%c0, %c0_0] : memref<32x128xbf16, #tpu.memory_space<vmem>>, vector<32x128xbf16>
    %c0_1 = arith.constant 0 : index
    %c0_2 = arith.constant 0 : index
    %1 = vector.load %arg3[%c0_1, %c0_2] : memref<128x256xbf16, #tpu.memory_space<vmem>>, vector<128x256xbf16>
    %cst = arith.constant dense<0.000000e+00> : vector<32x256xf32>
    %2 = tpu.matmul %0, %1, %cst {dimension_numbers = #tpu.dot_dimension_numbers<[1], [0], [0], [1], [0, 0, 1, 1], [], []>} : vector<32x128xbf16>, vector<128x256xbf16>, vector<32x256xf32> -> vector<32x256xf32>
    %c0_3 = arith.constant 0 : index
    %c0_4 = arith.constant 0 : index
    %3 = vector.load %arg4[%c0_3, %c0_4] : memref<1x256xf32, #tpu.memory_space<vmem>>, vector<1x256xf32>
    %4 = vector.broadcast %3 : vector<1x256xf32> to vector<32x256xf32>
    %5 = arith.addf %2, %4 : vector<32x256xf32>
    %6 = arith.truncf %5 : vector<32x256xf32> to vector<32x256xbf16>
    %c0_5 = arith.constant 0 : index
    %c0_6 = arith.constant 0 : index
    %7 = vector.load %arg5[%c0_5, %c0_6] : memref<32x256xbf16, #tpu.memory_space<vmem>>, vector<32x256xbf16>
    tpu.vector_store %arg5[%c0_5, %c0_6], %6 {strides = array<i32>} : memref<32x256xbf16, #tpu.memory_space<vmem>>, vector<32x256xbf16>,
    return
  }
  func.func @transform_0(%arg0: i32, %arg1: i32) -> (i32, i32) {
    %c0_i32 = arith.constant 0 : i32
    %c0_i32_0 = arith.constant 0 : i32
    return %arg0, %c0_i32 : i32, i32
  }
  func.func @transform_1(%arg0: i32, %arg1: i32) -> (i32, i32) {
    %c0_i32 = arith.constant 0 : i32
    %c0_i32_0 = arith.constant 0 : i32
    return %c0_i32, %arg1 : i32, i32
  }
  func.func @transform_2(%arg0: i32, %arg1: i32) -> (i32, i32) {
    %c0_i32 = arith.constant 0 : i32
    %c0_i32_0 = arith.constant 0 : i32
    return %c0_i32, %arg1 : i32, i32
  }
  func.func @transform_3(%arg0: i32, %arg1: i32) -> (i32, i32) {
    %c0_i32 = arith.constant 0 : i32
    return %arg0, %arg1 : i32, i32
  }
}

module attributes {stable_mosaic.version = 11 : i64} {
  func.func @_ln_kernel(%arg0: i32, %arg1: memref<32x128xbf16, #tpu.memory_space<vmem>>, %arg2: memref<1x128xf32, #tpu.memory_space<vmem>>, %arg3: memref<1x128xf32, #tpu.memory_space<vmem>>, %arg4: memref<32x128xbf16, #tpu.memory_space<vmem>>) attributes {dimension_semantics = [#tpu.dimension_semantics<parallel>], iteration_bounds = array<i64: 1>, scalar_prefetch = 0 : i64, scratch_operands = 0 : i64, tpu.core_type = #tpu.core_type<tc>, window_params = [{transform_indices = @transform_0, window_bounds = array<i64: 32, 128>}, {pipeline_mode = #tpu.pipeline_mode<synchronous>, transform_indices = @transform_1, window_bounds = array<i64: 1, 128>}, {pipeline_mode = #tpu.pipeline_mode<synchronous>, transform_indices = @transform_2, window_bounds = array<i64: 1, 128>}, {transform_indices = @transform_3, window_bounds = array<i64: 32, 128>}]} {
    %c0 = arith.constant 0 : index
    %c0_0 = arith.constant 0 : index
    %0 = vector.load %arg1[%c0, %c0_0] : memref<32x128xbf16, #tpu.memory_space<vmem>>, vector<32x128xbf16>
    %1 = arith.extf %0 : vector<32x128xbf16> to vector<32x128xf32>
    %c0_1 = arith.constant 0 : index
    %c0_2 = arith.constant 0 : index
    %2 = vector.load %arg2[%c0_1, %c0_2] : memref<1x128xf32, #tpu.memory_space<vmem>>, vector<1x128xf32>
    %c0_3 = arith.constant 0 : index
    %c0_4 = arith.constant 0 : index
    %3 = vector.load %arg3[%c0_3, %c0_4] : memref<1x128xf32, #tpu.memory_space<vmem>>, vector<1x128xf32>
    %cst = arith.constant dense<0.000000e+00> : vector<32xf32>
    %4 = vector.multi_reduction <add>, %1, %cst [1] : vector<32x128xf32> to vector<32xf32>
    %5 = vector.shape_cast %4 : vector<32xf32> to vector<32x1xf32>
    %cst_5 = arith.constant 1.280000e+02 : f32
    %6 = vector.broadcast %cst_5 : f32 to vector<32x1xf32>
    %7 = arith.divf %5, %6 : vector<32x1xf32>
    %8 = vector.broadcast %7 : vector<32x1xf32> to vector<32x128xf32>
    %9 = arith.subf %1, %8 : vector<32x128xf32>
    %10 = arith.mulf %9, %9 : vector<32x128xf32>
    %cst_6 = arith.constant dense<0.000000e+00> : vector<32xf32>
    %11 = vector.multi_reduction <add>, %10, %cst_6 [1] : vector<32x128xf32> to vector<32xf32>
    %12 = vector.shape_cast %11 : vector<32xf32> to vector<32x1xf32>
    %cst_7 = arith.constant 0.00787401571 : f32
    %13 = vector.broadcast %cst_7 : f32 to vector<32x1xf32>
    %14 = arith.mulf %12, %13 : vector<32x1xf32>
    %15 = math.sqrt %14 : vector<32x1xf32>
    %cst_8 = arith.constant 9.99999997E-7 : f32
    %16 = vector.broadcast %cst_8 : f32 to vector<32x1xf32>
    %17 = arith.addf %15, %16 : vector<32x1xf32>
    %18 = vector.broadcast %7 : vector<32x1xf32> to vector<32x128xf32>
    %19 = arith.subf %1, %18 : vector<32x128xf32>
    %20 = vector.broadcast %17 : vector<32x1xf32> to vector<32x128xf32>
    %21 = arith.divf %19, %20 : vector<32x128xf32>
    %22 = vector.broadcast %2 : vector<1x128xf32> to vector<32x128xf32>
    %23 = arith.mulf %22, %21 : vector<32x128xf32>
    %24 = vector.broadcast %3 : vector<1x128xf32> to vector<32x128xf32>
    %25 = arith.addf %23, %24 : vector<32x128xf32>
    %26 = arith.truncf %25 : vector<32x128xf32> to vector<32x128xbf16>
    %c0_9 = arith.constant 0 : index
    %c0_10 = arith.constant 0 : index
    %27 = vector.load %arg4[%c0_9, %c0_10] : memref<32x128xbf16, #tpu.memory_space<vmem>>, vector<32x128xbf16>
    tpu.vector_store %arg4[%c0_9, %c0_10], %26 {strides = array<i32>} : memref<32x128xbf16, #tpu.memory_space<vmem>>, vector<32x128xbf16>,
    return
  }
  func.func @transform_0(%arg0: i32) -> (i32, i32) {
    %c0_i32 = arith.constant 0 : i32
    %c0_i32_0 = arith.constant 0 : i32
    return %arg0, %c0_i32 : i32, i32
  }
  func.func @transform_1(%arg0: i32) -> (i32, i32) {
    %c0_i32 = arith.constant 0 : i32
    %c0_i32_0 = arith.constant 0 : i32
    %c0_i32_1 = arith.constant 0 : i32
    return %c0_i32, %c0_i32_0 : i32, i32
  }
  func.func @transform_2(%arg0: i32) -> (i32, i32) {
    %c0_i32 = arith.constant 0 : i32
    %c0_i32_0 = arith.constant 0 : i32
    %c0_i32_1 = arith.constant 0 : i32
    return %c0_i32, %c0_i32_0 : i32, i32
  }
  func.func @transform_3(%arg0: i32) -> (i32, i32) {
    %c0_i32 = arith.constant 0 : i32
    %c0_i32_0 = arith.constant 0 : i32
    return %arg0, %c0_i32 : i32, i32
  }
}

module attributes {stable_mosaic.version = 11 : i64} {
  func.func @flash_kernel(%arg0: i32, %arg1: i32, %arg2: i32, %arg3: memref<1x16x128xbf16, #tpu.memory_space<vmem>>, %arg4: memref<1x16x128xbf16, #tpu.memory_space<vmem>>, %arg5: memref<1x16x128xbf16, #tpu.memory_space<vmem>>, %arg6: memref<1x16x16xi32, #tpu.memory_space<vmem>>, %arg7: memref<1x16x128xbf16, #tpu.memory_space<vmem>>, %arg8: memref<4x16x1xf32, #tpu.memory_space<vmem>>, %arg9: memref<4x16x1xf32, #tpu.memory_space<vmem>>, %arg10: memref<16x128xf32, #tpu.memory_space<vmem>>) attributes {dimension_semantics = [#tpu.dimension_semantics<parallel>, #tpu.dimension_semantics<parallel>, #tpu.dimension_semantics<arbitrary>], iteration_bounds = array<i64: 2, 1, 1>, scalar_prefetch = 0 : i64, scratch_operands = 3 : i64, tpu.core_type = #tpu.core_type<tc>, window_params = [{transform_indices = @transform_0, window_bounds = array<i64: 1, 16, 128>}, {transform_indices = @transform_1, window_bounds = array<i64: 1, 16, 128>}, {transform_indices = @transform_2, window_bounds = array<i64: 1, 16, 128>}, {transform_indices = @transform_3, window_bounds = array<i64: 1, 16, 16>}, {transform_indices = @transform_4, window_bounds = array<i64: 1, 16, 128>}]} {
    %c0_i32 = arith.constant 0 : i32
    %0 = arith.cmpi eq, %arg2, %c0_i32 : i32
    %1 = arith.extui %0 : i1 to i32
    %c0_i32_0 = arith.constant 0 : i32
    %2 = arith.cmpi ne, %1, %c0_i32_0 : i32
    scf.if %2 {
      %cst_83 = arith.constant 0xFF800000 : f32
      %150 = vector.broadcast %cst_83 : f32 to vector<4x16x1xf32>
      %c0_84 = arith.constant 0 : index
      %c0_85 = arith.constant 0 : index
      %c0_86 = arith.constant 0 : index
      %151 = vector.load %arg8[%c0_84, %c0_85, %c0_86] : memref<4x16x1xf32, #tpu.memory_space<vmem>>, vector<4x16x1xf32>
      tpu.vector_store %arg8[%c0_84, %c0_85, %c0_86], %150 {strides = array<i32>} : memref<4x16x1xf32, #tpu.memory_space<vmem>>, vector<4x16x1xf32>,
      %cst_87 = arith.constant 0.000000e+00 : f32
      %152 = vector.broadcast %cst_87 : f32 to vector<4x16x1xf32>
      %c0_88 = arith.constant 0 : index
      %c0_89 = arith.constant 0 : index
      %c0_90 = arith.constant 0 : index
      %153 = vector.load %arg9[%c0_88, %c0_89, %c0_90] : memref<4x16x1xf32, #tpu.memory_space<vmem>>, vector<4x16x1xf32>
      tpu.vector_store %arg9[%c0_88, %c0_89, %c0_90], %152 {strides = array<i32>} : memref<4x16x1xf32, #tpu.memory_space<vmem>>, vector<4x16x1xf32>,
      %cst_91 = arith.constant 0.000000e+00 : f32
      %154 = vector.broadcast %cst_91 : f32 to vector<16x128xf32>
      %c0_92 = arith.constant 0 : index
      %c0_93 = arith.constant 0 : index
      %155 = vector.load %arg10[%c0_92, %c0_93] : memref<16x128xf32, #tpu.memory_space<vmem>>, vector<16x128xf32>
      tpu.vector_store %arg10[%c0_92, %c0_93], %154 {strides = array<i32>} : memref<16x128xf32, #tpu.memory_space<vmem>>, vector<16x128xf32>,
    } else {
    }
    %c0 = arith.constant 0 : index
    %c0_1 = arith.constant 0 : index
    %c0_2 = arith.constant 0 : index
    %3 = vector.load %arg3[%c0, %c0_1, %c0_2] : memref<1x16x128xbf16, #tpu.memory_space<vmem>>, vector<1x16x128xbf16>
    %4 = vector.shape_cast %3 : vector<1x16x128xbf16> to vector<16x128xbf16>
    %c0_3 = arith.constant 0 : index
    %c0_4 = arith.constant 0 : index
    %c0_5 = arith.constant 0 : index
    %5 = vector.load %arg4[%c0_3, %c0_4, %c0_5] : memref<1x16x128xbf16, #tpu.memory_space<vmem>>, vector<1x16x128xbf16>
    %6 = vector.shape_cast %5 : vector<1x16x128xbf16> to vector<16x128xbf16>
    %c0_6 = arith.constant 0 : index
    %c0_7 = arith.constant 0 : index
    %c0_8 = arith.constant 0 : index
    %7 = vector.load %arg5[%c0_6, %c0_7, %c0_8] : memref<1x16x128xbf16, #tpu.memory_space<vmem>>, vector<1x16x128xbf16>
    %8 = vector.shape_cast %7 : vector<1x16x128xbf16> to vector<16x128xbf16>
    %c0_9 = arith.constant 0 : index
    %c0_10 = arith.constant 0 : index
    %c0_11 = arith.constant 0 : index
    %9 = vector.load %arg6[%c0_9, %c0_10, %c0_11] : memref<1x16x16xi32, #tpu.memory_space<vmem>>, vector<1x16x16xi32>
    %10 = vector.shape_cast %9 : vector<1x16x16xi32> to vector<16x16xi32>
    %c0_i32_12 = arith.constant 0 : i32
    %11 = vector.broadcast %c0_i32_12 : i32 to vector<16x16xi32>
    %12 = arith.cmpi ne, %10, %11 : vector<16x16xi32>
    %13 = vector.extract_strided_slice %4 {offsets = [0, 0], sizes = [16, 32], strides = [1, 1]} : vector<16x128xbf16> to vector<16x32xbf16>
    %14 = vector.extract_strided_slice %6 {offsets = [0, 0], sizes = [16, 32], strides = [1, 1]} : vector<16x128xbf16> to vector<16x32xbf16>
    %cst = arith.constant dense<0.000000e+00> : vector<16x16xf32>
    %15 = tpu.matmul %13, %14, %cst {dimension_numbers = #tpu.dot_dimension_numbers<[1], [1], [0], [0], [0, 0, 1, 0], [], []>} : vector<16x32xbf16>, vector<16x32xbf16>, vector<16x16xf32> -> vector<16x16xf32>
    %cst_13 = arith.constant -1.000000e+09 : f32
    %16 = vector.broadcast %cst_13 : f32 to vector<16x16xf32>
    %17 = arith.select %12, %15, %16 : vector<16x16xi1>, vector<16x16xf32>
    %c0_14 = arith.constant 0 : index
    %c0_15 = arith.constant 0 : index
    %c0_16 = arith.constant 0 : index
    %18 = vector.load %arg8[%c0_14, %c0_15, %c0_16] : memref<4x16x1xf32, #tpu.memory_space<vmem>>, vector<1x16x1xf32>
    %19 = vector.shape_cast %18 : vector<1x16x1xf32> to vector<16x1xf32>
    %cst_17 = arith.constant dense<0xFF800000> : vector<16xf32>
    %20 = vector.multi_reduction <maximumf>, %17, %cst_17 [1] : vector<16x16xf32> to vector<16xf32>
    %21 = vector.shape_cast %20 : vector<16xf32> to vector<16x1xf32>
    %22 = arith.maximumf %19, %21 : vector<16x1xf32>
    %23 = arith.subf %19, %22 : vector<16x1xf32>
    %24 = math.exp %23 : vector<16x1xf32>
    %25 = vector.broadcast %22 : vector<16x1xf32> to vector<16x16xf32>
    %26 = arith.subf %17, %25 : vector<16x16xf32>
    %27 = math.exp %26 : vector<16x16xf32>
    %c0_18 = arith.constant 0 : index
    %c0_19 = arith.constant 0 : index
    %c0_20 = arith.constant 0 : index
    %28 = vector.load %arg9[%c0_18, %c0_19, %c0_20] : memref<4x16x1xf32, #tpu.memory_space<vmem>>, vector<1x16x1xf32>
    %29 = vector.shape_cast %28 : vector<1x16x1xf32> to vector<16x1xf32>
    %30 = arith.mulf %24, %29 : vector<16x1xf32>
    %cst_21 = arith.constant dense<0.000000e+00> : vector<16xf32>
    %31 = vector.multi_reduction <add>, %27, %cst_21 [1] : vector<16x16xf32> to vector<16xf32>
    %32 = vector.shape_cast %31 : vector<16xf32> to vector<16x1xf32>
    %33 = arith.addf %30, %32 : vector<16x1xf32>
    %c0_22 = arith.constant 0 : index
    %c0_23 = arith.constant 0 : index
    %c0_24 = arith.constant 0 : index
    %34 = vector.load %arg9[%c0_22, %c0_23, %c0_24] : memref<4x16x1xf32, #tpu.memory_space<vmem>>, vector<1x16x1xf32>
    %35 = vector.shape_cast %34 : vector<1x16x1xf32> to vector<16x1xf32>
    %36 = vector.shape_cast %33 : vector<16x1xf32> to vector<1x16x1xf32>
    tpu.vector_store %arg9[%c0_22, %c0_23, %c0_24], %36 {strides = array<i32>} : memref<4x16x1xf32, #tpu.memory_space<vmem>>, vector<1x16x1xf32>,
    %37 = arith.truncf %27 : vector<16x16xf32> to vector<16x16xbf16>
    %38 = vector.extract_strided_slice %8 {offsets = [0, 0], sizes = [16, 32], strides = [1, 1]} : vector<16x128xbf16> to vector<16x32xbf16>
    %cst_25 = arith.constant dense<0.000000e+00> : vector<16x32xf32>
    %39 = tpu.matmul %37, %38, %cst_25 {dimension_numbers = #tpu.dot_dimension_numbers<[1], [0], [0], [1], [0, 0, 1, 1], [], []>} : vector<16x16xbf16>, vector<16x32xbf16>, vector<16x32xf32> -> vector<16x32xf32>
    %c0_26 = arith.constant 0 : index
    %c0_27 = arith.constant 0 : index
    %c0_28 = arith.constant 0 : index
    %40 = vector.load %arg8[%c0_26, %c0_27, %c0_28] : memref<4x16x1xf32, #tpu.memory_space<vmem>>, vector<1x16x1xf32>
    %41 = vector.shape_cast %40 : vector<1x16x1xf32> to vector<16x1xf32>
    %42 = vector.shape_cast %22 : vector<16x1xf32> to vector<1x16x1xf32>
    tpu.vector_store %arg8[%c0_26, %c0_27, %c0_28], %42 {strides = array<i32>} : memref<4x16x1xf32, #tpu.memory_space<vmem>>, vector<1x16x1xf32>,
    %43 = vector.shape_cast %24 : vector<16x1xf32> to vector<16x1xf32>
    %44 = vector.broadcast %43 : vector<16x1xf32> to vector<16x32xf32>
    %45 = vector.extract_strided_slice %4 {offsets = [0, 32], sizes = [16, 32], strides = [1, 1]} : vector<16x128xbf16> to vector<16x32xbf16>
    %46 = vector.extract_strided_slice %6 {offsets = [0, 32], sizes = [16, 32], strides = [1, 1]} : vector<16x128xbf16> to vector<16x32xbf16>
    %cst_29 = arith.constant dense<0.000000e+00> : vector<16x16xf32>
    %47 = tpu.matmul %45, %46, %cst_29 {dimension_numbers = #tpu.dot_dimension_numbers<[1], [1], [0], [0], [0, 0, 1, 0], [], []>} : vector<16x32xbf16>, vector<16x32xbf16>, vector<16x16xf32> -> vector<16x16xf32>
    %cst_30 = arith.constant -1.000000e+09 : f32
    %48 = vector.broadcast %cst_30 : f32 to vector<16x16xf32>
    %49 = arith.select %12, %47, %48 : vector<16x16xi1>, vector<16x16xf32>
    %c1 = arith.constant 1 : index
    %c0_31 = arith.constant 0 : index
    %c0_32 = arith.constant 0 : index
    %50 = vector.load %arg8[%c1, %c0_31, %c0_32] : memref<4x16x1xf32, #tpu.memory_space<vmem>>, vector<1x16x1xf32>
    %51 = vector.shape_cast %50 : vector<1x16x1xf32> to vector<16x1xf32>
    %cst_33 = arith.constant dense<0xFF800000> : vector<16xf32>
    %52 = vector.multi_reduction <maximumf>, %49, %cst_33 [1] : vector<16x16xf32> to vector<16xf32>
    %53 = vector.shape_cast %52 : vector<16xf32> to vector<16x1xf32>
    %54 = arith.maximumf %51, %53 : vector<16x1xf32>
    %55 = arith.subf %51, %54 : vector<16x1xf32>
    %56 = math.exp %55 : vector<16x1xf32>
    %57 = vector.broadcast %54 : vector<16x1xf32> to vector<16x16xf32>
    %58 = arith.subf %49, %57 : vector<16x16xf32>
    %59 = math.exp %58 : vector<16x16xf32>
    %c1_34 = arith.constant 1 : index
    %c0_35 = arith.constant 0 : index
    %c0_36 = arith.constant 0 : index
    %60 = vector.load %arg9[%c1_34, %c0_35, %c0_36] : memref<4x16x1xf32, #tpu.memory_space<vmem>>, vector<1x16x1xf32>
    %61 = vector.shape_cast %60 : vector<1x16x1xf32> to vector<16x1xf32>
    %62 = arith.mulf %56, %61 : vector<16x1xf32>
    %cst_37 = arith.constant dense<0.000000e+00> : vector<16xf32>
    %63 = vector.multi_reduction <add>, %59, %cst_37 [1] : vector<16x16xf32> to vector<16xf32>
    %64 = vector.shape_cast %63 : vector<16xf32> to vector<16x1xf32>
    %65 = arith.addf %62, %64 : vector<16x1xf32>
    %c1_38 = arith.constant 1 : index
    %c0_39 = arith.constant 0 : index
    %c0_40 = arith.constant 0 : index
    %66 = vector.load %arg9[%c1_38, %c0_39, %c0_40] : memref<4x16x1xf32, #tpu.memory_space<vmem>>, vector<1x16x1xf32>
    %67 = vector.shape_cast %66 : vector<1x16x1xf32> to vector<16x1xf32>
    %68 = vector.shape_cast %65 : vector<16x1xf32> to vector<1x16x1xf32>
    tpu.vector_store %arg9[%c1_38, %c0_39, %c0_40], %68 {strides = array<i32>} : memref<4x16x1xf32, #tpu.memory_space<vmem>>, vector<1x16x1xf32>,
    %69 = arith.truncf %59 : vector<16x16xf32> to vector<16x16xbf16>
    %70 = vector.extract_strided_slice %8 {offsets = [0, 32], sizes = [16, 32], strides = [1, 1]} : vector<16x128xbf16> to vector<16x32xbf16>
    %cst_41 = arith.constant dense<0.000000e+00> : vector<16x32xf32>
    %71 = tpu.matmul %69, %70, %cst_41 {dimension_numbers = #tpu.dot_dimension_numbers<[1], [0], [0], [1], [0, 0, 1, 1], [], []>} : vector<16x16xbf16>, vector<16x32xbf16>, vector<16x32xf32> -> vector<16x32xf32>
    %c1_42 = arith.constant 1 : index
    %c0_43 = arith.constant 0 : index
    %c0_44 = arith.constant 0 : index
    %72 = vector.load %arg8[%c1_42, %c0_43, %c0_44] : memref<4x16x1xf32, #tpu.memory_space<vmem>>, vector<1x16x1xf32>
    %73 = vector.shape_cast %72 : vector<1x16x1xf32> to vector<16x1xf32>
    %74 = vector.shape_cast %54 : vector<16x1xf32> to vector<1x16x1xf32>
    tpu.vector_store %arg8[%c1_42, %c0_43, %c0_44], %74 {strides = array<i32>} : memref<4x16x1xf32, #tpu.memory_space<vmem>>, vector<1x16x1xf32>,
    %75 = vector.shape_cast %56 : vector<16x1xf32> to vector<16x1xf32>
    %76 = vector.broadcast %75 : vector<16x1xf32> to vector<16x32xf32>
    %77 = vector.extract_strided_slice %4 {offsets = [0, 64], sizes = [16, 32], strides = [1, 1]} : vector<16x128xbf16> to vector<16x32xbf16>
    %78 = vector.extract_strided_slice %6 {offsets = [0, 64], sizes = [16, 32], strides = [1, 1]} : vector<16x128xbf16> to vector<16x32xbf16>
    %cst_45 = arith.constant dense<0.000000e+00> : vector<16x16xf32>
    %79 = tpu.matmul %77, %78, %cst_45 {dimension_numbers = #tpu.dot_dimension_numbers<[1], [1], [0], [0], [0, 0, 1, 0], [], []>} : vector<16x32xbf16>, vector<16x32xbf16>, vector<16x16xf32> -> vector<16x16xf32>
    %cst_46 = arith.constant -1.000000e+09 : f32
    %80 = vector.broadcast %cst_46 : f32 to vector<16x16xf32>
    %81 = arith.select %12, %79, %80 : vector<16x16xi1>, vector<16x16xf32>
    %c2 = arith.constant 2 : index
    %c0_47 = arith.constant 0 : index
    %c0_48 = arith.constant 0 : index
    %82 = vector.load %arg8[%c2, %c0_47, %c0_48] : memref<4x16x1xf32, #tpu.memory_space<vmem>>, vector<1x16x1xf32>
    %83 = vector.shape_cast %82 : vector<1x16x1xf32> to vector<16x1xf32>
    %cst_49 = arith.constant dense<0xFF800000> : vector<16xf32>
    %84 = vector.multi_reduction <maximumf>, %81, %cst_49 [1] : vector<16x16xf32> to vector<16xf32>
    %85 = vector.shape_cast %84 : vector<16xf32> to vector<16x1xf32>
    %86 = arith.maximumf %83, %85 : vector<16x1xf32>
    %87 = arith.subf %83, %86 : vector<16x1xf32>
    %88 = math.exp %87 : vector<16x1xf32>
    %89 = vector.broadcast %86 : vector<16x1xf32> to vector<16x16xf32>
    %90 = arith.subf %81, %89 : vector<16x16xf32>
    %91 = math.exp %90 : vector<16x16xf32>
    %c2_50 = arith.constant 2 : index
    %c0_51 = arith.constant 0 : index
    %c0_52 = arith.constant 0 : index
    %92 = vector.load %arg9[%c2_50, %c0_51, %c0_52] : memref<4x16x1xf32, #tpu.memory_space<vmem>>, vector<1x16x1xf32>
    %93 = vector.shape_cast %92 : vector<1x16x1xf32> to vector<16x1xf32>
    %94 = arith.mulf %88, %93 : vector<16x1xf32>
    %cst_53 = arith.constant dense<0.000000e+00> : vector<16xf32>
    %95 = vector.multi_reduction <add>, %91, %cst_53 [1] : vector<16x16xf32> to vector<16xf32>
    %96 = vector.shape_cast %95 : vector<16xf32> to vector<16x1xf32>
    %97 = arith.addf %94, %96 : vector<16x1xf32>
    %c2_54 = arith.constant 2 : index
    %c0_55 = arith.constant 0 : index
    %c0_56 = arith.constant 0 : index
    %98 = vector.load %arg9[%c2_54, %c0_55, %c0_56] : memref<4x16x1xf32, #tpu.memory_space<vmem>>, vector<1x16x1xf32>
    %99 = vector.shape_cast %98 : vector<1x16x1xf32> to vector<16x1xf32>
    %100 = vector.shape_cast %97 : vector<16x1xf32> to vector<1x16x1xf32>
    tpu.vector_store %arg9[%c2_54, %c0_55, %c0_56], %100 {strides = array<i32>} : memref<4x16x1xf32, #tpu.memory_space<vmem>>, vector<1x16x1xf32>,
    %101 = arith.truncf %91 : vector<16x16xf32> to vector<16x16xbf16>
    %102 = vector.extract_strided_slice %8 {offsets = [0, 64], sizes = [16, 32], strides = [1, 1]} : vector<16x128xbf16> to vector<16x32xbf16>
    %cst_57 = arith.constant dense<0.000000e+00> : vector<16x32xf32>
    %103 = tpu.matmul %101, %102, %cst_57 {dimension_numbers = #tpu.dot_dimension_numbers<[1], [0], [0], [1], [0, 0, 1, 1], [], []>} : vector<16x16xbf16>, vector<16x32xbf16>, vector<16x32xf32> -> vector<16x32xf32>
    %c2_58 = arith.constant 2 : index
    %c0_59 = arith.constant 0 : index
    %c0_60 = arith.constant 0 : index
    %104 = vector.load %arg8[%c2_58, %c0_59, %c0_60] : memref<4x16x1xf32, #tpu.memory_space<vmem>>, vector<1x16x1xf32>
    %105 = vector.shape_cast %104 : vector<1x16x1xf32> to vector<16x1xf32>
    %106 = vector.shape_cast %86 : vector<16x1xf32> to vector<1x16x1xf32>
    tpu.vector_store %arg8[%c2_58, %c0_59, %c0_60], %106 {strides = array<i32>} : memref<4x16x1xf32, #tpu.memory_space<vmem>>, vector<1x16x1xf32>,
    %107 = vector.shape_cast %88 : vector<16x1xf32> to vector<16x1xf32>
    %108 = vector.broadcast %107 : vector<16x1xf32> to vector<16x32xf32>
    %109 = vector.extract_strided_slice %4 {offsets = [0, 96], sizes = [16, 32], strides = [1, 1]} : vector<16x128xbf16> to vector<16x32xbf16>
    %110 = vector.extract_strided_slice %6 {offsets = [0, 96], sizes = [16, 32], strides = [1, 1]} : vector<16x128xbf16> to vector<16x32xbf16>
    %cst_61 = arith.constant dense<0.000000e+00> : vector<16x16xf32>
    %111 = tpu.matmul %109, %110, %cst_61 {dimension_numbers = #tpu.dot_dimension_numbers<[1], [1], [0], [0], [0, 0, 1, 0], [], []>} : vector<16x32xbf16>, vector<16x32xbf16>, vector<16x16xf32> -> vector<16x16xf32>
    %cst_62 = arith.constant -1.000000e+09 : f32
    %112 = vector.broadcast %cst_62 : f32 to vector<16x16xf32>
    %113 = arith.select %12, %111, %112 : vector<16x16xi1>, vector<16x16xf32>
    %c3 = arith.constant 3 : index
    %c0_63 = arith.constant 0 : index
    %c0_64 = arith.constant 0 : index
    %114 = vector.load %arg8[%c3, %c0_63, %c0_64] : memref<4x16x1xf32, #tpu.memory_space<vmem>>, vector<1x16x1xf32>
    %115 = vector.shape_cast %114 : vector<1x16x1xf32> to vector<16x1xf32>
    %cst_65 = arith.constant dense<0xFF800000> : vector<16xf32>
    %116 = vector.multi_reduction <maximumf>, %113, %cst_65 [1] : vector<16x16xf32> to vector<16xf32>
    %117 = vector.shape_cast %116 : vector<16xf32> to vector<16x1xf32>
    %118 = arith.maximumf %115, %117 : vector<16x1xf32>
    %119 = arith.subf %115, %118 : vector<16x1xf32>
    %120 = math.exp %119 : vector<16x1xf32>
    %121 = vector.broadcast %118 : vector<16x1xf32> to vector<16x16xf32>
    %122 = arith.subf %113, %121 : vector<16x16xf32>
    %123 = math.exp %122 : vector<16x16xf32>
    %c3_66 = arith.constant 3 : index
    %c0_67 = arith.constant 0 : index
    %c0_68 = arith.constant 0 : index
    %124 = vector.load %arg9[%c3_66, %c0_67, %c0_68] : memref<4x16x1xf32, #tpu.memory_space<vmem>>, vector<1x16x1xf32>
    %125 = vector.shape_cast %124 : vector<1x16x1xf32> to vector<16x1xf32>
    %126 = arith.mulf %120, %125 : vector<16x1xf32>
    %cst_69 = arith.constant dense<0.000000e+00> : vector<16xf32>
    %127 = vector.multi_reduction <add>, %123, %cst_69 [1] : vector<16x16xf32> to vector<16xf32>
    %128 = vector.shape_cast %127 : vector<16xf32> to vector<16x1xf32>
    %129 = arith.addf %126, %128 : vector<16x1xf32>
    %c3_70 = arith.constant 3 : index
    %c0_71 = arith.constant 0 : index
    %c0_72 = arith.constant 0 : index
    %130 = vector.load %arg9[%c3_70, %c0_71, %c0_72] : memref<4x16x1xf32, #tpu.memory_space<vmem>>, vector<1x16x1xf32>
    %131 = vector.shape_cast %130 : vector<1x16x1xf32> to vector<16x1xf32>
    %132 = vector.shape_cast %129 : vector<16x1xf32> to vector<1x16x1xf32>
    tpu.vector_store %arg9[%c3_70, %c0_71, %c0_72], %132 {strides = array<i32>} : memref<4x16x1xf32, #tpu.memory_space<vmem>>, vector<1x16x1xf32>,
    %133 = arith.truncf %123 : vector<16x16xf32> to vector<16x16xbf16>
    %134 = vector.extract_strided_slice %8 {offsets = [0, 96], sizes = [16, 32], strides = [1, 1]} : vector<16x128xbf16> to vector<16x32xbf16>
    %cst_73 = arith.constant dense<0.000000e+00> : vector<16x32xf32>
    %135 = tpu.matmul %133, %134, %cst_73 {dimension_numbers = #tpu.dot_dimension_numbers<[1], [0], [0], [1], [0, 0, 1, 1], [], []>} : vector<16x16xbf16>, vector<16x32xbf16>, vector<16x32xf32> -> vector<16x32xf32>
    %c3_74 = arith.constant 3 : index
    %c0_75 = arith.constant 0 : index
    %c0_76 = arith.constant 0 : index
    %136 = vector.load %arg8[%c3_74, %c0_75, %c0_76] : memref<4x16x1xf32, #tpu.memory_space<vmem>>, vector<1x16x1xf32>
    %137 = vector.shape_cast %136 : vector<1x16x1xf32> to vector<16x1xf32>
    %138 = vector.shape_cast %118 : vector<16x1xf32> to vector<1x16x1xf32>
    tpu.vector_store %arg8[%c3_74, %c0_75, %c0_76], %138 {strides = array<i32>} : memref<4x16x1xf32, #tpu.memory_space<vmem>>, vector<1x16x1xf32>,
    %139 = vector.shape_cast %120 : vector<16x1xf32> to vector<16x1xf32>
    %140 = vector.broadcast %139 : vector<16x1xf32> to vector<16x32xf32>
    %141 = tpu.concatenate %44, %76, %108, %140 in 1 : vector<16x32xf32>, vector<16x32xf32>, vector<16x32xf32>, vector<16x32xf32> -> vector<16x128xf32>
    %142 = tpu.concatenate %39, %71, %103, %135 in 1 : vector<16x32xf32>, vector<16x32xf32>, vector<16x32xf32>, vector<16x32xf32> -> vector<16x128xf32>
    %c0_77 = arith.constant 0 : index
    %c0_78 = arith.constant 0 : index
    %143 = vector.load %arg10[%c0_77, %c0_78] : memref<16x128xf32, #tpu.memory_space<vmem>>, vector<16x128xf32>
    %144 = arith.mulf %141, %143 : vector<16x128xf32>
    %145 = arith.addf %144, %142 : vector<16x128xf32>
    %c0_79 = arith.constant 0 : index
    %c0_80 = arith.constant 0 : index
    %146 = vector.load %arg10[%c0_79, %c0_80] : memref<16x128xf32, #tpu.memory_space<vmem>>, vector<16x128xf32>
    tpu.vector_store %arg10[%c0_79, %c0_80], %145 {strides = array<i32>} : memref<16x128xf32, #tpu.memory_space<vmem>>, vector<16x128xf32>,
    %c0_i32_81 = arith.constant 0 : i32
    %147 = arith.cmpi eq, %arg2, %c0_i32_81 : i32
    %148 = arith.extui %147 : i1 to i32
    %c0_i32_82 = arith.constant 0 : i32
    %149 = arith.cmpi ne, %148, %c0_i32_82 : i32
    scf.if %149 {
      %c0_83 = arith.constant 0 : index
      %c0_84 = arith.constant 0 : index
      %c0_85 = arith.constant 0 : index
      %150 = vector.load %arg9[%c0_83, %c0_84, %c0_85] : memref<4x16x1xf32, #tpu.memory_space<vmem>>, vector<1x16x1xf32>
      %151 = vector.shape_cast %150 : vector<1x16x1xf32> to vector<16x1xf32>
      %152 = tpu.reciprocal %151 {approx = true} : vector<16x1xf32> -> vector<16x1xf32>
      %153 = vector.shape_cast %152 : vector<16x1xf32> to vector<16x1xf32>
      %154 = vector.broadcast %153 : vector<16x1xf32> to vector<16x32xf32>
      %c1_86 = arith.constant 1 : index
      %c0_87 = arith.constant 0 : index
      %c0_88 = arith.constant 0 : index
      %155 = vector.load %arg9[%c1_86, %c0_87, %c0_88] : memref<4x16x1xf32, #tpu.memory_space<vmem>>, vector<1x16x1xf32>
      %156 = vector.shape_cast %155 : vector<1x16x1xf32> to vector<16x1xf32>
      %157 = tpu.reciprocal %156 {approx = true} : vector<16x1xf32> -> vector<16x1xf32>
      %158 = vector.shape_cast %157 : vector<16x1xf32> to vector<16x1xf32>
      %159 = vector.broadcast %158 : vector<16x1xf32> to vector<16x32xf32>
      %c2_89 = arith.constant 2 : index
      %c0_90 = arith.constant 0 : index
      %c0_91 = arith.constant 0 : index
      %160 = vector.load %arg9[%c2_89, %c0_90, %c0_91] : memref<4x16x1xf32, #tpu.memory_space<vmem>>, vector<1x16x1xf32>
      %161 = vector.shape_cast %160 : vector<1x16x1xf32> to vector<16x1xf32>
      %162 = tpu.reciprocal %161 {approx = true} : vector<16x1xf32> -> vector<16x1xf32>
      %163 = vector.shape_cast %162 : vector<16x1xf32> to vector<16x1xf32>
      %164 = vector.broadcast %163 : vector<16x1xf32> to vector<16x32xf32>
      %c3_92 = arith.constant 3 : index
      %c0_93 = arith.constant 0 : index
      %c0_94 = arith.constant 0 : index
      %165 = vector.load %arg9[%c3_92, %c0_93, %c0_94] : memref<4x16x1xf32, #tpu.memory_space<vmem>>, vector<1x16x1xf32>
      %166 = vector.shape_cast %165 : vector<1x16x1xf32> to vector<16x1xf32>
      %167 = tpu.reciprocal %166 {approx = true} : vector<16x1xf32> -> vector<16x1xf32>
      %168 = vector.shape_cast %167 : vector<16x1xf32> to vector<16x1xf32>
      %169 = vector.broadcast %168 : vector<16x1xf32> to vector<16x32xf32>
      %c0_95 = arith.constant 0 : index
      %c0_96 = arith.constant 0 : index
      %170 = vector.load %arg10[%c0_95, %c0_96] : memref<16x128xf32, #tpu.memory_space<vmem>>, vector<16x128xf32>
      %171 = tpu.concatenate %154, %159, %164, %169 in 1 : vector<16x32xf32>, vector<16x32xf32>, vector<16x32xf32>, vector<16x32xf32> -> vector<16x128xf32>
      %172 = arith.mulf %170, %171 : vector<16x128xf32>
      %173 = arith.truncf %172 : vector<16x128xf32> to vector<16x128xbf16>
      %c0_97 = arith.constant 0 : index
      %c0_98 = arith.constant 0 : index
      %c0_99 = arith.constant 0 : index
      %174 = vector.load %arg7[%c0_97, %c0_98, %c0_99] : memref<1x16x128xbf16, #tpu.memory_space<vmem>>, vector<1x16x128xbf16>
      %175 = vector.shape_cast %174 : vector<1x16x128xbf16> to vector<16x128xbf16>
      %176 = vector.shape_cast %173 : vector<16x128xbf16> to vector<1x16x128xbf16>
      tpu.vector_store %arg7[%c0_97, %c0_98, %c0_99], %176 {strides = array<i32>} : memref<1x16x128xbf16, #tpu.memory_space<vmem>>, vector<1x16x128xbf16>,
    } else {
    }
    return
  }
  func.func @transform_0(%arg0: i32, %arg1: i32, %arg2: i32) -> (i32, i32, i32) {
    %c0_i32 = arith.constant 0 : i32
    %c0_i32_0 = arith.constant 0 : i32
    return %arg0, %arg1, %c0_i32 : i32, i32, i32
  }
  func.func @transform_1(%arg0: i32, %arg1: i32, %arg2: i32) -> (i32, i32, i32) {
    %c1_i32 = arith.constant 1 : i32
    %c0_i32 = arith.constant 0 : i32
    return %arg0, %arg2, %c1_i32 : i32, i32, i32
  }
  func.func @transform_2(%arg0: i32, %arg1: i32, %arg2: i32) -> (i32, i32, i32) {
    %c2_i32 = arith.constant 2 : i32
    %c0_i32 = arith.constant 0 : i32
    return %arg0, %arg2, %c2_i32 : i32, i32, i32
  }
  func.func @transform_3(%arg0: i32, %arg1: i32, %arg2: i32) -> (i32, i32, i32) {
    %c0_i32 = arith.constant 0 : i32
    return %arg0, %arg1, %arg2 : i32, i32, i32
  }
  func.func @transform_4(%arg0: i32, %arg1: i32, %arg2: i32) -> (i32, i32, i32) {
    %c0_i32 = arith.constant 0 : i32
    %c0_i32_0 = arith.constant 0 : i32
    return %arg0, %arg1, %c0_i32 : i32, i32, i32
  }
}

module attributes {stable_mosaic.version = 11 : i64} {
  func.func @_ln_matmul_kernel(%arg0: i32, %arg1: i32, %arg2: memref<32x128xbf16, #tpu.memory_space<vmem>>, %arg3: memref<1x128xf32, #tpu.memory_space<vmem>>, %arg4: memref<1x128xf32, #tpu.memory_space<vmem>>, %arg5: memref<128x128xbf16, #tpu.memory_space<vmem>>, %arg6: memref<1x128xf32, #tpu.memory_space<vmem>>, %arg7: memref<32x128xbf16, #tpu.memory_space<vmem>>, %arg8: memref<32x128xbf16, #tpu.memory_space<vmem>>) attributes {dimension_semantics = [#tpu.dimension_semantics<parallel>, #tpu.dimension_semantics<arbitrary>], iteration_bounds = array<i64: 1, 1>, scalar_prefetch = 0 : i64, scratch_operands = 1 : i64, tpu.core_type = #tpu.core_type<tc>, window_params = [{transform_indices = @transform_0, window_bounds = array<i64: 32, 128>}, {pipeline_mode = #tpu.pipeline_mode<synchronous>, transform_indices = @transform_1, window_bounds = array<i64: 1, 128>}, {pipeline_mode = #tpu.pipeline_mode<synchronous>, transform_indices = @transform_2, window_bounds = array<i64: 1, 128>}, {transform_indices = @transform_3, window_bounds = array<i64: 128, 128>}, {transform_indices = @transform_4, window_bounds = array<i64: 1, 128>}, {transform_indices = @transform_5, window_bounds = array<i64: 32, 128>}]} {
    %c0_i32 = arith.constant 0 : i32
    %0 = arith.cmpi eq, %arg1, %c0_i32 : i32
    %1 = arith.extui %0 : i1 to i32
    %c0_i32_0 = arith.constant 0 : i32
    %2 = arith.cmpi ne, %1, %c0_i32_0 : i32
    scf.if %2 {
      %c0_8 = arith.constant 0 : index
      %c0_9 = arith.constant 0 : index
      %11 = vector.load %arg2[%c0_8, %c0_9] : memref<32x128xbf16, #tpu.memory_space<vmem>>, vector<32x128xbf16>
      %12 = arith.extf %11 : vector<32x128xbf16> to vector<32x128xf32>
      %c0_10 = arith.constant 0 : index
      %c0_11 = arith.constant 0 : index
      %13 = vector.load %arg3[%c0_10, %c0_11] : memref<1x128xf32, #tpu.memory_space<vmem>>, vector<1x128xf32>
      %c0_12 = arith.constant 0 : index
      %c0_13 = arith.constant 0 : index
      %14 = vector.load %arg4[%c0_12, %c0_13] : memref<1x128xf32, #tpu.memory_space<vmem>>, vector<1x128xf32>
      %cst_14 = arith.constant dense<0.000000e+00> : vector<32xf32>
      %15 = vector.multi_reduction <add>, %12, %cst_14 [1] : vector<32x128xf32> to vector<32xf32>
      %16 = vector.shape_cast %15 : vector<32xf32> to vector<32x1xf32>
      %cst_15 = arith.constant 1.280000e+02 : f32
      %17 = vector.broadcast %cst_15 : f32 to vector<32x1xf32>
      %18 = arith.divf %16, %17 : vector<32x1xf32>
      %19 = vector.broadcast %18 : vector<32x1xf32> to vector<32x128xf32>
      %20 = arith.subf %12, %19 : vector<32x128xf32>
      %21 = arith.mulf %20, %20 : vector<32x128xf32>
      %cst_16 = arith.constant dense<0.000000e+00> : vector<32xf32>
      %22 = vector.multi_reduction <add>, %21, %cst_16 [1] : vector<32x128xf32> to vector<32xf32>
      %23 = vector.shape_cast %22 : vector<32xf32> to vector<32x1xf32>
      %cst_17 = arith.constant 0.00787401571 : f32
      %24 = vector.broadcast %cst_17 : f32 to vector<32x1xf32>
      %25 = arith.mulf %23, %24 : vector<32x1xf32>
      %26 = math.sqrt %25 : vector<32x1xf32>
      %cst_18 = arith.constant 9.99999997E-7 : f32
      %27 = vector.broadcast %cst_18 : f32 to vector<32x1xf32>
      %28 = arith.addf %26, %27 : vector<32x1xf32>
      %29 = vector.broadcast %18 : vector<32x1xf32> to vector<32x128xf32>
      %30 = arith.subf %12, %29 : vector<32x128xf32>
      %31 = tpu.reciprocal %28 {approx = true} : vector<32x1xf32> -> vector<32x1xf32>
      %32 = vector.broadcast %31 : vector<32x1xf32> to vector<32x128xf32>
      %33 = arith.mulf %30, %32 : vector<32x128xf32>
      %34 = vector.broadcast %13 : vector<1x128xf32> to vector<32x128xf32>
      %35 = arith.mulf %34, %33 : vector<32x128xf32>
      %36 = vector.broadcast %14 : vector<1x128xf32> to vector<32x128xf32>
      %37 = arith.addf %35, %36 : vector<32x128xf32>
      %38 = arith.truncf %37 : vector<32x128xf32> to vector<32x128xbf16>
      %c0_19 = arith.constant 0 : index
      %c0_20 = arith.constant 0 : index
      %39 = vector.load %arg8[%c0_19, %c0_20] : memref<32x128xbf16, #tpu.memory_space<vmem>>, vector<32x128xbf16>
      tpu.vector_store %arg8[%c0_19, %c0_20], %38 {strides = array<i32>} : memref<32x128xbf16, #tpu.memory_space<vmem>>, vector<32x128xbf16>,
    } else {
    }
    %c0 = arith.constant 0 : index
    %c0_1 = arith.constant 0 : index
    %3 = vector.load %arg8[%c0, %c0_1] : memref<32x128xbf16, #tpu.memory_space<vmem>>, vector<32x128xbf16>
    %c0_2 = arith.constant 0 : index
    %c0_3 = arith.constant 0 : index
    %4 = vector.load %arg5[%c0_2, %c0_3] : memref<128x128xbf16, #tpu.memory_space<vmem>>, vector<128x128xbf16>
    %cst = arith.constant dense<0.000000e+00> : vector<32x128xf32>
    %5 = tpu.matmul %3, %4, %cst {dimension_numbers = #tpu.dot_dimension_numbers<[1], [0], [0], [1], [0, 0, 1, 1], [], []>} : vector<32x128xbf16>, vector<128x128xbf16>, vector<32x128xf32> -> vector<32x128xf32>
    %c0_4 = arith.constant 0 : index
    %c0_5 = arith.constant 0 : index
    %6 = vector.load %arg6[%c0_4, %c0_5] : memref<1x128xf32, #tpu.memory_space<vmem>>, vector<1x128xf32>
    %7 = vector.broadcast %6 : vector<1x128xf32> to vector<32x128xf32>
    %8 = arith.addf %5, %7 : vector<32x128xf32>
    %9 = arith.truncf %8 : vector<32x128xf32> to vector<32x128xbf16>
    %c0_6 = arith.constant 0 : index
    %c0_7 = arith.constant 0 : index
    %10 = vector.load %arg7[%c0_6, %c0_7] : memref<32x128xbf16, #tpu.memory_space<vmem>>, vector<32x128xbf16>
    tpu.vector_store %arg7[%c0_6, %c0_7], %9 {strides = array<i32>} : memref<32x128xbf16, #tpu.memory_space<vmem>>, vector<32x128xbf16>,
    return
  }
  func.func @transform_0(%arg0: i32, %arg1: i32) -> (i32, i32) {
    %c0_i32 = arith.constant 0 : i32
    %c0_i32_0 = arith.constant 0 : i32
    return %arg0, %c0_i32 : i32, i32
  }
  func.func @transform_1(%arg0: i32, %arg1: i32) -> (i32, i32) {
    %c0_i32 = arith.constant 0 : i32
    %c0_i32_0 = arith.constant 0 : i32
    %c0_i32_1 = arith.constant 0 : i32
    return %c0_i32, %c0_i32_0 : i32, i32
  }
  func.func @transform_2(%arg0: i32, %arg1: i32) -> (i32, i32) {
    %c0_i32 = arith.constant 0 : i32
    %c0_i32_0 = arith.constant 0 : i32
    %c0_i32_1 = arith.constant 0 : i32
    return %c0_i32, %c0_i32_0 : i32, i32
  }
  func.func @transform_3(%arg0: i32, %arg1: i32) -> (i32, i32) {
    %c0_i32 = arith.constant 0 : i32
    %c0_i32_0 = arith.constant 0 : i32
    return %c0_i32, %arg1 : i32, i32
  }
  func.func @transform_4(%arg0: i32, %arg1: i32) -> (i32, i32) {
    %c0_i32 = arith.constant 0 : i32
    %c0_i32_0 = arith.constant 0 : i32
    return %c0_i32, %arg1 : i32, i32
  }
  func.func @transform_5(%arg0: i32, %arg1: i32) -> (i32, i32) {
    %c0_i32 = arith.constant 0 : i32
    return %arg0, %arg1 : i32, i32
  }
}

module attributes {stable_mosaic.version = 11 : i64} {
  func.func @_ln_kernel(%arg0: i32, %arg1: memref<32x128xbf16, #tpu.memory_space<vmem>>, %arg2: memref<1x128xf32, #tpu.memory_space<vmem>>, %arg3: memref<1x128xf32, #tpu.memory_space<vmem>>, %arg4: memref<32x128xf32, #tpu.memory_space<vmem>>) attributes {dimension_semantics = [#tpu.dimension_semantics<parallel>], iteration_bounds = array<i64: 1>, scalar_prefetch = 0 : i64, scratch_operands = 0 : i64, tpu.core_type = #tpu.core_type<tc>, window_params = [{transform_indices = @transform_0, window_bounds = array<i64: 32, 128>}, {pipeline_mode = #tpu.pipeline_mode<synchronous>, transform_indices = @transform_1, window_bounds = array<i64: 1, 128>}, {pipeline_mode = #tpu.pipeline_mode<synchronous>, transform_indices = @transform_2, window_bounds = array<i64: 1, 128>}, {transform_indices = @transform_3, window_bounds = array<i64: 32, 128>}]} {
    %c0 = arith.constant 0 : index
    %c0_0 = arith.constant 0 : index
    %0 = vector.load %arg1[%c0, %c0_0] : memref<32x128xbf16, #tpu.memory_space<vmem>>, vector<32x128xbf16>
    %1 = arith.extf %0 : vector<32x128xbf16> to vector<32x128xf32>
    %c0_1 = arith.constant 0 : index
    %c0_2 = arith.constant 0 : index
    %2 = vector.load %arg2[%c0_1, %c0_2] : memref<1x128xf32, #tpu.memory_space<vmem>>, vector<1x128xf32>
    %c0_3 = arith.constant 0 : index
    %c0_4 = arith.constant 0 : index
    %3 = vector.load %arg3[%c0_3, %c0_4] : memref<1x128xf32, #tpu.memory_space<vmem>>, vector<1x128xf32>
    %cst = arith.constant dense<0.000000e+00> : vector<32xf32>
    %4 = vector.multi_reduction <add>, %1, %cst [1] : vector<32x128xf32> to vector<32xf32>
    %5 = vector.shape_cast %4 : vector<32xf32> to vector<32x1xf32>
    %cst_5 = arith.constant 1.280000e+02 : f32
    %6 = vector.broadcast %cst_5 : f32 to vector<32x1xf32>
    %7 = arith.divf %5, %6 : vector<32x1xf32>
    %8 = vector.broadcast %7 : vector<32x1xf32> to vector<32x128xf32>
    %9 = arith.subf %1, %8 : vector<32x128xf32>
    %10 = arith.mulf %9, %9 : vector<32x128xf32>
    %cst_6 = arith.constant dense<0.000000e+00> : vector<32xf32>
    %11 = vector.multi_reduction <add>, %10, %cst_6 [1] : vector<32x128xf32> to vector<32xf32>
    %12 = vector.shape_cast %11 : vector<32xf32> to vector<32x1xf32>
    %cst_7 = arith.constant 0.00787401571 : f32
    %13 = vector.broadcast %cst_7 : f32 to vector<32x1xf32>
    %14 = arith.mulf %12, %13 : vector<32x1xf32>
    %15 = math.sqrt %14 : vector<32x1xf32>
    %cst_8 = arith.constant 9.99999997E-7 : f32
    %16 = vector.broadcast %cst_8 : f32 to vector<32x1xf32>
    %17 = arith.addf %15, %16 : vector<32x1xf32>
    %18 = vector.broadcast %7 : vector<32x1xf32> to vector<32x128xf32>
    %19 = arith.subf %1, %18 : vector<32x128xf32>
    %20 = vector.broadcast %17 : vector<32x1xf32> to vector<32x128xf32>
    %21 = arith.divf %19, %20 : vector<32x128xf32>
    %22 = vector.broadcast %2 : vector<1x128xf32> to vector<32x128xf32>
    %23 = arith.mulf %22, %21 : vector<32x128xf32>
    %24 = vector.broadcast %3 : vector<1x128xf32> to vector<32x128xf32>
    %25 = arith.addf %23, %24 : vector<32x128xf32>
    %c0_9 = arith.constant 0 : index
    %c0_10 = arith.constant 0 : index
    %26 = vector.load %arg4[%c0_9, %c0_10] : memref<32x128xf32, #tpu.memory_space<vmem>>, vector<32x128xf32>
    tpu.vector_store %arg4[%c0_9, %c0_10], %25 {strides = array<i32>} : memref<32x128xf32, #tpu.memory_space<vmem>>, vector<32x128xf32>,
    return
  }
  func.func @transform_0(%arg0: i32) -> (i32, i32) {
    %c0_i32 = arith.constant 0 : i32
    %c0_i32_0 = arith.constant 0 : i32
    return %arg0, %c0_i32 : i32, i32
  }
  func.func @transform_1(%arg0: i32) -> (i32, i32) {
    %c0_i32 = arith.constant 0 : i32
    %c0_i32_0 = arith.constant 0 : i32
    %c0_i32_1 = arith.constant 0 : i32
    return %c0_i32, %c0_i32_0 : i32, i32
  }
  func.func @transform_2(%arg0: i32) -> (i32, i32) {
    %c0_i32 = arith.constant 0 : i32
    %c0_i32_0 = arith.constant 0 : i32
    %c0_i32_1 = arith.constant 0 : i32
    return %c0_i32, %c0_i32_0 : i32, i32
  }
  func.func @transform_3(%arg0: i32) -> (i32, i32) {
    %c0_i32 = arith.constant 0 : i32
    %c0_i32_0 = arith.constant 0 : i32
    return %arg0, %c0_i32 : i32, i32
  }
}

module attributes {stable_mosaic.version = 11 : i64} {
  func.func @flash_kernel(%arg0: i32, %arg1: i32, %arg2: i32, %arg3: memref<1x16x128xbf16, #tpu.memory_space<vmem>>, %arg4: memref<1x16x128xbf16, #tpu.memory_space<vmem>>, %arg5: memref<1x16x128xbf16, #tpu.memory_space<vmem>>, %arg6: memref<1x1x16xi32, #tpu.memory_space<vmem>>, %arg7: memref<1x16x128xbf16, #tpu.memory_space<vmem>>, %arg8: memref<4x16x1xf32, #tpu.memory_space<vmem>>, %arg9: memref<4x16x1xf32, #tpu.memory_space<vmem>>, %arg10: memref<16x128xf32, #tpu.memory_space<vmem>>) attributes {dimension_semantics = [#tpu.dimension_semantics<parallel>, #tpu.dimension_semantics<parallel>, #tpu.dimension_semantics<arbitrary>], iteration_bounds = array<i64: 2, 1, 1>, scalar_prefetch = 0 : i64, scratch_operands = 3 : i64, tpu.core_type = #tpu.core_type<tc>, window_params = [{transform_indices = @transform_0, window_bounds = array<i64: 1, 16, 128>}, {transform_indices = @transform_1, window_bounds = array<i64: 1, 16, 128>}, {transform_indices = @transform_2, window_bounds = array<i64: 1, 16, 128>}, {transform_indices = @transform_3, window_bounds = array<i64: 1, 1, 16>}, {transform_indices = @transform_4, window_bounds = array<i64: 1, 16, 128>}]} {
    %c0_i32 = arith.constant 0 : i32
    %0 = arith.cmpi eq, %arg2, %c0_i32 : i32
    %1 = arith.extui %0 : i1 to i32
    %c0_i32_0 = arith.constant 0 : i32
    %2 = arith.cmpi ne, %1, %c0_i32_0 : i32
    scf.if %2 {
      %cst_83 = arith.constant 0xFF800000 : f32
      %152 = vector.broadcast %cst_83 : f32 to vector<4x16x1xf32>
      %c0_84 = arith.constant 0 : index
      %c0_85 = arith.constant 0 : index
      %c0_86 = arith.constant 0 : index
      %153 = vector.load %arg8[%c0_84, %c0_85, %c0_86] : memref<4x16x1xf32, #tpu.memory_space<vmem>>, vector<4x16x1xf32>
      tpu.vector_store %arg8[%c0_84, %c0_85, %c0_86], %152 {strides = array<i32>} : memref<4x16x1xf32, #tpu.memory_space<vmem>>, vector<4x16x1xf32>,
      %cst_87 = arith.constant 0.000000e+00 : f32
      %154 = vector.broadcast %cst_87 : f32 to vector<4x16x1xf32>
      %c0_88 = arith.constant 0 : index
      %c0_89 = arith.constant 0 : index
      %c0_90 = arith.constant 0 : index
      %155 = vector.load %arg9[%c0_88, %c0_89, %c0_90] : memref<4x16x1xf32, #tpu.memory_space<vmem>>, vector<4x16x1xf32>
      tpu.vector_store %arg9[%c0_88, %c0_89, %c0_90], %154 {strides = array<i32>} : memref<4x16x1xf32, #tpu.memory_space<vmem>>, vector<4x16x1xf32>,
      %cst_91 = arith.constant 0.000000e+00 : f32
      %156 = vector.broadcast %cst_91 : f32 to vector<16x128xf32>
      %c0_92 = arith.constant 0 : index
      %c0_93 = arith.constant 0 : index
      %157 = vector.load %arg10[%c0_92, %c0_93] : memref<16x128xf32, #tpu.memory_space<vmem>>, vector<16x128xf32>
      tpu.vector_store %arg10[%c0_92, %c0_93], %156 {strides = array<i32>} : memref<16x128xf32, #tpu.memory_space<vmem>>, vector<16x128xf32>,
    } else {
    }
    %c0 = arith.constant 0 : index
    %c0_1 = arith.constant 0 : index
    %c0_2 = arith.constant 0 : index
    %3 = vector.load %arg3[%c0, %c0_1, %c0_2] : memref<1x16x128xbf16, #tpu.memory_space<vmem>>, vector<1x16x128xbf16>
    %4 = vector.shape_cast %3 : vector<1x16x128xbf16> to vector<16x128xbf16>
    %c0_3 = arith.constant 0 : index
    %c0_4 = arith.constant 0 : index
    %c0_5 = arith.constant 0 : index
    %5 = vector.load %arg4[%c0_3, %c0_4, %c0_5] : memref<1x16x128xbf16, #tpu.memory_space<vmem>>, vector<1x16x128xbf16>
    %6 = vector.shape_cast %5 : vector<1x16x128xbf16> to vector<16x128xbf16>
    %c0_6 = arith.constant 0 : index
    %c0_7 = arith.constant 0 : index
    %c0_8 = arith.constant 0 : index
    %7 = vector.load %arg5[%c0_6, %c0_7, %c0_8] : memref<1x16x128xbf16, #tpu.memory_space<vmem>>, vector<1x16x128xbf16>
    %8 = vector.shape_cast %7 : vector<1x16x128xbf16> to vector<16x128xbf16>
    %c0_9 = arith.constant 0 : index
    %c0_10 = arith.constant 0 : index
    %c0_11 = arith.constant 0 : index
    %9 = vector.load %arg6[%c0_9, %c0_10, %c0_11] : memref<1x1x16xi32, #tpu.memory_space<vmem>>, vector<1x1x16xi32>
    %10 = vector.shape_cast %9 : vector<1x1x16xi32> to vector<1x16xi32>
    %c0_i32_12 = arith.constant 0 : i32
    %11 = vector.broadcast %c0_i32_12 : i32 to vector<1x16xi32>
    %12 = arith.cmpi ne, %10, %11 : vector<1x16xi32>
    %13 = vector.shape_cast %12 : vector<1x16xi1> to vector<1x16xi1>
    %14 = vector.broadcast %13 : vector<1x16xi1> to vector<16x16xi1>
    %15 = vector.extract_strided_slice %4 {offsets = [0, 0], sizes = [16, 32], strides = [1, 1]} : vector<16x128xbf16> to vector<16x32xbf16>
    %16 = vector.extract_strided_slice %6 {offsets = [0, 0], sizes = [16, 32], strides = [1, 1]} : vector<16x128xbf16> to vector<16x32xbf16>
    %cst = arith.constant dense<0.000000e+00> : vector<16x16xf32>
    %17 = tpu.matmul %15, %16, %cst {dimension_numbers = #tpu.dot_dimension_numbers<[1], [1], [0], [0], [0, 0, 1, 0], [], []>} : vector<16x32xbf16>, vector<16x32xbf16>, vector<16x16xf32> -> vector<16x16xf32>
    %cst_13 = arith.constant -1.000000e+09 : f32
    %18 = vector.broadcast %cst_13 : f32 to vector<16x16xf32>
    %19 = arith.select %14, %17, %18 : vector<16x16xi1>, vector<16x16xf32>
    %c0_14 = arith.constant 0 : index
    %c0_15 = arith.constant 0 : index
    %c0_16 = arith.constant 0 : index
    %20 = vector.load %arg8[%c0_14, %c0_15, %c0_16] : memref<4x16x1xf32, #tpu.memory_space<vmem>>, vector<1x16x1xf32>
    %21 = vector.shape_cast %20 : vector<1x16x1xf32> to vector<16x1xf32>
    %cst_17 = arith.constant dense<0xFF800000> : vector<16xf32>
    %22 = vector.multi_reduction <maximumf>, %19, %cst_17 [1] : vector<16x16xf32> to vector<16xf32>
    %23 = vector.shape_cast %22 : vector<16xf32> to vector<16x1xf32>
    %24 = arith.maximumf %21, %23 : vector<16x1xf32>
    %25 = arith.subf %21, %24 : vector<16x1xf32>
    %26 = math.exp %25 : vector<16x1xf32>
    %27 = vector.broadcast %24 : vector<16x1xf32> to vector<16x16xf32>
    %28 = arith.subf %19, %27 : vector<16x16xf32>
    %29 = math.exp %28 : vector<16x16xf32>
    %c0_18 = arith.constant 0 : index
    %c0_19 = arith.constant 0 : index
    %c0_20 = arith.constant 0 : index
    %30 = vector.load %arg9[%c0_18, %c0_19, %c0_20] : memref<4x16x1xf32, #tpu.memory_space<vmem>>, vector<1x16x1xf32>
    %31 = vector.shape_cast %30 : vector<1x16x1xf32> to vector<16x1xf32>
    %32 = arith.mulf %26, %31 : vector<16x1xf32>
    %cst_21 = arith.constant dense<0.000000e+00> : vector<16xf32>
    %33 = vector.multi_reduction <add>, %29, %cst_21 [1] : vector<16x16xf32> to vector<16xf32>
    %34 = vector.shape_cast %33 : vector<16xf32> to vector<16x1xf32>
    %35 = arith.addf %32, %34 : vector<16x1xf32>
    %c0_22 = arith.constant 0 : index
    %c0_23 = arith.constant 0 : index
    %c0_24 = arith.constant 0 : index
    %36 = vector.load %arg9[%c0_22, %c0_23, %c0_24] : memref<4x16x1xf32, #tpu.memory_space<vmem>>, vector<1x16x1xf32>
    %37 = vector.shape_cast %36 : vector<1x16x1xf32> to vector<16x1xf32>
    %38 = vector.shape_cast %35 : vector<16x1xf32> to vector<1x16x1xf32>
    tpu.vector_store %arg9[%c0_22, %c0_23, %c0_24], %38 {strides = array<i32>} : memref<4x16x1xf32, #tpu.memory_space<vmem>>, vector<1x16x1xf32>,
    %39 = arith.truncf %29 : vector<16x16xf32> to vector<16x16xbf16>
    %40 = vector.extract_strided_slice %8 {offsets = [0, 0], sizes = [16, 32], strides = [1, 1]} : vector<16x128xbf16> to vector<16x32xbf16>
    %cst_25 = arith.constant dense<0.000000e+00> : vector<16x32xf32>
    %41 = tpu.matmul %39, %40, %cst_25 {dimension_numbers = #tpu.dot_dimension_numbers<[1], [0], [0], [1], [0, 0, 1, 1], [], []>} : vector<16x16xbf16>, vector<16x32xbf16>, vector<16x32xf32> -> vector<16x32xf32>
    %c0_26 = arith.constant 0 : index
    %c0_27 = arith.constant 0 : index
    %c0_28 = arith.constant 0 : index
    %42 = vector.load %arg8[%c0_26, %c0_27, %c0_28] : memref<4x16x1xf32, #tpu.memory_space<vmem>>, vector<1x16x1xf32>
    %43 = vector.shape_cast %42 : vector<1x16x1xf32> to vector<16x1xf32>
    %44 = vector.shape_cast %24 : vector<16x1xf32> to vector<1x16x1xf32>
    tpu.vector_store %arg8[%c0_26, %c0_27, %c0_28], %44 {strides = array<i32>} : memref<4x16x1xf32, #tpu.memory_space<vmem>>, vector<1x16x1xf32>,
    %45 = vector.shape_cast %26 : vector<16x1xf32> to vector<16x1xf32>
    %46 = vector.broadcast %45 : vector<16x1xf32> to vector<16x32xf32>
    %47 = vector.extract_strided_slice %4 {offsets = [0, 32], sizes = [16, 32], strides = [1, 1]} : vector<16x128xbf16> to vector<16x32xbf16>
    %48 = vector.extract_strided_slice %6 {offsets = [0, 32], sizes = [16, 32], strides = [1, 1]} : vector<16x128xbf16> to vector<16x32xbf16>
    %cst_29 = arith.constant dense<0.000000e+00> : vector<16x16xf32>
    %49 = tpu.matmul %47, %48, %cst_29 {dimension_numbers = #tpu.dot_dimension_numbers<[1], [1], [0], [0], [0, 0, 1, 0], [], []>} : vector<16x32xbf16>, vector<16x32xbf16>, vector<16x16xf32> -> vector<16x16xf32>
    %cst_30 = arith.constant -1.000000e+09 : f32
    %50 = vector.broadcast %cst_30 : f32 to vector<16x16xf32>
    %51 = arith.select %14, %49, %50 : vector<16x16xi1>, vector<16x16xf32>
    %c1 = arith.constant 1 : index
    %c0_31 = arith.constant 0 : index
    %c0_32 = arith.constant 0 : index
    %52 = vector.load %arg8[%c1, %c0_31, %c0_32] : memref<4x16x1xf32, #tpu.memory_space<vmem>>, vector<1x16x1xf32>
    %53 = vector.shape_cast %52 : vector<1x16x1xf32> to vector<16x1xf32>
    %cst_33 = arith.constant dense<0xFF800000> : vector<16xf32>
    %54 = vector.multi_reduction <maximumf>, %51, %cst_33 [1] : vector<16x16xf32> to vector<16xf32>
    %55 = vector.shape_cast %54 : vector<16xf32> to vector<16x1xf32>
    %56 = arith.maximumf %53, %55 : vector<16x1xf32>
    %57 = arith.subf %53, %56 : vector<16x1xf32>
    %58 = math.exp %57 : vector<16x1xf32>
    %59 = vector.broadcast %56 : vector<16x1xf32> to vector<16x16xf32>
    %60 = arith.subf %51, %59 : vector<16x16xf32>
    %61 = math.exp %60 : vector<16x16xf32>
    %c1_34 = arith.constant 1 : index
    %c0_35 = arith.constant 0 : index
    %c0_36 = arith.constant 0 : index
    %62 = vector.load %arg9[%c1_34, %c0_35, %c0_36] : memref<4x16x1xf32, #tpu.memory_space<vmem>>, vector<1x16x1xf32>
    %63 = vector.shape_cast %62 : vector<1x16x1xf32> to vector<16x1xf32>
    %64 = arith.mulf %58, %63 : vector<16x1xf32>
    %cst_37 = arith.constant dense<0.000000e+00> : vector<16xf32>
    %65 = vector.multi_reduction <add>, %61, %cst_37 [1] : vector<16x16xf32> to vector<16xf32>
    %66 = vector.shape_cast %65 : vector<16xf32> to vector<16x1xf32>
    %67 = arith.addf %64, %66 : vector<16x1xf32>
    %c1_38 = arith.constant 1 : index
    %c0_39 = arith.constant 0 : index
    %c0_40 = arith.constant 0 : index
    %68 = vector.load %arg9[%c1_38, %c0_39, %c0_40] : memref<4x16x1xf32, #tpu.memory_space<vmem>>, vector<1x16x1xf32>
    %69 = vector.shape_cast %68 : vector<1x16x1xf32> to vector<16x1xf32>
    %70 = vector.shape_cast %67 : vector<16x1xf32> to vector<1x16x1xf32>
    tpu.vector_store %arg9[%c1_38, %c0_39, %c0_40], %70 {strides = array<i32>} : memref<4x16x1xf32, #tpu.memory_space<vmem>>, vector<1x16x1xf32>,
    %71 = arith.truncf %61 : vector<16x16xf32> to vector<16x16xbf16>
    %72 = vector.extract_strided_slice %8 {offsets = [0, 32], sizes = [16, 32], strides = [1, 1]} : vector<16x128xbf16> to vector<16x32xbf16>
    %cst_41 = arith.constant dense<0.000000e+00> : vector<16x32xf32>
    %73 = tpu.matmul %71, %72, %cst_41 {dimension_numbers = #tpu.dot_dimension_numbers<[1], [0], [0], [1], [0, 0, 1, 1], [], []>} : vector<16x16xbf16>, vector<16x32xbf16>, vector<16x32xf32> -> vector<16x32xf32>
    %c1_42 = arith.constant 1 : index
    %c0_43 = arith.constant 0 : index
    %c0_44 = arith.constant 0 : index
    %74 = vector.load %arg8[%c1_42, %c0_43, %c0_44] : memref<4x16x1xf32, #tpu.memory_space<vmem>>, vector<1x16x1xf32>
    %75 = vector.shape_cast %74 : vector<1x16x1xf32> to vector<16x1xf32>
    %76 = vector.shape_cast %56 : vector<16x1xf32> to vector<1x16x1xf32>
    tpu.vector_store %arg8[%c1_42, %c0_43, %c0_44], %76 {strides = array<i32>} : memref<4x16x1xf32, #tpu.memory_space<vmem>>, vector<1x16x1xf32>,
    %77 = vector.shape_cast %58 : vector<16x1xf32> to vector<16x1xf32>
    %78 = vector.broadcast %77 : vector<16x1xf32> to vector<16x32xf32>
    %79 = vector.extract_strided_slice %4 {offsets = [0, 64], sizes = [16, 32], strides = [1, 1]} : vector<16x128xbf16> to vector<16x32xbf16>
    %80 = vector.extract_strided_slice %6 {offsets = [0, 64], sizes = [16, 32], strides = [1, 1]} : vector<16x128xbf16> to vector<16x32xbf16>
    %cst_45 = arith.constant dense<0.000000e+00> : vector<16x16xf32>
    %81 = tpu.matmul %79, %80, %cst_45 {dimension_numbers = #tpu.dot_dimension_numbers<[1], [1], [0], [0], [0, 0, 1, 0], [], []>} : vector<16x32xbf16>, vector<16x32xbf16>, vector<16x16xf32> -> vector<16x16xf32>
    %cst_46 = arith.constant -1.000000e+09 : f32
    %82 = vector.broadcast %cst_46 : f32 to vector<16x16xf32>
    %83 = arith.select %14, %81, %82 : vector<16x16xi1>, vector<16x16xf32>
    %c2 = arith.constant 2 : index
    %c0_47 = arith.constant 0 : index
    %c0_48 = arith.constant 0 : index
    %84 = vector.load %arg8[%c2, %c0_47, %c0_48] : memref<4x16x1xf32, #tpu.memory_space<vmem>>, vector<1x16x1xf32>
    %85 = vector.shape_cast %84 : vector<1x16x1xf32> to vector<16x1xf32>
    %cst_49 = arith.constant dense<0xFF800000> : vector<16xf32>
    %86 = vector.multi_reduction <maximumf>, %83, %cst_49 [1] : vector<16x16xf32> to vector<16xf32>
    %87 = vector.shape_cast %86 : vector<16xf32> to vector<16x1xf32>
    %88 = arith.maximumf %85, %87 : vector<16x1xf32>
    %89 = arith.subf %85, %88 : vector<16x1xf32>
    %90 = math.exp %89 : vector<16x1xf32>
    %91 = vector.broadcast %88 : vector<16x1xf32> to vector<16x16xf32>
    %92 = arith.subf %83, %91 : vector<16x16xf32>
    %93 = math.exp %92 : vector<16x16xf32>
    %c2_50 = arith.constant 2 : index
    %c0_51 = arith.constant 0 : index
    %c0_52 = arith.constant 0 : index
    %94 = vector.load %arg9[%c2_50, %c0_51, %c0_52] : memref<4x16x1xf32, #tpu.memory_space<vmem>>, vector<1x16x1xf32>
    %95 = vector.shape_cast %94 : vector<1x16x1xf32> to vector<16x1xf32>
    %96 = arith.mulf %90, %95 : vector<16x1xf32>
    %cst_53 = arith.constant dense<0.000000e+00> : vector<16xf32>
    %97 = vector.multi_reduction <add>, %93, %cst_53 [1] : vector<16x16xf32> to vector<16xf32>
    %98 = vector.shape_cast %97 : vector<16xf32> to vector<16x1xf32>
    %99 = arith.addf %96, %98 : vector<16x1xf32>
    %c2_54 = arith.constant 2 : index
    %c0_55 = arith.constant 0 : index
    %c0_56 = arith.constant 0 : index
    %100 = vector.load %arg9[%c2_54, %c0_55, %c0_56] : memref<4x16x1xf32, #tpu.memory_space<vmem>>, vector<1x16x1xf32>
    %101 = vector.shape_cast %100 : vector<1x16x1xf32> to vector<16x1xf32>
    %102 = vector.shape_cast %99 : vector<16x1xf32> to vector<1x16x1xf32>
    tpu.vector_store %arg9[%c2_54, %c0_55, %c0_56], %102 {strides = array<i32>} : memref<4x16x1xf32, #tpu.memory_space<vmem>>, vector<1x16x1xf32>,
    %103 = arith.truncf %93 : vector<16x16xf32> to vector<16x16xbf16>
    %104 = vector.extract_strided_slice %8 {offsets = [0, 64], sizes = [16, 32], strides = [1, 1]} : vector<16x128xbf16> to vector<16x32xbf16>
    %cst_57 = arith.constant dense<0.000000e+00> : vector<16x32xf32>
    %105 = tpu.matmul %103, %104, %cst_57 {dimension_numbers = #tpu.dot_dimension_numbers<[1], [0], [0], [1], [0, 0, 1, 1], [], []>} : vector<16x16xbf16>, vector<16x32xbf16>, vector<16x32xf32> -> vector<16x32xf32>
    %c2_58 = arith.constant 2 : index
    %c0_59 = arith.constant 0 : index
    %c0_60 = arith.constant 0 : index
    %106 = vector.load %arg8[%c2_58, %c0_59, %c0_60] : memref<4x16x1xf32, #tpu.memory_space<vmem>>, vector<1x16x1xf32>
    %107 = vector.shape_cast %106 : vector<1x16x1xf32> to vector<16x1xf32>
    %108 = vector.shape_cast %88 : vector<16x1xf32> to vector<1x16x1xf32>
    tpu.vector_store %arg8[%c2_58, %c0_59, %c0_60], %108 {strides = array<i32>} : memref<4x16x1xf32, #tpu.memory_space<vmem>>, vector<1x16x1xf32>,
    %109 = vector.shape_cast %90 : vector<16x1xf32> to vector<16x1xf32>
    %110 = vector.broadcast %109 : vector<16x1xf32> to vector<16x32xf32>
    %111 = vector.extract_strided_slice %4 {offsets = [0, 96], sizes = [16, 32], strides = [1, 1]} : vector<16x128xbf16> to vector<16x32xbf16>
    %112 = vector.extract_strided_slice %6 {offsets = [0, 96], sizes = [16, 32], strides = [1, 1]} : vector<16x128xbf16> to vector<16x32xbf16>
    %cst_61 = arith.constant dense<0.000000e+00> : vector<16x16xf32>
    %113 = tpu.matmul %111, %112, %cst_61 {dimension_numbers = #tpu.dot_dimension_numbers<[1], [1], [0], [0], [0, 0, 1, 0], [], []>} : vector<16x32xbf16>, vector<16x32xbf16>, vector<16x16xf32> -> vector<16x16xf32>
    %cst_62 = arith.constant -1.000000e+09 : f32
    %114 = vector.broadcast %cst_62 : f32 to vector<16x16xf32>
    %115 = arith.select %14, %113, %114 : vector<16x16xi1>, vector<16x16xf32>
    %c3 = arith.constant 3 : index
    %c0_63 = arith.constant 0 : index
    %c0_64 = arith.constant 0 : index
    %116 = vector.load %arg8[%c3, %c0_63, %c0_64] : memref<4x16x1xf32, #tpu.memory_space<vmem>>, vector<1x16x1xf32>
    %117 = vector.shape_cast %116 : vector<1x16x1xf32> to vector<16x1xf32>
    %cst_65 = arith.constant dense<0xFF800000> : vector<16xf32>
    %118 = vector.multi_reduction <maximumf>, %115, %cst_65 [1] : vector<16x16xf32> to vector<16xf32>
    %119 = vector.shape_cast %118 : vector<16xf32> to vector<16x1xf32>
    %120 = arith.maximumf %117, %119 : vector<16x1xf32>
    %121 = arith.subf %117, %120 : vector<16x1xf32>
    %122 = math.exp %121 : vector<16x1xf32>
    %123 = vector.broadcast %120 : vector<16x1xf32> to vector<16x16xf32>
    %124 = arith.subf %115, %123 : vector<16x16xf32>
    %125 = math.exp %124 : vector<16x16xf32>
    %c3_66 = arith.constant 3 : index
    %c0_67 = arith.constant 0 : index
    %c0_68 = arith.constant 0 : index
    %126 = vector.load %arg9[%c3_66, %c0_67, %c0_68] : memref<4x16x1xf32, #tpu.memory_space<vmem>>, vector<1x16x1xf32>
    %127 = vector.shape_cast %126 : vector<1x16x1xf32> to vector<16x1xf32>
    %128 = arith.mulf %122, %127 : vector<16x1xf32>
    %cst_69 = arith.constant dense<0.000000e+00> : vector<16xf32>
    %129 = vector.multi_reduction <add>, %125, %cst_69 [1] : vector<16x16xf32> to vector<16xf32>
    %130 = vector.shape_cast %129 : vector<16xf32> to vector<16x1xf32>
    %131 = arith.addf %128, %130 : vector<16x1xf32>
    %c3_70 = arith.constant 3 : index
    %c0_71 = arith.constant 0 : index
    %c0_72 = arith.constant 0 : index
    %132 = vector.load %arg9[%c3_70, %c0_71, %c0_72] : memref<4x16x1xf32, #tpu.memory_space<vmem>>, vector<1x16x1xf32>
    %133 = vector.shape_cast %132 : vector<1x16x1xf32> to vector<16x1xf32>
    %134 = vector.shape_cast %131 : vector<16x1xf32> to vector<1x16x1xf32>
    tpu.vector_store %arg9[%c3_70, %c0_71, %c0_72], %134 {strides = array<i32>} : memref<4x16x1xf32, #tpu.memory_space<vmem>>, vector<1x16x1xf32>,
    %135 = arith.truncf %125 : vector<16x16xf32> to vector<16x16xbf16>
    %136 = vector.extract_strided_slice %8 {offsets = [0, 96], sizes = [16, 32], strides = [1, 1]} : vector<16x128xbf16> to vector<16x32xbf16>
    %cst_73 = arith.constant dense<0.000000e+00> : vector<16x32xf32>
    %137 = tpu.matmul %135, %136, %cst_73 {dimension_numbers = #tpu.dot_dimension_numbers<[1], [0], [0], [1], [0, 0, 1, 1], [], []>} : vector<16x16xbf16>, vector<16x32xbf16>, vector<16x32xf32> -> vector<16x32xf32>
    %c3_74 = arith.constant 3 : index
    %c0_75 = arith.constant 0 : index
    %c0_76 = arith.constant 0 : index
    %138 = vector.load %arg8[%c3_74, %c0_75, %c0_76] : memref<4x16x1xf32, #tpu.memory_space<vmem>>, vector<1x16x1xf32>
    %139 = vector.shape_cast %138 : vector<1x16x1xf32> to vector<16x1xf32>
    %140 = vector.shape_cast %120 : vector<16x1xf32> to vector<1x16x1xf32>
    tpu.vector_store %arg8[%c3_74, %c0_75, %c0_76], %140 {strides = array<i32>} : memref<4x16x1xf32, #tpu.memory_space<vmem>>, vector<1x16x1xf32>,
    %141 = vector.shape_cast %122 : vector<16x1xf32> to vector<16x1xf32>
    %142 = vector.broadcast %141 : vector<16x1xf32> to vector<16x32xf32>
    %143 = tpu.concatenate %46, %78, %110, %142 in 1 : vector<16x32xf32>, vector<16x32xf32>, vector<16x32xf32>, vector<16x32xf32> -> vector<16x128xf32>
    %144 = tpu.concatenate %41, %73, %105, %137 in 1 : vector<16x32xf32>, vector<16x32xf32>, vector<16x32xf32>, vector<16x32xf32> -> vector<16x128xf32>
    %c0_77 = arith.constant 0 : index
    %c0_78 = arith.constant 0 : index
    %145 = vector.load %arg10[%c0_77, %c0_78] : memref<16x128xf32, #tpu.memory_space<vmem>>, vector<16x128xf32>
    %146 = arith.mulf %143, %145 : vector<16x128xf32>
    %147 = arith.addf %146, %144 : vector<16x128xf32>
    %c0_79 = arith.constant 0 : index
    %c0_80 = arith.constant 0 : index
    %148 = vector.load %arg10[%c0_79, %c0_80] : memref<16x128xf32, #tpu.memory_space<vmem>>, vector<16x128xf32>
    tpu.vector_store %arg10[%c0_79, %c0_80], %147 {strides = array<i32>} : memref<16x128xf32, #tpu.memory_space<vmem>>, vector<16x128xf32>,
    %c0_i32_81 = arith.constant 0 : i32
    %149 = arith.cmpi eq, %arg2, %c0_i32_81 : i32
    %150 = arith.extui %149 : i1 to i32
    %c0_i32_82 = arith.constant 0 : i32
    %151 = arith.cmpi ne, %150, %c0_i32_82 : i32
    scf.if %151 {
      %c0_83 = arith.constant 0 : index
      %c0_84 = arith.constant 0 : index
      %c0_85 = arith.constant 0 : index
      %152 = vector.load %arg9[%c0_83, %c0_84, %c0_85] : memref<4x16x1xf32, #tpu.memory_space<vmem>>, vector<1x16x1xf32>
      %153 = vector.shape_cast %152 : vector<1x16x1xf32> to vector<16x1xf32>
      %154 = tpu.reciprocal %153 {approx = true} : vector<16x1xf32> -> vector<16x1xf32>
      %155 = vector.shape_cast %154 : vector<16x1xf32> to vector<16x1xf32>
      %156 = vector.broadcast %155 : vector<16x1xf32> to vector<16x32xf32>
      %c1_86 = arith.constant 1 : index
      %c0_87 = arith.constant 0 : index
      %c0_88 = arith.constant 0 : index
      %157 = vector.load %arg9[%c1_86, %c0_87, %c0_88] : memref<4x16x1xf32, #tpu.memory_space<vmem>>, vector<1x16x1xf32>
      %158 = vector.shape_cast %157 : vector<1x16x1xf32> to vector<16x1xf32>
      %159 = tpu.reciprocal %158 {approx = true} : vector<16x1xf32> -> vector<16x1xf32>
      %160 = vector.shape_cast %159 : vector<16x1xf32> to vector<16x1xf32>
      %161 = vector.broadcast %160 : vector<16x1xf32> to vector<16x32xf32>
      %c2_89 = arith.constant 2 : index
      %c0_90 = arith.constant 0 : index
      %c0_91 = arith.constant 0 : index
      %162 = vector.load %arg9[%c2_89, %c0_90, %c0_91] : memref<4x16x1xf32, #tpu.memory_space<vmem>>, vector<1x16x1xf32>
      %163 = vector.shape_cast %162 : vector<1x16x1xf32> to vector<16x1xf32>
      %164 = tpu.reciprocal %163 {approx = true} : vector<16x1xf32> -> vector<16x1xf32>
      %165 = vector.shape_cast %164 : vector<16x1xf32> to vector<16x1xf32>
      %166 = vector.broadcast %165 : vector<16x1xf32> to vector<16x32xf32>
      %c3_92 = arith.constant 3 : index
      %c0_93 = arith.constant 0 : index
      %c0_94 = arith.constant 0 : index
      %167 = vector.load %arg9[%c3_92, %c0_93, %c0_94] : memref<4x16x1xf32, #tpu.memory_space<vmem>>, vector<1x16x1xf32>
      %168 = vector.shape_cast %167 : vector<1x16x1xf32> to vector<16x1xf32>
      %169 = tpu.reciprocal %168 {approx = true} : vector<16x1xf32> -> vector<16x1xf32>
      %170 = vector.shape_cast %169 : vector<16x1xf32> to vector<16x1xf32>
      %171 = vector.broadcast %170 : vector<16x1xf32> to vector<16x32xf32>
      %c0_95 = arith.constant 0 : index
      %c0_96 = arith.constant 0 : index
      %172 = vector.load %arg10[%c0_95, %c0_96] : memref<16x128xf32, #tpu.memory_space<vmem>>, vector<16x128xf32>
      %173 = tpu.concatenate %156, %161, %166, %171 in 1 : vector<16x32xf32>, vector<16x32xf32>, vector<16x32xf32>, vector<16x32xf32> -> vector<16x128xf32>
      %174 = arith.mulf %172, %173 : vector<16x128xf32>
      %175 = arith.truncf %174 : vector<16x128xf32> to vector<16x128xbf16>
      %c0_97 = arith.constant 0 : index
      %c0_98 = arith.constant 0 : index
      %c0_99 = arith.constant 0 : index
      %176 = vector.load %arg7[%c0_97, %c0_98, %c0_99] : memref<1x16x128xbf16, #tpu.memory_space<vmem>>, vector<1x16x128xbf16>
      %177 = vector.shape_cast %176 : vector<1x16x128xbf16> to vector<16x128xbf16>
      %178 = vector.shape_cast %175 : vector<16x128xbf16> to vector<1x16x128xbf16>
      tpu.vector_store %arg7[%c0_97, %c0_98, %c0_99], %178 {strides = array<i32>} : memref<1x16x128xbf16, #tpu.memory_space<vmem>>, vector<1x16x128xbf16>,
    } else {
    }
    return
  }
  func.func @transform_0(%arg0: i32, %arg1: i32, %arg2: i32) -> (i32, i32, i32) {
    %c0_i32 = arith.constant 0 : i32
    %c0_i32_0 = arith.constant 0 : i32
    return %arg0, %arg1, %c0_i32 : i32, i32, i32
  }
  func.func @transform_1(%arg0: i32, %arg1: i32, %arg2: i32) -> (i32, i32, i32) {
    %c0_i32 = arith.constant 0 : i32
    %c0_i32_0 = arith.constant 0 : i32
    return %arg0, %arg2, %c0_i32 : i32, i32, i32
  }
  func.func @transform_2(%arg0: i32, %arg1: i32, %arg2: i32) -> (i32, i32, i32) {
    %c1_i32 = arith.constant 1 : i32
    %c0_i32 = arith.constant 0 : i32
    return %arg0, %arg2, %c1_i32 : i32, i32, i32
  }
  func.func @transform_3(%arg0: i32, %arg1: i32, %arg2: i32) -> (i32, i32, i32) {
    %c0_i32 = arith.constant 0 : i32
    %c0_i32_0 = arith.constant 0 : i32
    return %arg0, %c0_i32, %arg2 : i32, i32, i32
  }
  func.func @transform_4(%arg0: i32, %arg1: i32, %arg2: i32) -> (i32, i32, i32) {
    %c0_i32 = arith.constant 0 : i32
    %c0_i32_0 = arith.constant 0 : i32
    return %arg0, %arg1, %c0_i32 : i32, i32, i32
  }
}

</mosaic_0001>

<bundles_post_ra>
// kernel: encoder_decoder_forward.26
= control target key start
LH: loop header
LB: loop body
LE: loop exit
PB: predicated region body
PF: predicated region fallthrough
CT: control target
= control target key end

     0   :  { %v595_v41 = vmov 0   ;;  %s759_s0 = inlined_call_operand.vmem [shape: bf16[32,128], index: 0, kind: input, shape index: {}]   ;;  %s760_s3 = inlined_call_operand.vmem [shape: bf16[128,384], index: 3, kind: input, shape index: {}]   ;;  %s761_s1 = inlined_call_operand.vmem [shape: f32[1,128], index: 1, kind: input, shape index: {}]   ;;  %s762_s2 = inlined_call_operand.vmem [shape: f32[1,128], index: 2, kind: input, shape index: {}]   ;;  %s763_s4 = inlined_call_operand.vmem [shape: f32[1,384], index: 4, kind: input, shape index: {}]   ;;  %s764_s5 = inlined_call_operand.vmem [shape: bf16[32,384], index: 5, kind: output, shape index: {}]  }
   0x1   :  { %v508_v0 = vld [vmem:[%s759_s0] sm:$0xff]   ;;  %v515_v1 = vld [vmem:[%s759_s0 + $0x8] sm:$0xff]   ;;  %v557_v29 = vld [vmem:[%s760_s3 + $0x30] ss:$12 sps:$4 sm:$0xff]   ;;  %343 = vmatprep.mubr.bf16.mxu0 %v595_v41 }
   0x2   :  { %v509_v2 = vunpack.c.l.bf16 %v508_v0  ;;  %v513_v3 = vunpack.c.l.bf16 %v515_v1  ;;  %v510_v4 = vunpack.c.h.bf16 %v508_v0  ;;  %v514_v5 = vunpack.c.h.bf16 %v515_v1  ;;  %v547_v22 = vld [vmem:[%s760_s3 + $0x4] ss:$12 sps:$4 sm:$0xff]   ;;  %v549_v23 = vld [vmem:[%s760_s3] ss:$12 sps:$4 sm:$0xff]   ;;  %v550_v24 = vld [vmem:[%s760_s3 + $0x1c] ss:$12 sps:$4 sm:$0xff]  }
   0x3   :  { %311 = vmatprep.subr.bf16.mxu0 %v547_v22  ;;  %v552_v25 = vld [vmem:[%s760_s3 + $0x8] ss:$12 sps:$4 sm:$0xff]   ;;  %v553_v26 = vld [vmem:[%s760_s3 + $0x18] ss:$12 sps:$4 sm:$0xff]   ;;  %v556_v28 = vld [vmem:[%s760_s3 + $0x20] ss:$12 sps:$4 sm:$0xff]  }
   0x4   :  { %35 = vadd.xlane.f32.xlu0 %v509_v2  ;;  %39 = vadd.xlane.f32.xlu1 %v513_v3  ;;  %v554_v27 = vld [vmem:[%s760_s3 + $0x34] ss:$12 sps:$4 sm:$0xff]   ;;  %v558_v30 = vld [vmem:[%s760_s3 + $0x4c] ss:$12 sps:$4 sm:$0xff]   ;;  %v562_v33 = vld [vmem:[%s760_s3 + $0x64] ss:$12 sps:$4 sm:$0xff]  }
   0x5   :  { %312 = vmatpush1.bf16.msra.mxu0 %v549_v23  ;;  %526 = vmatprep.subr.bf16.mxu1 %v552_v25  ;;  %v560_v31 = vld [vmem:[%s760_s3 + $0x38] ss:$12 sps:$4 sm:$0xff]   ;;  %v561_v32 = vld [vmem:[%s760_s3 + $0x48] ss:$12 sps:$4 sm:$0xff]   ;;  %v564_v34 = vld [vmem:[%s760_s3 + $0x50] ss:$12 sps:$4 sm:$0xff]  }
   0x6   :  { %313 = vmatprep.subr.bf16.mxu0 %v550_v24  ;;  %527 = vmatpush3.bf16.msra.mxu1 %v552_v25  ;;  %v565_v35 = vld [vmem:[%s760_s3 + $0x60] ss:$12 sps:$4 sm:$0xff]   ;;  %v566_v36 = vld [vmem:[%s760_s3 + $0x7c] ss:$12 sps:$4 sm:$0xff]   ;;  %v569_v38 = vld [vmem:[%s760_s3 + $0x78] ss:$12 sps:$4 sm:$0xff]  }
   0x7   :  { %528 = vmatprep.subr.bf16.mxu1 %v556_v28  ;;  %v568_v37 = vld [vmem:[%s760_s3 + $0x68] ss:$12 sps:$4 sm:$0xff]   ;;  %v572_v40 = vld [vmem:[%s760_s3 + $0x80] ss:$12 sps:$4 sm:$0xff]   ;;  %v573_v42 = vld [vmem:[%s760_s3 + $0x90] ss:$12 sps:$4 sm:$0xff]  }
   0x8   :  { %37 = vadd.xlane.f32.xlu0 %v510_v4  ;;  %41 = vadd.xlane.f32.xlu1 %v514_v5  ;;  %v570_v39 = vld [vmem:[%s760_s3 + $0x94] ss:$12 sps:$4 sm:$0xff]   ;;  %v574_v43 = vld [vmem:[%s760_s3 + $0xac] ss:$12 sps:$4 sm:$0xff]   ;;  %v578_v46 = vld [vmem:[%s760_s3 + $0xb0] ss:$12 sps:$4 sm:$0xff]  }
   0x9   :  { %314 = vmatpush1.bf16.msra.mxu0 %v553_v26  ;;  %v576_v44 = vld [vmem:[%s760_s3 + $0x98] ss:$12 sps:$4 sm:$0xff]   ;;  %v577_v45 = vld [vmem:[%s760_s3 + $0xa8] ss:$12 sps:$4 sm:$0xff]   ;;  %v466_v26 = vld [vmem:[%s762_s2] ss:$0 sm:$0xff] }
   0xa   :  { %315 = vmatprep.subr.bf16.mxu0 %v554_v27  ;;  %529 = vmatpush3.bf16.msra.mxu1 %v556_v28 }
   0xb   :  { %530 = vmatprep.subr.bf16.mxu1 %v560_v31 }
   0xd   :  { %316 = vmatpush1.bf16.msra.mxu0 %v557_v29 }
   0xe   :  { %317 = vmatprep.subr.bf16.mxu0 %v558_v30  ;;  %531 = vmatpush3.bf16.msra.mxu1 %v560_v31 }
   0xf   :  { %532 = vmatprep.subr.bf16.mxu1 %v564_v34 }
  0x11   :  { %318 = vmatpush1.bf16.msra.mxu0 %v561_v32 }
  0x12   :  { %319 = vmatprep.subr.bf16.mxu0 %v562_v33  ;;  %533 = vmatpush3.bf16.msra.mxu1 %v564_v34 }
  0x13   :  { %534 = vmatprep.subr.bf16.mxu1 %v568_v37 }
  0x15   :  { %320 = vmatpush1.bf16.msra.mxu0 %v565_v35 }
  0x16   :  { %321 = vmatprep.subr.bf16.mxu0 %v566_v36  ;;  %535 = vmatpush3.bf16.msra.mxu1 %v568_v37  ;;  %v168_v37 = vlaneseq }
  0x17   :  { %536 = vmatprep.subr.bf16.mxu1 %v572_v40 }
  0x19   :  { %322 = vmatpush1.bf16.msra.mxu0 %v569_v38 }
  0x1a   :  { %323 = vmatprep.subr.bf16.mxu0 %v570_v39  ;;  %537 = vmatpush3.bf16.msra.mxu1 %v572_v40  ;;  %v166_v39 = vld [vmem:[%s763_s4] sm:$0x7] }
  0x1b   :  { %538 = vmatprep.subr.bf16.mxu1 %v576_v44 }
  0x1d   :  { %324 = vmatpush1.bf16.msra.mxu0 %v573_v42 }
  0x1e   :  { %325 = vmatprep.subr.bf16.mxu0 %v574_v43  ;;  %539 = vmatpush3.bf16.msra.mxu1 %v576_v44 }
  0x1f   :  { %540 = vmatprep.subr.bf16.mxu1 %v578_v46 }
  0x21   :  { %326 = vmatpush1.bf16.msra.mxu0 %v577_v45 }
  0x22   :  { %541 = vmatpush3.bf16.msra.mxu1 %v578_v46 }
  0x91   :  { %v36_v6 = vpop.xlane.xlu0 %35  ;;  %v40_v7 = vpop.xlane.xlu1 %39 }
  0x92   :  { %v44_v8 = vmul.f32 0.0078125, %v36_v6  ;;  %v46_v9 = vmul.f32 0.0078125, %v40_v7 }
  0x94   :  { %v632_v10 = vsub.f32 %v509_v2, %v44_v8  ;;  %v634_v11 = vsub.f32 %v513_v3, %v46_v9 }
  0x95   :  { %v38_v12 = vpop.xlane.xlu0 %37  ;;  %v42_v13 = vpop.xlane.xlu1 %41 }
  0x96   :  { %v45_v14 = vmul.f32 0.0078125, %v38_v12  ;;  %v52_v15 = vmul.f32 %v632_v10, %v632_v10  ;;  %v47_v16 = vmul.f32 0.0078125, %v42_v13  ;;  %v54_v19 = vmul.f32 %v634_v11, %v634_v11 }
  0x98   :  { %v638_v17 = vsub.f32 %v510_v4, %v45_v14  ;;  %56 = vadd.xlane.f32.xlu0 %v52_v15  ;;  %v640_v18 = vsub.f32 %v514_v5, %v47_v16 }
  0x9a   :  { %v53_v20 = vmul.f32 %v638_v17, %v638_v17  ;;  %v55_v21 = vmul.f32 %v640_v18, %v640_v18 }
  0x9c   :  { %60 = vadd.xlane.f32.xlu0 %v54_v19  ;;  %58 = vadd.xlane.f32.xlu1 %v53_v20 }
  0xa0   :  { %62 = vadd.xlane.f32.xlu1 %v55_v21  ;;  %v465_v21 = vld [vmem:[%s761_s1] ss:$0 sm:$0xff] }
 0x125   :  { %v57_v47 = vpop.xlane.xlu0 %56 }
 0x126   :  { %v64_v48 = vmul.f32 0.007874016, %v57_v47 }
 0x128   :  { %579 = vrsqrt.f32 %v64_v48  ;;  %vm70_vm0 = vcmp.eq.f32.partialorder %v64_v48, inf  ;;  %v73_v57 = vand.u32 2147483648, %v64_v48  ;;  %vm72_vm1 = vcmp.eq.f32.partialorder %v64_v48, 0.0 }
 0x129   :  { %v59_v49 = vpop.xlane.xlu1 %58  ;;  %v61_v50 = vpop.xlane.xlu0 %60 }
 0x12a   :  { %v65_v51 = vmul.f32 0.007874016, %v59_v49  ;;  %v66_v52 = vmul.f32 0.007874016, %v61_v50 }
 0x12c   :  { %581 = vrsqrt.f32 %v65_v51  ;;  %vm77_vm2 = vcmp.eq.f32.partialorder %v65_v51, inf  ;;  %vm79_vm3 = vcmp.eq.f32.partialorder %v65_v51, 0.0  ;;  %v80_v0 = vand.u32 2147483648, %v65_v51 }
 0x12d   :  { %583 = vrsqrt.f32 %v66_v52  ;;  %v63_v53 = vpop.xlane.xlu1 %62  ;;  %vm84_vm4 = vcmp.eq.f32.partialorder %v66_v52, inf  ;;  %v87_v3 = vand.u32 2147483648, %v66_v52  ;;  %vm86_vm5 = vcmp.eq.f32.partialorder %v66_v52, 0.0 }
 0x12e   :  { %v67_v54 = vmul.f32 0.007874016, %v63_v53 }
 0x130   :  { %585 = vrsqrt.f32 %v67_v54  ;;  %vm91_vm6 = vcmp.eq.f32.partialorder %v67_v54, inf  ;;  %v94_v13 = vand.u32 2147483648, %v67_v54  ;;  %vm93_vm7 = vcmp.eq.f32.partialorder %v67_v54, 0.0 }
 0x132   :  { %v580_v55 = vpop.eup %579 }
 0x133   :  { %v69_v56 = vmul.f32 %v580_v55, %v64_v48 }
 0x135   :  { %v71_v58 = vsel %vm70_vm0, %v64_v48, %v69_v56 }
 0x136   :  { %v582_v59 = vpop.eup %581  ;;  %v74_v60 = vsel %vm72_vm1, %v73_v57, %v71_v58 }
 0x137   :  { %v584_v61 = vpop.eup %583  ;;  %v96_v62 = vadd.f32 1e-06, %v74_v60  ;;  %v76_v63 = vmul.f32 %v582_v59, %v65_v51 }
 0x138   :  { %v83_v1 = vmul.f32 %v584_v61, %v66_v52 }
 0x139   :  { %v78_v2 = vsel %vm77_vm2, %v65_v51, %v76_v63  ;;  %587 = vrcp.f32 %v96_v62 }
 0x13a   :  { %v586_v4 = vpop.eup %585  ;;  %v81_v5 = vsel %vm79_vm3, %v80_v0, %v78_v2  ;;  %v85_v6 = vsel %vm84_vm4, %v66_v52, %v83_v1 }
 0x13b   :  { %v97_v7 = vadd.f32 1e-06, %v81_v5  ;;  %v88_v8 = vsel %vm86_vm5, %v87_v3, %v85_v6  ;;  %v90_v9 = vmul.f32 %v586_v4, %v67_v54 }
 0x13c   :  { %v98_v12 = vadd.f32 1e-06, %v88_v8 }
 0x13d   :  { %v92_v14 = vsel %vm91_vm6, %v67_v54, %v90_v9  ;;  %589 = vrcp.f32 %v97_v7 }
 0x13e   :  { %591 = vrcp.f32 %v98_v12  ;;  %v95_v15 = vsel %vm93_vm7, %v94_v13, %v92_v14 }
 0x13f   :  { %v99_v16 = vadd.f32 1e-06, %v95_v15 }
 0x141   :  { %593 = vrcp.f32 %v99_v16 }
 0x143   :  { %v588_v19 = vpop.eup %587 }
 0x144   :  { %v104_v20 = vmul.f32 %v588_v19, %v632_v10 }
 0x146   :  { %v114_v25 = vmul.f32 %v465_v21, %v104_v20 }
 0x147   :  { %v590_v22 = vpop.eup %589 }
 0x148   :  { %v592_v23 = vpop.eup %591  ;;  %v105_v24 = vmul.f32 %v590_v22, %v638_v17  ;;  %v124_v30 = vadd.f32 %v466_v26, %v114_v25 }
 0x149   :  { %v106_v27 = vmul.f32 %v592_v23, %v634_v11  ;;  %v169_v11 = vshrl.u32 %v168_v37, 7 }
 0x14a   :  { %v115_v28 = vmul.f32 %v465_v21, %v105_v24 }
 0x14b   :  { %v594_v29 = vpop.eup %593  ;;  %v116_v32 = vmul.f32 %v465_v21, %v106_v27  ;;  %v170_v38 = vsub.s32 0, %v169_v11  ;;  %v178_v42 = vsub.s32 2, %v169_v11 }
 0x14c   :  { %v125_v31 = vadd.f32 %v466_v26, %v115_v28  ;;  %v107_v10 = vmul.f32 %v594_v29, %v640_v18  ;;  %v174_v18 = vsub.s32 1, %v169_v11 }
 0x14d   :  { %v126_v35 = vadd.f32 %v466_v26, %v116_v32  ;;  %v171_v40 = vrot.slane %v166_v39, %v170_v38  ;;  %v179_v47 = vrot.slane %v166_v39, %v178_v42 }
 0x14e   :  { %v128_v33 = vpack.c.bf16 %v125_v31, %v124_v30  ;;  %v117_v34 = vmul.f32 %v465_v21, %v107_v10  ;;  %v175_v43 = vrot.slane %v166_v39, %v174_v18 }
 0x150   :  { %344 = vmatmul.mubr.bf16.vlgmr.msra.gmra.mrb[0].mxu0 %v128_v33  ;;  %542 = vmatprep.mubr.bf16.mxu1 %v128_v33  ;;  %v127_v17 = vadd.f32 %v466_v26, %v117_v34 }
 0x151   :  { %353 = vmatprep.mubr.bf16.mxu0 %v595_v41 }
 0x152   :  { %v129_v36 = vpack.c.bf16 %v127_v17, %v126_v35 }
 0x154   :  { %543 = vmatmul.mubr.bf16.vlgmr.msra.gmra.mrb[0].mxu1 %v129_v36 }
 0x158   :  { %354 = vmatmul.mubr.bf16.gmra.mrb[4].mxu0 %v129_v36 }
 0x223   :  { %v345_v44 = vpop.f32.mrb[0].mxu0 }
 0x224   :  { %v346_v45 = vadd.f32 %v345_v44, %v171_v40  ;;  %v347_v46 = vpop.f32.mrb[1].mxu0 }
 0x225   :  { %v348_v48 = vadd.f32 %v347_v46, %v175_v43  ;;  %v349_v41 = vpop.f32.mrb[2].mxu0 }
 0x226   :  { %v350_v49 = vadd.f32 %v349_v41, %v171_v40  ;;  %v351_v50 = vpop.f32.mrb[3].mxu0 }
 0x227   :  { %v499_v51 = vpack.c.bf16 %v348_v48, %v346_v45  ;;  %v352_v52 = vadd.f32 %v351_v50, %v175_v43  ;;  %v544_v53 = vpop.f32.mrb[0].mxu1 }
 0x228   :  { %v407_v54 = vadd.f32 %v544_v53, %v179_v47  ;;  %v398_v55 = vpop.f32.mrb[1].mxu1 }
 0x229   :  { %453 = vst [vmem:[%s764_s5] sm:$0xff] %v499_v51  ;;  %v501_v56 = vpack.c.bf16 %v352_v52, %v350_v49  ;;  %v399_v57 = vadd.f32 %v398_v55, %v179_v47  ;;  %v545_v58 = vpop.f32.mrb[2].mxu1 }
 0x22a   :  { %v504_v59 = vpack.c.bf16 %v407_v54, %v407_v54  ;;  %v410_v60 = vadd.f32 %v545_v58, %v179_v47  ;;  %v401_v61 = vpop.f32.mrb[3].mxu1 }
 0x22b   :  { %455 = vst [vmem:[%s764_s5 + $0xc] sm:$0xff] %v501_v56  ;;  %v500_v62 = vpack.c.bf16 %v399_v57, %v399_v57  ;;  %v402_v63 = vadd.f32 %v401_v61, %v179_v47  ;;  %v355_v0 = vpop.f32.mrb[4].mxu0 }
 0x22c   :  { %458 = vst [vmem:[%s764_s5 + $0x20] sm:$0xf] %v504_v59  ;;  %v506_v1 = vpack.c.bf16 %v410_v60, %v410_v60  ;;  %v356_v2 = vadd.f32 %v355_v0, %v171_v40  ;;  %v357_v3 = vpop.f32.mrb[5].mxu0 }
 0x22d   :  { %454 = vst [vmem:[%s764_s5 + $0x8] sm:$0xf] %v500_v62  ;;  %v502_v4 = vpack.c.bf16 %v402_v63, %v402_v63  ;;  %v358_v5 = vadd.f32 %v357_v3, %v175_v43  ;;  %v359_v6 = vpop.f32.mrb[6].mxu0 }
 0x22e   :  { %460 = vst [vmem:[%s764_s5 + $0x2c] sm:$0xf] %v506_v1  ;;  %v360_v7 = vadd.f32 %v359_v6, %v171_v40  ;;  %v361_v8 = vpop.f32.mrb[7].mxu0 }
 0x22f   :  { %456 = vst [vmem:[%s764_s5 + $0x14] sm:$0xf] %v502_v4  ;;  %v503_v9 = vpack.c.bf16 %v358_v5, %v356_v2  ;;  %v362_v12 = vadd.f32 %v361_v8, %v175_v43 }
 0x231   :  { %457 = vst [vmem:[%s764_s5 + $0x18] sm:$0xff] %v503_v9  ;;  %v505_v13 = vpack.c.bf16 %v362_v12, %v360_v7 }
 0x233   :  { %459 = vst [vmem:[%s764_s5 + $0x24] sm:$0xff] %v505_v13 }

// kernel: encoder_decoder_forward.28
= control target key start
LH: loop header
LB: loop body
LE: loop exit
PB: predicated region body
PF: predicated region fallthrough
CT: control target
= control target key end

     0   :  { %s339_s1 = inlined_call_operand.vmem [shape: bf16[128,128], index: 1, kind: input, shape index: {}]   ;;  %s340_s0 = inlined_call_operand.vmem [shape: bf16[32,128], index: 0, kind: input, shape index: {}]   ;;  %s341_s2 = inlined_call_operand.vmem [shape: f32[1,128], index: 2, kind: input, shape index: {}]   ;;  %s342_s3 = inlined_call_operand.vmem [shape: bf16[32,128], index: 3, kind: input, shape index: {}]   ;;  %s343_s4 = inlined_call_operand.vmem [shape: bf16[32,128], index: 4, kind: output, shape index: {}]  }
   0x1   :  { %v259_v0 = vld [vmem:[%s339_s1] sm:$0xff]   ;;  %v260_v1 = vld [vmem:[%s339_s1 + $0x8] sm:$0xff]   ;;  %v261_v2 = vld [vmem:[%s339_s1 + $0x10] sm:$0xff]  }
   0x2   :  { %239 = vmatprep.subr.bf16.mxu0 %v259_v0  ;;  %v262_v3 = vld [vmem:[%s339_s1 + $0x18] sm:$0xff]   ;;  %v267_v4 = vld [vmem:[%s340_s0] sm:$0xff]   ;;  %v264_v6 = vld [vmem:[%s339_s1 + $0x28] sm:$0xff]  }
   0x3   :  { %240 = vmatpush3.bf16.msra.mxu0 %v259_v0  ;;  %255 = vmatprep.mubr.bf16.mxu0 %v267_v4  ;;  %v263_v5 = vld [vmem:[%s339_s1 + $0x20] sm:$0xff]   ;;  %v265_v7 = vld [vmem:[%s339_s1 + $0x30] sm:$0xff]   ;;  %v266_v8 = vld [vmem:[%s339_s1 + $0x38] sm:$0xff]  }
   0x4   :  { %241 = vmatprep.subr.bf16.mxu0 %v260_v1  ;;  %v268_v9 = vld [vmem:[%s340_s0 + $0x8] sm:$0xff]   ;;  %v190_v10 = vld [vmem:[%s341_s2] ss:$0 sm:$0xff] }
   0x5   :  { %v227_v11 = vld [vmem:[%s342_s3 + $0x8] sm:$0xff]   ;;  %v210_v12 = vld [vmem:[%s342_s3] sm:$0xff]  }
   0x6   :  { %v215_v15 = vunpack.c.l.bf16 %v227_v11  ;;  %v216_v17 = vunpack.c.h.bf16 %v227_v11  ;;  %v211_v19 = vunpack.c.l.bf16 %v210_v12  ;;  %v212_v21 = vunpack.c.h.bf16 %v210_v12 }
   0x7   :  { %242 = vmatpush3.bf16.msra.mxu0 %v260_v1 }
   0x8   :  { %243 = vmatprep.subr.bf16.mxu0 %v261_v2 }
   0xb   :  { %244 = vmatpush3.bf16.msra.mxu0 %v261_v2 }
   0xc   :  { %245 = vmatprep.subr.bf16.mxu0 %v262_v3 }
   0xf   :  { %246 = vmatpush3.bf16.msra.mxu0 %v262_v3 }
  0x10   :  { %247 = vmatprep.subr.bf16.mxu0 %v263_v5 }
  0x13   :  { %248 = vmatpush3.bf16.msra.mxu0 %v263_v5 }
  0x14   :  { %249 = vmatprep.subr.bf16.mxu0 %v264_v6 }
  0x17   :  { %250 = vmatpush3.bf16.msra.mxu0 %v264_v6 }
  0x18   :  { %251 = vmatprep.subr.bf16.mxu0 %v265_v7 }
  0x1b   :  { %252 = vmatpush3.bf16.msra.mxu0 %v265_v7 }
  0x1c   :  { %253 = vmatprep.subr.bf16.mxu0 %v266_v8 }
  0x1f   :  { %254 = vmatpush3.bf16.msra.mxu0 %v266_v8 }
  0x22   :  { %256 = vmatmul.mubr.bf16.vlgmr.msra.gmra.mrb[0].mxu0 %v268_v9 }
  0xf5   :  { %v257_v13 = vpop.f32.mrb[0].mxu0 }
  0xf6   :  { %v148_v14 = vadd.f32 %v257_v13, %v190_v10  ;;  %v139_v16 = vpop.f32.mrb[1].mxu0 }
  0xf7   :  { %v140_v18 = vadd.f32 %v190_v10, %v139_v16  ;;  %v258_v20 = vpop.f32.mrb[2].mxu0 }
  0xf8   :  { %v151_v22 = vadd.f32 %v258_v20, %v190_v10  ;;  %v142_v23 = vpop.f32.mrb[3].mxu0  ;;  %v164_v25 = vadd.f32 %v215_v15, %v148_v14 }
  0xf9   :  { %v143_v24 = vadd.f32 %v190_v10, %v142_v23  ;;  %v162_v27 = vadd.f32 %v211_v19, %v140_v18 }
  0xfa   :  { %v165_v26 = vadd.f32 %v216_v17, %v151_v22 }
  0xfb   :  { %v163_v28 = vadd.f32 %v212_v21, %v143_v24 }
  0xfc   :  { %v225_v29 = vpack.c.bf16 %v165_v26, %v164_v25 }
  0xfd   :  { %v220_v30 = vpack.c.bf16 %v163_v28, %v162_v27 }
  0xfe   :  { %228 = vst [vmem:[%s343_s4 + $0x8] sm:$0xff] %v225_v29  }
  0xff   :  { %221 = vst [vmem:[%s343_s4] sm:$0xff] %v220_v30  }

// kernel: encoder_decoder_forward.27
= control target key start
LH: loop header
LB: loop body
LE: loop exit
PB: predicated region body
PF: predicated region fallthrough
CT: control target
= control target key end

     0   :  { %s1697_s15 = smov 0   ;;  %s1699_s16 = smov 0   ;;  %s2091_s0 = inlined_call_operand.vmem [shape: bf16[2,16,384], index: 0, kind: input, shape index: {}, may-alias: {0,1,2}]   ;;  %s2092_s1 = inlined_call_operand.vmem [shape: bf16[2,16,384], index: 1, kind: input, shape index: {}, may-alias: {0,1,2}]   ;;  %s2093_s2 = inlined_call_operand.vmem [shape: bf16[2,16,384], index: 2, kind: input, shape index: {}, may-alias: {0,1,2}]   ;;  %s2094_s3 = inlined_call_operand.vmem [shape: s32[2,1,16], index: 3, kind: input, shape index: {}]   ;;  %s2095_s4 = inlined_call_operand.vmem [shape: bf16[2,16,128], index: 4, kind: output, shape index: {}]  }
   0x1   :  { %s1701_s17 = smov 0   ;;  %s1703_s18 = smov 0  }
   0x2   :  { %s1705_s19 = smov 0  }
   0x3 LB: > { %s33_s20 = sadd.s32 1, %s1659_s18  ;;  %p49_p1 = scmp.ne.s32.totalorder %s1651_s16, %s1647_s15  ;;  %s1663_s19 = sphi %s1705_s19, %s14_s19   ;;  %s1659_s18 = sphi %s1703_s18, %s2100_s18   ;;  %s1655_s17 = sphi %s1701_s17, %s2099_s17   ;;  %s1651_s16 = sphi %s1699_s16, %s2098_s16   ;;  %s1647_s15 = sphi %s1697_s15, %s2097_s15  }
   0x4   : > { %p35_p0 = scmp.ge.s32.totalorder %s33_s20, 2  ;;  %p50_p2 = scmp.eq.s32.totalorder %s1663_s19, 0 }
   0x5   : > { %s42_s23 = sadd.s32 1, %s1651_s16  ;;  %p1420_p5 = scmp.ge.s32.totalorder %s1663_s19, 2 }
   0x6   : > { %s2102_s20 = smov (%p35_p0, %s33_s20), 0  ;;  %p1728_p3 = por %p50_p2, %p49_p1 }
   0x7   : > { %s37_s22 = ssub.s32 %s1659_s18, %s2102_s20  ;;  %187 = sbr.rel (%p1420_p5) target bundleno = 35 (0x23), region = 16 }
   0x8   : > { %p40_p4 = scmp.eq.s32.totalorder %s37_s22, 0 }
   0xa   : > { %s1736_s24 = scalar_select %p40_p4, %s1651_s16, %s42_s23  }
   0xe   : > { %190 = sbr.rel (!%p1728_p3) target bundleno = 21 (0x15), region = 20  ;;  %s192_s25 = sand.u32 (%p1728_p3), 1, %s1651_s16  }
   0xf   : > { %s1524_s26 = smul.u32 (%p1728_p3), 24, %s1659_s18  ;;  %s1421_s27 = sshll.u32 (%p1728_p3), %s192_s25, 3 }
  0x10   : > { %s194_s5 = scalar_lea.vmem (%p1728_p3), [#allocation5], %s1421_s27 }
  0x11   : > { %s200_s30 = scalar_lea.vmem (%p1728_p3), %s2091_s0, %s1524_s26 }
  0x12   : > { %v216_v0 = vld [vmem:[%s200_s30] sm:$0xf] (%p1728_p3)  ;;  %v218_v1 = vld [vmem:[%s200_s30 + $0xc] sm:$0xf] (%p1728_p3) }
  0x13   : > { %217 = vst [vmem:[%s194_s5] sm:$0xf] (%p1728_p3), %v216_v0  ;;  %219 = vst [vmem:[%s194_s5 + $0x4] sm:$0xf] (%p1728_p3), %v218_v1 }
  0x15 PF: > { %246 = sbr.rel (!%p1728_p3) target bundleno = 28 (0x1c), region = 61  ;;  %s248_s6 = sand.u32 (%p1728_p3), 1, %s1651_s16  }
  0x16   : > { %s1424_s7 = smul.u32 (%p1728_p3), 24, %s1659_s18  ;;  %s1423_s8 = sshll.u32 (%p1728_p3), %s248_s6, 3 }
  0x17   : > { %s250_s12 = scalar_lea.vmem (%p1728_p3), [#allocation6], %s1423_s8 }
  0x18   : > { %s1311_s11 = scalar_lea.vmem (%p1728_p3), %s2092_s1, %s1424_s7 }
  0x19   : > { %v1425_v2 = vld [vmem:[%s1311_s11 + $0x4] sm:$0xf] (%p1728_p3)  ;;  %v1426_v3 = vld [vmem:[%s1311_s11 + $0x10] sm:$0xf] (%p1728_p3) }
  0x1a   : > { %274 = vst [vmem:[%s250_s12] sm:$0xf] (%p1728_p3), %v1425_v2  ;;  %276 = vst [vmem:[%s250_s12 + $0x4] sm:$0xf] (%p1728_p3), %v1426_v3 }
  0x1c PF: > { %303 = sbr.rel (!%p1728_p3) target bundleno = 35 (0x23), region = 102  ;;  %s305_s13 = sand.u32 (%p1728_p3), 1, %s1651_s16  }
  0x1d   : > { %s1428_s14 = smul.u32 (%p1728_p3), 24, %s1659_s18  ;;  %s1427_s22 = sshll.u32 (%p1728_p3), %s305_s13, 3 }
  0x1e   : > { %s307_s27 = scalar_lea.vmem (%p1728_p3), [#allocation7], %s1427_s22 }
  0x1f   : > { %s1319_s26 = scalar_lea.vmem (%p1728_p3), %s2093_s2, %s1428_s14 }
  0x20   : > { %v1429_v4 = vld [vmem:[%s1319_s26 + $0x8] sm:$0xf] (%p1728_p3)  ;;  %v1430_v5 = vld [vmem:[%s1319_s26 + $0x14] sm:$0xf] (%p1728_p3) }
  0x21   : > { %331 = vst [vmem:[%s307_s27] sm:$0xf] (%p1728_p3), %v1429_v4  ;;  %333 = vst [vmem:[%s307_s27 + $0x4] sm:$0xf] (%p1728_p3), %v1430_v5 }
  0x23 PF: > { %p1431_p6 = scmp.ge.s32.totalorder %s1663_s19, 1  ;;  %p368_p7 = scmp.lt.s32.totalorder %s1663_s19, 3 }
  0x25   : > { %p369_p8 = pnand %p1431_p6, %p368_p7 }
  0x26   : > { %s375_s21 = sand.u32 (!%p369_p8), 1, %s1647_s15   ;;  %v1665_v6 = vmov (!%p369_p8), 0.0   ;;  %vm1666_vm0 = vmmov (!%p369_p8), 0   ;;  %vm499_vm1 = vcmask (!%p369_p8), 261120   ;;  %v1667_v7 = vmov (!%p369_p8), 0   ;;  %p435_p9 = scmp.lt.s32.totalorder (!%p369_p8), %s1655_s17, 1 }
  0x27   : > { %372 = sbr.rel (%p369_p8) target bundleno = 1446 (0x5a6), region = 147  ;;  %1476 = vmatprep.subr.bf16.mxu0 (!%p369_p8), %v1665_v6  ;;  %s1764_s28 = sshll.u32 (!%p369_p8), %s375_s21, 3  ;;  %1478 = vmatprep.mubr.msk.bf16.mxu0 (!%p369_p8), %vm1666_vm0, %v1665_v6  ;;  %vm456_vm2 = vcmask (!%p369_p8), 7168   ;;  %v1668_v11 = vmov (!%p369_p8), -inf   ;;  %v484_v12 = vlaneseq (!%p369_p8)  ;;  %vm551_vm5 = vcmask (!%p369_p8), 130048  }
  0x28   : > { %1572 = vset.pattern.permute.xlu1 (!%p369_p8), %v1667_v7  ;;  %1482 = vmatprep.subr.bf16.mxu1 (!%p369_p8), %v1665_v6  ;;  %s384_s29 = scalar_lea.vmem (!%p369_p8), [#allocation6], %s1764_s28  ;;  %s377_s15 = scalar_lea.vmem (!%p369_p8), [#allocation5], %s1764_s28  ;;  %457 = vst.msk [vmem:[#allocation2] sm:$0xff] (!%p369_p8), %vm456_vm2, %v1668_v11  ;;  %458 = vst.msk [vmem:[#allocation2 + $0x8] sm:$0xff] (!%p369_p8), %vm456_vm2, %v1668_v11  ;;  %vm1145_vm6 = vcmask (!%p369_p8), 523264   ;;  %vm1148_vm7 = vcmask (!%p369_p8), 785408  }
  0x29   : > { %v1770_v8 = vld [vmem:[%s384_s29] sm:$0xff] (!%p369_p8)   ;;  %1484 = vmatprep.mubr.msk.bf16.mxu1 (!%p369_p8), %vm1666_vm0, %v1665_v6  ;;  %1573 = vset.pattern.permute.xlu0 (!%p369_p8), %v1667_v7  ;;  %v1778_v10 = vld [vmem:[%s377_s15] sm:$0xff] (!%p369_p8)   ;;  %459 = vst.msk [vmem:[#allocation2 + $0x10] sm:$0xff] (!%p369_p8), %vm456_vm2, %v1668_v11  ;;  %460 = vst.msk [vmem:[#allocation2 + $0x18] sm:$0xff] (!%p369_p8), %vm456_vm2, %v1668_v11  ;;  %v485_v14 = vshrl.u32 (!%p369_p8), %v484_v12, 7  ;;  %s1669_s7 = smov (!%p369_p8), 96  }
  0x2a   : > { %v504_v9 = vsel (!%p369_p8), %vm499_vm1, %v1770_v8, 0  ;;  %461 = vst.msk [vmem:[#allocation2 + $0x20] sm:$0xff] (!%p369_p8), %vm456_vm2, %v1668_v11  ;;  %462 = vst.msk [vmem:[#allocation2 + $0x28] sm:$0xff] (!%p369_p8), %vm456_vm2, %v1668_v11  ;;  %s391_s8 = scalar_lea.vmem (!%p369_p8), [#allocation7], %s1764_s28  ;;  %s1670_s9 = smov (!%p369_p8), 64  }
  0x2b   : > { %1477 = vmatpush3.bf16.xpose.msra.mxu0 (!%p369_p8), %v504_v9  ;;  %463 = vst.msk [vmem:[#allocation2 + $0x30] sm:$0xff] (!%p369_p8), %vm456_vm2, %v1668_v11  ;;  %464 = vst.msk [vmem:[#allocation2 + $0x38] sm:$0xff] (!%p369_p8), %vm456_vm2, %v1668_v11  ;;  %v486_v15 = vsub.s32 (!%p369_p8), 0, %v485_v14  ;;  %v1850_v34 = vld [vmem:[%s391_s8] sm:$0xff] (!%p369_p8)   ;;  %s1671_s10 = smov (!%p369_p8), 32  }
  0x2c   : > { %1494 = vmatprep.subr.bf16.mxu0 (!%p369_p8), %v1665_v6  ;;  %465 = vst.msk [vmem:[#allocation3] sm:$0xff] (!%p369_p8), %vm456_vm2, %v1665_v6  ;;  %466 = vst.msk [vmem:[#allocation3 + $0x8] sm:$0xff] (!%p369_p8), %vm456_vm2, %v1665_v6  ;;  %1483 = vmatpush3.bf16.msra.mxu1 (!%p369_p8), %v1850_v34 }
  0x2d   : > { %467 = vst.msk [vmem:[#allocation3 + $0x10] sm:$0xff] (!%p369_p8), %vm456_vm2, %v1665_v6  ;;  %468 = vst.msk [vmem:[#allocation3 + $0x18] sm:$0xff] (!%p369_p8), %vm456_vm2, %v1665_v6  ;;  %1488 = vmatprep.subr.bf16.mxu1 (!%p369_p8), %v1665_v6 }
  0x2e   : > { %469 = vst.msk [vmem:[#allocation3 + $0x20] sm:$0xff] %vm456_vm2, %v1665_v6  ;;  %470 = vst.msk [vmem:[#allocation3 + $0x28] sm:$0xff] %vm456_vm2, %v1665_v6  ;;  %s2104_s17 = smov (!%p435_p9, %s1655_s17), 1 }
  0x2f   : > { %471 = vst.msk [vmem:[#allocation3 + $0x30] sm:$0xff] %vm456_vm2, %v1665_v6  ;;  %472 = vst.msk [vmem:[#allocation3 + $0x38] sm:$0xff] %vm456_vm2, %v1665_v6  ;;  %s440_s6 = scalar_lea.vmem %s2094_s3, %s2104_s17  ;;  %v1827_v26 = vld [vmem:[#allocation2] sm:$0xff]  ;;  %v1832_v29 = vld [vmem:[#allocation2 + $0x8] sm:$0xff]  ;;  %s1452_s11 = sshll.u32 %s2104_s17, 3 }
  0x30   : > { %v481_v13 = vld [vmem:[%s440_s6] sm:$0x1]  ;;  %s449_s14 = scalar_lea.vmem %s2095_s4, %s1452_s11 }
  0x31   : > { %vm482_vm3 = vcmp.ne.s32.totalorder %v481_v13, 0 }
  0x32   : > { %1479 = vmatmul.mubr.msk.bf16.vlgmr.msra.gmra.mrb[0].mxu0 %vm499_vm1, %v1778_v10  ;;  %v483_v16 = vsel %vm482_vm3, 1, %v1667_v7 }
  0x33   : > { %1496 = vmatprep.mubr.msk.bf16.mxu0 %vm1666_vm0, %v1665_v6  ;;  %v1816_v17 = vrot.slane %v483_v16, %v486_v15 }
  0x35   : > { %vm488_vm4 = vcmp.eq.s32.totalorder %v1816_v17, 1 }
 0x105   : > { %v540_v18 = vpop.f32.mrb[0].mxu0 }
 0x106   : > { %v547_v19 = vsel %vm488_vm4, %v540_v18, -1e+09  ;;  %v1480_v20 = vpop.f32.mrb[1].mxu0 }
 0x107   : > { %v543_v21 = vpop.f32.mrb[2].mxu0  ;;  %v552_v22 = vsel %vm551_vm5, %v547_v19, -inf }
 0x108   : > { %v548_v23 = vsel %vm488_vm4, %v543_v21, -1e+09  ;;  %553 = vmax.xlane.f32.xlu0 %v552_v22  ;;  %v1481_v24 = vpop.f32.mrb[3].mxu0  ;;  %v1925_v21 = vld [vmem:[#allocation2 + $0x18] sm:$0xff] }
 0x109   : > { %v555_v25 = vsel %vm551_vm5, %v548_v23, -inf }
 0x10c   : > { %556 = vmax.xlane.f32.xlu0 %v555_v25 }
 0x122   : > { %662 = vrot.lane.b32.xlu0 %v1770_v8, %s1669_s7 }
 0x195   : > { %v554_v27 = vpop.xlane.xlu0 %553 }
 0x196   : > { %v1830_v28 = vmax.f32 %v1827_v26, %v554_v27  ;;  %v1943_v27 = vld [vmem:[#allocation2 + $0x20] sm:$0xff] }
 0x198   : > { %v560_v30 = vsub.f32 %v1827_v26, %v1830_v28  ;;  %648 = vst.msk [vmem:[#allocation2] sm:$0xff] %vm456_vm2, %v1830_v28  ;;  %568 = vperm.xlu1 %1572, %v1830_v28  }
 0x199   : > { %v557_v31 = vpop.xlane.xlu0 %556 }
 0x19a   : > { %v1840_v32 = vmax.f32 %v1832_v29, %v557_v31 }
 0x19c   : > { %v561_v33 = vsub.f32 %v1832_v29, %v1840_v32  ;;  %649 = vst.msk [vmem:[#allocation2 + $0x8] sm:$0xff] %vm456_vm2, %v1840_v32  ;;  %573 = vperm.xlu1 %1572, %v1840_v32   ;;  %v562_v29 = vmul.f32 1.442695, %v560_v30 }
 0x19d   : > { %v663_v42 = vpop.permute.xlu0 %662 }
 0x19e   : > { %v668_v45 = vsel %vm499_vm1, %v663_v42, 0 }
 0x1a0   : > { %660 = vrot.lane.b32.xlu1 %v1778_v10, %s1669_s7 }
 0x1a4   : > { %823 = vrot.lane.b32.xlu1 %v1770_v8, %s1670_s9 }
 0x1a8   : > { %821 = vrot.lane.b32.xlu1 %v1778_v10, %s1670_s9 }
 0x1ac   : > { %984 = vrot.lane.b32.xlu1 %v1770_v8, %s1671_s10 }
 0x1b0   : > { %982 = vrot.lane.b32.xlu1 %v1778_v10, %s1671_s10 }
 0x217   : > { %v569_v35 = vpop.permute.xlu1 %568 }
 0x218   : > { %v576_v36 = vsub.f32 %v547_v19, %v569_v35  ;;  %v1923_v19 = vld [vmem:[#allocation2 + $0x10] sm:$0xff]  ;;  %v1947_v35 = vld [vmem:[#allocation2 + $0x28] sm:$0xff] }
 0x21a   : > { %v578_v37 = vmul.f32 1.442695, %v576_v36 }
 0x21b   : > { %v574_v38 = vpop.permute.xlu1 %573 }
 0x21c   : > { %v577_v39 = vsub.f32 %v548_v23, %v574_v38  ;;  %1577 = vpow2.f32 %v578_v37 }
 0x21e   : > { %v580_v40 = vmul.f32 1.442695, %v577_v39 }
 0x21f   : > { %v661_v41 = vpop.permute.xlu1 %660 }
 0x220   : > { %1579 = vpow2.f32 %v580_v40 }
 0x223   : > { %v824_v47 = vpop.permute.xlu1 %823 }
 0x224   : > { %v829_v49 = vsel %vm499_vm1, %v824_v47, 0 }
 0x226   : > { %v1862_v43 = vpop.eup %1577 }
 0x227   : > { %v822_v48 = vpop.permute.xlu1 %821 }
 0x22a   : > { %v1864_v44 = vpop.eup %1579 }
 0x22b   : > { %v597_v46 = vpack.c.bf16 %v1864_v44, %v1862_v43  ;;  %v985_v50 = vpop.permute.xlu1 %984 }
 0x22c   : > { %v990_v51 = vsel %vm499_vm1, %v985_v50, 0 }
 0x22d   : > { %1485 = vmatmul.mubr.msk.bf16.vlgmr.msra.gmra.mrb[0].mxu1 %vm551_vm5, %v597_v46 }
 0x22e   : > { %1489 = vmatpush3.bf16.xpose.msra.mxu1 %v668_v45  ;;  %1490 = vmatprep.mubr.msk.bf16.mxu1 %vm1666_vm0, %v1665_v6  ;;  %v1967_v45 = vld [vmem:[#allocation2 + $0x38] sm:$0xff] }
 0x22f   : > { %1500 = vmatprep.subr.bf16.mxu1 %v1665_v6  ;;  %v983_v52 = vpop.permute.xlu1 %982 }
 0x235   : > { %1491 = vmatmul.mubr.msk.bf16.vlgmr.msra.gmra.mrb[4].mxu1 %vm499_vm1, %v661_v41  ;;  %v1964_v41 = vld [vmem:[#allocation2 + $0x30] sm:$0xff] }
 0x236   : > { %1501 = vmatpush3.bf16.xpose.msra.mxu1 %v829_v49  ;;  %1502 = vmatprep.mubr.msk.bf16.mxu1 %vm1666_vm0, %v1665_v6 }
 0x237   : > { %1512 = vmatprep.subr.bf16.mxu1 %v1665_v6 }
 0x23d   : > { %1503 = vmatmul.mubr.msk.bf16.vlgmr.msra.gmra.mrb[8].mxu1 %vm499_vm1, %v822_v48 }
 0x23e   : > { %1513 = vmatpush3.bf16.xpose.msra.mxu1 %v990_v51  ;;  %1514 = vmatprep.mubr.msk.bf16.mxu1 %vm1666_vm0, %v1665_v6  ;;  %v589_v51 = vsel %vm551_vm5, %v1864_v44, 0.0 }
 0x245   : > { %1515 = vmatmul.mubr.msk.bf16.vlgmr.msra.gmra.mrb[12].mxu1 %vm499_vm1, %v983_v52  ;;  %v586_v52 = vsel %vm551_vm5, %v1862_v43, 0.0 }
 0x300   : > { %v1883_v53 = vpop.f32.mrb[0].mxu1 }
 0x301   : > { %v1486_v54 = vpop.f32.mrb[1].mxu1 }
 0x302   : > { %v1885_v55 = vpop.f32.mrb[2].mxu1 }
 0x303   : > { %v1487_v56 = vpop.f32.mrb[3].mxu1 }
 0x308   : > { %v704_v57 = vpop.f32.mrb[4].mxu1 }
 0x309   : > { %v1889_v58 = vsel %vm488_vm4, %v704_v57, -1e+09  ;;  %v1492_v59 = vpop.f32.mrb[5].mxu1 }
 0x30a   : > { %v707_v60 = vpop.f32.mrb[6].mxu1  ;;  %v716_v61 = vsel %vm551_vm5, %v1889_v58, -inf }
 0x30b   : > { %v1895_v62 = vsel %vm488_vm4, %v707_v60, -1e+09  ;;  %717 = vmax.xlane.f32.xlu1 %v716_v61  ;;  %v1493_v63 = vpop.f32.mrb[7].mxu1 }
 0x30c   : > { %v719_v0 = vsel %vm551_vm5, %v1895_v62, -inf }
 0x30d   : > { %720 = vmax.xlane.f32.xlu0 %v719_v0 }
 0x310   : > { %v865_v1 = vpop.f32.mrb[8].mxu1 }
 0x311   : > { %v1901_v2 = vsel %vm488_vm4, %v865_v1, -1e+09  ;;  %v1504_v3 = vpop.f32.mrb[9].mxu1 }
 0x312   : > { %v868_v4 = vpop.f32.mrb[10].mxu1  ;;  %v877_v5 = vsel %vm551_vm5, %v1901_v2, -inf }
 0x313   : > { %v1907_v7 = vsel %vm488_vm4, %v868_v4, -1e+09  ;;  %878 = vmax.xlane.f32.xlu0 %v877_v5  ;;  %v1505_v8 = vpop.f32.mrb[11].mxu1 }
 0x314   : > { %v880_v9 = vsel %vm551_vm5, %v1907_v7, -inf }
 0x315   : > { %881 = vmax.xlane.f32.xlu1 %v880_v9 }
 0x318   : > { %v1026_v10 = vpop.f32.mrb[12].mxu1 }
 0x319   : > { %v1913_v11 = vsel %vm488_vm4, %v1026_v10, -1e+09  ;;  %v1516_v12 = vpop.f32.mrb[13].mxu1 }
 0x31a   : > { %v1029_v13 = vpop.f32.mrb[14].mxu1  ;;  %v1038_v14 = vsel %vm551_vm5, %v1913_v11, -inf }
 0x31b   : > { %v1919_v15 = vsel %vm488_vm4, %v1029_v13, -1e+09  ;;  %1039 = vmax.xlane.f32.xlu0 %v1038_v14  ;;  %v1517_v16 = vpop.f32.mrb[15].mxu1 }
 0x31c   : > { %v1041_v18 = vsel %vm551_vm5, %v1919_v15, -inf }
 0x31d   : > { %1042 = vmax.xlane.f32.xlu1 %v1041_v18 }
 0x398   : > { %v718_v20 = vpop.xlane.xlu1 %717 }
 0x399   : > { %v1928_v22 = vmax.f32 %v1923_v19, %v718_v20 }
 0x39a   : > { %v721_v23 = vpop.xlane.xlu0 %720 }
 0x39b   : > { %v724_v17 = vsub.f32 %v1923_v19, %v1928_v22  ;;  %809 = vst.msk [vmem:[#allocation2 + $0x10] sm:$0xff] %vm456_vm2, %v1928_v22  ;;  %v1935_v24 = vmax.f32 %v1925_v21, %v721_v23  ;;  %732 = vperm.xlu0 %1573, %v1928_v22   ;;  %v564_v23 = vmul.f32 1.442695, %v561_v33 }
 0x39d   : > { %v725_v25 = vsub.f32 %v1925_v21, %v1935_v24  ;;  %810 = vst.msk [vmem:[#allocation2 + $0x18] sm:$0xff] %vm456_vm2, %v1935_v24  ;;  %737 = vperm.xlu1 %1572, %v1935_v24  }
 0x39f   : > { %1084 = vrot.lane.b32.xlu0 %v1850_v34, %s1671_s10  ;;  %v728_v33 = vmul.f32 1.442695, %v725_v25 }
 0x3a0   : > { %v879_v31 = vpop.xlane.xlu0 %878 }
 0x3a1   : > { %v1950_v36 = vmax.f32 %v1943_v27, %v879_v31 }
 0x3a2   : > { %v882_v37 = vpop.xlane.xlu1 %881 }
 0x3a3   : > { %v885_v38 = vsub.f32 %v1943_v27, %v1950_v36  ;;  %970 = vst.msk [vmem:[#allocation2 + $0x20] sm:$0xff] %vm456_vm2, %v1950_v36  ;;  %v1957_v39 = vmax.f32 %v1947_v35, %v882_v37  ;;  %893 = vperm.xlu1 %1572, %v1950_v36  }
 0x3a5   : > { %v886_v40 = vsub.f32 %v1947_v35, %v1957_v39  ;;  %971 = vst.msk [vmem:[#allocation2 + $0x28] sm:$0xff] %vm456_vm2, %v1957_v39  ;;  %v887_v26 = vmul.f32 1.442695, %v885_v38 }
 0x3a7   : > { %898 = vperm.xlu1 %1572, %v1957_v39  }
 0x3a8   : > { %v1040_v42 = vpop.xlane.xlu0 %1039 }
 0x3a9   : > { %v1970_v46 = vmax.f32 %v1964_v41, %v1040_v42 }
 0x3aa   : > { %v1043_v47 = vpop.xlane.xlu1 %1042 }
 0x3ab   : > { %v1046_v48 = vsub.f32 %v1964_v41, %v1970_v46  ;;  %1131 = vst.msk [vmem:[#allocation2 + $0x30] sm:$0xff] %vm456_vm2, %v1970_v46  ;;  %v1977_v49 = vmax.f32 %v1967_v45, %v1043_v47  ;;  %1054 = vperm.xlu1 %1572, %v1970_v46   ;;  %v582_v41 = vld [vmem:[#allocation3] sm:$0xff] }
 0x3ad   : > { %v1047_v50 = vsub.f32 %v1967_v45, %v1977_v49  ;;  %1132 = vst.msk [vmem:[#allocation2 + $0x38] sm:$0xff] %vm456_vm2, %v1977_v49  ;;  %v1048_v19 = vmul.f32 1.442695, %v1046_v48 }
 0x3af   : > { %1059 = vperm.xlu1 %1572, %v1977_v49   ;;  %v1050_v22 = vmul.f32 1.442695, %v1047_v50 }
 0x3b3   : > { %762 = vrot.lane.b32.xlu1 %v1850_v34, %s1669_s7 }
 0x3b7   : > { %923 = vrot.lane.b32.xlu1 %v1850_v34, %s1670_s9 }
 0x3be   : > { %590 = vadd.xlane.f32.xlu0 %v589_v51 }
 0x3db   : > { %587 = vadd.xlane.f32.xlu1 %v586_v52  ;;  %v726_v52 = vmul.f32 1.442695, %v724_v17 }
 0x41a   : > { %v733_v54 = vpop.permute.xlu0 %732 }
 0x41b   : > { %v740_v56 = vsub.f32 %v1889_v58, %v733_v54 }
 0x41c   : > { %v738_v57 = vpop.permute.xlu1 %737 }
 0x41d   : > { %v742_v59 = vmul.f32 1.442695, %v740_v56  ;;  %v741_v60 = vsub.f32 %v1895_v62, %v738_v57  ;;  %v583_v56 = vld [vmem:[#allocation3 + $0x8] sm:$0xff]  ;;  %v747_v57 = vld [vmem:[#allocation3 + $0x10] sm:$0xff] }
 0x41e   : > { %v1085_v42 = vpop.permute.xlu0 %1084 }
 0x41f   : > { %1581 = vpow2.f32 %v742_v59  ;;  %v744_v61 = vmul.f32 1.442695, %v741_v60  ;;  %v748_v59 = vld [vmem:[#allocation3 + $0x18] sm:$0xff] }
 0x421   : > { %1583 = vpow2.f32 %v744_v61 }
 0x422   : > { %v894_v63 = vpop.permute.xlu1 %893 }
 0x423   : > { %v901_v34 = vsub.f32 %v1901_v2, %v894_v63 }
 0x425   : > { %v903_v0 = vmul.f32 1.442695, %v901_v34 }
 0x426   : > { %v899_v44 = vpop.permute.xlu1 %898 }
 0x427   : > { %1585 = vpow2.f32 %v903_v0  ;;  %v902_v1 = vsub.f32 %v1907_v7, %v899_v44 }
 0x429   : > { %v1582_v43 = vpop.eup %1581  ;;  %v905_v3 = vmul.f32 1.442695, %v902_v1  ;;  %v908_v1 = vld [vmem:[#allocation3 + $0x20] sm:$0xff] }
 0x42a   : > { %v1055_v4 = vpop.permute.xlu1 %1054  ;;  %v751_v58 = vsel %vm551_vm5, %v1582_v43, 0.0 }
 0x42b   : > { %v1584_v5 = vpop.eup %1583  ;;  %1587 = vpow2.f32 %v905_v3  ;;  %v1062_v62 = vsub.f32 %v1913_v11, %v1055_v4  ;;  %752 = vadd.xlane.f32.xlu1 %v751_v58  ;;  %v909_v4 = vld [vmem:[#allocation3 + $0x28] sm:$0xff] }
 0x42c   : > { %v754_v8 = vsel %vm551_vm5, %v1584_v5, 0.0  ;;  %v761_v16 = vpack.c.bf16 %v1584_v5, %v1582_v43 }
 0x42d   : > { %v1064_v9 = vmul.f32 1.442695, %v1062_v62  ;;  %755 = vadd.xlane.f32.xlu0 %v754_v8 }
 0x42e   : > { %v1060_v2 = vpop.permute.xlu1 %1059 }
 0x42f   : > { %1589 = vpow2.f32 %v1064_v9  ;;  %v1063_v10 = vsub.f32 %v1919_v15, %v1060_v2  ;;  %v1069_v9 = vld [vmem:[#allocation3 + $0x30] sm:$0xff] }
 0x431   : > { %v1586_v12 = vpop.eup %1585  ;;  %v1066_v7 = vmul.f32 1.442695, %v1063_v10 }
 0x432   : > { %v763_v13 = vpop.permute.xlu1 %762  ;;  %v912_v14 = vsel %vm551_vm5, %v1586_v12, 0.0 }
 0x433   : > { %1591 = vpow2.f32 %v1066_v7  ;;  %913 = vadd.xlane.f32.xlu1 %v912_v14  ;;  %1495 = vmatpush3.bf16.msra.mxu0 %v763_v13  ;;  %v1070_v13 = vld [vmem:[#allocation3 + $0x38] sm:$0xff] }
 0x434   : > { %1506 = vmatprep.subr.bf16.mxu0 %v1665_v6  ;;  %1593 = vpow2.f32 %v564_v23 }
 0x435   : > { %v1588_v11 = vpop.eup %1587  ;;  %1595 = vpow2.f32 %v562_v29 }
 0x436   : > { %1497 = vmatmul.mubr.msk.bf16.vlgmr.msra.gmra.mrb[4].mxu0 %vm551_vm5, %v761_v16  ;;  %v915_v18 = vsel %vm551_vm5, %v1588_v11, 0.0  ;;  %v924_v20 = vpop.permute.xlu1 %923  ;;  %v922_v37 = vpack.c.bf16 %v1588_v11, %v1586_v12  ;;  %1597 = vpow2.f32 %v728_v33 }
 0x437   : > { %916 = vadd.xlane.f32.xlu0 %v915_v18  ;;  %1507 = vmatpush3.bf16.msra.mxu0 %v924_v20  ;;  %1599 = vpow2.f32 %v726_v52 }
 0x438   : > { %1508 = vmatprep.mubr.msk.bf16.mxu0 %vm1666_vm0, %v1665_v6  ;;  %1518 = vmatprep.subr.bf16.mxu0 %v1665_v6 }
 0x439   : > { %v1590_v15 = vpop.eup %1589 }
 0x43a   : > { %v1073_v31 = vsel %vm551_vm5, %v1590_v15, 0.0 }
 0x43b   : > { %1074 = vadd.xlane.f32.xlu0 %v1073_v31 }
 0x43d   : > { %v1592_v47 = vpop.eup %1591 }
 0x43e   : > { %1509 = vmatmul.mubr.msk.bf16.vlgmr.msra.gmra.mrb[8].mxu0 %vm551_vm5, %v922_v37  ;;  %v1076_v51 = vsel %vm551_vm5, %v1592_v47, 0.0  ;;  %v1083_v32 = vpack.c.bf16 %v1592_v47, %v1590_v15  ;;  %v1594_v54 = vpop.eup %1593 }
 0x43f   : > { %1077 = vadd.xlane.f32.xlu1 %v1076_v51  ;;  %1519 = vmatpush3.bf16.msra.mxu0 %v1085_v42  ;;  %v585_v28 = vmul.f32 %v1594_v54, %v583_v56  ;;  %v1596_v17 = vpop.eup %1595 }
 0x440   : > { %1520 = vmatprep.mubr.msk.bf16.mxu0 %vm1666_vm0, %v1665_v6  ;;  %v889_v6 = vmul.f32 1.442695, %v886_v40  ;;  %v1598_v24 = vpop.eup %1597  ;;  %v584_v45 = vmul.f32 %v1596_v17, %v582_v41 }
 0x441   : > { %v1600_v25 = vpop.eup %1599  ;;  %v750_v34 = vmul.f32 %v1598_v24, %v748_v59 }
 0x442   : > { %1601 = vpow2.f32 %v889_v6  ;;  %v749_v60 = vmul.f32 %v1600_v25, %v747_v57 }
 0x443   : > { %1603 = vpow2.f32 %v887_v26 }
 0x444   : > { %1605 = vpow2.f32 %v1048_v19 }
 0x445   : > { %1607 = vpow2.f32 %v1050_v22 }
 0x446   : > { %1521 = vmatmul.mubr.msk.bf16.vlgmr.msra.gmra.mrb[12].mxu0 %vm551_vm5, %v1083_v32 }
 0x44b   : > { %v591_v30 = vpop.xlane.xlu0 %590 }
 0x44c   : > { %v593_v21 = vadd.f32 %v591_v30, %v585_v28  ;;  %v1602_v35 = vpop.eup %1601 }
 0x44d   : > { %v1604_v36 = vpop.eup %1603  ;;  %v911_v62 = vmul.f32 %v1602_v35, %v909_v4 }
 0x44e   : > { %596 = vst.msk [vmem:[#allocation3 + $0x8] sm:$0xff] %vm456_vm2, %v593_v21  ;;  %v1606_v38 = vpop.eup %1605  ;;  %v910_v43 = vmul.f32 %v1604_v36, %v908_v1 }
 0x44f   : > { %v1608_v39 = vpop.eup %1607  ;;  %v1071_v12 = vmul.f32 %v1606_v38, %v1069_v9 }
 0x450   : > { %657 = vperm.xlu1 %1572, %v1594_v54   ;;  %v1072_v11 = vmul.f32 %v1608_v39, %v1070_v13 }
 0x451   : > { %652 = vperm.xlu0 %1573, %v1596_v17  }
 0x454   : > { %818 = vperm.xlu1 %1572, %v1598_v24  }
 0x455   : > { %813 = vperm.xlu0 %1573, %v1600_v25   ;;  %v1193_v27 = vld [vmem:[#allocation3 + $0x8] sm:$0xff] }
 0x456   : > { %1609 = vrcp.f32 %v1193_v27 }
 0x458   : > { %979 = vperm.xlu1 %1572, %v1602_v35  }
 0x459   : > { %974 = vperm.xlu0 %1573, %v1604_v36  }
 0x45c   : > { %1135 = vperm.xlu1 %1572, %v1606_v38  }
 0x45d   : > { %1140 = vperm.xlu0 %1573, %v1608_v39  }
 0x460   : > { %v1610_v40 = vpop.eup %1609 }
 0x461   : > { %1203 = vperm.xlu0 %1573, %v1610_v40  }
 0x468   : > { %v588_v46 = vpop.xlane.xlu1 %587 }
 0x469   : > { %v592_v48 = vadd.f32 %v588_v46, %v584_v45 }
 0x46b   : > { %595 = vst.msk [vmem:[#allocation3] sm:$0xff] %vm456_vm2, %v592_v48 }
 0x472   : > { %v1192_v49 = vld [vmem:[#allocation3] sm:$0xff] }
 0x473   : > { %1611 = vrcp.f32 %v1192_v49 }
 0x47d   : > { %v1612_v50 = vpop.eup %1611 }
 0x47e   : > { %1198 = vperm.xlu1 %1572, %v1612_v50  }
 0x4b8   : > { %v753_v61 = vpop.xlane.xlu1 %752 }
 0x4b9   : > { %v757_v63 = vadd.f32 %v753_v61, %v749_v60 }
 0x4ba   : > { %v756_v0 = vpop.xlane.xlu0 %755 }
 0x4bb   : > { %759 = vst.msk [vmem:[#allocation3 + $0x10] sm:$0xff] %vm456_vm2, %v757_v63  ;;  %v758_v44 = vadd.f32 %v756_v0, %v750_v34 }
 0x4bd   : > { %760 = vst.msk [vmem:[#allocation3 + $0x18] sm:$0xff] %vm456_vm2, %v758_v44 }
 0x4c0   : > { %v914_v3 = vpop.xlane.xlu1 %913 }
 0x4c1   : > { %v918_v58 = vadd.f32 %v914_v3, %v910_v43 }
 0x4c2   : > { %v1206_v5 = vld [vmem:[#allocation3 + $0x10] sm:$0xff] }
 0x4c3   : > { %920 = vst.msk [vmem:[#allocation3 + $0x20] sm:$0xff] %vm456_vm2, %v918_v58  ;;  %1613 = vrcp.f32 %v1206_v5 }
 0x4c4   : > { %v917_v8 = vpop.xlane.xlu0 %916  ;;  %v1207_v2 = vld [vmem:[#allocation3 + $0x18] sm:$0xff] }
 0x4c5   : > { %v919_v10 = vadd.f32 %v917_v8, %v911_v62  ;;  %1615 = vrcp.f32 %v1207_v2 }
 0x4c7   : > { %921 = vst.msk [vmem:[#allocation3 + $0x28] sm:$0xff] %vm456_vm2, %v919_v10 }
 0x4c8   : > { %v1075_v7 = vpop.xlane.xlu0 %1074 }
 0x4c9   : > { %v1079_v14 = vadd.f32 %v1075_v7, %v1071_v12 }
 0x4ca   : > { %v1220_v16 = vld [vmem:[#allocation3 + $0x20] sm:$0xff] }
 0x4cb   : > { %1081 = vst.msk [vmem:[#allocation3 + $0x30] sm:$0xff] %vm456_vm2, %v1079_v14  ;;  %1617 = vrcp.f32 %v1220_v16 }
 0x4cc   : > { %v1078_v18 = vpop.xlane.xlu1 %1077 }
 0x4cd   : > { %v1614_v20 = vpop.eup %1613  ;;  %v1080_v15 = vadd.f32 %v1078_v18, %v1072_v11 }
 0x4ce   : > { %1212 = vperm.xlu1 %1572, %v1614_v20   ;;  %v1221_v23 = vld [vmem:[#allocation3 + $0x28] sm:$0xff] }
 0x4cf   : > { %v1616_v31 = vpop.eup %1615  ;;  %1082 = vst.msk [vmem:[#allocation3 + $0x38] sm:$0xff] %vm456_vm2, %v1080_v15  ;;  %1619 = vrcp.f32 %v1221_v23 }
 0x4d0   : > { %1217 = vperm.xlu0 %1573, %v1616_v31   ;;  %v653_v24 = vpop.permute.xlu0 %652  ;;  %v658_v25 = vpop.permute.xlu1 %657 }
 0x4d2   : > { %v1234_v33 = vld [vmem:[#allocation3 + $0x30] sm:$0xff] }
 0x4d3   : > { %1621 = vrcp.f32 %v1234_v33 }
 0x4d4   : > { %v814_v27 = vpop.permute.xlu0 %813  ;;  %v819_v35 = vpop.permute.xlu1 %818 }
 0x4d5   : > { %v1618_v37 = vpop.eup %1617  ;;  %v1143_v63 = vsel %vm499_vm1, %v653_v24, %v814_v27  ;;  %v1144_v34 = vsel %vm499_vm1, %v658_v25, %v819_v35 }
 0x4d6   : > { %1226 = vperm.xlu1 %1572, %v1618_v37   ;;  %v1235_v56 = vld [vmem:[#allocation3 + $0x38] sm:$0xff] }
 0x4d7   : > { %1623 = vrcp.f32 %v1235_v56 }
 0x4d8   : > { %v975_v36 = vpop.permute.xlu0 %974  ;;  %v980_v38 = vpop.permute.xlu1 %979 }
 0x4d9   : > { %v1620_v42 = vpop.eup %1619  ;;  %v1146_v0 = vsel %vm1145_vm6, %v1143_v63, %v975_v36  ;;  %v1147_v44 = vsel %vm1145_vm6, %v1144_v34, %v980_v38 }
 0x4da   : > { %1231 = vperm.xlu0 %1573, %v1620_v42  }
 0x4dc   : > { %v1141_v39 = vpop.permute.xlu0 %1140  ;;  %v1136_v40 = vpop.permute.xlu1 %1135 }
 0x4dd   : > { %v1622_v22 = vpop.eup %1621  ;;  %v1150_v3 = vsel %vm1148_vm7, %v1147_v44, %v1141_v39  ;;  %v1149_v4 = vsel %vm1148_vm7, %v1146_v0, %v1136_v40 }
 0x4de   : > { %v1184_v12 = vmul.f32 0.0, %v1150_v3  ;;  %v1183_v7 = vmul.f32 0.0, %v1149_v4 }
 0x4e0   : > { %v1204_v41 = vpop.permute.xlu0 %1203 }
 0x4e1   : > { %v1624_v17 = vpop.eup %1623 }
 0x4fd   : > { %v1199_v45 = vpop.permute.xlu1 %1198 }
 0x509   : > { %v802_v47 = vpop.f32.mrb[4].mxu0 }
 0x50a   : > { %1153 = vrot.lane.b32.xlu1 %v802_v47, %s1671_s10  ;;  %v1498_v51 = vpop.f32.mrb[5].mxu0 }
 0x50b   : > { %v805_v29 = vpop.f32.mrb[6].mxu0 }
 0x50c   : > { %1155 = vrot.lane.b32.xlu0 %v805_v29, %s1671_s10  ;;  %v1499_v32 = vpop.f32.mrb[7].mxu0 }
 0x511   : > { %v963_v52 = vpop.f32.mrb[8].mxu0 }
 0x512   : > { %1161 = vrot.lane.b32.xlu1 %v963_v52, %s1670_s9  ;;  %v1510_v54 = vpop.f32.mrb[9].mxu0 }
 0x513   : > { %v966_v6 = vpop.f32.mrb[10].mxu0 }
 0x514   : > { %1163 = vrot.lane.b32.xlu0 %v966_v6, %s1670_s9  ;;  %v1511_v26 = vpop.f32.mrb[11].mxu0 }
 0x519   : > { %v1124_v28 = vpop.f32.mrb[12].mxu0 }
 0x51a   : > { %1169 = vrot.lane.b32.xlu1 %v1124_v28, %s1669_s7  ;;  %v1522_v30 = vpop.f32.mrb[13].mxu0 }
 0x51b   : > { %v1127_v21 = vpop.f32.mrb[14].mxu0 }
 0x51c   : > { %1171 = vrot.lane.b32.xlu0 %v1127_v21, %s1669_s7  ;;  %v1523_v19 = vpop.f32.mrb[15].mxu0 }
 0x51e   : > { %1240 = vperm.xlu1 %1572, %v1622_v22  }
 0x520   : > { %1245 = vperm.xlu0 %1573, %v1624_v17  }
 0x54d   : > { %v1213_v46 = vpop.permute.xlu1 %1212 }
 0x54e   : > { %v1250_v9 = vsel %vm499_vm1, %v1199_v45, %v1213_v46 }
 0x54f   : > { %v1218_v48 = vpop.permute.xlu0 %1217 }
 0x555   : > { %v1227_v49 = vpop.permute.xlu1 %1226 }
 0x556   : > { %v1252_v13 = vsel %vm1145_vm6, %v1250_v9, %v1227_v49 }
 0x559   : > { %v1232_v50 = vpop.permute.xlu0 %1231 }
 0x57c   : > { %v1154_v57 = vpop.permute.xlu1 %1153 }
 0x57d   : > { %v1175_v58 = vsel %vm499_vm1, %v1883_v53, %v1154_v57  ;;  %v1251_v53 = vsel %vm499_vm1, %v1204_v41, %v1218_v48 }
 0x57e   : > { %v1156_v59 = vpop.permute.xlu0 %1155 }
 0x57f   : > { %v1176_v5 = vsel %vm499_vm1, %v1885_v55, %v1156_v59  ;;  %v1253_v55 = vsel %vm1145_vm6, %v1251_v53, %v1232_v50 }
 0x584   : > { %v1162_v60 = vpop.permute.xlu1 %1161 }
 0x585   : > { %v1177_v62 = vsel %vm1145_vm6, %v1175_v58, %v1162_v60 }
 0x586   : > { %v1164_v61 = vpop.permute.xlu0 %1163 }
 0x587   : > { %v1178_v8 = vsel %vm1145_vm6, %v1176_v5, %v1164_v61 }
 0x58c   : > { %v1170_v1 = vpop.permute.xlu1 %1169 }
 0x58d   : > { %v1179_v2 = vsel %vm1148_vm7, %v1177_v62, %v1170_v1 }
 0x58e   : > { %v1172_v43 = vpop.permute.xlu0 %1171  ;;  %v1185_v11 = vadd.f32 %v1183_v7, %v1179_v2 }
 0x58f   : > { %v1180_v10 = vsel %vm1148_vm7, %v1178_v8, %v1172_v43 }
 0x590   : > { %v1186_v18 = vadd.f32 %v1184_v12, %v1180_v10 }
 0x59d   : > { %v1241_v14 = vpop.permute.xlu1 %1240 }
 0x59e   : > { %v1254_v16 = vsel %vm1148_vm7, %v1252_v13, %v1241_v14 }
 0x59f   : > { %v1246_v20 = vpop.permute.xlu0 %1245  ;;  %v1256_v23 = vmul.f32 %v1254_v16, %v1185_v11 }
 0x5a0   : > { %v1255_v15 = vsel %vm1148_vm7, %v1253_v55, %v1246_v20 }
 0x5a1   : > { %v1257_v31 = vmul.f32 %v1255_v15, %v1186_v18 }
 0x5a3   : > { %v1458_v37 = vpack.c.bf16 %v1257_v31, %v1256_v23 }
 0x5a5   : > { %1459 = vst [vmem:[%s449_s14] sm:$0xff] %v1458_v37  }
 0x5a6 PF: > { %s14_s19 = sadd.s32 1, %s1663_s19   ;;  %s2097_s15 = smov %s1651_s16 }
 0x5a7   : > { %p11_p10 = scmp.ge.s32.totalorder %s14_s19, 4   ;;  %s2098_s16 = smov %s1736_s24 }
 0x5a8   : > { %s2099_s17 = smov %s1659_s18  ;;  %s2100_s18 = smov %s2102_s20 }
 0x5a9   :  { %13 = sbr.rel (!%p11_p10) target bundleno = 3 (0x3), region = 227 }

// kernel: encoder_decoder_forward.29
= control target key start
LH: loop header
LB: loop body
LE: loop exit
PB: predicated region body
PF: predicated region fallthrough
CT: control target
= control target key end

     0   :  { %v717_v35 = vmov 0   ;;  %s920_s0 = inlined_call_operand.vmem [shape: bf16[32,128], index: 0, kind: input, shape index: {}]   ;;  %s921_s3 = inlined_call_operand.vmem [shape: bf16[128,256], index: 3, kind: input, shape index: {}]   ;;  %s922_s5 = inlined_call_operand.vmem [shape: bf16[256,128], index: 5, kind: input, shape index: {}]   ;;  %s923_s1 = inlined_call_operand.vmem [shape: f32[1,128], index: 1, kind: input, shape index: {}]   ;;  %s924_s2 = inlined_call_operand.vmem [shape: f32[1,128], index: 2, kind: input, shape index: {}]   ;;  %s925_s4 = inlined_call_operand.vmem [shape: f32[1,256], index: 4, kind: input, shape index: {}]   ;;  %s926_s6 = inlined_call_operand.vmem [shape: f32[1,128], index: 6, kind: input, shape index: {}]   ;;  %s927_s7 = inlined_call_operand.vmem [shape: bf16[32,128], index: 7, kind: output, shape index: {}]  }
   0x1   :  { %v604_v0 = vld [vmem:[%s920_s0] sm:$0xff]   ;;  %v629_v1 = vld [vmem:[%s920_s0 + $0x8] sm:$0xff]   ;;  %v664_v24 = vld [vmem:[%s921_s3 + $0x14] ss:$8 sps:$4 sm:$0xff]   ;;  %284 = vmatprep.mubr.bf16.mxu0 %v717_v35 }
   0x2   :  { %v764_v2 = vunpack.c.l.bf16 %v604_v0  ;;  %v766_v3 = vunpack.c.l.bf16 %v629_v1  ;;  %v770_v4 = vunpack.c.h.bf16 %v604_v0  ;;  %v772_v5 = vunpack.c.h.bf16 %v629_v1  ;;  %v661_v22 = vld [vmem:[%s921_s3 + $0x4] ss:$8 sps:$4 sm:$0xff]   ;;  %v663_v23 = vld [vmem:[%s921_s3] ss:$8 sps:$4 sm:$0xff]   ;;  %v666_v25 = vld [vmem:[%s921_s3 + $0x10] ss:$8 sps:$4 sm:$0xff]  }
   0x3   :  { %252 = vmatprep.subr.bf16.mxu0 %v661_v22  ;;  %v667_v26 = vld [vmem:[%s921_s3 + $0x24] ss:$8 sps:$4 sm:$0xff]   ;;  %v669_v27 = vld [vmem:[%s921_s3 + $0x20] ss:$8 sps:$4 sm:$0xff]   ;;  %v670_v28 = vld [vmem:[%s921_s3 + $0x34] ss:$8 sps:$4 sm:$0xff]  }
   0x4   :  { %41 = vadd.xlane.f32.xlu0 %v764_v2  ;;  %45 = vadd.xlane.f32.xlu1 %v766_v3  ;;  %v672_v29 = vld [vmem:[%s921_s3 + $0x30] ss:$8 sps:$4 sm:$0xff]   ;;  %v673_v30 = vld [vmem:[%s921_s3 + $0x44] ss:$8 sps:$4 sm:$0xff]   ;;  %v675_v31 = vld [vmem:[%s921_s3 + $0x40] ss:$8 sps:$4 sm:$0xff]  }
   0x5   :  { %253 = vmatpush1.bf16.msra.mxu0 %v663_v23  ;;  %v676_v32 = vld [vmem:[%s921_s3 + $0x54] ss:$8 sps:$4 sm:$0xff]   ;;  %v678_v33 = vld [vmem:[%s921_s3 + $0x50] ss:$8 sps:$4 sm:$0xff]   ;;  %v679_v34 = vld [vmem:[%s921_s3 + $0x64] ss:$8 sps:$4 sm:$0xff]  }
   0x6   :  { %254 = vmatprep.subr.bf16.mxu0 %v664_v24  ;;  %v681_v36 = vld [vmem:[%s921_s3 + $0x60] ss:$8 sps:$4 sm:$0xff]   ;;  %v682_v37 = vld [vmem:[%s921_s3 + $0x74] ss:$8 sps:$4 sm:$0xff]   ;;  %v684_v38 = vld [vmem:[%s921_s3 + $0x70] ss:$8 sps:$4 sm:$0xff]  }
   0x7   :  { %v685_v39 = vld [vmem:[%s922_s5 + $0x40] sm:$0xff]   ;;  %v687_v41 = vld [vmem:[%s922_s5 + $0x48] sm:$0xff]   ;;  %v689_v43 = vld [vmem:[%s922_s5 + $0x50] sm:$0xff]  }
   0x8   :  { %43 = vadd.xlane.f32.xlu0 %v770_v4  ;;  %47 = vadd.xlane.f32.xlu1 %v772_v5  ;;  %v686_v40 = vld [vmem:[%s922_s5] sm:$0xff]   ;;  %v688_v42 = vld [vmem:[%s922_s5 + $0x8] sm:$0xff]   ;;  %v690_v44 = vld [vmem:[%s922_s5 + $0x10] sm:$0xff]  }
   0x9   :  { %255 = vmatpush1.bf16.msra.mxu0 %v666_v25  ;;  %632 = vmatprep.subr.bf16.mxu1 %v685_v39  ;;  %v691_v45 = vld [vmem:[%s922_s5 + $0x58] sm:$0xff]   ;;  %v693_v47 = vld [vmem:[%s922_s5 + $0x60] sm:$0xff]   ;;  %v695_v49 = vld [vmem:[%s922_s5 + $0x68] sm:$0xff]  }
   0xa   :  { %256 = vmatprep.subr.bf16.mxu0 %v667_v26  ;;  %633 = vmatpush3.bf16.msra.mxu1 %v686_v40  ;;  %v692_v46 = vld [vmem:[%s922_s5 + $0x18] sm:$0xff]   ;;  %v694_v48 = vld [vmem:[%s922_s5 + $0x20] sm:$0xff]  }
   0xb   :  { %634 = vmatprep.subr.bf16.mxu1 %v687_v41 }
   0xd   :  { %257 = vmatpush1.bf16.msra.mxu0 %v669_v27 }
   0xe   :  { %258 = vmatprep.subr.bf16.mxu0 %v670_v28  ;;  %635 = vmatpush3.bf16.msra.mxu1 %v688_v42  ;;  %v560_v28 = vld [vmem:[%s923_s1] ss:$0 sm:$0xff] }
   0xf   :  { %636 = vmatprep.subr.bf16.mxu1 %v689_v43 }
  0x11   :  { %259 = vmatpush1.bf16.msra.mxu0 %v672_v29 }
  0x12   :  { %260 = vmatprep.subr.bf16.mxu0 %v673_v30  ;;  %637 = vmatpush3.bf16.msra.mxu1 %v690_v44 }
  0x13   :  { %638 = vmatprep.subr.bf16.mxu1 %v691_v45  ;;  %v696_v45 = vld [vmem:[%s922_s5 + $0x28] sm:$0xff]  }
  0x15   :  { %261 = vmatpush1.bf16.msra.mxu0 %v675_v31 }
  0x16   :  { %262 = vmatprep.subr.bf16.mxu0 %v676_v32  ;;  %639 = vmatpush3.bf16.msra.mxu1 %v692_v46  ;;  %v700_v46 = vld [vmem:[%s922_s5 + $0x38] sm:$0xff]  }
  0x17   :  { %640 = vmatprep.subr.bf16.mxu1 %v693_v47  ;;  %v162_v47 = vlaneseq }
  0x19   :  { %263 = vmatpush1.bf16.msra.mxu0 %v678_v33  ;;  %v561_v33 = vld [vmem:[%s924_s2] ss:$0 sm:$0xff] }
  0x1a   :  { %264 = vmatprep.subr.bf16.mxu0 %v679_v34  ;;  %641 = vmatpush3.bf16.msra.mxu1 %v694_v48  ;;  %v163_v48 = vshrl.u32 %v162_v47, 7 }
  0x1b   :  { %642 = vmatprep.subr.bf16.mxu1 %v695_v49 }
  0x1c   :  { %v164_v49 = vsub.s32 0, %v163_v48 }
  0x1d   :  { %265 = vmatpush1.bf16.msra.mxu0 %v681_v36 }
  0x1e   :  { %266 = vmatprep.subr.bf16.mxu0 %v682_v37  ;;  %643 = vmatpush3.bf16.msra.mxu1 %v696_v45 }
  0x21   :  { %267 = vmatpush1.bf16.msra.mxu0 %v684_v38 }
  0x91   :  { %v42_v6 = vpop.xlane.xlu0 %41  ;;  %v46_v7 = vpop.xlane.xlu1 %45 }
  0x92   :  { %v50_v8 = vmul.f32 0.0078125, %v42_v6  ;;  %v52_v9 = vmul.f32 0.0078125, %v46_v7 }
  0x94   :  { %v777_v10 = vsub.f32 %v764_v2, %v50_v8  ;;  %v780_v11 = vsub.f32 %v766_v3, %v52_v9 }
  0x95   :  { %v44_v12 = vpop.xlane.xlu0 %43  ;;  %v48_v13 = vpop.xlane.xlu1 %47 }
  0x96   :  { %v51_v14 = vmul.f32 0.0078125, %v44_v12  ;;  %v58_v15 = vmul.f32 %v777_v10, %v777_v10  ;;  %v53_v16 = vmul.f32 0.0078125, %v48_v13  ;;  %v60_v19 = vmul.f32 %v780_v11, %v780_v11 }
  0x98   :  { %v785_v17 = vsub.f32 %v770_v4, %v51_v14  ;;  %62 = vadd.xlane.f32.xlu0 %v58_v15  ;;  %v788_v18 = vsub.f32 %v772_v5, %v53_v16 }
  0x9a   :  { %v59_v20 = vmul.f32 %v785_v17, %v785_v17  ;;  %v61_v21 = vmul.f32 %v788_v18, %v788_v18 }
  0x9c   :  { %66 = vadd.xlane.f32.xlu0 %v60_v19  ;;  %64 = vadd.xlane.f32.xlu1 %v59_v20 }
  0xa0   :  { %68 = vadd.xlane.f32.xlu1 %v61_v21 }
 0x125   :  { %v63_v50 = vpop.xlane.xlu0 %62 }
 0x126   :  { %v70_v51 = vmul.f32 0.007874016, %v63_v50  ;;  %v160_v50 = vld [vmem:[%s925_s4] sm:$0x3] }
 0x128   :  { %701 = vrsqrt.f32 %v70_v51  ;;  %vm76_vm0 = vcmp.eq.f32.partialorder %v70_v51, inf  ;;  %v79_v60 = vand.u32 2147483648, %v70_v51  ;;  %vm78_vm1 = vcmp.eq.f32.partialorder %v70_v51, 0.0 }
 0x129   :  { %v65_v52 = vpop.xlane.xlu1 %64  ;;  %v67_v53 = vpop.xlane.xlu0 %66 }
 0x12a   :  { %v71_v54 = vmul.f32 0.007874016, %v65_v52  ;;  %v72_v55 = vmul.f32 0.007874016, %v67_v53  ;;  %v165_v52 = vrot.slane %v160_v50, %v164_v49 }
 0x12c   :  { %703 = vrsqrt.f32 %v71_v54  ;;  %vm83_vm2 = vcmp.eq.f32.partialorder %v71_v54, inf  ;;  %vm85_vm3 = vcmp.eq.f32.partialorder %v71_v54, 0.0  ;;  %v86_v7 = vand.u32 2147483648, %v71_v54 }
 0x12d   :  { %705 = vrsqrt.f32 %v72_v55  ;;  %v69_v56 = vpop.xlane.xlu1 %68  ;;  %vm90_vm4 = vcmp.eq.f32.partialorder %v72_v55, inf  ;;  %v93_v12 = vand.u32 2147483648, %v72_v55  ;;  %vm92_vm5 = vcmp.eq.f32.partialorder %v72_v55, 0.0 }
 0x12e   :  { %v73_v57 = vmul.f32 0.007874016, %v69_v56 }
 0x130   :  { %707 = vrsqrt.f32 %v73_v57  ;;  %vm97_vm6 = vcmp.eq.f32.partialorder %v73_v57, inf  ;;  %v100_v22 = vand.u32 2147483648, %v73_v57  ;;  %vm99_vm7 = vcmp.eq.f32.partialorder %v73_v57, 0.0 }
 0x132   :  { %v702_v58 = vpop.eup %701 }
 0x133   :  { %v75_v59 = vmul.f32 %v702_v58, %v70_v51 }
 0x135   :  { %v77_v61 = vsel %vm76_vm0, %v70_v51, %v75_v59  ;;  %v168_v51 = vsub.s32 1, %v163_v48 }
 0x136   :  { %v704_v62 = vpop.eup %703  ;;  %v80_v63 = vsel %vm78_vm1, %v79_v60, %v77_v61 }
 0x137   :  { %v706_v0 = vpop.eup %705  ;;  %v102_v1 = vadd.f32 1e-06, %v80_v63  ;;  %v82_v6 = vmul.f32 %v704_v62, %v71_v54  ;;  %v169_v53 = vrot.slane %v160_v50, %v168_v51 }
 0x138   :  { %v89_v8 = vmul.f32 %v706_v0, %v72_v55 }
 0x139   :  { %v84_v9 = vsel %vm83_vm2, %v71_v54, %v82_v6  ;;  %709 = vrcp.f32 %v102_v1 }
 0x13a   :  { %v708_v13 = vpop.eup %707  ;;  %v87_v14 = vsel %vm85_vm3, %v86_v7, %v84_v9  ;;  %v91_v15 = vsel %vm90_vm4, %v72_v55, %v89_v8 }
 0x13b   :  { %v103_v16 = vadd.f32 1e-06, %v87_v14  ;;  %v94_v19 = vsel %vm92_vm5, %v93_v12, %v91_v15  ;;  %v96_v20 = vmul.f32 %v708_v13, %v73_v57 }
 0x13c   :  { %v104_v21 = vadd.f32 1e-06, %v94_v19 }
 0x13d   :  { %v98_v23 = vsel %vm97_vm6, %v73_v57, %v96_v20  ;;  %711 = vrcp.f32 %v103_v16 }
 0x13e   :  { %v101_v24 = vsel %vm99_vm7, %v100_v22, %v98_v23  ;;  %713 = vrcp.f32 %v104_v21 }
 0x13f   :  { %v105_v25 = vadd.f32 1e-06, %v101_v24 }
 0x141   :  { %715 = vrcp.f32 %v105_v25 }
 0x143   :  { %v710_v26 = vpop.eup %709 }
 0x144   :  { %v110_v27 = vmul.f32 %v710_v26, %v777_v10 }
 0x146   :  { %v120_v31 = vmul.f32 %v560_v28, %v110_v27 }
 0x147   :  { %v712_v29 = vpop.eup %711 }
 0x148   :  { %v111_v30 = vmul.f32 %v712_v29, %v785_v17  ;;  %v714_v32 = vpop.eup %713  ;;  %v130_v37 = vadd.f32 %v561_v33, %v120_v31 }
 0x149   :  { %v112_v39 = vmul.f32 %v714_v32, %v780_v11  ;;  %v697_v11 = vld [vmem:[%s922_s5 + $0x70] sm:$0xff]  }
 0x14a   :  { %v121_v34 = vmul.f32 %v560_v28, %v111_v30  ;;  %644 = vmatprep.subr.bf16.mxu1 %v697_v11 }
 0x14b   :  { %v716_v36 = vpop.eup %715  ;;  %v122_v42 = vmul.f32 %v560_v28, %v112_v39 }
 0x14c   :  { %v131_v38 = vadd.f32 %v561_v33, %v121_v34  ;;  %v113_v10 = vmul.f32 %v716_v36, %v788_v18  ;;  %v698_v18 = vld [vmem:[%s922_s5 + $0x30] sm:$0xff]  }
 0x14d   :  { %v132_v43 = vadd.f32 %v561_v33, %v122_v42  ;;  %645 = vmatpush3.bf16.msra.mxu1 %v698_v18 }
 0x14e   :  { %v134_v40 = vpack.c.bf16 %v131_v38, %v130_v37  ;;  %v123_v41 = vmul.f32 %v560_v28, %v113_v10  ;;  %v594_v28 = vld [vmem:[%s926_s6] ss:$0 sm:$0xff] }
 0x150   :  { %285 = vmatmul.mubr.bf16.vlgmr.msra.gmra.mrb[0].mxu0 %v134_v40  ;;  %v133_v17 = vadd.f32 %v561_v33, %v123_v41 }
 0x151   :  { %294 = vmatprep.mubr.bf16.mxu0 %v717_v35  ;;  %v699_v35 = vld [vmem:[%s922_s5 + $0x78] sm:$0xff]  }
 0x152   :  { %v135_v44 = vpack.c.bf16 %v133_v17, %v132_v43  ;;  %646 = vmatprep.subr.bf16.mxu1 %v699_v35 }
 0x153   :  { %647 = vmatpush3.bf16.msra.mxu1 %v700_v46 }
 0x158   :  { %295 = vmatmul.mubr.bf16.gmra.mrb[4].mxu0 %v135_v44 }
 0x223   :  { %v286_v54 = vpop.f32.mrb[0].mxu0 }
 0x224   :  { %v287_v55 = vadd.f32 %v286_v54, %v165_v52  ;;  %v288_v56 = vpop.f32.mrb[1].mxu0 }
 0x225   :  { %v289_v57 = vadd.f32 %v288_v56, %v169_v53  ;;  %v290_v58 = vpop.f32.mrb[2].mxu0 }
 0x226   :  { %v291_v59 = vadd.f32 %v290_v58, %v165_v52  ;;  %v292_v60 = vpop.f32.mrb[3].mxu0  ;;  %v305_v62 = vmax.f32 %v287_v55, 0.0 }
 0x227   :  { %v293_v61 = vadd.f32 %v292_v60, %v169_v53  ;;  %v306_v0 = vmax.f32 %v289_v57, 0.0 }
 0x228   :  { %v307_v63 = vmax.f32 %v291_v59, 0.0 }
 0x229   :  { %v308_v1 = vmax.f32 %v293_v61, 0.0 }
 0x22a   :  { %v313_v6 = vpack.c.bf16 %v307_v63, %v305_v62 }
 0x22b   :  { %v296_v7 = vpop.f32.mrb[4].mxu0  ;;  %v314_v8 = vpack.c.bf16 %v308_v1, %v306_v0 }
 0x22c   :  { %v297_v9 = vadd.f32 %v296_v7, %v165_v52  ;;  %v298_v12 = vpop.f32.mrb[5].mxu0 }
 0x22d   :  { %v299_v13 = vadd.f32 %v298_v12, %v169_v53  ;;  %v300_v14 = vpop.f32.mrb[6].mxu0  ;;  %481 = vmatprep.mubr.bf16.mxu1 %v314_v8 }
 0x22e   :  { %v301_v15 = vadd.f32 %v300_v14, %v165_v52  ;;  %v302_v16 = vpop.f32.mrb[7].mxu0  ;;  %482 = vmatmul.mubr.bf16.vlgmr.msra.gmra.mrb[0].mxu1 %v313_v6  ;;  %v309_v20 = vmax.f32 %v297_v9, 0.0 }
 0x22f   :  { %v303_v19 = vadd.f32 %v302_v16, %v169_v53  ;;  %v310_v22 = vmax.f32 %v299_v13, 0.0 }
 0x230   :  { %v311_v21 = vmax.f32 %v301_v15, 0.0 }
 0x231   :  { %v312_v23 = vmax.f32 %v303_v19, 0.0 }
 0x232   :  { %v315_v24 = vpack.c.bf16 %v311_v21, %v309_v20 }
 0x233   :  { %v316_v25 = vpack.c.bf16 %v312_v23, %v310_v22 }
 0x235   :  { %489 = vmatprep.mubr.bf16.mxu1 %v316_v25 }
 0x236   :  { %490 = vmatmul.mubr.bf16.gmra.mrb[4].mxu1 %v315_v24 }
 0x301   :  { %v648_v26 = vpop.f32.mrb[0].mxu1 }
 0x302   :  { %v649_v27 = vpop.f32.mrb[1].mxu1 }
 0x303   :  { %v650_v29 = vadd.f32 %v649_v27, %v648_v26  ;;  %v651_v30 = vpop.f32.mrb[2].mxu1 }
 0x304   :  { %v652_v31 = vpop.f32.mrb[3].mxu1 }
 0x305   :  { %v520_v32 = vadd.f32 %v650_v29, %v594_v28  ;;  %v653_v33 = vadd.f32 %v652_v31, %v651_v30 }
 0x307   :  { %v521_v34 = vadd.f32 %v653_v33, %v594_v28  ;;  %v532_v36 = vadd.f32 %v764_v2, %v520_v32 }
 0x309   :  { %v533_v37 = vadd.f32 %v770_v4, %v521_v34  ;;  %v654_v38 = vpop.f32.mrb[4].mxu1 }
 0x30a   :  { %v655_v39 = vpop.f32.mrb[5].mxu1 }
 0x30b   :  { %v622_v10 = vpack.c.bf16 %v533_v37, %v532_v36  ;;  %v656_v40 = vadd.f32 %v655_v39, %v654_v38  ;;  %v657_v41 = vpop.f32.mrb[6].mxu1 }
 0x30c   :  { %v658_v42 = vpop.f32.mrb[7].mxu1 }
 0x30d   :  { %623 = vst [vmem:[%s927_s7] sm:$0xff] %v622_v10   ;;  %v522_v17 = vadd.f32 %v656_v40, %v594_v28  ;;  %v659_v43 = vadd.f32 %v658_v42, %v657_v41 }
 0x30f   :  { %v523_v44 = vadd.f32 %v659_v43, %v594_v28  ;;  %v534_v45 = vadd.f32 %v766_v3, %v522_v17 }
 0x311   :  { %v535_v11 = vadd.f32 %v772_v5, %v523_v44 }
 0x313   :  { %v627_v2 = vpack.c.bf16 %v535_v11, %v534_v45 }
 0x315   :  { %631 = vst [vmem:[%s927_s7 + $0x8] sm:$0xff] %v627_v2  }

// kernel: encoder_decoder_forward.34
= control target key start
LH: loop header
LB: loop body
LE: loop exit
PB: predicated region body
PF: predicated region fallthrough
CT: control target
= control target key end

     0   :  { %s245_s0 = inlined_call_operand.vmem [shape: bf16[32,128], index: 0, kind: input, shape index: {}]   ;;  %s246_s1 = inlined_call_operand.vmem [shape: f32[1,128], index: 1, kind: input, shape index: {}]   ;;  %s247_s2 = inlined_call_operand.vmem [shape: f32[1,128], index: 2, kind: input, shape index: {}]   ;;  %s248_s3 = inlined_call_operand.vmem [shape: bf16[32,128], index: 3, kind: output, shape index: {}]  }
   0x1   :  { %v152_v0 = vld [vmem:[%s245_s0] sm:$0xff]   ;;  %v169_v1 = vld [vmem:[%s245_s0 + $0x8] sm:$0xff]  }
   0x2   :  { %v153_v2 = vunpack.c.l.bf16 %v152_v0  ;;  %v157_v3 = vunpack.c.l.bf16 %v169_v1  ;;  %v154_v4 = vunpack.c.h.bf16 %v152_v0  ;;  %v158_v5 = vunpack.c.h.bf16 %v169_v1  ;;  %v141_v56 = vld [vmem:[%s246_s1] ss:$0 sm:$0xff] }
   0x3   :  { %v142_v61 = vld [vmem:[%s247_s2] ss:$0 sm:$0xff] }
   0x4   :  { %24 = vadd.xlane.f32.xlu0 %v153_v2  ;;  %28 = vadd.xlane.f32.xlu1 %v157_v3 }
   0x8   :  { %26 = vadd.xlane.f32.xlu0 %v154_v4  ;;  %30 = vadd.xlane.f32.xlu1 %v158_v5 }
  0x91   :  { %v25_v6 = vpop.xlane.xlu0 %24  ;;  %v29_v7 = vpop.xlane.xlu1 %28 }
  0x92   :  { %v33_v8 = vmul.f32 0.0078125, %v25_v6  ;;  %v35_v9 = vmul.f32 0.0078125, %v29_v7 }
  0x94   :  { %v213_v10 = vsub.f32 %v153_v2, %v33_v8  ;;  %v215_v11 = vsub.f32 %v157_v3, %v35_v9 }
  0x95   :  { %v27_v12 = vpop.xlane.xlu0 %26  ;;  %v31_v13 = vpop.xlane.xlu1 %30 }
  0x96   :  { %v34_v14 = vmul.f32 0.0078125, %v27_v12  ;;  %v41_v15 = vmul.f32 %v213_v10, %v213_v10  ;;  %v36_v16 = vmul.f32 0.0078125, %v31_v13  ;;  %v43_v19 = vmul.f32 %v215_v11, %v215_v11 }
  0x98   :  { %v219_v17 = vsub.f32 %v154_v4, %v34_v14  ;;  %45 = vadd.xlane.f32.xlu0 %v41_v15  ;;  %v221_v18 = vsub.f32 %v158_v5, %v36_v16 }
  0x9a   :  { %v42_v20 = vmul.f32 %v219_v17, %v219_v17  ;;  %v44_v21 = vmul.f32 %v221_v18, %v221_v18 }
  0x9c   :  { %49 = vadd.xlane.f32.xlu0 %v43_v19  ;;  %47 = vadd.xlane.f32.xlu1 %v42_v20 }
  0xa0   :  { %51 = vadd.xlane.f32.xlu1 %v44_v21 }
 0x125   :  { %v46_v22 = vpop.xlane.xlu0 %45 }
 0x126   :  { %v53_v23 = vmul.f32 0.007874016, %v46_v22 }
 0x128   :  { %171 = vrsqrt.f32 %v53_v23  ;;  %vm59_vm0 = vcmp.eq.f32.partialorder %v53_v23, inf  ;;  %v62_v32 = vand.u32 2147483648, %v53_v23  ;;  %vm61_vm1 = vcmp.eq.f32.partialorder %v53_v23, 0.0 }
 0x129   :  { %v48_v24 = vpop.xlane.xlu1 %47  ;;  %v50_v25 = vpop.xlane.xlu0 %49 }
 0x12a   :  { %v54_v26 = vmul.f32 0.007874016, %v48_v24  ;;  %v55_v27 = vmul.f32 0.007874016, %v50_v25 }
 0x12c   :  { %173 = vrsqrt.f32 %v54_v26  ;;  %vm66_vm2 = vcmp.eq.f32.partialorder %v54_v26, inf  ;;  %vm68_vm3 = vcmp.eq.f32.partialorder %v54_v26, 0.0  ;;  %v69_v39 = vand.u32 2147483648, %v54_v26 }
 0x12d   :  { %175 = vrsqrt.f32 %v55_v27  ;;  %v52_v28 = vpop.xlane.xlu1 %51  ;;  %vm73_vm4 = vcmp.eq.f32.partialorder %v55_v27, inf  ;;  %v76_v42 = vand.u32 2147483648, %v55_v27  ;;  %vm75_vm5 = vcmp.eq.f32.partialorder %v55_v27, 0.0 }
 0x12e   :  { %v56_v29 = vmul.f32 0.007874016, %v52_v28 }
 0x130   :  { %177 = vrsqrt.f32 %v56_v29  ;;  %vm80_vm6 = vcmp.eq.f32.partialorder %v56_v29, inf  ;;  %v83_v50 = vand.u32 2147483648, %v56_v29  ;;  %vm82_vm7 = vcmp.eq.f32.partialorder %v56_v29, 0.0 }
 0x132   :  { %v172_v30 = vpop.eup %171 }
 0x133   :  { %v58_v31 = vmul.f32 %v172_v30, %v53_v23 }
 0x135   :  { %v60_v33 = vsel %vm59_vm0, %v53_v23, %v58_v31 }
 0x136   :  { %v174_v34 = vpop.eup %173  ;;  %v63_v35 = vsel %vm61_vm1, %v62_v32, %v60_v33 }
 0x137   :  { %v176_v36 = vpop.eup %175  ;;  %v85_v37 = vadd.f32 1e-06, %v63_v35  ;;  %v65_v38 = vmul.f32 %v174_v34, %v54_v26 }
 0x138   :  { %v72_v40 = vmul.f32 %v176_v36, %v55_v27 }
 0x139   :  { %179 = vrcp.f32 %v85_v37  ;;  %v67_v41 = vsel %vm66_vm2, %v54_v26, %v65_v38 }
 0x13a   :  { %v178_v43 = vpop.eup %177  ;;  %v70_v44 = vsel %vm68_vm3, %v69_v39, %v67_v41  ;;  %v74_v45 = vsel %vm73_vm4, %v55_v27, %v72_v40 }
 0x13b   :  { %v86_v46 = vadd.f32 1e-06, %v70_v44  ;;  %v77_v47 = vsel %vm75_vm5, %v76_v42, %v74_v45  ;;  %v79_v48 = vmul.f32 %v178_v43, %v56_v29 }
 0x13c   :  { %v87_v49 = vadd.f32 1e-06, %v77_v47 }
 0x13d   :  { %181 = vrcp.f32 %v86_v46  ;;  %v81_v51 = vsel %vm80_vm6, %v56_v29, %v79_v48 }
 0x13e   :  { %183 = vrcp.f32 %v87_v49  ;;  %v84_v52 = vsel %vm82_vm7, %v83_v50, %v81_v51 }
 0x13f   :  { %v88_v53 = vadd.f32 1e-06, %v84_v52 }
 0x141   :  { %185 = vrcp.f32 %v88_v53 }
 0x143   :  { %v180_v54 = vpop.eup %179 }
 0x144   :  { %v90_v55 = vmul.f32 %v180_v54, %v213_v10 }
 0x146   :  { %v103_v59 = vmul.f32 %v141_v56, %v90_v55 }
 0x147   :  { %v182_v57 = vpop.eup %181 }
 0x148   :  { %v184_v58 = vpop.eup %183  ;;  %v92_v60 = vmul.f32 %v182_v57, %v219_v17  ;;  %v113_v1 = vadd.f32 %v142_v61, %v103_v59 }
 0x149   :  { %v94_v62 = vmul.f32 %v184_v58, %v215_v11 }
 0x14a   :  { %v104_v63 = vmul.f32 %v141_v56, %v92_v60 }
 0x14b   :  { %v186_v0 = vpop.eup %185  ;;  %v105_v3 = vmul.f32 %v141_v56, %v94_v62 }
 0x14c   :  { %v114_v2 = vadd.f32 %v142_v61, %v104_v63  ;;  %v96_v4 = vmul.f32 %v186_v0, %v221_v18 }
 0x14d   :  { %v115_v7 = vadd.f32 %v142_v61, %v105_v3 }
 0x14e   :  { %v162_v5 = vpack.c.bf16 %v114_v2, %v113_v1  ;;  %v106_v6 = vmul.f32 %v141_v56, %v96_v4 }
 0x150   :  { %163 = vst [vmem:[%s248_s3] sm:$0xff] %v162_v5   ;;  %v116_v8 = vadd.f32 %v142_v61, %v106_v6 }
 0x152   :  { %v167_v9 = vpack.c.bf16 %v116_v8, %v115_v7 }
 0x154   :  { %170 = vst [vmem:[%s248_s3 + $0x8] sm:$0xff] %v167_v9  }

// kernel: encoder_decoder_forward.39
= control target key start
LH: loop header
LB: loop body
LE: loop exit
PB: predicated region body
PF: predicated region fallthrough
CT: control target
= control target key end

     0   :  { %v293_v1 = vmov 0   ;;  %v37_v19 = vlaneseq  ;;  %s383_s1 = inlined_call_operand.vmem [shape: bf16[128,256], index: 1, kind: input, shape index: {}]   ;;  %s384_s0 = inlined_call_operand.vmem [shape: bf16[32,128], index: 0, kind: input, shape index: {}]   ;;  %s385_s2 = inlined_call_operand.vmem [shape: f32[1,256], index: 2, kind: input, shape index: {}]   ;;  %s386_s3 = inlined_call_operand.vmem [shape: bf16[32,256], index: 3, kind: output, shape index: {}]  }
   0x1   :  { %v267_v0 = vld [vmem:[%s383_s1 + $0x4] ss:$8 sps:$4 sm:$0xff]   ;;  %171 = vmatprep.mubr.bf16.mxu0 %v293_v1  ;;  %181 = vmatprep.mubr.bf16.mxu1 %v293_v1  ;;  %v269_v2 = vld [vmem:[%s383_s1] ss:$8 sps:$4 sm:$0xff]   ;;  %v270_v3 = vld [vmem:[%s383_s1 + $0x14] ss:$8 sps:$4 sm:$0xff]  }
   0x2   :  { %139 = vmatprep.subr.bf16.mxu0 %v267_v0  ;;  %250 = vmatprep.subr.bf16.mxu1 %v267_v0  ;;  %v272_v4 = vld [vmem:[%s383_s1 + $0x10] ss:$8 sps:$4 sm:$0xff]   ;;  %v273_v5 = vld [vmem:[%s383_s1 + $0x24] ss:$8 sps:$4 sm:$0xff]   ;;  %v275_v6 = vld [vmem:[%s383_s1 + $0x20] ss:$8 sps:$4 sm:$0xff]  }
   0x3   :  { %140 = vmatpush1.bf16.msra.mxu0 %v269_v2  ;;  %258 = vmatpush1.bf16.msra.mxu1 %v269_v2  ;;  %v276_v7 = vld [vmem:[%s383_s1 + $0x34] ss:$8 sps:$4 sm:$0xff]   ;;  %v278_v8 = vld [vmem:[%s383_s1 + $0x30] ss:$8 sps:$4 sm:$0xff]   ;;  %v279_v9 = vld [vmem:[%s383_s1 + $0x44] ss:$8 sps:$4 sm:$0xff]  }
   0x4   :  { %141 = vmatprep.subr.bf16.mxu0 %v270_v3  ;;  %251 = vmatprep.subr.bf16.mxu1 %v270_v3  ;;  %v281_v10 = vld [vmem:[%s383_s1 + $0x40] ss:$8 sps:$4 sm:$0xff]   ;;  %v282_v11 = vld [vmem:[%s383_s1 + $0x54] ss:$8 sps:$4 sm:$0xff]   ;;  %v284_v12 = vld [vmem:[%s383_s1 + $0x50] ss:$8 sps:$4 sm:$0xff]  }
   0x5   :  { %v285_v13 = vld [vmem:[%s383_s1 + $0x64] ss:$8 sps:$4 sm:$0xff]   ;;  %v287_v14 = vld [vmem:[%s383_s1 + $0x60] ss:$8 sps:$4 sm:$0xff]   ;;  %v288_v15 = vld [vmem:[%s383_s1 + $0x74] ss:$8 sps:$4 sm:$0xff]  }
   0x6   :  { %v290_v16 = vld [vmem:[%s383_s1 + $0x70] ss:$8 sps:$4 sm:$0xff]   ;;  %v291_v17 = vld [vmem:[%s384_s0] sm:$0xff]   ;;  %v292_v18 = vld [vmem:[%s384_s0 + $0x8] sm:$0xff]   ;;  %v38_v20 = vshrl.u32 %v37_v19, 7 }
   0x7   :  { %142 = vmatpush1.bf16.msra.mxu0 %v272_v4  ;;  %259 = vmatpush1.bf16.msra.mxu1 %v272_v4  ;;  %v35_v22 = vld [vmem:[%s385_s2] sm:$0x3] }
   0x8   :  { %143 = vmatprep.subr.bf16.mxu0 %v273_v5  ;;  %252 = vmatprep.subr.bf16.mxu1 %v273_v5  ;;  %v39_v21 = vsub.s32 0, %v38_v20  ;;  %v43_v23 = vsub.s32 1, %v38_v20 }
   0xa   :  { %v40_v24 = vrot.slane %v35_v22, %v39_v21  ;;  %v44_v25 = vrot.slane %v35_v22, %v43_v23 }
   0xb   :  { %144 = vmatpush1.bf16.msra.mxu0 %v275_v6  ;;  %260 = vmatpush1.bf16.msra.mxu1 %v275_v6 }
   0xc   :  { %145 = vmatprep.subr.bf16.mxu0 %v276_v7  ;;  %253 = vmatprep.subr.bf16.mxu1 %v276_v7 }
   0xf   :  { %146 = vmatpush1.bf16.msra.mxu0 %v278_v8  ;;  %261 = vmatpush1.bf16.msra.mxu1 %v278_v8 }
  0x10   :  { %147 = vmatprep.subr.bf16.mxu0 %v279_v9  ;;  %254 = vmatprep.subr.bf16.mxu1 %v279_v9 }
  0x13   :  { %148 = vmatpush1.bf16.msra.mxu0 %v281_v10  ;;  %262 = vmatpush1.bf16.msra.mxu1 %v281_v10 }
  0x14   :  { %149 = vmatprep.subr.bf16.mxu0 %v282_v11  ;;  %255 = vmatprep.subr.bf16.mxu1 %v282_v11 }
  0x17   :  { %150 = vmatpush1.bf16.msra.mxu0 %v284_v12  ;;  %263 = vmatpush1.bf16.msra.mxu1 %v284_v12 }
  0x18   :  { %151 = vmatprep.subr.bf16.mxu0 %v285_v13  ;;  %256 = vmatprep.subr.bf16.mxu1 %v285_v13 }
  0x1b   :  { %152 = vmatpush1.bf16.msra.mxu0 %v287_v14  ;;  %264 = vmatpush1.bf16.msra.mxu1 %v287_v14 }
  0x1c   :  { %153 = vmatprep.subr.bf16.mxu0 %v288_v15  ;;  %257 = vmatprep.subr.bf16.mxu1 %v288_v15 }
  0x1f   :  { %154 = vmatpush1.bf16.msra.mxu0 %v290_v16  ;;  %265 = vmatpush1.bf16.msra.mxu1 %v290_v16 }
  0x22   :  { %172 = vmatmul.mubr.bf16.vlgmr.msra.gmra.mrb[0].mxu0 %v291_v17  ;;  %182 = vmatmul.mubr.bf16.vlgmr.msra.gmra.mrb[0].mxu1 %v292_v18 }
  0xf5   :  { %v173_v26 = vpop.f32.mrb[0].mxu0  ;;  %v183_v27 = vpop.f32.mrb[0].mxu1 }
  0xf6   :  { %v174_v28 = vadd.f32 %v173_v26, %v40_v24  ;;  %v184_v29 = vadd.f32 %v183_v27, %v40_v24  ;;  %v175_v30 = vpop.f32.mrb[1].mxu0  ;;  %v185_v31 = vpop.f32.mrb[1].mxu1 }
  0xf7   :  { %v176_v32 = vadd.f32 %v175_v30, %v44_v25  ;;  %v186_v33 = vadd.f32 %v185_v31, %v44_v25  ;;  %v177_v34 = vpop.f32.mrb[2].mxu0  ;;  %v187_v35 = vpop.f32.mrb[2].mxu1 }
  0xf8   :  { %v178_v36 = vadd.f32 %v177_v34, %v40_v24  ;;  %v188_v37 = vadd.f32 %v187_v35, %v40_v24  ;;  %v179_v38 = vpop.f32.mrb[3].mxu0  ;;  %v189_v39 = vpop.f32.mrb[3].mxu1 }
  0xf9   :  { %v246_v40 = vpack.c.bf16 %v176_v32, %v174_v28  ;;  %v248_v41 = vpack.c.bf16 %v186_v33, %v184_v29  ;;  %v180_v42 = vadd.f32 %v179_v38, %v44_v25  ;;  %v190_v43 = vadd.f32 %v189_v39, %v44_v25 }
  0xfb   :  { %216 = vst [vmem:[%s386_s3] sm:$0xff] %v246_v40  ;;  %218 = vst [vmem:[%s386_s3 + $0x10] sm:$0xff] %v248_v41  ;;  %v247_v44 = vpack.c.bf16 %v180_v42, %v178_v36  ;;  %v249_v45 = vpack.c.bf16 %v190_v43, %v188_v37 }
  0xfd   :  { %217 = vst [vmem:[%s386_s3 + $0x8] sm:$0xff] %v247_v44  ;;  %219 = vst [vmem:[%s386_s3 + $0x18] sm:$0xff] %v249_v45 }

// kernel: encoder_decoder_forward.38
= control target key start
LH: loop header
LB: loop body
LE: loop exit
PB: predicated region body
PF: predicated region fallthrough
CT: control target
= control target key end

     0   :  { %s466_s0 = inlined_call_operand.vmem [shape: bf16[32,128], index: 0, kind: input, shape index: {}]   ;;  %s467_s3 = inlined_call_operand.vmem [shape: bf16[128,128], index: 3, kind: input, shape index: {}]   ;;  %s468_s1 = inlined_call_operand.vmem [shape: f32[1,128], index: 1, kind: input, shape index: {}]   ;;  %s469_s2 = inlined_call_operand.vmem [shape: f32[1,128], index: 2, kind: input, shape index: {}]   ;;  %s470_s4 = inlined_call_operand.vmem [shape: f32[1,128], index: 4, kind: input, shape index: {}]   ;;  %s471_s5 = inlined_call_operand.vmem [shape: bf16[32,128], index: 5, kind: output, shape index: {}]  }
   0x1   :  { %v298_v0 = vld [vmem:[%s466_s0] sm:$0xff]   ;;  %v315_v1 = vld [vmem:[%s466_s0 + $0x8] sm:$0xff]   ;;  %v349_v24 = vld [vmem:[%s467_s3 + $0x10] sm:$0xff]  }
   0x2   :  { %v299_v2 = vunpack.c.l.bf16 %v298_v0  ;;  %v303_v3 = vunpack.c.l.bf16 %v315_v1  ;;  %v300_v4 = vunpack.c.h.bf16 %v298_v0  ;;  %v304_v5 = vunpack.c.h.bf16 %v315_v1  ;;  %v347_v22 = vld [vmem:[%s467_s3] sm:$0xff]   ;;  %v348_v23 = vld [vmem:[%s467_s3 + $0x8] sm:$0xff]   ;;  %v350_v25 = vld [vmem:[%s467_s3 + $0x18] sm:$0xff]  }
   0x3   :  { %327 = vmatprep.subr.bf16.mxu0 %v347_v22  ;;  %v351_v26 = vld [vmem:[%s467_s3 + $0x20] sm:$0xff]   ;;  %v352_v27 = vld [vmem:[%s467_s3 + $0x28] sm:$0xff]   ;;  %v353_v28 = vld [vmem:[%s467_s3 + $0x30] sm:$0xff]  }
   0x4   :  { %35 = vadd.xlane.f32.xlu0 %v299_v2  ;;  %39 = vadd.xlane.f32.xlu1 %v303_v3  ;;  %v354_v29 = vld [vmem:[%s467_s3 + $0x38] sm:$0xff]   ;;  %v278_v0 = vld [vmem:[%s468_s1] ss:$0 sm:$0xff] }
   0x5   :  { %328 = vmatpush3.bf16.msra.mxu0 %v347_v22 }
   0x6   :  { %329 = vmatprep.subr.bf16.mxu0 %v348_v23 }
   0x8   :  { %37 = vadd.xlane.f32.xlu0 %v300_v4  ;;  %41 = vadd.xlane.f32.xlu1 %v304_v5 }
   0x9   :  { %330 = vmatpush3.bf16.msra.mxu0 %v348_v23 }
   0xa   :  { %331 = vmatprep.subr.bf16.mxu0 %v349_v24 }
   0xd   :  { %332 = vmatpush3.bf16.msra.mxu0 %v349_v24 }
   0xe   :  { %333 = vmatprep.subr.bf16.mxu0 %v350_v25 }
  0x11   :  { %334 = vmatpush3.bf16.msra.mxu0 %v350_v25 }
  0x12   :  { %335 = vmatprep.subr.bf16.mxu0 %v351_v26 }
  0x15   :  { %336 = vmatpush3.bf16.msra.mxu0 %v351_v26 }
  0x16   :  { %337 = vmatprep.subr.bf16.mxu0 %v352_v27 }
  0x19   :  { %338 = vmatpush3.bf16.msra.mxu0 %v352_v27 }
  0x1a   :  { %339 = vmatprep.subr.bf16.mxu0 %v353_v28 }
  0x1d   :  { %340 = vmatpush3.bf16.msra.mxu0 %v353_v28 }
  0x1e   :  { %341 = vmatprep.subr.bf16.mxu0 %v354_v29 }
  0x21   :  { %342 = vmatpush3.bf16.msra.mxu0 %v354_v29 }
  0x91   :  { %v36_v6 = vpop.xlane.xlu0 %35  ;;  %v40_v7 = vpop.xlane.xlu1 %39 }
  0x92   :  { %v44_v8 = vmul.f32 0.0078125, %v36_v6  ;;  %v46_v9 = vmul.f32 0.0078125, %v40_v7 }
  0x94   :  { %v407_v10 = vsub.f32 %v299_v2, %v44_v8  ;;  %v409_v11 = vsub.f32 %v303_v3, %v46_v9 }
  0x95   :  { %v38_v12 = vpop.xlane.xlu0 %37  ;;  %v42_v13 = vpop.xlane.xlu1 %41 }
  0x96   :  { %v45_v14 = vmul.f32 0.0078125, %v38_v12  ;;  %v52_v15 = vmul.f32 %v407_v10, %v407_v10  ;;  %v47_v16 = vmul.f32 0.0078125, %v42_v13  ;;  %v54_v19 = vmul.f32 %v409_v11, %v409_v11 }
  0x98   :  { %v413_v17 = vsub.f32 %v300_v4, %v45_v14  ;;  %56 = vadd.xlane.f32.xlu0 %v52_v15  ;;  %v415_v18 = vsub.f32 %v304_v5, %v47_v16  ;;  %v279_v5 = vld [vmem:[%s469_s2] ss:$0 sm:$0xff] }
  0x9a   :  { %v53_v20 = vmul.f32 %v413_v17, %v413_v17  ;;  %v55_v21 = vmul.f32 %v415_v18, %v415_v18 }
  0x9c   :  { %60 = vadd.xlane.f32.xlu0 %v54_v19  ;;  %58 = vadd.xlane.f32.xlu1 %v53_v20 }
  0xa0   :  { %62 = vadd.xlane.f32.xlu1 %v55_v21  ;;  %v280_v21 = vld [vmem:[%s470_s4] ss:$0 sm:$0xff] }
 0x125   :  { %v57_v30 = vpop.xlane.xlu0 %56 }
 0x126   :  { %v64_v31 = vmul.f32 0.007874016, %v57_v30 }
 0x128   :  { %355 = vrsqrt.f32 %v64_v31  ;;  %vm70_vm0 = vcmp.eq.f32.partialorder %v64_v31, inf  ;;  %v73_v40 = vand.u32 2147483648, %v64_v31  ;;  %vm72_vm1 = vcmp.eq.f32.partialorder %v64_v31, 0.0 }
 0x129   :  { %v59_v32 = vpop.xlane.xlu1 %58  ;;  %v61_v33 = vpop.xlane.xlu0 %60 }
 0x12a   :  { %v65_v34 = vmul.f32 0.007874016, %v59_v32  ;;  %v66_v35 = vmul.f32 0.007874016, %v61_v33 }
 0x12c   :  { %357 = vrsqrt.f32 %v65_v34  ;;  %vm77_vm2 = vcmp.eq.f32.partialorder %v65_v34, inf  ;;  %vm79_vm3 = vcmp.eq.f32.partialorder %v65_v34, 0.0  ;;  %v80_v47 = vand.u32 2147483648, %v65_v34 }
 0x12d   :  { %359 = vrsqrt.f32 %v66_v35  ;;  %v63_v36 = vpop.xlane.xlu1 %62  ;;  %vm84_vm4 = vcmp.eq.f32.partialorder %v66_v35, inf  ;;  %v87_v50 = vand.u32 2147483648, %v66_v35  ;;  %vm86_vm5 = vcmp.eq.f32.partialorder %v66_v35, 0.0 }
 0x12e   :  { %v67_v37 = vmul.f32 0.007874016, %v63_v36 }
 0x130   :  { %361 = vrsqrt.f32 %v67_v37  ;;  %vm91_vm6 = vcmp.eq.f32.partialorder %v67_v37, inf  ;;  %v94_v58 = vand.u32 2147483648, %v67_v37  ;;  %vm93_vm7 = vcmp.eq.f32.partialorder %v67_v37, 0.0 }
 0x132   :  { %v356_v38 = vpop.eup %355 }
 0x133   :  { %v69_v39 = vmul.f32 %v356_v38, %v64_v31 }
 0x135   :  { %v71_v41 = vsel %vm70_vm0, %v64_v31, %v69_v39 }
 0x136   :  { %v358_v42 = vpop.eup %357  ;;  %v74_v43 = vsel %vm72_vm1, %v73_v40, %v71_v41 }
 0x137   :  { %v360_v44 = vpop.eup %359  ;;  %v76_v45 = vmul.f32 %v358_v42, %v65_v34  ;;  %v96_v46 = vadd.f32 1e-06, %v74_v43 }
 0x138   :  { %v83_v48 = vmul.f32 %v360_v44, %v66_v35 }
 0x139   :  { %v78_v49 = vsel %vm77_vm2, %v65_v34, %v76_v45  ;;  %363 = vrcp.f32 %v96_v46 }
 0x13a   :  { %v362_v51 = vpop.eup %361  ;;  %v85_v52 = vsel %vm84_vm4, %v66_v35, %v83_v48  ;;  %v81_v53 = vsel %vm79_vm3, %v80_v47, %v78_v49 }
 0x13b   :  { %v88_v54 = vsel %vm86_vm5, %v87_v50, %v85_v52  ;;  %v90_v55 = vmul.f32 %v362_v51, %v67_v37  ;;  %v97_v56 = vadd.f32 1e-06, %v81_v53 }
 0x13c   :  { %v98_v57 = vadd.f32 1e-06, %v88_v54 }
 0x13d   :  { %v92_v59 = vsel %vm91_vm6, %v67_v37, %v90_v55  ;;  %365 = vrcp.f32 %v97_v56 }
 0x13e   :  { %367 = vrcp.f32 %v98_v57  ;;  %v95_v60 = vsel %vm93_vm7, %v94_v58, %v92_v59 }
 0x13f   :  { %v99_v61 = vadd.f32 1e-06, %v95_v60 }
 0x141   :  { %369 = vrcp.f32 %v99_v61 }
 0x143   :  { %v364_v62 = vpop.eup %363 }
 0x144   :  { %v104_v63 = vmul.f32 %v364_v62, %v407_v10 }
 0x146   :  { %v114_v4 = vmul.f32 %v278_v0, %v104_v63 }
 0x147   :  { %v366_v1 = vpop.eup %365 }
 0x148   :  { %v368_v2 = vpop.eup %367  ;;  %v105_v3 = vmul.f32 %v366_v1, %v413_v17  ;;  %v124_v9 = vadd.f32 %v279_v5, %v114_v4 }
 0x149   :  { %v106_v6 = vmul.f32 %v368_v2, %v409_v11 }
 0x14a   :  { %v115_v7 = vmul.f32 %v278_v0, %v105_v3 }
 0x14b   :  { %v370_v8 = vpop.eup %369  ;;  %v116_v13 = vmul.f32 %v278_v0, %v106_v6 }
 0x14c   :  { %v125_v12 = vadd.f32 %v279_v5, %v115_v7  ;;  %v107_v10 = vmul.f32 %v370_v8, %v415_v18 }
 0x14d   :  { %v126_v16 = vadd.f32 %v279_v5, %v116_v13 }
 0x14e   :  { %v128_v14 = vpack.c.bf16 %v125_v12, %v124_v9  ;;  %v117_v15 = vmul.f32 %v278_v0, %v107_v10 }
 0x150   :  { %343 = vmatprep.mubr.bf16.mxu0 %v128_v14  ;;  %v127_v19 = vadd.f32 %v279_v5, %v117_v15 }
 0x152   :  { %v129_v17 = vpack.c.bf16 %v127_v19, %v126_v16 }
 0x154   :  { %344 = vmatmul.mubr.bf16.vlgmr.msra.gmra.mrb[0].mxu0 %v129_v17 }
 0x227   :  { %v345_v20 = vpop.f32.mrb[0].mxu0 }
 0x228   :  { %v239_v11 = vpop.f32.mrb[1].mxu0  ;;  %v248_v23 = vadd.f32 %v345_v20, %v280_v21 }
 0x229   :  { %v346_v22 = vpop.f32.mrb[2].mxu0  ;;  %v240_v26 = vadd.f32 %v280_v21, %v239_v11 }
 0x22a   :  { %v251_v24 = vadd.f32 %v346_v22, %v280_v21  ;;  %v242_v25 = vpop.f32.mrb[3].mxu0 }
 0x22b   :  { %v243_v18 = vadd.f32 %v280_v21, %v242_v25 }
 0x22c   :  { %v313_v27 = vpack.c.bf16 %v251_v24, %v248_v23 }
 0x22d   :  { %v308_v28 = vpack.c.bf16 %v243_v18, %v240_v26 }
 0x22e   :  { %316 = vst [vmem:[%s471_s5 + $0x8] sm:$0xff] %v313_v27  }
 0x22f   :  { %309 = vst [vmem:[%s471_s5] sm:$0xff] %v308_v28  }

// kernel: encoder_decoder_forward.51
= control target key start
LH: loop header
LB: loop body
LE: loop exit
PB: predicated region body
PF: predicated region fallthrough
CT: control target
= control target key end

     0   :  { %s259_s0 = inlined_call_operand.vmem [shape: bf16[32,128], index: 0, kind: input, shape index: {}]   ;;  %s260_s1 = inlined_call_operand.vmem [shape: f32[1,128], index: 1, kind: input, shape index: {}]   ;;  %s261_s2 = inlined_call_operand.vmem [shape: f32[1,128], index: 2, kind: input, shape index: {}]   ;;  %s262_s3 = inlined_call_operand.hbm [shape: f32[32,128], index: 3, kind: output, shape index: {}]  }
   0x1   :  { %v141_v0 = vld [vmem:[%s259_s0] sm:$0xff]   ;;  %v148_v1 = vld [vmem:[%s259_s0 + $0x8] sm:$0xff]  }
   0x2   :  { %8 = vsyncpa [#allocation3], 0  ;;  %v142_v2 = vunpack.c.l.bf16 %v141_v0  ;;  %v146_v3 = vunpack.c.l.bf16 %v148_v1  ;;  %v143_v4 = vunpack.c.h.bf16 %v141_v0  ;;  %v147_v5 = vunpack.c.h.bf16 %v148_v1  ;;  %v138_v55 = vld [vmem:[%s260_s1] ss:$0 sm:$0xff]  ;;  %s192_s1 = smov [#allocation2]  }
   0x3   :  { %v139_v57 = vld [vmem:[%s261_s2] ss:$0 sm:$0xff]  ;;  %s127_s19 = sshll.u32 %s192_s1, 4  ;;  %s128_s19 = int_to_ptr.vmem [resolvable:$true] %s127_s19 }
   0x4   :  { %25 = vadd.xlane.f32.xlu0 %v142_v2  ;;  %29 = vadd.xlane.f32.xlu1 %v146_v3  ;;  %s168_s2 = scalar_lea.vmem %s128_s19, 512  ;;  %p173_p1 = scmp.lt.s32.totalorder %s128_s19, %s128_s19 }
   0x5   :  { %p169_p0 = scmp.ne.s32.totalorder %s128_s19, %s168_s2  ;;  %p174_p2 = scmp.lt.s32.totalorder %s168_s2, %s168_s2 }
   0x7   :  { %p175_p3 = por %p174_p2, %p173_p1 }
   0x8   :  { %27 = vadd.xlane.f32.xlu0 %v143_v4  ;;  %31 = vadd.xlane.f32.xlu1 %v147_v5 }
   0x9   :  { %p176_p4 = pnand %p175_p3, %p169_p0 }
  0x91   :  { %v26_v6 = vpop.xlane.xlu0 %25  ;;  %v30_v7 = vpop.xlane.xlu1 %29 }
  0x92   :  { %v34_v8 = vmul.f32 0.0078125, %v26_v6  ;;  %v36_v9 = vmul.f32 0.0078125, %v30_v7 }
  0x94   :  { %v221_v10 = vsub.f32 %v142_v2, %v34_v8  ;;  %v223_v11 = vsub.f32 %v146_v3, %v36_v9 }
  0x95   :  { %v28_v12 = vpop.xlane.xlu0 %27  ;;  %v32_v13 = vpop.xlane.xlu1 %31 }
  0x96   :  { %v35_v14 = vmul.f32 0.0078125, %v28_v12  ;;  %v42_v15 = vmul.f32 %v221_v10, %v221_v10  ;;  %v37_v16 = vmul.f32 0.0078125, %v32_v13  ;;  %v44_v19 = vmul.f32 %v223_v11, %v223_v11 }
  0x98   :  { %v227_v17 = vsub.f32 %v143_v4, %v35_v14  ;;  %46 = vadd.xlane.f32.xlu0 %v42_v15  ;;  %v229_v18 = vsub.f32 %v147_v5, %v37_v16 }
  0x9a   :  { %v43_v20 = vmul.f32 %v227_v17, %v227_v17  ;;  %v45_v21 = vmul.f32 %v229_v18, %v229_v18 }
  0x9c   :  { %50 = vadd.xlane.f32.xlu0 %v44_v19  ;;  %48 = vadd.xlane.f32.xlu1 %v43_v20 }
  0xa0   :  { %52 = vadd.xlane.f32.xlu1 %v45_v21 }
 0x125   :  { %v47_v22 = vpop.xlane.xlu0 %46 }
 0x126   :  { %v54_v23 = vmul.f32 0.007874016, %v47_v22 }
 0x128   :  { %152 = vrsqrt.f32 %v54_v23  ;;  %vm60_vm0 = vcmp.eq.f32.partialorder %v54_v23, inf  ;;  %v63_v32 = vand.u32 2147483648, %v54_v23  ;;  %vm62_vm1 = vcmp.eq.f32.partialorder %v54_v23, 0.0 }
 0x129   :  { %v49_v24 = vpop.xlane.xlu1 %48  ;;  %v51_v25 = vpop.xlane.xlu0 %50 }
 0x12a   :  { %v55_v26 = vmul.f32 0.007874016, %v49_v24  ;;  %v56_v27 = vmul.f32 0.007874016, %v51_v25 }
 0x12c   :  { %154 = vrsqrt.f32 %v55_v26  ;;  %vm67_vm2 = vcmp.eq.f32.partialorder %v55_v26, inf  ;;  %vm69_vm3 = vcmp.eq.f32.partialorder %v55_v26, 0.0  ;;  %v70_v39 = vand.u32 2147483648, %v55_v26 }
 0x12d   :  { %156 = vrsqrt.f32 %v56_v27  ;;  %v53_v28 = vpop.xlane.xlu1 %52  ;;  %vm74_vm4 = vcmp.eq.f32.partialorder %v56_v27, inf  ;;  %v77_v42 = vand.u32 2147483648, %v56_v27  ;;  %vm76_vm5 = vcmp.eq.f32.partialorder %v56_v27, 0.0 }
 0x12e   :  { %v57_v29 = vmul.f32 0.007874016, %v53_v28 }
 0x130   :  { %158 = vrsqrt.f32 %v57_v29  ;;  %vm81_vm6 = vcmp.eq.f32.partialorder %v57_v29, inf  ;;  %v84_v50 = vand.u32 2147483648, %v57_v29  ;;  %vm83_vm7 = vcmp.eq.f32.partialorder %v57_v29, 0.0 }
 0x132   :  { %v153_v30 = vpop.eup %152 }
 0x133   :  { %v59_v31 = vmul.f32 %v153_v30, %v54_v23 }
 0x135   :  { %v61_v33 = vsel %vm60_vm0, %v54_v23, %v59_v31 }
 0x136   :  { %v155_v34 = vpop.eup %154  ;;  %v64_v35 = vsel %vm62_vm1, %v63_v32, %v61_v33 }
 0x137   :  { %v157_v36 = vpop.eup %156  ;;  %v86_v37 = vadd.f32 1e-06, %v64_v35  ;;  %v66_v38 = vmul.f32 %v155_v34, %v55_v26 }
 0x138   :  { %v73_v40 = vmul.f32 %v157_v36, %v56_v27 }
 0x139   :  { %160 = vrcp.f32 %v86_v37  ;;  %v68_v41 = vsel %vm67_vm2, %v55_v26, %v66_v38 }
 0x13a   :  { %v159_v43 = vpop.eup %158  ;;  %v71_v44 = vsel %vm69_vm3, %v70_v39, %v68_v41  ;;  %v75_v45 = vsel %vm74_vm4, %v56_v27, %v73_v40 }
 0x13b   :  { %v87_v46 = vadd.f32 1e-06, %v71_v44  ;;  %v78_v47 = vsel %vm76_vm5, %v77_v42, %v75_v45  ;;  %v80_v48 = vmul.f32 %v159_v43, %v57_v29 }
 0x13c   :  { %v88_v49 = vadd.f32 1e-06, %v78_v47 }
 0x13d   :  { %162 = vrcp.f32 %v87_v46  ;;  %v82_v51 = vsel %vm81_vm6, %v57_v29, %v80_v48 }
 0x13e   :  { %164 = vrcp.f32 %v88_v49  ;;  %v85_v52 = vsel %vm83_vm7, %v84_v50, %v82_v51 }
 0x13f   :  { %v89_v53 = vadd.f32 1e-06, %v85_v52 }
 0x141   :  { %166 = vrcp.f32 %v89_v53 }
 0x143   :  { %v161_v54 = vpop.eup %160 }
 0x144   :  { %v91_v56 = vmul.f32 %v161_v54, %v221_v10 }
 0x146   :  { %v104_v58 = vmul.f32 %v138_v55, %v91_v56 }
 0x147   :  { %v163_v59 = vpop.eup %162 }
 0x148   :  { %v165_v60 = vpop.eup %164  ;;  %v93_v61 = vmul.f32 %v163_v59, %v227_v17  ;;  %v114_v62 = vadd.f32 %v139_v57, %v104_v58 }
 0x149   :  { %v95_v63 = vmul.f32 %v165_v60, %v223_v11 }
 0x14a   :  { %v105_v0 = vmul.f32 %v138_v55, %v93_v61  ;;  %118 = vst [vmem:[#allocation2] sm:$0xff] %v114_v62 }
 0x14b   :  { %v167_v1 = vpop.eup %166  ;;  %v106_v2 = vmul.f32 %v138_v55, %v95_v63 }
 0x14c   :  { %v97_v3 = vmul.f32 %v167_v1, %v229_v18  ;;  %v115_v4 = vadd.f32 %v139_v57, %v105_v0 }
 0x14d   :  { %v116_v5 = vadd.f32 %v139_v57, %v106_v2 }
 0x14e   :  { %v107_v6 = vmul.f32 %v138_v55, %v97_v3  ;;  %119 = vst [vmem:[#allocation2 + $0x8] sm:$0xff] %v115_v4 }
 0x14f   :  { %120 = vst [vmem:[#allocation2 + $0x10] sm:$0xff] %v116_v5 }
 0x150   :  { %v117_v7 = vadd.f32 %v139_v57, %v107_v6 }
 0x152   :  { %121 = vst [vmem:[#allocation2 + $0x18] sm:$0xff] %v117_v7 }
 0x153   :  { %179 = shalt.err (!%p176_p4)
}
 0x154   :  { %s180_s22 = scalar_lea.hbm %s262_s3, 512 }
 0x155   :  { %p181_p5 = scmp.ne.s32.totalorder %s262_s3, %s180_s22  ;;  %p184_p6 = scmp.lt.u32.totalorder %s180_s22, %s262_s3 }
 0x157   :  { %p186_p7 = pnand %p184_p6, %p181_p5 }
 0x159   :  { %189 = shalt.err (!%p186_p7)
}
 0x15a   :  { %s193_s27 = smov 128   ;;  %s194_s28 = smov 8  }
 0x15b   :  { %133 = dma.vmem_to_hbm [thread:$0]  %s128_s19, 512, %s262_s3, [#allocation3], %s193_s27, %s193_s27, %s194_s28  }
 0x15c   :  { %190 = dma.done.wait [#allocation3], 512  }
 0x15d   :  { %191 = vsyncadd [#allocation3], 4294966784 }
 0x15e   :  { %137 = vsyncpa [#allocation3], 1 }

// kernel: encoder_decoder_forward.36
= control target key start
LH: loop header
LB: loop body
LE: loop exit
PB: predicated region body
PF: predicated region fallthrough
CT: control target
= control target key end

     0   :  { %s1727_s15 = smov 0   ;;  %s1729_s16 = smov 0   ;;  %s2124_s0 = inlined_call_operand.vmem [shape: bf16[2,16,384], index: 0, kind: input, shape index: {}, may-alias: {0,1,2}]   ;;  %s2125_s1 = inlined_call_operand.vmem [shape: bf16[2,16,384], index: 1, kind: input, shape index: {}, may-alias: {0,1,2}]   ;;  %s2126_s2 = inlined_call_operand.vmem [shape: bf16[2,16,384], index: 2, kind: input, shape index: {}, may-alias: {0,1,2}]   ;;  %s2127_s3 = inlined_call_operand.vmem [shape: s32[2,16,16], index: 3, kind: input, shape index: {}]   ;;  %s2128_s4 = inlined_call_operand.vmem [shape: bf16[2,16,128], index: 4, kind: output, shape index: {}]  }
   0x1   :  { %s1731_s17 = smov 0   ;;  %s1733_s18 = smov 0  }
   0x2   :  { %s1735_s19 = smov 0  }
   0x3 LB: > { %s33_s20 = sadd.s32 1, %s1689_s18  ;;  %p49_p1 = scmp.ne.s32.totalorder %s1681_s16, %s1677_s15  ;;  %s1693_s19 = sphi %s1735_s19, %s14_s19   ;;  %s1689_s18 = sphi %s1733_s18, %s2133_s18   ;;  %s1685_s17 = sphi %s1731_s17, %s2132_s17   ;;  %s1681_s16 = sphi %s1729_s16, %s2131_s16   ;;  %s1677_s15 = sphi %s1727_s15, %s2130_s15  }
   0x4   : > { %p35_p0 = scmp.ge.s32.totalorder %s33_s20, 2  ;;  %p50_p2 = scmp.eq.s32.totalorder %s1693_s19, 0 }
   0x5   : > { %s42_s23 = sadd.s32 1, %s1681_s16  ;;  %p1447_p5 = scmp.ge.s32.totalorder %s1693_s19, 2 }
   0x6   : > { %s2135_s20 = smov (%p35_p0, %s33_s20), 0  ;;  %p1758_p3 = por %p50_p2, %p49_p1 }
   0x7   : > { %s37_s22 = ssub.s32 %s1689_s18, %s2135_s20  ;;  %189 = sbr.rel (%p1447_p5) target bundleno = 35 (0x23), region = 16 }
   0x8   : > { %p40_p4 = scmp.eq.s32.totalorder %s37_s22, 0 }
   0xa   : > { %s1766_s24 = scalar_select %p40_p4, %s1681_s16, %s42_s23  }
   0xe   : > { %192 = sbr.rel (!%p1758_p3) target bundleno = 21 (0x15), region = 20  ;;  %s194_s25 = sand.u32 (%p1758_p3), 1, %s1681_s16  }
   0xf   : > { %s1554_s26 = smul.u32 (%p1758_p3), 24, %s1689_s18  ;;  %s1448_s27 = sshll.u32 (%p1758_p3), %s194_s25, 3 }
  0x10   : > { %s196_s5 = scalar_lea.vmem (%p1758_p3), [#allocation5], %s1448_s27 }
  0x11   : > { %s202_s30 = scalar_lea.vmem (%p1758_p3), %s2124_s0, %s1554_s26 }
  0x12   : > { %v218_v0 = vld [vmem:[%s202_s30] sm:$0xf] (%p1758_p3)  ;;  %v220_v1 = vld [vmem:[%s202_s30 + $0xc] sm:$0xf] (%p1758_p3) }
  0x13   : > { %219 = vst [vmem:[%s196_s5] sm:$0xf] (%p1758_p3), %v218_v0  ;;  %221 = vst [vmem:[%s196_s5 + $0x4] sm:$0xf] (%p1758_p3), %v220_v1 }
  0x15 PF: > { %248 = sbr.rel (!%p1758_p3) target bundleno = 28 (0x1c), region = 61  ;;  %s250_s6 = sand.u32 (%p1758_p3), 1, %s1681_s16  }
  0x16   : > { %s1451_s7 = smul.u32 (%p1758_p3), 24, %s1689_s18  ;;  %s1450_s8 = sshll.u32 (%p1758_p3), %s250_s6, 3 }
  0x17   : > { %s252_s12 = scalar_lea.vmem (%p1758_p3), [#allocation6], %s1450_s8 }
  0x18   : > { %s1329_s11 = scalar_lea.vmem (%p1758_p3), %s2125_s1, %s1451_s7 }
  0x19   : > { %v1452_v2 = vld [vmem:[%s1329_s11 + $0x4] sm:$0xf] (%p1758_p3)  ;;  %v1453_v3 = vld [vmem:[%s1329_s11 + $0x10] sm:$0xf] (%p1758_p3) }
  0x1a   : > { %276 = vst [vmem:[%s252_s12] sm:$0xf] (%p1758_p3), %v1452_v2  ;;  %278 = vst [vmem:[%s252_s12 + $0x4] sm:$0xf] (%p1758_p3), %v1453_v3 }
  0x1c PF: > { %305 = sbr.rel (!%p1758_p3) target bundleno = 35 (0x23), region = 102  ;;  %s307_s13 = sand.u32 (%p1758_p3), 1, %s1681_s16  }
  0x1d   : > { %s1455_s14 = smul.u32 (%p1758_p3), 24, %s1689_s18  ;;  %s1454_s22 = sshll.u32 (%p1758_p3), %s307_s13, 3 }
  0x1e   : > { %s309_s27 = scalar_lea.vmem (%p1758_p3), [#allocation7], %s1454_s22 }
  0x1f   : > { %s1337_s26 = scalar_lea.vmem (%p1758_p3), %s2126_s2, %s1455_s14 }
  0x20   : > { %v1456_v4 = vld [vmem:[%s1337_s26 + $0x8] sm:$0xf] (%p1758_p3)  ;;  %v1457_v5 = vld [vmem:[%s1337_s26 + $0x14] sm:$0xf] (%p1758_p3) }
  0x21   : > { %333 = vst [vmem:[%s309_s27] sm:$0xf] (%p1758_p3), %v1456_v4  ;;  %335 = vst [vmem:[%s309_s27 + $0x4] sm:$0xf] (%p1758_p3), %v1457_v5 }
  0x23 PF: > { %p1458_p6 = scmp.ge.s32.totalorder %s1693_s19, 1  ;;  %p377_p7 = scmp.lt.s32.totalorder %s1693_s19, 3 }
  0x25   : > { %p378_p8 = pnand %p1458_p6, %p377_p7 }
  0x26   : > { %s384_s21 = sand.u32 (!%p378_p8), 1, %s1677_s15   ;;  %v1695_v6 = vmov (!%p378_p8), 0.0   ;;  %vm1696_vm0 = vmmov (!%p378_p8), 0   ;;  %vm517_vm1 = vcmask (!%p378_p8), 261120   ;;  %vm478_vm2 = vcmask (!%p378_p8), 7168   ;;  %p451_p9 = scmp.lt.s32.totalorder (!%p378_p8), %s1685_s17, 1 }
  0x27   : > { %381 = sbr.rel (%p378_p8) target bundleno = 1446 (0x5a6), region = 147  ;;  %1506 = vmatprep.subr.bf16.mxu0 (!%p378_p8), %v1695_v6  ;;  %s1794_s28 = sshll.u32 (!%p378_p8), %s384_s21, 3  ;;  %1508 = vmatprep.mubr.msk.bf16.mxu0 (!%p378_p8), %vm1696_vm0, %v1695_v6  ;;  %v1697_v10 = vmov (!%p378_p8), -inf   ;;  %487 = vst.msk [vmem:[#allocation3] sm:$0xff] (!%p378_p8), %vm478_vm2, %v1695_v6  ;;  %488 = vst.msk [vmem:[#allocation3 + $0x8] sm:$0xff] (!%p378_p8), %vm478_vm2, %v1695_v6  ;;  %vm569_vm4 = vcmask (!%p378_p8), 130048  }
  0x28   : > { %1512 = vmatprep.subr.bf16.mxu1 (!%p378_p8), %v1695_v6  ;;  %1514 = vmatprep.mubr.msk.bf16.mxu1 (!%p378_p8), %vm1696_vm0, %v1695_v6  ;;  %s393_s29 = scalar_lea.vmem (!%p378_p8), [#allocation6], %s1794_s28  ;;  %s386_s15 = scalar_lea.vmem (!%p378_p8), [#allocation5], %s1794_s28  ;;  %479 = vst.msk [vmem:[#allocation2] sm:$0xff] (!%p378_p8), %vm478_vm2, %v1697_v10  ;;  %480 = vst.msk [vmem:[#allocation2 + $0x8] sm:$0xff] (!%p378_p8), %vm478_vm2, %v1697_v10  ;;  %v1698_v21 = vmov (!%p378_p8), 0   ;;  %vm1163_vm6 = vcmask (!%p378_p8), 523264  }
  0x29   : > { %v1802_v7 = vld [vmem:[%s393_s29] sm:$0xff] (!%p378_p8)   ;;  %v1808_v9 = vld [vmem:[%s386_s15] sm:$0xff] (!%p378_p8)   ;;  %481 = vst.msk [vmem:[#allocation2 + $0x10] sm:$0xff] (!%p378_p8), %vm478_vm2, %v1697_v10  ;;  %482 = vst.msk [vmem:[#allocation2 + $0x18] sm:$0xff] (!%p378_p8), %vm478_vm2, %v1697_v10  ;;  %1602 = vset.pattern.permute.xlu1 (!%p378_p8), %v1698_v21  ;;  %1603 = vset.pattern.permute.xlu0 (!%p378_p8), %v1698_v21  ;;  %s1699_s8 = smov (!%p378_p8), 96   ;;  %s400_s9 = scalar_lea.vmem (!%p378_p8), [#allocation7], %s1794_s28 }
  0x2a   : > { %v522_v8 = vsel (!%p378_p8), %vm517_vm1, %v1802_v7, 0  ;;  %483 = vst.msk [vmem:[#allocation2 + $0x20] sm:$0xff] (!%p378_p8), %vm478_vm2, %v1697_v10  ;;  %484 = vst.msk [vmem:[#allocation2 + $0x28] sm:$0xff] (!%p378_p8), %vm478_vm2, %v1697_v10  ;;  %v1883_v30 = vld [vmem:[%s400_s9] sm:$0xff] (!%p378_p8)   ;;  %s1700_s10 = smov (!%p378_p8), 64   ;;  %s1701_s11 = smov (!%p378_p8), 32  }
  0x2b   : > { %1507 = vmatpush3.bf16.xpose.msra.mxu0 (!%p378_p8), %v522_v8  ;;  %485 = vst.msk [vmem:[#allocation2 + $0x30] sm:$0xff] (!%p378_p8), %vm478_vm2, %v1697_v10  ;;  %486 = vst.msk [vmem:[#allocation2 + $0x38] sm:$0xff] (!%p378_p8), %vm478_vm2, %v1697_v10  ;;  %1513 = vmatpush3.bf16.msra.mxu1 (!%p378_p8), %v1883_v30  ;;  %vm1166_vm7 = vcmask (!%p378_p8), 785408  }
  0x2c   : > { %1524 = vmatprep.subr.bf16.mxu0 (!%p378_p8), %v1695_v6  ;;  %489 = vst.msk [vmem:[#allocation3 + $0x10] sm:$0xff] (!%p378_p8), %vm478_vm2, %v1695_v6  ;;  %490 = vst.msk [vmem:[#allocation3 + $0x18] sm:$0xff] (!%p378_p8), %vm478_vm2, %v1695_v6  ;;  %1518 = vmatprep.subr.bf16.mxu1 (!%p378_p8), %v1695_v6 }
  0x2d   : > { %491 = vst.msk [vmem:[#allocation3 + $0x20] sm:$0xff] (!%p378_p8), %vm478_vm2, %v1695_v6  ;;  %492 = vst.msk [vmem:[#allocation3 + $0x28] sm:$0xff] (!%p378_p8), %vm478_vm2, %v1695_v6 }
  0x2e   : > { %493 = vst.msk [vmem:[#allocation3 + $0x30] sm:$0xff] %vm478_vm2, %v1695_v6  ;;  %494 = vst.msk [vmem:[#allocation3 + $0x38] sm:$0xff] %vm478_vm2, %v1695_v6  ;;  %s2137_s17 = smov (!%p451_p9, %s1685_s17), 1 }
  0x2f   : > { %s1481_s30 = sshll.u32 %s2137_s17, 4  ;;  %v1860_v22 = vld [vmem:[#allocation2] sm:$0xff]  ;;  %v1865_v25 = vld [vmem:[#allocation2 + $0x8] sm:$0xff]  ;;  %s1482_s12 = sshll.u32 %s2137_s17, 3 }
  0x30   : > { %s461_s7 = scalar_lea.vmem %s2127_s3, %s1481_s30  ;;  %s471_s22 = scalar_lea.vmem %s2128_s4, %s1482_s12 }
  0x31   : > { %v1846_v11 = vld [vmem:[%s461_s7] sm:$0xff]  ;;  %v1848_v12 = vld [vmem:[%s461_s7 + $0x8] sm:$0xff] }
  0x32   : > { %1509 = vmatmul.mubr.msk.bf16.vlgmr.msra.gmra.mrb[0].mxu0 %vm517_vm1, %v1808_v9  ;;  %vm505_vm3 = vcmp.ne.s32.totalorder %v1846_v11, 0  ;;  %vm506_vm5 = vcmp.ne.s32.totalorder %v1848_v12, 0 }
  0x33   : > { %1526 = vmatprep.mubr.msk.bf16.mxu0 %vm1696_vm0, %v1695_v6 }
 0x105   : > { %v558_v13 = vpop.f32.mrb[0].mxu0 }
 0x106   : > { %v565_v14 = vsel %vm505_vm3, %v558_v13, -1e+09  ;;  %v1510_v15 = vpop.f32.mrb[1].mxu0 }
 0x107   : > { %v561_v16 = vpop.f32.mrb[2].mxu0  ;;  %v570_v17 = vsel %vm569_vm4, %v565_v14, -inf }
 0x108   : > { %v566_v18 = vsel %vm506_vm5, %v561_v16, -1e+09  ;;  %571 = vmax.xlane.f32.xlu0 %v570_v17  ;;  %v1511_v19 = vpop.f32.mrb[3].mxu0  ;;  %v1956_v16 = vld [vmem:[#allocation2 + $0x10] sm:$0xff]  ;;  %v1958_v17 = vld [vmem:[#allocation2 + $0x18] sm:$0xff] }
 0x109   : > { %v573_v20 = vsel %vm569_vm4, %v566_v18, -inf }
 0x10c   : > { %574 = vmax.xlane.f32.xlu0 %v573_v20 }
 0x122   : > { %680 = vrot.lane.b32.xlu0 %v1802_v7, %s1699_s8 }
 0x195   : > { %v572_v23 = vpop.xlane.xlu0 %571 }
 0x196   : > { %v1863_v24 = vmax.f32 %v1860_v22, %v572_v23  ;;  %v1976_v23 = vld [vmem:[#allocation2 + $0x20] sm:$0xff] }
 0x198   : > { %v578_v26 = vsub.f32 %v1860_v22, %v1863_v24  ;;  %666 = vst.msk [vmem:[#allocation2] sm:$0xff] %vm478_vm2, %v1863_v24  ;;  %586 = vperm.xlu1 %1602, %v1863_v24  }
 0x199   : > { %v575_v27 = vpop.xlane.xlu0 %574 }
 0x19a   : > { %v1873_v28 = vmax.f32 %v1865_v25, %v575_v27 }
 0x19c   : > { %v579_v29 = vsub.f32 %v1865_v25, %v1873_v28  ;;  %667 = vst.msk [vmem:[#allocation2 + $0x8] sm:$0xff] %vm478_vm2, %v1873_v28  ;;  %591 = vperm.xlu1 %1602, %v1873_v28   ;;  %v580_v25 = vmul.f32 1.442695, %v578_v26 }
 0x19d   : > { %v681_v38 = vpop.permute.xlu0 %680 }
 0x19e   : > { %v686_v41 = vsel %vm517_vm1, %v681_v38, 0 }
 0x1a0   : > { %678 = vrot.lane.b32.xlu1 %v1808_v9, %s1699_s8 }
 0x1a4   : > { %841 = vrot.lane.b32.xlu1 %v1802_v7, %s1700_s10 }
 0x1a8   : > { %839 = vrot.lane.b32.xlu1 %v1808_v9, %s1700_s10 }
 0x1ac   : > { %1002 = vrot.lane.b32.xlu1 %v1802_v7, %s1701_s11 }
 0x1b0   : > { %1000 = vrot.lane.b32.xlu1 %v1808_v9, %s1701_s11 }
 0x217   : > { %v587_v31 = vpop.permute.xlu1 %586 }
 0x218   : > { %v594_v32 = vsub.f32 %v565_v14, %v587_v31  ;;  %v1980_v31 = vld [vmem:[#allocation2 + $0x28] sm:$0xff] }
 0x21a   : > { %v596_v33 = vmul.f32 1.442695, %v594_v32 }
 0x21b   : > { %v592_v34 = vpop.permute.xlu1 %591 }
 0x21c   : > { %v595_v35 = vsub.f32 %v566_v18, %v592_v34  ;;  %1607 = vpow2.f32 %v596_v33 }
 0x21e   : > { %v598_v36 = vmul.f32 1.442695, %v595_v35 }
 0x21f   : > { %v679_v37 = vpop.permute.xlu1 %678 }
 0x220   : > { %1609 = vpow2.f32 %v598_v36 }
 0x223   : > { %v842_v43 = vpop.permute.xlu1 %841 }
 0x224   : > { %v847_v45 = vsel %vm517_vm1, %v842_v43, 0 }
 0x226   : > { %v1895_v39 = vpop.eup %1607 }
 0x227   : > { %v840_v44 = vpop.permute.xlu1 %839 }
 0x22a   : > { %v1897_v40 = vpop.eup %1609 }
 0x22b   : > { %v615_v42 = vpack.c.bf16 %v1897_v40, %v1895_v39  ;;  %v1003_v46 = vpop.permute.xlu1 %1002 }
 0x22c   : > { %v1008_v47 = vsel %vm517_vm1, %v1003_v46, 0 }
 0x22d   : > { %1515 = vmatmul.mubr.msk.bf16.vlgmr.msra.gmra.mrb[0].mxu1 %vm569_vm4, %v615_v42 }
 0x22e   : > { %1519 = vmatpush3.bf16.xpose.msra.mxu1 %v686_v41  ;;  %1520 = vmatprep.mubr.msk.bf16.mxu1 %vm1696_vm0, %v1695_v6  ;;  %v2000_v41 = vld [vmem:[#allocation2 + $0x38] sm:$0xff] }
 0x22f   : > { %1530 = vmatprep.subr.bf16.mxu1 %v1695_v6  ;;  %v1001_v48 = vpop.permute.xlu1 %1000 }
 0x235   : > { %1521 = vmatmul.mubr.msk.bf16.vlgmr.msra.gmra.mrb[4].mxu1 %vm517_vm1, %v679_v37  ;;  %v1997_v37 = vld [vmem:[#allocation2 + $0x30] sm:$0xff] }
 0x236   : > { %1531 = vmatpush3.bf16.xpose.msra.mxu1 %v847_v45  ;;  %1532 = vmatprep.mubr.msk.bf16.mxu1 %vm1696_vm0, %v1695_v6 }
 0x237   : > { %1542 = vmatprep.subr.bf16.mxu1 %v1695_v6 }
 0x23d   : > { %1533 = vmatmul.mubr.msk.bf16.vlgmr.msra.gmra.mrb[8].mxu1 %vm517_vm1, %v840_v44 }
 0x23e   : > { %1543 = vmatpush3.bf16.xpose.msra.mxu1 %v1008_v47  ;;  %1544 = vmatprep.mubr.msk.bf16.mxu1 %vm1696_vm0, %v1695_v6  ;;  %v607_v47 = vsel %vm569_vm4, %v1897_v40, 0.0 }
 0x245   : > { %1545 = vmatmul.mubr.msk.bf16.vlgmr.msra.gmra.mrb[12].mxu1 %vm517_vm1, %v1001_v48  ;;  %v604_v48 = vsel %vm569_vm4, %v1895_v39, 0.0 }
 0x300   : > { %v1916_v49 = vpop.f32.mrb[0].mxu1 }
 0x301   : > { %v1516_v50 = vpop.f32.mrb[1].mxu1 }
 0x302   : > { %v1918_v51 = vpop.f32.mrb[2].mxu1 }
 0x303   : > { %v1517_v52 = vpop.f32.mrb[3].mxu1 }
 0x308   : > { %v722_v53 = vpop.f32.mrb[4].mxu1 }
 0x309   : > { %v1922_v54 = vsel %vm505_vm3, %v722_v53, -1e+09  ;;  %v1522_v55 = vpop.f32.mrb[5].mxu1 }
 0x30a   : > { %v725_v56 = vpop.f32.mrb[6].mxu1  ;;  %v734_v57 = vsel %vm569_vm4, %v1922_v54, -inf }
 0x30b   : > { %v1928_v58 = vsel %vm506_vm5, %v725_v56, -1e+09  ;;  %735 = vmax.xlane.f32.xlu1 %v734_v57  ;;  %v1523_v59 = vpop.f32.mrb[7].mxu1 }
 0x30c   : > { %v737_v60 = vsel %vm569_vm4, %v1928_v58, -inf }
 0x30d   : > { %738 = vmax.xlane.f32.xlu0 %v737_v60 }
 0x310   : > { %v883_v61 = vpop.f32.mrb[8].mxu1 }
 0x311   : > { %v1934_v62 = vsel %vm505_vm3, %v883_v61, -1e+09  ;;  %v1534_v63 = vpop.f32.mrb[9].mxu1 }
 0x312   : > { %v886_v0 = vpop.f32.mrb[10].mxu1  ;;  %v895_v1 = vsel %vm569_vm4, %v1934_v62, -inf }
 0x313   : > { %v1940_v2 = vsel %vm506_vm5, %v886_v0, -1e+09  ;;  %896 = vmax.xlane.f32.xlu0 %v895_v1  ;;  %v1535_v3 = vpop.f32.mrb[11].mxu1 }
 0x314   : > { %v898_v4 = vsel %vm569_vm4, %v1940_v2, -inf }
 0x315   : > { %899 = vmax.xlane.f32.xlu1 %v898_v4 }
 0x318   : > { %v1044_v5 = vpop.f32.mrb[12].mxu1 }
 0x319   : > { %v1946_v7 = vsel %vm505_vm3, %v1044_v5, -1e+09  ;;  %v1546_v8 = vpop.f32.mrb[13].mxu1 }
 0x31a   : > { %v1047_v9 = vpop.f32.mrb[14].mxu1  ;;  %v1056_v10 = vsel %vm569_vm4, %v1946_v7, -inf }
 0x31b   : > { %v1952_v13 = vsel %vm506_vm5, %v1047_v9, -1e+09  ;;  %1057 = vmax.xlane.f32.xlu0 %v1056_v10  ;;  %v1547_v14 = vpop.f32.mrb[15].mxu1 }
 0x31c   : > { %v1059_v15 = vsel %vm569_vm4, %v1952_v13, -inf }
 0x31d   : > { %1060 = vmax.xlane.f32.xlu1 %v1059_v15 }
 0x398   : > { %v736_v11 = vpop.xlane.xlu1 %735 }
 0x399   : > { %v1961_v18 = vmax.f32 %v1956_v16, %v736_v11 }
 0x39a   : > { %v739_v19 = vpop.xlane.xlu0 %738 }
 0x39b   : > { %v742_v12 = vsub.f32 %v1956_v16, %v1961_v18  ;;  %827 = vst.msk [vmem:[#allocation2 + $0x10] sm:$0xff] %vm478_vm2, %v1961_v18  ;;  %v1968_v20 = vmax.f32 %v1958_v17, %v739_v19  ;;  %750 = vperm.xlu0 %1603, %v1961_v18   ;;  %v582_v19 = vmul.f32 1.442695, %v579_v29 }
 0x39d   : > { %v743_v21 = vsub.f32 %v1958_v17, %v1968_v20  ;;  %828 = vst.msk [vmem:[#allocation2 + $0x18] sm:$0xff] %vm478_vm2, %v1968_v20  ;;  %755 = vperm.xlu1 %1602, %v1968_v20  }
 0x39f   : > { %1102 = vrot.lane.b32.xlu0 %v1883_v30, %s1701_s11  ;;  %v746_v29 = vmul.f32 1.442695, %v743_v21 }
 0x3a0   : > { %v897_v27 = vpop.xlane.xlu0 %896 }
 0x3a1   : > { %v1983_v32 = vmax.f32 %v1976_v23, %v897_v27 }
 0x3a2   : > { %v900_v33 = vpop.xlane.xlu1 %899 }
 0x3a3   : > { %v903_v34 = vsub.f32 %v1976_v23, %v1983_v32  ;;  %988 = vst.msk [vmem:[#allocation2 + $0x20] sm:$0xff] %vm478_vm2, %v1983_v32  ;;  %v1990_v35 = vmax.f32 %v1980_v31, %v900_v33  ;;  %911 = vperm.xlu1 %1602, %v1983_v32  }
 0x3a5   : > { %v904_v36 = vsub.f32 %v1980_v31, %v1990_v35  ;;  %989 = vst.msk [vmem:[#allocation2 + $0x28] sm:$0xff] %vm478_vm2, %v1990_v35  ;;  %v905_v22 = vmul.f32 1.442695, %v903_v34 }
 0x3a7   : > { %916 = vperm.xlu1 %1602, %v1990_v35  }
 0x3a8   : > { %v1058_v38 = vpop.xlane.xlu0 %1057 }
 0x3a9   : > { %v2003_v42 = vmax.f32 %v1997_v37, %v1058_v38 }
 0x3aa   : > { %v1061_v43 = vpop.xlane.xlu1 %1060 }
 0x3ab   : > { %v1064_v44 = vsub.f32 %v1997_v37, %v2003_v42  ;;  %1149 = vst.msk [vmem:[#allocation2 + $0x30] sm:$0xff] %vm478_vm2, %v2003_v42  ;;  %v2010_v45 = vmax.f32 %v2000_v41, %v1061_v43  ;;  %1072 = vperm.xlu1 %1602, %v2003_v42   ;;  %v600_v37 = vld [vmem:[#allocation3] sm:$0xff] }
 0x3ad   : > { %v1065_v46 = vsub.f32 %v2000_v41, %v2010_v45  ;;  %1150 = vst.msk [vmem:[#allocation2 + $0x38] sm:$0xff] %vm478_vm2, %v2010_v45  ;;  %v1066_v16 = vmul.f32 1.442695, %v1064_v44 }
 0x3af   : > { %1077 = vperm.xlu1 %1602, %v2010_v45   ;;  %v1068_v18 = vmul.f32 1.442695, %v1065_v46 }
 0x3b3   : > { %780 = vrot.lane.b32.xlu1 %v1883_v30, %s1699_s8 }
 0x3b7   : > { %941 = vrot.lane.b32.xlu1 %v1883_v30, %s1700_s10 }
 0x3be   : > { %608 = vadd.xlane.f32.xlu0 %v607_v47 }
 0x3db   : > { %605 = vadd.xlane.f32.xlu1 %v604_v48  ;;  %v744_v48 = vmul.f32 1.442695, %v742_v12 }
 0x41a   : > { %v751_v50 = vpop.permute.xlu0 %750 }
 0x41b   : > { %v758_v52 = vsub.f32 %v1922_v54, %v751_v50 }
 0x41c   : > { %v756_v53 = vpop.permute.xlu1 %755 }
 0x41d   : > { %v760_v55 = vmul.f32 1.442695, %v758_v52  ;;  %v759_v56 = vsub.f32 %v1928_v58, %v756_v53  ;;  %v601_v52 = vld [vmem:[#allocation3 + $0x8] sm:$0xff]  ;;  %v765_v53 = vld [vmem:[#allocation3 + $0x10] sm:$0xff] }
 0x41e   : > { %v1103_v38 = vpop.permute.xlu0 %1102 }
 0x41f   : > { %1611 = vpow2.f32 %v760_v55  ;;  %v762_v57 = vmul.f32 1.442695, %v759_v56  ;;  %v766_v55 = vld [vmem:[#allocation3 + $0x18] sm:$0xff] }
 0x421   : > { %1613 = vpow2.f32 %v762_v57 }
 0x422   : > { %v912_v59 = vpop.permute.xlu1 %911 }
 0x423   : > { %v919_v30 = vsub.f32 %v1934_v62, %v912_v59 }
 0x425   : > { %v921_v60 = vmul.f32 1.442695, %v919_v30 }
 0x426   : > { %v917_v40 = vpop.permute.xlu1 %916 }
 0x427   : > { %1615 = vpow2.f32 %v921_v60  ;;  %v920_v61 = vsub.f32 %v1940_v2, %v917_v40 }
 0x429   : > { %v1612_v39 = vpop.eup %1611  ;;  %v923_v63 = vmul.f32 1.442695, %v920_v61  ;;  %v926_v61 = vld [vmem:[#allocation3 + $0x20] sm:$0xff] }
 0x42a   : > { %v1073_v0 = vpop.permute.xlu1 %1072  ;;  %v769_v54 = vsel %vm569_vm4, %v1612_v39, 0.0 }
 0x42b   : > { %v1614_v1 = vpop.eup %1613  ;;  %1617 = vpow2.f32 %v923_v63  ;;  %v1080_v58 = vsub.f32 %v1946_v7, %v1073_v0  ;;  %770 = vadd.xlane.f32.xlu1 %v769_v54  ;;  %v927_v0 = vld [vmem:[#allocation3 + $0x28] sm:$0xff] }
 0x42c   : > { %v772_v3 = vsel %vm569_vm4, %v1614_v1, 0.0  ;;  %v779_v14 = vpack.c.bf16 %v1614_v1, %v1612_v39 }
 0x42d   : > { %v1082_v4 = vmul.f32 1.442695, %v1080_v58  ;;  %773 = vadd.xlane.f32.xlu0 %v772_v3 }
 0x42e   : > { %v1078_v62 = vpop.permute.xlu1 %1077 }
 0x42f   : > { %1619 = vpow2.f32 %v1082_v4  ;;  %v1081_v5 = vsub.f32 %v1952_v13, %v1078_v62  ;;  %v1087_v4 = vld [vmem:[#allocation3 + $0x30] sm:$0xff] }
 0x431   : > { %v1616_v8 = vpop.eup %1615  ;;  %v1084_v2 = vmul.f32 1.442695, %v1081_v5 }
 0x432   : > { %v781_v9 = vpop.permute.xlu1 %780  ;;  %v930_v10 = vsel %vm569_vm4, %v1616_v8, 0.0 }
 0x433   : > { %1621 = vpow2.f32 %v1084_v2  ;;  %931 = vadd.xlane.f32.xlu1 %v930_v10  ;;  %1525 = vmatpush3.bf16.msra.mxu0 %v781_v9  ;;  %v1088_v9 = vld [vmem:[#allocation3 + $0x38] sm:$0xff] }
 0x434   : > { %1536 = vmatprep.subr.bf16.mxu0 %v1695_v6  ;;  %1623 = vpow2.f32 %v582_v19 }
 0x435   : > { %v1618_v7 = vpop.eup %1617  ;;  %1625 = vpow2.f32 %v580_v25 }
 0x436   : > { %1527 = vmatmul.mubr.msk.bf16.vlgmr.msra.gmra.mrb[4].mxu0 %vm569_vm4, %v779_v14  ;;  %v933_v15 = vsel %vm569_vm4, %v1618_v7, 0.0  ;;  %v942_v11 = vpop.permute.xlu1 %941  ;;  %v940_v33 = vpack.c.bf16 %v1618_v7, %v1616_v8  ;;  %1627 = vpow2.f32 %v746_v29 }
 0x437   : > { %934 = vadd.xlane.f32.xlu0 %v933_v15  ;;  %1537 = vmatpush3.bf16.msra.mxu0 %v942_v11  ;;  %1629 = vpow2.f32 %v744_v48 }
 0x438   : > { %1538 = vmatprep.mubr.msk.bf16.mxu0 %vm1696_vm0, %v1695_v6  ;;  %1548 = vmatprep.subr.bf16.mxu0 %v1695_v6 }
 0x439   : > { %v1620_v13 = vpop.eup %1619 }
 0x43a   : > { %v1091_v27 = vsel %vm569_vm4, %v1620_v13, 0.0 }
 0x43b   : > { %1092 = vadd.xlane.f32.xlu0 %v1091_v27 }
 0x43d   : > { %v1622_v43 = vpop.eup %1621 }
 0x43e   : > { %1539 = vmatmul.mubr.msk.bf16.vlgmr.msra.gmra.mrb[8].mxu0 %vm569_vm4, %v940_v33  ;;  %v1094_v47 = vsel %vm569_vm4, %v1622_v43, 0.0  ;;  %v1101_v28 = vpack.c.bf16 %v1622_v43, %v1620_v13  ;;  %v1624_v50 = vpop.eup %1623 }
 0x43f   : > { %1095 = vadd.xlane.f32.xlu1 %v1094_v47  ;;  %1549 = vmatpush3.bf16.msra.mxu0 %v1103_v38  ;;  %v603_v24 = vmul.f32 %v1624_v50, %v601_v52  ;;  %v1626_v12 = vpop.eup %1625 }
 0x440   : > { %1550 = vmatprep.mubr.msk.bf16.mxu0 %vm1696_vm0, %v1695_v6  ;;  %v907_v6 = vmul.f32 1.442695, %v904_v36  ;;  %v1628_v20 = vpop.eup %1627  ;;  %v602_v41 = vmul.f32 %v1626_v12, %v600_v37 }
 0x441   : > { %v1630_v21 = vpop.eup %1629  ;;  %v768_v30 = vmul.f32 %v1628_v20, %v766_v55 }
 0x442   : > { %1631 = vpow2.f32 %v907_v6  ;;  %v767_v56 = vmul.f32 %v1630_v21, %v765_v53 }
 0x443   : > { %1633 = vpow2.f32 %v905_v22 }
 0x444   : > { %1635 = vpow2.f32 %v1066_v16 }
 0x445   : > { %1637 = vpow2.f32 %v1068_v18 }
 0x446   : > { %1551 = vmatmul.mubr.msk.bf16.vlgmr.msra.gmra.mrb[12].mxu0 %vm569_vm4, %v1101_v28 }
 0x44b   : > { %v609_v26 = vpop.xlane.xlu0 %608 }
 0x44c   : > { %v611_v17 = vadd.f32 %v609_v26, %v603_v24  ;;  %v1632_v31 = vpop.eup %1631 }
 0x44d   : > { %v1634_v32 = vpop.eup %1633  ;;  %v929_v58 = vmul.f32 %v1632_v31, %v927_v0 }
 0x44e   : > { %614 = vst.msk [vmem:[#allocation3 + $0x8] sm:$0xff] %vm478_vm2, %v611_v17  ;;  %v1636_v34 = vpop.eup %1635  ;;  %v928_v39 = vmul.f32 %v1634_v32, %v926_v61 }
 0x44f   : > { %v1638_v35 = vpop.eup %1637  ;;  %v1089_v8 = vmul.f32 %v1636_v34, %v1087_v4 }
 0x450   : > { %675 = vperm.xlu1 %1602, %v1624_v50   ;;  %v1090_v7 = vmul.f32 %v1638_v35, %v1088_v9 }
 0x451   : > { %670 = vperm.xlu0 %1603, %v1626_v12  }
 0x454   : > { %836 = vperm.xlu1 %1602, %v1628_v20  }
 0x455   : > { %831 = vperm.xlu0 %1603, %v1630_v21   ;;  %v1211_v23 = vld [vmem:[#allocation3 + $0x8] sm:$0xff] }
 0x456   : > { %1639 = vrcp.f32 %v1211_v23 }
 0x458   : > { %997 = vperm.xlu1 %1602, %v1632_v31  }
 0x459   : > { %992 = vperm.xlu0 %1603, %v1634_v32  }
 0x45c   : > { %1153 = vperm.xlu1 %1602, %v1636_v34  }
 0x45d   : > { %1158 = vperm.xlu0 %1603, %v1638_v35  }
 0x460   : > { %v1640_v36 = vpop.eup %1639 }
 0x461   : > { %1221 = vperm.xlu0 %1603, %v1640_v36  }
 0x468   : > { %v606_v42 = vpop.xlane.xlu1 %605 }
 0x469   : > { %v610_v44 = vadd.f32 %v606_v42, %v602_v41 }
 0x46b   : > { %613 = vst.msk [vmem:[#allocation3] sm:$0xff] %vm478_vm2, %v610_v44 }
 0x472   : > { %v1210_v45 = vld [vmem:[#allocation3] sm:$0xff] }
 0x473   : > { %1641 = vrcp.f32 %v1210_v45 }
 0x47d   : > { %v1642_v46 = vpop.eup %1641 }
 0x47e   : > { %1216 = vperm.xlu1 %1602, %v1642_v46  }
 0x4b8   : > { %v771_v57 = vpop.xlane.xlu1 %770 }
 0x4b9   : > { %v775_v59 = vadd.f32 %v771_v57, %v767_v56 }
 0x4ba   : > { %v774_v60 = vpop.xlane.xlu0 %773 }
 0x4bb   : > { %777 = vst.msk [vmem:[#allocation3 + $0x10] sm:$0xff] %vm478_vm2, %v775_v59  ;;  %v776_v40 = vadd.f32 %v774_v60, %v768_v30 }
 0x4bd   : > { %778 = vst.msk [vmem:[#allocation3 + $0x18] sm:$0xff] %vm478_vm2, %v776_v40 }
 0x4c0   : > { %v932_v63 = vpop.xlane.xlu1 %931 }
 0x4c1   : > { %v936_v54 = vadd.f32 %v932_v63, %v928_v39 }
 0x4c2   : > { %v1224_v1 = vld [vmem:[#allocation3 + $0x10] sm:$0xff] }
 0x4c3   : > { %938 = vst.msk [vmem:[#allocation3 + $0x20] sm:$0xff] %vm478_vm2, %v936_v54  ;;  %1643 = vrcp.f32 %v1224_v1 }
 0x4c4   : > { %v935_v3 = vpop.xlane.xlu0 %934  ;;  %v1225_v62 = vld [vmem:[#allocation3 + $0x18] sm:$0xff] }
 0x4c5   : > { %v937_v5 = vadd.f32 %v935_v3, %v929_v58  ;;  %1645 = vrcp.f32 %v1225_v62 }
 0x4c7   : > { %939 = vst.msk [vmem:[#allocation3 + $0x28] sm:$0xff] %vm478_vm2, %v937_v5 }
 0x4c8   : > { %v1093_v2 = vpop.xlane.xlu0 %1092 }
 0x4c9   : > { %v1097_v10 = vadd.f32 %v1093_v2, %v1089_v8 }
 0x4ca   : > { %v1238_v14 = vld [vmem:[#allocation3 + $0x20] sm:$0xff] }
 0x4cb   : > { %1099 = vst.msk [vmem:[#allocation3 + $0x30] sm:$0xff] %vm478_vm2, %v1097_v10  ;;  %1647 = vrcp.f32 %v1238_v14 }
 0x4cc   : > { %v1096_v15 = vpop.xlane.xlu1 %1095 }
 0x4cd   : > { %v1644_v11 = vpop.eup %1643  ;;  %v1098_v13 = vadd.f32 %v1096_v15, %v1090_v7 }
 0x4ce   : > { %1230 = vperm.xlu1 %1602, %v1644_v11   ;;  %v1239_v19 = vld [vmem:[#allocation3 + $0x28] sm:$0xff] }
 0x4cf   : > { %v1646_v27 = vpop.eup %1645  ;;  %1100 = vst.msk [vmem:[#allocation3 + $0x38] sm:$0xff] %vm478_vm2, %v1098_v13  ;;  %1649 = vrcp.f32 %v1239_v19 }
 0x4d0   : > { %1235 = vperm.xlu0 %1603, %v1646_v27   ;;  %v671_v20 = vpop.permute.xlu0 %670  ;;  %v676_v21 = vpop.permute.xlu1 %675 }
 0x4d2   : > { %v1252_v29 = vld [vmem:[#allocation3 + $0x30] sm:$0xff] }
 0x4d3   : > { %1651 = vrcp.f32 %v1252_v29 }
 0x4d4   : > { %v832_v23 = vpop.permute.xlu0 %831  ;;  %v837_v31 = vpop.permute.xlu1 %836 }
 0x4d5   : > { %v1648_v33 = vpop.eup %1647  ;;  %v1161_v59 = vsel %vm517_vm1, %v671_v20, %v832_v23  ;;  %v1162_v30 = vsel %vm517_vm1, %v676_v21, %v837_v31 }
 0x4d6   : > { %1244 = vperm.xlu1 %1602, %v1648_v33   ;;  %v1253_v52 = vld [vmem:[#allocation3 + $0x38] sm:$0xff] }
 0x4d7   : > { %1653 = vrcp.f32 %v1253_v52 }
 0x4d8   : > { %v993_v32 = vpop.permute.xlu0 %992  ;;  %v998_v34 = vpop.permute.xlu1 %997 }
 0x4d9   : > { %v1650_v38 = vpop.eup %1649  ;;  %v1164_v60 = vsel %vm1163_vm6, %v1161_v59, %v993_v32  ;;  %v1165_v40 = vsel %vm1163_vm6, %v1162_v30, %v998_v34 }
 0x4da   : > { %1249 = vperm.xlu0 %1603, %v1650_v38  }
 0x4dc   : > { %v1159_v35 = vpop.permute.xlu0 %1158  ;;  %v1154_v36 = vpop.permute.xlu1 %1153 }
 0x4dd   : > { %v1652_v18 = vpop.eup %1651  ;;  %v1168_v63 = vsel %vm1166_vm7, %v1165_v40, %v1159_v35  ;;  %v1167_v0 = vsel %vm1166_vm7, %v1164_v60, %v1154_v36 }
 0x4de   : > { %v1202_v8 = vmul.f32 0.0, %v1168_v63  ;;  %v1201_v2 = vmul.f32 0.0, %v1167_v0 }
 0x4e0   : > { %v1222_v37 = vpop.permute.xlu0 %1221 }
 0x4e1   : > { %v1654_v12 = vpop.eup %1653 }
 0x4fd   : > { %v1217_v41 = vpop.permute.xlu1 %1216 }
 0x509   : > { %v820_v43 = vpop.f32.mrb[4].mxu0 }
 0x50a   : > { %1171 = vrot.lane.b32.xlu1 %v820_v43, %s1701_s11  ;;  %v1528_v47 = vpop.f32.mrb[5].mxu0 }
 0x50b   : > { %v823_v25 = vpop.f32.mrb[6].mxu0 }
 0x50c   : > { %1173 = vrot.lane.b32.xlu0 %v823_v25, %s1701_s11  ;;  %v1529_v28 = vpop.f32.mrb[7].mxu0 }
 0x511   : > { %v981_v48 = vpop.f32.mrb[8].mxu0 }
 0x512   : > { %1179 = vrot.lane.b32.xlu1 %v981_v48, %s1700_s10  ;;  %v1540_v50 = vpop.f32.mrb[9].mxu0 }
 0x513   : > { %v984_v6 = vpop.f32.mrb[10].mxu0 }
 0x514   : > { %1181 = vrot.lane.b32.xlu0 %v984_v6, %s1700_s10  ;;  %v1541_v22 = vpop.f32.mrb[11].mxu0 }
 0x519   : > { %v1142_v24 = vpop.f32.mrb[12].mxu0 }
 0x51a   : > { %1187 = vrot.lane.b32.xlu1 %v1142_v24, %s1699_s8  ;;  %v1552_v26 = vpop.f32.mrb[13].mxu0 }
 0x51b   : > { %v1145_v17 = vpop.f32.mrb[14].mxu0 }
 0x51c   : > { %1189 = vrot.lane.b32.xlu0 %v1145_v17, %s1699_s8  ;;  %v1553_v16 = vpop.f32.mrb[15].mxu0 }
 0x51e   : > { %1258 = vperm.xlu1 %1602, %v1652_v18  }
 0x520   : > { %1263 = vperm.xlu0 %1603, %v1654_v12  }
 0x54d   : > { %v1231_v42 = vpop.permute.xlu1 %1230 }
 0x54e   : > { %v1268_v4 = vsel %vm517_vm1, %v1217_v41, %v1231_v42 }
 0x54f   : > { %v1236_v44 = vpop.permute.xlu0 %1235 }
 0x555   : > { %v1245_v45 = vpop.permute.xlu1 %1244 }
 0x556   : > { %v1270_v9 = vsel %vm1163_vm6, %v1268_v4, %v1245_v45 }
 0x559   : > { %v1250_v46 = vpop.permute.xlu0 %1249 }
 0x57c   : > { %v1172_v53 = vpop.permute.xlu1 %1171 }
 0x57d   : > { %v1193_v54 = vsel %vm517_vm1, %v1916_v49, %v1172_v53  ;;  %v1269_v49 = vsel %vm517_vm1, %v1222_v37, %v1236_v44 }
 0x57e   : > { %v1174_v55 = vpop.permute.xlu0 %1173 }
 0x57f   : > { %v1194_v1 = vsel %vm517_vm1, %v1918_v51, %v1174_v55  ;;  %v1271_v51 = vsel %vm1163_vm6, %v1269_v49, %v1250_v46 }
 0x584   : > { %v1180_v56 = vpop.permute.xlu1 %1179 }
 0x585   : > { %v1195_v58 = vsel %vm1163_vm6, %v1193_v54, %v1180_v56 }
 0x586   : > { %v1182_v57 = vpop.permute.xlu0 %1181 }
 0x587   : > { %v1196_v3 = vsel %vm1163_vm6, %v1194_v1, %v1182_v57 }
 0x58c   : > { %v1188_v61 = vpop.permute.xlu1 %1187 }
 0x58d   : > { %v1197_v62 = vsel %vm1166_vm7, %v1195_v58, %v1188_v61 }
 0x58e   : > { %v1190_v39 = vpop.permute.xlu0 %1189  ;;  %v1203_v7 = vadd.f32 %v1201_v2, %v1197_v62 }
 0x58f   : > { %v1198_v5 = vsel %vm1166_vm7, %v1196_v3, %v1190_v39 }
 0x590   : > { %v1204_v15 = vadd.f32 %v1202_v8, %v1198_v5 }
 0x59d   : > { %v1259_v10 = vpop.permute.xlu1 %1258 }
 0x59e   : > { %v1272_v14 = vsel %vm1166_vm7, %v1270_v9, %v1259_v10 }
 0x59f   : > { %v1264_v11 = vpop.permute.xlu0 %1263  ;;  %v1274_v19 = vmul.f32 %v1272_v14, %v1203_v7 }
 0x5a0   : > { %v1273_v13 = vsel %vm1166_vm7, %v1271_v51, %v1264_v11 }
 0x5a1   : > { %v1275_v27 = vmul.f32 %v1273_v13, %v1204_v15 }
 0x5a3   : > { %v1488_v33 = vpack.c.bf16 %v1275_v27, %v1274_v19 }
 0x5a5   : > { %1489 = vst [vmem:[%s471_s22] sm:$0xff] %v1488_v33  }
 0x5a6 PF: > { %s14_s19 = sadd.s32 1, %s1693_s19   ;;  %s2130_s15 = smov %s1681_s16 }
 0x5a7   : > { %p11_p10 = scmp.ge.s32.totalorder %s14_s19, 4   ;;  %s2131_s16 = smov %s1766_s24 }
 0x5a8   : > { %s2132_s17 = smov %s1689_s18  ;;  %s2133_s18 = smov %s2135_s20 }
 0x5a9   :  { %13 = sbr.rel (!%p11_p10) target bundleno = 3 (0x3), region = 227 }

// kernel: encoder_decoder_forward.40
= control target key start
LH: loop header
LB: loop body
LE: loop exit
PB: predicated region body
PF: predicated region fallthrough
CT: control target
= control target key end

     0   :  { %s1657_s15 = smov 0   ;;  %s1659_s16 = smov 0   ;;  %s2044_s0 = inlined_call_operand.vmem [shape: bf16[2,16,128], index: 0, kind: input, shape index: {}]   ;;  %s2045_s1 = inlined_call_operand.vmem [shape: bf16[2,16,256], index: 1, kind: input, shape index: {}, may-alias: {1,2}]   ;;  %s2046_s2 = inlined_call_operand.vmem [shape: bf16[2,16,256], index: 2, kind: input, shape index: {}, may-alias: {1,2}]   ;;  %s2047_s3 = inlined_call_operand.vmem [shape: s32[2,1,16], index: 3, kind: input, shape index: {}]   ;;  %s2048_s4 = inlined_call_operand.vmem [shape: bf16[2,16,128], index: 4, kind: output, shape index: {}]  }
   0x1   :  { %s1661_s17 = smov 0   ;;  %s1663_s18 = smov 0  }
   0x2   :  { %s1665_s19 = smov 0  }
   0x3 LB: > { %s33_s20 = sadd.s32 1, %s1619_s18  ;;  %p77_p1 = scmp.ne.s32.totalorder %s1611_s16, %s1607_s15  ;;  %s1623_s19 = sphi %s1665_s19, %s14_s19   ;;  %s1619_s18 = sphi %s1663_s18, %s2053_s18   ;;  %s1615_s17 = sphi %s1661_s17, %s2052_s17   ;;  %s1611_s16 = sphi %s1659_s16, %s2051_s16   ;;  %s1607_s15 = sphi %s1657_s15, %s2050_s15  }
   0x4   : > { %p35_p0 = scmp.ge.s32.totalorder %s33_s20, 2  ;;  %p78_p2 = scmp.eq.s32.totalorder %s1623_s19, 0 }
   0x5   : > { %s70_s23 = sadd.s32 1, %s1611_s16  ;;  %p1379_p5 = scmp.ge.s32.totalorder %s1623_s19, 2 }
   0x6   : > { %s2055_s20 = smov (%p35_p0, %s33_s20), 0  ;;  %p1688_p3 = por %p78_p2, %p77_p1 }
   0x7   : > { %s65_s22 = ssub.s32 %s1619_s18, %s2055_s20  ;;  %187 = sbr.rel (%p1379_p5) target bundleno = 28 (0x1c), region = 16 }
   0x8   : > { %p68_p4 = scmp.eq.s32.totalorder %s65_s22, 0 }
   0xa   : > { %s1696_s24 = scalar_select %p68_p4, %s1611_s16, %s70_s23  }
   0xe   : > { %203 = sbr.rel (!%p1688_p3) target bundleno = 21 (0x15), region = 24  ;;  %s205_s25 = sand.u32 (%p1688_p3), 1, %s1611_s16  }
   0xf   : > { %s1410_s26 = sshll.u32 (%p1688_p3), %s1619_s18, 4  ;;  %s1380_s27 = sshll.u32 (%p1688_p3), %s205_s25, 3 }
  0x10   : > { %s213_s30 = scalar_lea.vmem (%p1688_p3), %s2045_s1, %s1410_s26  ;;  %s207_s5 = scalar_lea.vmem (%p1688_p3), [#allocation5], %s1380_s27 }
  0x11   : > { %v229_v0 = vld [vmem:[%s213_s30] sm:$0xf] (%p1688_p3)  ;;  %v231_v1 = vld [vmem:[%s213_s30 + $0x8] sm:$0xf] (%p1688_p3) }
  0x12   : > { %230 = vst [vmem:[%s207_s5] sm:$0xf] (%p1688_p3), %v229_v0  ;;  %232 = vst [vmem:[%s207_s5 + $0x4] sm:$0xf] (%p1688_p3), %v231_v1 }
  0x15 PF: > { %259 = sbr.rel (!%p1688_p3) target bundleno = 28 (0x1c), region = 65  ;;  %s261_s6 = sand.u32 (%p1688_p3), 1, %s1611_s16  }
  0x16   : > { %s1411_s7 = sshll.u32 (%p1688_p3), %s1619_s18, 4  ;;  %s1383_s8 = sshll.u32 (%p1688_p3), %s261_s6, 3 }
  0x17   : > { %s1278_s11 = scalar_lea.vmem (%p1688_p3), %s2046_s2, %s1411_s7  ;;  %s263_s12 = scalar_lea.vmem (%p1688_p3), [#allocation6], %s1383_s8 }
  0x18   : > { %v1386_v2 = vld [vmem:[%s1278_s11 + $0x4] sm:$0xf] (%p1688_p3)  ;;  %v1387_v3 = vld [vmem:[%s1278_s11 + $0xc] sm:$0xf] (%p1688_p3) }
  0x19   : > { %287 = vst [vmem:[%s263_s12] sm:$0xf] (%p1688_p3), %v1386_v2  ;;  %289 = vst [vmem:[%s263_s12 + $0x4] sm:$0xf] (%p1688_p3), %v1387_v3 }
  0x1c PF: > { %p1388_p6 = scmp.ge.s32.totalorder %s1623_s19, 1  ;;  %p324_p7 = scmp.lt.s32.totalorder %s1623_s19, 3 }
  0x1e   : > { %p325_p8 = pnand %p1388_p6, %p324_p7 }
  0x1f   : > { %s331_s13 = sand.u32 (!%p325_p8), 1, %s1607_s15   ;;  %p387_p9 = scmp.lt.s32.totalorder (!%p325_p8), %s1615_s17, 1  ;;  %v1625_v4 = vmov (!%p325_p8), 0.0   ;;  %vm1626_vm0 = vmmov (!%p325_p8), 0   ;;  %vm462_vm1 = vcmask (!%p325_p8), 261120   ;;  %v1627_v5 = vmov (!%p325_p8), 0  }
  0x20   : > { %328 = sbr.rel (%p325_p8) target bundleno = 1439 (0x59f), region = 110  ;;  %1437 = vmatprep.subr.bf16.mxu0 (!%p325_p8), %v1625_v4  ;;  %s1718_s14 = sshll.u32 (!%p325_p8), %s331_s13, 3  ;;  %1439 = vmatprep.mubr.msk.bf16.mxu0 (!%p325_p8), %vm1626_vm0, %v1625_v4  ;;  %vm419_vm3 = vcmask (!%p325_p8), 7168   ;;  %v1628_v11 = vmov (!%p325_p8), -inf   ;;  %v447_v12 = vlaneseq (!%p325_p8)  ;;  %vm514_vm5 = vcmask (!%p325_p8), 130048  }
  0x21   : > { %1532 = vset.pattern.permute.xlu1 (!%p325_p8), %v1627_v5  ;;  %1443 = vmatprep.subr.bf16.mxu1 (!%p325_p8), %v1625_v4  ;;  %s333_s21 = scalar_lea.vmem (!%p325_p8), [#allocation5], %s1718_s14  ;;  %420 = vst.msk [vmem:[#allocation2] sm:$0xff] (!%p325_p8), %vm419_vm3, %v1628_v11  ;;  %421 = vst.msk [vmem:[#allocation2 + $0x8] sm:$0xff] (!%p325_p8), %vm419_vm3, %v1628_v11  ;;  %s1629_s29 = smov (!%p325_p8), 96   ;;  %vm1108_vm6 = vcmask (!%p325_p8), 523264   ;;  %vm1111_vm7 = vcmask (!%p325_p8), 785408  }
  0x22   : > { %v1724_v6 = vld [vmem:[%s333_s21] sm:$0xff] (!%p325_p8)   ;;  %1445 = vmatprep.mubr.msk.bf16.mxu1 (!%p325_p8), %vm1626_vm0, %v1625_v4  ;;  %1533 = vset.pattern.permute.xlu0 (!%p325_p8), %v1627_v5  ;;  %422 = vst.msk [vmem:[#allocation2 + $0x10] sm:$0xff] (!%p325_p8), %vm419_vm3, %v1628_v11  ;;  %423 = vst.msk [vmem:[#allocation2 + $0x18] sm:$0xff] (!%p325_p8), %vm419_vm3, %v1628_v11  ;;  %v448_v13 = vshrl.u32 (!%p325_p8), %v447_v12, 7  ;;  %s340_s30 = scalar_lea.vmem (!%p325_p8), [#allocation6], %s1718_s14  ;;  %s1630_s5 = smov (!%p325_p8), 64  }
  0x23   : > { %v467_v7 = vsel (!%p325_p8), %vm462_vm1, %v1724_v6, 0  ;;  %424 = vst.msk [vmem:[#allocation2 + $0x20] sm:$0xff] (!%p325_p8), %vm419_vm3, %v1628_v11  ;;  %425 = vst.msk [vmem:[#allocation2 + $0x28] sm:$0xff] (!%p325_p8), %vm419_vm3, %v1628_v11  ;;  %v1804_v32 = vld [vmem:[%s340_s30] sm:$0xff] (!%p325_p8)   ;;  %s1631_s6 = smov (!%p325_p8), 32  }
  0x24   : > { %1438 = vmatpush3.bf16.xpose.msra.mxu0 (!%p325_p8), %v467_v7  ;;  %426 = vst.msk [vmem:[#allocation2 + $0x30] sm:$0xff] (!%p325_p8), %vm419_vm3, %v1628_v11  ;;  %427 = vst.msk [vmem:[#allocation2 + $0x38] sm:$0xff] (!%p325_p8), %vm419_vm3, %v1628_v11  ;;  %v449_v14 = vsub.s32 (!%p325_p8), 0, %v448_v13  ;;  %1444 = vmatpush3.bf16.msra.mxu1 (!%p325_p8), %v1804_v32 }
  0x25   : > { %1455 = vmatprep.subr.bf16.mxu0 (!%p325_p8), %v1625_v4  ;;  %428 = vst.msk [vmem:[#allocation3] sm:$0xff] (!%p325_p8), %vm419_vm3, %v1625_v4  ;;  %429 = vst.msk [vmem:[#allocation3 + $0x8] sm:$0xff] (!%p325_p8), %vm419_vm3, %v1625_v4  ;;  %1449 = vmatprep.subr.bf16.mxu1 (!%p325_p8), %v1625_v4 }
  0x26   : > { %430 = vst.msk [vmem:[#allocation3 + $0x10] sm:$0xff] (!%p325_p8), %vm419_vm3, %v1625_v4  ;;  %431 = vst.msk [vmem:[#allocation3 + $0x18] sm:$0xff] (!%p325_p8), %vm419_vm3, %v1625_v4 }
  0x27   : > { %s2057_s17 = smov (!%p387_p9, %s1615_s17), 1  ;;  %432 = vst.msk [vmem:[#allocation3 + $0x20] sm:$0xff] %vm419_vm3, %v1625_v4  ;;  %433 = vst.msk [vmem:[#allocation3 + $0x28] sm:$0xff] %vm419_vm3, %v1625_v4 }
  0x28   : > { %s1412_s15 = sshll.u32 %s2057_s17, 3  ;;  %s403_s25 = scalar_lea.vmem %s2047_s3, %s2057_s17  ;;  %434 = vst.msk [vmem:[#allocation3 + $0x30] sm:$0xff] %vm419_vm3, %v1625_v4  ;;  %435 = vst.msk [vmem:[#allocation3 + $0x38] sm:$0xff] %vm419_vm3, %v1625_v4  ;;  %v1782_v24 = vld [vmem:[#allocation2] sm:$0xff]  ;;  %v1787_v27 = vld [vmem:[#allocation2 + $0x8] sm:$0xff] }
  0x29   : > { %s394_s28 = scalar_lea.vmem %s2044_s0, %s1412_s15  ;;  %v444_v8 = vld [vmem:[%s403_s25] sm:$0x1]  ;;  %s412_s9 = scalar_lea.vmem %s2048_s4, %s1412_s15 }
  0x2a   : > { %vm445_vm2 = vcmp.ne.s32.totalorder %v444_v8, 0  ;;  %v1535_v10 = vld [vmem:[%s394_s28] sm:$0xff]  }
  0x2b   : > { %v446_v9 = vsel %vm445_vm2, 1, %v1627_v5  ;;  %1440 = vmatmul.mubr.msk.bf16.vlgmr.msra.gmra.mrb[0].mxu0 %vm462_vm1, %v1535_v10 }
  0x2c   : > { %1457 = vmatprep.mubr.msk.bf16.mxu0 %vm1626_vm0, %v1625_v4  ;;  %v1771_v15 = vrot.slane %v446_v9, %v449_v14 }
  0x2e   : > { %vm451_vm4 = vcmp.eq.s32.totalorder %v1771_v15, 1 }
  0xfe   : > { %v503_v16 = vpop.f32.mrb[0].mxu0 }
  0xff   : > { %v510_v17 = vsel %vm451_vm4, %v503_v16, -1e+09  ;;  %v1441_v18 = vpop.f32.mrb[1].mxu0 }
 0x100   : > { %v506_v19 = vpop.f32.mrb[2].mxu0  ;;  %v515_v20 = vsel %vm514_vm5, %v510_v17, -inf }
 0x101   : > { %v511_v21 = vsel %vm451_vm4, %v506_v19, -1e+09  ;;  %516 = vmax.xlane.f32.xlu0 %v515_v20  ;;  %v1442_v22 = vpop.f32.mrb[3].mxu0  ;;  %v1877_v19 = vld [vmem:[#allocation2 + $0x18] sm:$0xff] }
 0x102   : > { %v518_v23 = vsel %vm514_vm5, %v511_v21, -inf }
 0x105   : > { %519 = vmax.xlane.f32.xlu0 %v518_v23 }
 0x11b   : > { %625 = vrot.lane.b32.xlu0 %v1724_v6, %s1629_s29 }
 0x18e   : > { %v517_v25 = vpop.xlane.xlu0 %516 }
 0x18f   : > { %v1785_v26 = vmax.f32 %v1782_v24, %v517_v25  ;;  %v1895_v25 = vld [vmem:[#allocation2 + $0x20] sm:$0xff] }
 0x191   : > { %v523_v28 = vsub.f32 %v1782_v24, %v1785_v26  ;;  %611 = vst.msk [vmem:[#allocation2] sm:$0xff] %vm419_vm3, %v1785_v26  ;;  %531 = vperm.xlu1 %1532, %v1785_v26  }
 0x192   : > { %v520_v29 = vpop.xlane.xlu0 %519 }
 0x193   : > { %v1795_v30 = vmax.f32 %v1787_v27, %v520_v29 }
 0x195   : > { %v524_v31 = vsub.f32 %v1787_v27, %v1795_v30  ;;  %612 = vst.msk [vmem:[#allocation2 + $0x8] sm:$0xff] %vm419_vm3, %v1795_v30  ;;  %536 = vperm.xlu1 %1532, %v1795_v30   ;;  %v525_v27 = vmul.f32 1.442695, %v523_v28 }
 0x196   : > { %v626_v40 = vpop.permute.xlu0 %625 }
 0x197   : > { %v631_v43 = vsel %vm462_vm1, %v626_v40, 0 }
 0x199   : > { %623 = vrot.lane.b32.xlu1 %v1535_v10, %s1629_s29 }
 0x19d   : > { %786 = vrot.lane.b32.xlu1 %v1724_v6, %s1630_s5 }
 0x1a1   : > { %784 = vrot.lane.b32.xlu1 %v1535_v10, %s1630_s5 }
 0x1a5   : > { %947 = vrot.lane.b32.xlu1 %v1724_v6, %s1631_s6 }
 0x1a9   : > { %945 = vrot.lane.b32.xlu1 %v1535_v10, %s1631_s6 }
 0x210   : > { %v532_v33 = vpop.permute.xlu1 %531 }
 0x211   : > { %v539_v34 = vsub.f32 %v510_v17, %v532_v33  ;;  %v1875_v17 = vld [vmem:[#allocation2 + $0x10] sm:$0xff]  ;;  %v1899_v33 = vld [vmem:[#allocation2 + $0x28] sm:$0xff] }
 0x213   : > { %v541_v35 = vmul.f32 1.442695, %v539_v34 }
 0x214   : > { %v537_v36 = vpop.permute.xlu1 %536 }
 0x215   : > { %v540_v37 = vsub.f32 %v511_v21, %v537_v36  ;;  %1537 = vpow2.f32 %v541_v35 }
 0x217   : > { %v543_v38 = vmul.f32 1.442695, %v540_v37 }
 0x218   : > { %v624_v39 = vpop.permute.xlu1 %623 }
 0x219   : > { %1539 = vpow2.f32 %v543_v38 }
 0x21c   : > { %v787_v45 = vpop.permute.xlu1 %786 }
 0x21d   : > { %v792_v47 = vsel %vm462_vm1, %v787_v45, 0 }
 0x21f   : > { %v1814_v41 = vpop.eup %1537 }
 0x220   : > { %v785_v46 = vpop.permute.xlu1 %784 }
 0x223   : > { %v1816_v42 = vpop.eup %1539 }
 0x224   : > { %v560_v44 = vpack.c.bf16 %v1816_v42, %v1814_v41  ;;  %v948_v48 = vpop.permute.xlu1 %947 }
 0x225   : > { %v953_v49 = vsel %vm462_vm1, %v948_v48, 0 }
 0x226   : > { %1446 = vmatmul.mubr.msk.bf16.vlgmr.msra.gmra.mrb[0].mxu1 %vm514_vm5, %v560_v44 }
 0x227   : > { %1450 = vmatpush3.bf16.xpose.msra.mxu1 %v631_v43  ;;  %1451 = vmatprep.mubr.msk.bf16.mxu1 %vm1626_vm0, %v1625_v4  ;;  %v1919_v43 = vld [vmem:[#allocation2 + $0x38] sm:$0xff] }
 0x228   : > { %1461 = vmatprep.subr.bf16.mxu1 %v1625_v4  ;;  %v946_v50 = vpop.permute.xlu1 %945 }
 0x22e   : > { %1452 = vmatmul.mubr.msk.bf16.vlgmr.msra.gmra.mrb[4].mxu1 %vm462_vm1, %v624_v39  ;;  %v1916_v39 = vld [vmem:[#allocation2 + $0x30] sm:$0xff] }
 0x22f   : > { %1462 = vmatpush3.bf16.xpose.msra.mxu1 %v792_v47  ;;  %1463 = vmatprep.mubr.msk.bf16.mxu1 %vm1626_vm0, %v1625_v4 }
 0x230   : > { %1473 = vmatprep.subr.bf16.mxu1 %v1625_v4 }
 0x236   : > { %1464 = vmatmul.mubr.msk.bf16.vlgmr.msra.gmra.mrb[8].mxu1 %vm462_vm1, %v785_v46 }
 0x237   : > { %1474 = vmatpush3.bf16.xpose.msra.mxu1 %v953_v49  ;;  %1475 = vmatprep.mubr.msk.bf16.mxu1 %vm1626_vm0, %v1625_v4  ;;  %v552_v49 = vsel %vm514_vm5, %v1816_v42, 0.0 }
 0x23e   : > { %1476 = vmatmul.mubr.msk.bf16.vlgmr.msra.gmra.mrb[12].mxu1 %vm462_vm1, %v946_v50  ;;  %v549_v50 = vsel %vm514_vm5, %v1814_v41, 0.0 }
 0x2f9   : > { %v1835_v51 = vpop.f32.mrb[0].mxu1 }
 0x2fa   : > { %v1447_v52 = vpop.f32.mrb[1].mxu1 }
 0x2fb   : > { %v1837_v53 = vpop.f32.mrb[2].mxu1 }
 0x2fc   : > { %v1448_v54 = vpop.f32.mrb[3].mxu1 }
 0x301   : > { %v667_v55 = vpop.f32.mrb[4].mxu1 }
 0x302   : > { %v1841_v56 = vsel %vm451_vm4, %v667_v55, -1e+09  ;;  %v1453_v57 = vpop.f32.mrb[5].mxu1 }
 0x303   : > { %v670_v58 = vpop.f32.mrb[6].mxu1  ;;  %v679_v59 = vsel %vm514_vm5, %v1841_v56, -inf }
 0x304   : > { %v1847_v60 = vsel %vm451_vm4, %v670_v58, -1e+09  ;;  %680 = vmax.xlane.f32.xlu1 %v679_v59  ;;  %v1454_v61 = vpop.f32.mrb[7].mxu1 }
 0x305   : > { %v682_v62 = vsel %vm514_vm5, %v1847_v60, -inf }
 0x306   : > { %683 = vmax.xlane.f32.xlu0 %v682_v62 }
 0x309   : > { %v828_v63 = vpop.f32.mrb[8].mxu1 }
 0x30a   : > { %v1853_v0 = vsel %vm451_vm4, %v828_v63, -1e+09  ;;  %v1465_v1 = vpop.f32.mrb[9].mxu1 }
 0x30b   : > { %v831_v2 = vpop.f32.mrb[10].mxu1  ;;  %v840_v3 = vsel %vm514_vm5, %v1853_v0, -inf }
 0x30c   : > { %v1859_v5 = vsel %vm451_vm4, %v831_v2, -1e+09  ;;  %841 = vmax.xlane.f32.xlu0 %v840_v3  ;;  %v1466_v6 = vpop.f32.mrb[11].mxu1 }
 0x30d   : > { %v843_v7 = vsel %vm514_vm5, %v1859_v5, -inf }
 0x30e   : > { %844 = vmax.xlane.f32.xlu1 %v843_v7 }
 0x311   : > { %v989_v8 = vpop.f32.mrb[12].mxu1 }
 0x312   : > { %v1865_v9 = vsel %vm451_vm4, %v989_v8, -1e+09  ;;  %v1477_v10 = vpop.f32.mrb[13].mxu1 }
 0x313   : > { %v992_v11 = vpop.f32.mrb[14].mxu1  ;;  %v1001_v12 = vsel %vm514_vm5, %v1865_v9, -inf }
 0x314   : > { %v1871_v13 = vsel %vm451_vm4, %v992_v11, -1e+09  ;;  %1002 = vmax.xlane.f32.xlu0 %v1001_v12  ;;  %v1478_v14 = vpop.f32.mrb[15].mxu1 }
 0x315   : > { %v1004_v16 = vsel %vm514_vm5, %v1871_v13, -inf }
 0x316   : > { %1005 = vmax.xlane.f32.xlu1 %v1004_v16 }
 0x391   : > { %v681_v18 = vpop.xlane.xlu1 %680 }
 0x392   : > { %v1880_v20 = vmax.f32 %v1875_v17, %v681_v18 }
 0x393   : > { %v684_v21 = vpop.xlane.xlu0 %683 }
 0x394   : > { %v687_v15 = vsub.f32 %v1875_v17, %v1880_v20  ;;  %772 = vst.msk [vmem:[#allocation2 + $0x10] sm:$0xff] %vm419_vm3, %v1880_v20  ;;  %v1887_v22 = vmax.f32 %v1877_v19, %v684_v21  ;;  %695 = vperm.xlu0 %1533, %v1880_v20   ;;  %v527_v21 = vmul.f32 1.442695, %v524_v31 }
 0x396   : > { %v688_v23 = vsub.f32 %v1877_v19, %v1887_v22  ;;  %773 = vst.msk [vmem:[#allocation2 + $0x18] sm:$0xff] %vm419_vm3, %v1887_v22  ;;  %700 = vperm.xlu1 %1532, %v1887_v22  }
 0x398   : > { %1047 = vrot.lane.b32.xlu0 %v1804_v32, %s1631_s6  ;;  %v691_v31 = vmul.f32 1.442695, %v688_v23 }
 0x399   : > { %v842_v29 = vpop.xlane.xlu0 %841 }
 0x39a   : > { %v1902_v34 = vmax.f32 %v1895_v25, %v842_v29 }
 0x39b   : > { %v845_v35 = vpop.xlane.xlu1 %844 }
 0x39c   : > { %v848_v36 = vsub.f32 %v1895_v25, %v1902_v34  ;;  %933 = vst.msk [vmem:[#allocation2 + $0x20] sm:$0xff] %vm419_vm3, %v1902_v34  ;;  %v1909_v37 = vmax.f32 %v1899_v33, %v845_v35  ;;  %856 = vperm.xlu1 %1532, %v1902_v34  }
 0x39e   : > { %v849_v38 = vsub.f32 %v1899_v33, %v1909_v37  ;;  %934 = vst.msk [vmem:[#allocation2 + $0x28] sm:$0xff] %vm419_vm3, %v1909_v37  ;;  %v850_v24 = vmul.f32 1.442695, %v848_v36 }
 0x3a0   : > { %861 = vperm.xlu1 %1532, %v1909_v37  }
 0x3a1   : > { %v1003_v40 = vpop.xlane.xlu0 %1002 }
 0x3a2   : > { %v1922_v44 = vmax.f32 %v1916_v39, %v1003_v40 }
 0x3a3   : > { %v1006_v45 = vpop.xlane.xlu1 %1005 }
 0x3a4   : > { %v1009_v46 = vsub.f32 %v1916_v39, %v1922_v44  ;;  %1094 = vst.msk [vmem:[#allocation2 + $0x30] sm:$0xff] %vm419_vm3, %v1922_v44  ;;  %v1929_v47 = vmax.f32 %v1919_v43, %v1006_v45  ;;  %1017 = vperm.xlu1 %1532, %v1922_v44   ;;  %v545_v39 = vld [vmem:[#allocation3] sm:$0xff] }
 0x3a6   : > { %v1010_v48 = vsub.f32 %v1919_v43, %v1929_v47  ;;  %1095 = vst.msk [vmem:[#allocation2 + $0x38] sm:$0xff] %vm419_vm3, %v1929_v47  ;;  %v1011_v17 = vmul.f32 1.442695, %v1009_v46 }
 0x3a8   : > { %1022 = vperm.xlu1 %1532, %v1929_v47   ;;  %v1013_v20 = vmul.f32 1.442695, %v1010_v48 }
 0x3ac   : > { %725 = vrot.lane.b32.xlu1 %v1804_v32, %s1629_s29 }
 0x3b0   : > { %886 = vrot.lane.b32.xlu1 %v1804_v32, %s1630_s5 }
 0x3b7   : > { %553 = vadd.xlane.f32.xlu0 %v552_v49 }
 0x3d4   : > { %550 = vadd.xlane.f32.xlu1 %v549_v50  ;;  %v689_v50 = vmul.f32 1.442695, %v687_v15 }
 0x413   : > { %v696_v52 = vpop.permute.xlu0 %695 }
 0x414   : > { %v703_v54 = vsub.f32 %v1841_v56, %v696_v52 }
 0x415   : > { %v701_v55 = vpop.permute.xlu1 %700 }
 0x416   : > { %v705_v57 = vmul.f32 1.442695, %v703_v54  ;;  %v704_v58 = vsub.f32 %v1847_v60, %v701_v55  ;;  %v546_v54 = vld [vmem:[#allocation3 + $0x8] sm:$0xff]  ;;  %v710_v55 = vld [vmem:[#allocation3 + $0x10] sm:$0xff] }
 0x417   : > { %v1048_v40 = vpop.permute.xlu0 %1047 }
 0x418   : > { %1541 = vpow2.f32 %v705_v57  ;;  %v707_v59 = vmul.f32 1.442695, %v704_v58  ;;  %v711_v57 = vld [vmem:[#allocation3 + $0x18] sm:$0xff] }
 0x41a   : > { %1543 = vpow2.f32 %v707_v59 }
 0x41b   : > { %v857_v61 = vpop.permute.xlu1 %856 }
 0x41c   : > { %v864_v32 = vsub.f32 %v1853_v0, %v857_v61 }
 0x41e   : > { %v866_v62 = vmul.f32 1.442695, %v864_v32 }
 0x41f   : > { %v862_v42 = vpop.permute.xlu1 %861 }
 0x420   : > { %1545 = vpow2.f32 %v866_v62  ;;  %v865_v63 = vsub.f32 %v1859_v5, %v862_v42 }
 0x422   : > { %v1542_v41 = vpop.eup %1541  ;;  %v868_v1 = vmul.f32 1.442695, %v865_v63  ;;  %v871_v63 = vld [vmem:[#allocation3 + $0x20] sm:$0xff] }
 0x423   : > { %v1018_v2 = vpop.permute.xlu1 %1017  ;;  %v714_v56 = vsel %vm514_vm5, %v1542_v41, 0.0 }
 0x424   : > { %v1544_v3 = vpop.eup %1543  ;;  %1547 = vpow2.f32 %v868_v1  ;;  %v1025_v60 = vsub.f32 %v1865_v9, %v1018_v2  ;;  %715 = vadd.xlane.f32.xlu1 %v714_v56  ;;  %v872_v2 = vld [vmem:[#allocation3 + $0x28] sm:$0xff] }
 0x425   : > { %v717_v6 = vsel %vm514_vm5, %v1544_v3, 0.0  ;;  %v724_v14 = vpack.c.bf16 %v1544_v3, %v1542_v41 }
 0x426   : > { %v1027_v7 = vmul.f32 1.442695, %v1025_v60  ;;  %718 = vadd.xlane.f32.xlu0 %v717_v6 }
 0x427   : > { %v1023_v0 = vpop.permute.xlu1 %1022 }
 0x428   : > { %1549 = vpow2.f32 %v1027_v7  ;;  %v1026_v8 = vsub.f32 %v1871_v13, %v1023_v0  ;;  %v1032_v7 = vld [vmem:[#allocation3 + $0x30] sm:$0xff] }
 0x42a   : > { %v1546_v10 = vpop.eup %1545  ;;  %v1029_v5 = vmul.f32 1.442695, %v1026_v8 }
 0x42b   : > { %v726_v11 = vpop.permute.xlu1 %725  ;;  %v875_v12 = vsel %vm514_vm5, %v1546_v10, 0.0 }
 0x42c   : > { %1551 = vpow2.f32 %v1029_v5  ;;  %876 = vadd.xlane.f32.xlu1 %v875_v12  ;;  %1456 = vmatpush3.bf16.msra.mxu0 %v726_v11  ;;  %v1033_v11 = vld [vmem:[#allocation3 + $0x38] sm:$0xff] }
 0x42d   : > { %1467 = vmatprep.subr.bf16.mxu0 %v1625_v4  ;;  %1553 = vpow2.f32 %v527_v21 }
 0x42e   : > { %v1548_v9 = vpop.eup %1547  ;;  %1555 = vpow2.f32 %v525_v27 }
 0x42f   : > { %1458 = vmatmul.mubr.msk.bf16.vlgmr.msra.gmra.mrb[4].mxu0 %vm514_vm5, %v724_v14  ;;  %v878_v16 = vsel %vm514_vm5, %v1548_v9, 0.0  ;;  %v887_v18 = vpop.permute.xlu1 %886  ;;  %v885_v35 = vpack.c.bf16 %v1548_v9, %v1546_v10  ;;  %1557 = vpow2.f32 %v691_v31 }
 0x430   : > { %879 = vadd.xlane.f32.xlu0 %v878_v16  ;;  %1468 = vmatpush3.bf16.msra.mxu0 %v887_v18  ;;  %1559 = vpow2.f32 %v689_v50 }
 0x431   : > { %1469 = vmatprep.mubr.msk.bf16.mxu0 %vm1626_vm0, %v1625_v4  ;;  %1479 = vmatprep.subr.bf16.mxu0 %v1625_v4 }
 0x432   : > { %v1550_v13 = vpop.eup %1549 }
 0x433   : > { %v1036_v29 = vsel %vm514_vm5, %v1550_v13, 0.0 }
 0x434   : > { %1037 = vadd.xlane.f32.xlu0 %v1036_v29 }
 0x436   : > { %v1552_v45 = vpop.eup %1551 }
 0x437   : > { %1470 = vmatmul.mubr.msk.bf16.vlgmr.msra.gmra.mrb[8].mxu0 %vm514_vm5, %v885_v35  ;;  %v1039_v49 = vsel %vm514_vm5, %v1552_v45, 0.0  ;;  %v1046_v30 = vpack.c.bf16 %v1552_v45, %v1550_v13  ;;  %v1554_v52 = vpop.eup %1553 }
 0x438   : > { %1040 = vadd.xlane.f32.xlu1 %v1039_v49  ;;  %1480 = vmatpush3.bf16.msra.mxu0 %v1048_v40  ;;  %v548_v26 = vmul.f32 %v1554_v52, %v546_v54  ;;  %v1556_v15 = vpop.eup %1555 }
 0x439   : > { %1481 = vmatprep.mubr.msk.bf16.mxu0 %vm1626_vm0, %v1625_v4  ;;  %v852_v4 = vmul.f32 1.442695, %v849_v38  ;;  %v1558_v22 = vpop.eup %1557  ;;  %v547_v43 = vmul.f32 %v1556_v15, %v545_v39 }
 0x43a   : > { %v1560_v23 = vpop.eup %1559  ;;  %v713_v32 = vmul.f32 %v1558_v22, %v711_v57 }
 0x43b   : > { %1561 = vpow2.f32 %v852_v4  ;;  %v712_v58 = vmul.f32 %v1560_v23, %v710_v55 }
 0x43c   : > { %1563 = vpow2.f32 %v850_v24 }
 0x43d   : > { %1565 = vpow2.f32 %v1011_v17 }
 0x43e   : > { %1567 = vpow2.f32 %v1013_v20 }
 0x43f   : > { %1482 = vmatmul.mubr.msk.bf16.vlgmr.msra.gmra.mrb[12].mxu0 %vm514_vm5, %v1046_v30 }
 0x444   : > { %v554_v28 = vpop.xlane.xlu0 %553 }
 0x445   : > { %v556_v19 = vadd.f32 %v554_v28, %v548_v26  ;;  %v1562_v33 = vpop.eup %1561 }
 0x446   : > { %v1564_v34 = vpop.eup %1563  ;;  %v874_v60 = vmul.f32 %v1562_v33, %v872_v2 }
 0x447   : > { %559 = vst.msk [vmem:[#allocation3 + $0x8] sm:$0xff] %vm419_vm3, %v556_v19  ;;  %v1566_v36 = vpop.eup %1565  ;;  %v873_v41 = vmul.f32 %v1564_v34, %v871_v63 }
 0x448   : > { %v1568_v37 = vpop.eup %1567  ;;  %v1034_v10 = vmul.f32 %v1566_v36, %v1032_v7 }
 0x449   : > { %620 = vperm.xlu1 %1532, %v1554_v52   ;;  %v1035_v9 = vmul.f32 %v1568_v37, %v1033_v11 }
 0x44a   : > { %615 = vperm.xlu0 %1533, %v1556_v15  }
 0x44d   : > { %781 = vperm.xlu1 %1532, %v1558_v22  }
 0x44e   : > { %776 = vperm.xlu0 %1533, %v1560_v23   ;;  %v1156_v25 = vld [vmem:[#allocation3 + $0x8] sm:$0xff] }
 0x44f   : > { %1569 = vrcp.f32 %v1156_v25 }
 0x451   : > { %942 = vperm.xlu1 %1532, %v1562_v33  }
 0x452   : > { %937 = vperm.xlu0 %1533, %v1564_v34  }
 0x455   : > { %1098 = vperm.xlu1 %1532, %v1566_v36  }
 0x456   : > { %1103 = vperm.xlu0 %1533, %v1568_v37  }
 0x459   : > { %v1570_v38 = vpop.eup %1569 }
 0x45a   : > { %1166 = vperm.xlu0 %1533, %v1570_v38  }
 0x461   : > { %v551_v44 = vpop.xlane.xlu1 %550 }
 0x462   : > { %v555_v46 = vadd.f32 %v551_v44, %v547_v43 }
 0x464   : > { %558 = vst.msk [vmem:[#allocation3] sm:$0xff] %vm419_vm3, %v555_v46 }
 0x46b   : > { %v1155_v47 = vld [vmem:[#allocation3] sm:$0xff] }
 0x46c   : > { %1571 = vrcp.f32 %v1155_v47 }
 0x476   : > { %v1572_v48 = vpop.eup %1571 }
 0x477   : > { %1161 = vperm.xlu1 %1532, %v1572_v48  }
 0x4b1   : > { %v716_v59 = vpop.xlane.xlu1 %715 }
 0x4b2   : > { %v720_v61 = vadd.f32 %v716_v59, %v712_v58 }
 0x4b3   : > { %v719_v62 = vpop.xlane.xlu0 %718 }
 0x4b4   : > { %722 = vst.msk [vmem:[#allocation3 + $0x10] sm:$0xff] %vm419_vm3, %v720_v61  ;;  %v721_v42 = vadd.f32 %v719_v62, %v713_v32 }
 0x4b6   : > { %723 = vst.msk [vmem:[#allocation3 + $0x18] sm:$0xff] %vm419_vm3, %v721_v42 }
 0x4b9   : > { %v877_v1 = vpop.xlane.xlu1 %876 }
 0x4ba   : > { %v881_v56 = vadd.f32 %v877_v1, %v873_v41 }
 0x4bb   : > { %v1169_v3 = vld [vmem:[#allocation3 + $0x10] sm:$0xff] }
 0x4bc   : > { %883 = vst.msk [vmem:[#allocation3 + $0x20] sm:$0xff] %vm419_vm3, %v881_v56  ;;  %1573 = vrcp.f32 %v1169_v3 }
 0x4bd   : > { %v880_v6 = vpop.xlane.xlu0 %879  ;;  %v1170_v0 = vld [vmem:[#allocation3 + $0x18] sm:$0xff] }
 0x4be   : > { %v882_v8 = vadd.f32 %v880_v6, %v874_v60  ;;  %1575 = vrcp.f32 %v1170_v0 }
 0x4c0   : > { %884 = vst.msk [vmem:[#allocation3 + $0x28] sm:$0xff] %vm419_vm3, %v882_v8 }
 0x4c1   : > { %v1038_v5 = vpop.xlane.xlu0 %1037 }
 0x4c2   : > { %v1042_v12 = vadd.f32 %v1038_v5, %v1034_v10 }
 0x4c3   : > { %v1183_v14 = vld [vmem:[#allocation3 + $0x20] sm:$0xff] }
 0x4c4   : > { %1044 = vst.msk [vmem:[#allocation3 + $0x30] sm:$0xff] %vm419_vm3, %v1042_v12  ;;  %1577 = vrcp.f32 %v1183_v14 }
 0x4c5   : > { %v1041_v16 = vpop.xlane.xlu1 %1040 }
 0x4c6   : > { %v1574_v18 = vpop.eup %1573  ;;  %v1043_v13 = vadd.f32 %v1041_v16, %v1035_v9 }
 0x4c7   : > { %1175 = vperm.xlu1 %1532, %v1574_v18   ;;  %v1184_v21 = vld [vmem:[#allocation3 + $0x28] sm:$0xff] }
 0x4c8   : > { %v1576_v29 = vpop.eup %1575  ;;  %1045 = vst.msk [vmem:[#allocation3 + $0x38] sm:$0xff] %vm419_vm3, %v1043_v13  ;;  %1579 = vrcp.f32 %v1184_v21 }
 0x4c9   : > { %1180 = vperm.xlu0 %1533, %v1576_v29   ;;  %v616_v22 = vpop.permute.xlu0 %615  ;;  %v621_v23 = vpop.permute.xlu1 %620 }
 0x4cb   : > { %v1197_v31 = vld [vmem:[#allocation3 + $0x30] sm:$0xff] }
 0x4cc   : > { %1581 = vrcp.f32 %v1197_v31 }
 0x4cd   : > { %v777_v25 = vpop.permute.xlu0 %776  ;;  %v782_v33 = vpop.permute.xlu1 %781 }
 0x4ce   : > { %v1578_v35 = vpop.eup %1577  ;;  %v1106_v61 = vsel %vm462_vm1, %v616_v22, %v777_v25  ;;  %v1107_v32 = vsel %vm462_vm1, %v621_v23, %v782_v33 }
 0x4cf   : > { %1189 = vperm.xlu1 %1532, %v1578_v35   ;;  %v1198_v54 = vld [vmem:[#allocation3 + $0x38] sm:$0xff] }
 0x4d0   : > { %1583 = vrcp.f32 %v1198_v54 }
 0x4d1   : > { %v938_v34 = vpop.permute.xlu0 %937  ;;  %v943_v36 = vpop.permute.xlu1 %942 }
 0x4d2   : > { %v1580_v40 = vpop.eup %1579  ;;  %v1109_v62 = vsel %vm1108_vm6, %v1106_v61, %v938_v34  ;;  %v1110_v42 = vsel %vm1108_vm6, %v1107_v32, %v943_v36 }
 0x4d3   : > { %1194 = vperm.xlu0 %1533, %v1580_v40  }
 0x4d5   : > { %v1104_v37 = vpop.permute.xlu0 %1103  ;;  %v1099_v38 = vpop.permute.xlu1 %1098 }
 0x4d6   : > { %v1582_v20 = vpop.eup %1581  ;;  %v1113_v1 = vsel %vm1111_vm7, %v1110_v42, %v1104_v37  ;;  %v1112_v2 = vsel %vm1111_vm7, %v1109_v62, %v1099_v38 }
 0x4d7   : > { %v1147_v10 = vmul.f32 0.0, %v1113_v1  ;;  %v1146_v5 = vmul.f32 0.0, %v1112_v2 }
 0x4d9   : > { %v1167_v39 = vpop.permute.xlu0 %1166 }
 0x4da   : > { %v1584_v15 = vpop.eup %1583 }
 0x4f6   : > { %v1162_v43 = vpop.permute.xlu1 %1161 }
 0x502   : > { %v765_v45 = vpop.f32.mrb[4].mxu0 }
 0x503   : > { %1116 = vrot.lane.b32.xlu1 %v765_v45, %s1631_s6  ;;  %v1459_v49 = vpop.f32.mrb[5].mxu0 }
 0x504   : > { %v768_v27 = vpop.f32.mrb[6].mxu0 }
 0x505   : > { %1118 = vrot.lane.b32.xlu0 %v768_v27, %s1631_s6  ;;  %v1460_v30 = vpop.f32.mrb[7].mxu0 }
 0x50a   : > { %v926_v50 = vpop.f32.mrb[8].mxu0 }
 0x50b   : > { %1124 = vrot.lane.b32.xlu1 %v926_v50, %s1630_s5  ;;  %v1471_v52 = vpop.f32.mrb[9].mxu0 }
 0x50c   : > { %v929_v4 = vpop.f32.mrb[10].mxu0 }
 0x50d   : > { %1126 = vrot.lane.b32.xlu0 %v929_v4, %s1630_s5  ;;  %v1472_v24 = vpop.f32.mrb[11].mxu0 }
 0x512   : > { %v1087_v26 = vpop.f32.mrb[12].mxu0 }
 0x513   : > { %1132 = vrot.lane.b32.xlu1 %v1087_v26, %s1629_s29  ;;  %v1483_v28 = vpop.f32.mrb[13].mxu0 }
 0x514   : > { %v1090_v19 = vpop.f32.mrb[14].mxu0 }
 0x515   : > { %1134 = vrot.lane.b32.xlu0 %v1090_v19, %s1629_s29  ;;  %v1484_v17 = vpop.f32.mrb[15].mxu0 }
 0x517   : > { %1203 = vperm.xlu1 %1532, %v1582_v20  }
 0x519   : > { %1208 = vperm.xlu0 %1533, %v1584_v15  }
 0x546   : > { %v1176_v44 = vpop.permute.xlu1 %1175 }
 0x547   : > { %v1213_v7 = vsel %vm462_vm1, %v1162_v43, %v1176_v44 }
 0x548   : > { %v1181_v46 = vpop.permute.xlu0 %1180 }
 0x54e   : > { %v1190_v47 = vpop.permute.xlu1 %1189 }
 0x54f   : > { %v1215_v11 = vsel %vm1108_vm6, %v1213_v7, %v1190_v47 }
 0x552   : > { %v1195_v48 = vpop.permute.xlu0 %1194 }
 0x575   : > { %v1117_v55 = vpop.permute.xlu1 %1116 }
 0x576   : > { %v1138_v56 = vsel %vm462_vm1, %v1835_v51, %v1117_v55  ;;  %v1214_v51 = vsel %vm462_vm1, %v1167_v39, %v1181_v46 }
 0x577   : > { %v1119_v57 = vpop.permute.xlu0 %1118  ;;  %v1216_v14 = vsel %vm1108_vm6, %v1214_v51, %v1195_v48 }
 0x578   : > { %v1139_v3 = vsel %vm462_vm1, %v1837_v53, %v1119_v57 }
 0x57d   : > { %v1125_v58 = vpop.permute.xlu1 %1124 }
 0x57e   : > { %v1140_v60 = vsel %vm1108_vm6, %v1138_v56, %v1125_v58 }
 0x57f   : > { %v1127_v59 = vpop.permute.xlu0 %1126 }
 0x580   : > { %v1141_v6 = vsel %vm1108_vm6, %v1139_v3, %v1127_v59 }
 0x585   : > { %v1133_v63 = vpop.permute.xlu1 %1132 }
 0x586   : > { %v1142_v0 = vsel %vm1111_vm7, %v1140_v60, %v1133_v63 }
 0x587   : > { %v1135_v41 = vpop.permute.xlu0 %1134  ;;  %v1148_v9 = vadd.f32 %v1146_v5, %v1142_v0 }
 0x588   : > { %v1143_v8 = vsel %vm1111_vm7, %v1141_v6, %v1135_v41 }
 0x589   : > { %v1149_v16 = vadd.f32 %v1147_v10, %v1143_v8 }
 0x596   : > { %v1204_v12 = vpop.permute.xlu1 %1203 }
 0x597   : > { %v1217_v53 = vsel %vm1111_vm7, %v1215_v11, %v1204_v12 }
 0x598   : > { %v1209_v18 = vpop.permute.xlu0 %1208  ;;  %v1219_v21 = vmul.f32 %v1217_v53, %v1148_v9 }
 0x599   : > { %v1218_v13 = vsel %vm1111_vm7, %v1216_v14, %v1209_v18 }
 0x59a   : > { %v1220_v29 = vmul.f32 %v1218_v13, %v1149_v16 }
 0x59c   : > { %v1419_v35 = vpack.c.bf16 %v1220_v29, %v1219_v21 }
 0x59e   : > { %1420 = vst [vmem:[%s412_s9] sm:$0xff] %v1419_v35  }
 0x59f PF: > { %s14_s19 = sadd.s32 1, %s1623_s19   ;;  %s2050_s15 = smov %s1611_s16 }
 0x5a0   : > { %p11_p10 = scmp.ge.s32.totalorder %s14_s19, 4   ;;  %s2051_s16 = smov %s1696_s24 }
 0x5a1   : > { %s2052_s17 = smov %s1619_s18  ;;  %s2053_s18 = smov %s2055_s20 }
 0x5a2   :  { %13 = sbr.rel (!%p11_p10) target bundleno = 3 (0x3), region = 181 }

</bundles_post_ra>
